<compile_context>
chip_gen: v6e
topology: v6e:2x2x1
jax: 0.10.0
libtpu: 0.0.40
codegen_flags: <defaults>
</compile_context>

<pallas_src>
import functools

import jax
import jax.numpy as jnp
from jax.experimental import pallas as pl
from jax.experimental.pallas import tpu as pltpu


# ---------------------------------------------------------------------------
# helpers
# ---------------------------------------------------------------------------
def _round_up(n, m):
    return ((n + m - 1) // m) * m


# ---------------------------------------------------------------------------
# Generic "sum of tap matmuls" conv + bias + ReLU (NHWC, bf16 in/out, f32 acc).
# One grid step = one image x one 128-wide cout block.  The whole spatially
# padded image block is auto-pipelined into VMEM by BlockSpec.
# ---------------------------------------------------------------------------
def _make_conv_kernel(kh, kw, h_out, w_out, cout_blk):
    def kernel(x_ref, w_ref, b_ref, o_ref):
        wp = x_ref.shape[2]
        cin_p = x_ref.shape[3]
        bias = b_ref[...]                                   # (1, cout_blk) f32
        acc = None
        for dy in range(kh):
            # (h_out, wp, cin_p) -> (h_out*wp, cin_p): leading-dim merge only.
            lhs = x_ref[0, dy:dy + h_out, :, :].reshape(h_out * wp, cin_p)
            for dx in range(kw):
                y = jnp.dot(lhs, w_ref[dy * kw + dx],
                            preferred_element_type=jnp.float32)
                y = y.reshape(h_out, wp, cout_blk)
                if dx != 0 or wp != w_out:
                    y = y[:, dx:dx + w_out, :]              # static column shift
                acc = y if acc is None else acc + y
        res = jnp.maximum(acc + bias, 0.0)                  # bias + ReLU in f32
        o_ref[0] = res.astype(o_ref.dtype)

    return kernel


def conv_relu(x, w_taps, b, *, kh, kw, cout_pad):
    """ReLU(conv(x) + b), 'same' padding, stride 1.

    x:      (N, H, W, Cin_x) bf16 (Cin_x may exceed the weight Cin; the extra
            channels are exact zeros from previous lane padding).
    w_taps: (kh*kw, Cin, Cout) f32, taps ordered t = dy*kw + dx.
    b:      (Cout,) f32.
    Returns (N, H, W, cout_pad) bf16; channels >= Cout are exactly zero.
    """
    N, H, W, cin_x = x.shape
    taps, cin, cout = w_taps.shape
    assert taps == kh * kw and cout <= cout_pad and cout_pad % 128 == 0

    cin_p = max(_round_up(cin, 8), cin_x)
    if cin_x < cin_p:
        x = jnp.pad(x, ((0, 0), (0, 0), (0, 0), (0, cin_p - cin_x)))

    # spatial 'same' padding; padded width rounded up to a sublane multiple so
    # the in-kernel (h, wp) -> (h*wp) merge stays layout friendly.
    hp = H + kh - 1
    wp = _round_up(W + kw - 1, 8)
    xp = jnp.pad(x, ((0, 0),
                     (kh // 2, hp - H - kh // 2),
                     (kw // 2, wp - W - kw // 2),
                     (0, 0)))

    wt = jnp.pad(w_taps.astype(jnp.float32),
                 ((0, 0), (0, cin_p - cin),
                  (0, cout_pad - cout))).astype(jnp.bfloat16)
    bt = jnp.pad(b.astype(jnp.float32),
                 (0, cout_pad - cout)).reshape(1, cout_pad)

    cout_blk = 128                       # lane-dense output block
    grid = (N, cout_pad // cout_blk)     # 2 cout blocks on the 256-ch layer

    # tight VMEM estimate (double buffers + f32 intermediates) with slack,
    # capped well below v7x's 64 MiB physical VMEM.
    vmem_bytes = (2 * hp * wp * max(cin_p, 128) * 2        # input block x2
                  + 2 * taps * cin_p * cout_blk * 2        # weights x2
                  + 2 * H * W * cout_blk * 2               # output block x2
                  + 4 * H * wp * cout_blk * 4              # f32 acc/tap temps
                  + (2 << 20))
    vmem_limit = int(min(48 << 20, max(16 << 20, 2 * vmem_bytes)))

    return pl.pallas_call(
        _make_conv_kernel(kh, kw, H, W, cout_blk),
        out_shape=jax.ShapeDtypeStruct((N, H, W, cout_pad), jnp.bfloat16),
        grid=grid,
        in_specs=[
            pl.BlockSpec((1, hp, wp, cin_p), lambda n, j: (n, 0, 0, 0)),
            pl.BlockSpec((taps, cin_p, cout_blk), lambda n, j: (0, 0, j)),
            pl.BlockSpec((1, cout_blk), lambda n, j: (0, j)),
        ],
        out_specs=pl.BlockSpec((1, H, W, cout_blk), lambda n, j: (n, 0, 0, j)),
        compiler_params=pltpu.CompilerParams(
            dimension_semantics=("parallel", "parallel"),
            vmem_limit_bytes=vmem_limit),
    )(xp, wt, bt)


# ---------------------------------------------------------------------------
# MaxPool2d(kernel_size=2, stride=2), NHWC bf16, C % 128 == 0.
# The two pooled rows become a leading size-2 axis and the two pooled columns
# land lane-aligned inside a 2*C last axis (free row-major HBM reshape), so the
# kernel only uses leading-dim indexing and 128-aligned lane slices.
# ---------------------------------------------------------------------------
def _maxpool_kernel(x_ref, o_ref, *, c):
    top = x_ref[0, :, 0, :, :]                       # (H2, W2, 2C)
    bot = x_ref[0, :, 1, :, :]
    m = jnp.maximum(top, bot)                        # reduce pooled rows
    o_ref[0] = jnp.maximum(m[:, :, :c], m[:, :, c:]) # reduce pooled cols


def maxpool2x2(x):
    N, H, W, C = x.shape
    assert H % 2 == 0 and W % 2 == 0 and C % 128 == 0
    H2, W2 = H // 2, W // 2
    xr = x.reshape(N, H2, 2, W2, 2 * C)
    return pl.pallas_call(
        functools.partial(_maxpool_kernel, c=C),
        out_shape=jax.ShapeDtypeStruct((N, H2, W2, C), x.dtype),
        grid=(N,),
        in_specs=[pl.BlockSpec((1, H2, 2, W2, 2 * C),
                               lambda n: (n, 0, 0, 0, 0))],
        out_specs=pl.BlockSpec((1, H2, W2, C), lambda n: (n, 0, 0, 0)),
        compiler_params=pltpu.CompilerParams(
            dimension_semantics=("parallel",)),
    )(xr)


# ---------------------------------------------------------------------------
# Parameter init (matches VGG._initialize_weights: kaiming_normal_ fan_out /
# relu, bias = 0) — deterministic, in-script.
# ---------------------------------------------------------------------------
def _kaiming_conv(key, kh, kw, cin, cout):
    fan_out = cout * kh * kw
    std = (2.0 / fan_out) ** 0.5
    return std * jax.random.normal(key, (kh, kw, cin, cout), jnp.float32)


def init_params(key):
    # truncated VGG cfg ending at 256 channels (final_layer expects 256 in):
    #   Conv(3->64)+ReLU, MaxPool, Conv(64->128)+ReLU, MaxPool, Conv(128->256)+ReLU
    cfg = [(3, 64), (64, 128), (128, 256)]
    keys = jax.random.split(key, len(cfg) + 1)
    params = {}
    for idx, (cin, cout) in enumerate(cfg):
        params[f"conv{idx}_w"] = _kaiming_conv(keys[idx], 3, 3, cin, cout)
        params[f"conv{idx}_b"] = jnp.zeros((cout,), jnp.float32)
    # final_layer: Conv2d(256, 32, kernel_size=3, padding=1)
    params["final_w"] = _kaiming_conv(keys[-1], 3, 3, 256, 32)
    params["final_b"] = jnp.zeros((32,), jnp.float32)
    return params


# ---------------------------------------------------------------------------
# Forward pass (matches VGG.forward: features -> final_layer -> final_relu)
# ---------------------------------------------------------------------------
@jax.jit
def vgg_forward(x_nchw, params):
    x = jnp.transpose(x_nchw, (0, 2, 3, 1)).astype(jnp.bfloat16)  # NCHW -> NHWC
    N, H, W, _ = x.shape

    # layer 0: fold the 3x3 taps into K (im2col -> K=27, padded to 32) so the
    # first matmul is not stuck at K=8 / 8-of-128 lanes.  Pure layout plumbing.
    xp0 = jnp.pad(x, ((0, 0), (1, 1), (1, 1), (0, 0)))
    patches = jnp.concatenate(
        [xp0[:, dy:dy + H, dx:dx + W, :] for dy in range(3) for dx in range(3)],
        axis=-1)                                                  # (N, H, W, 27)
    w0 = params["conv0_w"].reshape(27, -1)[None]                  # (1, 27, 64)
    x = conv_relu(patches, w0, params["conv0_b"], kh=1, kw=1, cout_pad=128)
    x = maxpool2x2(x)

    w1 = params["conv1_w"].reshape(9, 64, 128)
    x = conv_relu(x, w1, params["conv1_b"], kh=3, kw=3, cout_pad=128)
    x = maxpool2x2(x)

    w2 = params["conv2_w"].reshape(9, 128, 256)
    x = conv_relu(x, w2, params["conv2_b"], kh=3, kw=3, cout_pad=256)

    # self.final_layer + self.final_relu (ReLU fused into the conv kernel)
    wf = params["final_w"].reshape(9, 256, 32)
    x = conv_relu(x, wf, params["final_b"], kh=3, kw=3, cout_pad=128)
    x = x[..., :32]
    return jnp.transpose(x, (0, 3, 1, 2)).astype(jnp.float32)     # NHWC -> NCHW


# ---------------------------------------------------------------------------
# Pure-JAX reference with the same bf16 activation path (for a sanity check).
# ---------------------------------------------------------------------------
def _ref_forward(x_nchw, params):
    x = jnp.transpose(x_nchw, (0, 2, 3, 1)).astype(jnp.bfloat16)

    def conv(h, w, b):
        y = jax.lax.conv_general_dilated(
            h.astype(jnp.bfloat16), w.astype(jnp.bfloat16),
            window_strides=(1, 1), padding="SAME",
            dimension_numbers=("NHWC", "HWIO", "NHWC"),
            preferred_element_type=jnp.float32)
        return jnp.maximum(y + b, 0.0).astype(jnp.bfloat16)

    def pool(h):
        n, hh, ww, c = h.shape
        return jnp.max(h.reshape(n, hh // 2, 2, ww // 2, 2, c), axis=(2, 4))

    x = conv(x, params["conv0_w"], params["conv0_b"]); x = pool(x)
    x = conv(x, params["conv1_w"], params["conv1_b"]); x = pool(x)
    x = conv(x, params["conv2_w"], params["conv2_b"])
    x = conv(x, params["final_w"], params["final_b"])
    return jnp.transpose(x, (0, 3, 1, 2)).astype(jnp.float32)


if __name__ == "__main__":
    key = jax.random.PRNGKey(0)
    k_param, k_x = jax.random.split(key)

    params = init_params(k_param)
    # NCHW input: batch=2, 3 channels, 32x32 spatial (keeps every pooled width
    # a multiple of 8 so all Pallas tiles stay layout-aligned).
    x = jax.random.normal(k_x, (2, 3, 32, 32), jnp.float32)

    out = vgg_forward(x, params)
    out = jax.block_until_ready(out)

    assert out.shape == (2, 32, 8, 8), out.shape   # 32 -> /2 -> /2 spatial, 32 ch
    assert bool(jnp.all(out >= 0.0))               # final ReLU

    ref = jax.block_until_ready(_ref_forward(x, params))
    err = float(jnp.max(jnp.abs(out - ref)))
    assert err < 0.25, err                         # bf16-path agreement

    print("KERNEL_OK")
</pallas_src>

<mosaic_0001>
module attributes {stable_mosaic.version = 11 : i64} {
  func.func @kernel(%arg0: i32, %arg1: i32, %arg2: memref<1x32x32x32xbf16, #tpu.memory_space<vmem>>, %arg3: memref<1x32x128xbf16, #tpu.memory_space<vmem>>, %arg4: memref<1x128xf32, #tpu.memory_space<vmem>>, %arg5: memref<1x32x32x128xbf16, #tpu.memory_space<vmem>>) attributes {dimension_semantics = [#tpu.dimension_semantics<parallel>, #tpu.dimension_semantics<parallel>], iteration_bounds = array<i64: 2, 1>, scalar_prefetch = 0 : i64, scratch_operands = 0 : i64, tpu.core_type = #tpu.core_type<tc>, window_params = [{transform_indices = @transform_0, window_bounds = array<i64: 1, 32, 32, 32>}, {transform_indices = @transform_1, window_bounds = array<i64: 1, 32, 128>}, {transform_indices = @transform_2, window_bounds = array<i64: 1, 128>}, {transform_indices = @transform_3, window_bounds = array<i64: 1, 32, 32, 128>}]} {
    %c0 = arith.constant 0 : index
    %c0_0 = arith.constant 0 : index
    %0 = vector.load %arg4[%c0, %c0_0] : memref<1x128xf32, #tpu.memory_space<vmem>>, vector<1x128xf32>
    %c0_1 = arith.constant 0 : index
    %c0_2 = arith.constant 0 : index
    %c0_3 = arith.constant 0 : index
    %c0_4 = arith.constant 0 : index
    %1 = vector.load %arg2[%c0_1, %c0_2, %c0_3, %c0_4] : memref<1x32x32x32xbf16, #tpu.memory_space<vmem>>, vector<1x32x32x32xbf16>
    %2 = vector.shape_cast %1 : vector<1x32x32x32xbf16> to vector<32x32x32xbf16>
    %3 = vector.shape_cast %2 : vector<32x32x32xbf16> to vector<1024x32xbf16>
    %c0_5 = arith.constant 0 : index
    %c0_6 = arith.constant 0 : index
    %c0_7 = arith.constant 0 : index
    %4 = vector.load %arg3[%c0_5, %c0_6, %c0_7] : memref<1x32x128xbf16, #tpu.memory_space<vmem>>, vector<1x32x128xbf16>
    %5 = vector.shape_cast %4 : vector<1x32x128xbf16> to vector<32x128xbf16>
    %cst = arith.constant dense<0.000000e+00> : vector<1024x128xf32>
    %6 = tpu.matmul %3, %5, %cst {dimension_numbers = #tpu.dot_dimension_numbers<[1], [0], [0], [1], [0, 0, 1, 1], [], []>} : vector<1024x32xbf16>, vector<32x128xbf16>, vector<1024x128xf32> -> vector<1024x128xf32>
    %7 = vector.shape_cast %6 : vector<1024x128xf32> to vector<32x32x128xf32>
    %8 = vector.shape_cast %0 : vector<1x128xf32> to vector<1x1x128xf32>
    %9 = vector.broadcast %8 : vector<1x1x128xf32> to vector<32x32x128xf32>
    %10 = arith.addf %7, %9 : vector<32x32x128xf32>
    %cst_8 = arith.constant 0.000000e+00 : f32
    %11 = vector.broadcast %cst_8 : f32 to vector<32x32x128xf32>
    %12 = arith.maximumf %10, %11 : vector<32x32x128xf32>
    %13 = arith.truncf %12 : vector<32x32x128xf32> to vector<32x32x128xbf16>
    %c0_9 = arith.constant 0 : index
    %c0_10 = arith.constant 0 : index
    %c0_11 = arith.constant 0 : index
    %c0_12 = arith.constant 0 : index
    %14 = vector.load %arg5[%c0_9, %c0_10, %c0_11, %c0_12] : memref<1x32x32x128xbf16, #tpu.memory_space<vmem>>, vector<1x32x32x128xbf16>
    %15 = vector.shape_cast %14 : vector<1x32x32x128xbf16> to vector<32x32x128xbf16>
    %16 = vector.shape_cast %13 : vector<32x32x128xbf16> to vector<1x32x32x128xbf16>
    tpu.vector_store %arg5[%c0_9, %c0_10, %c0_11, %c0_12], %16 {strides = array<i32>} : memref<1x32x32x128xbf16, #tpu.memory_space<vmem>>, vector<1x32x32x128xbf16>,
    return
  }
  func.func @transform_0(%arg0: i32, %arg1: i32) -> (i32, i32, i32, i32) {
    %c0_i32 = arith.constant 0 : i32
    %c0_i32_0 = arith.constant 0 : i32
    %c0_i32_1 = arith.constant 0 : i32
    %c0_i32_2 = arith.constant 0 : i32
    return %arg0, %c0_i32, %c0_i32_0, %c0_i32_1 : i32, i32, i32, i32
  }
  func.func @transform_1(%arg0: i32, %arg1: i32) -> (i32, i32, i32) {
    %c0_i32 = arith.constant 0 : i32
    %c0_i32_0 = arith.constant 0 : i32
    %c0_i32_1 = arith.constant 0 : i32
    return %c0_i32, %c0_i32_0, %arg1 : i32, i32, i32
  }
  func.func @transform_2(%arg0: i32, %arg1: i32) -> (i32, i32) {
    %c0_i32 = arith.constant 0 : i32
    %c0_i32_0 = arith.constant 0 : i32
    return %c0_i32, %arg1 : i32, i32
  }
  func.func @transform_3(%arg0: i32, %arg1: i32) -> (i32, i32, i32, i32) {
    %c0_i32 = arith.constant 0 : i32
    %c0_i32_0 = arith.constant 0 : i32
    %c0_i32_1 = arith.constant 0 : i32
    return %arg0, %c0_i32, %c0_i32_0, %arg1 : i32, i32, i32, i32
  }
}

module attributes {stable_mosaic.version = 11 : i64} {
  func.func @_maxpool_kernel(%arg0: i32, %arg1: memref<1x16x2x16x256xbf16, #tpu.memory_space<vmem>>, %arg2: memref<1x16x16x128xbf16, #tpu.memory_space<vmem>>) attributes {dimension_semantics = [#tpu.dimension_semantics<parallel>], iteration_bounds = array<i64: 2>, scalar_prefetch = 0 : i64, scratch_operands = 0 : i64, tpu.core_type = #tpu.core_type<tc>, window_params = [{transform_indices = @transform_0, window_bounds = array<i64: 1, 16, 2, 16, 256>}, {transform_indices = @transform_1, window_bounds = array<i64: 1, 16, 16, 128>}]} {
    %c0 = arith.constant 0 : index
    %c0_0 = arith.constant 0 : index
    %c0_1 = arith.constant 0 : index
    %c0_2 = arith.constant 0 : index
    %c0_3 = arith.constant 0 : index
    %0 = vector.load %arg1[%c0, %c0_0, %c0_1, %c0_2, %c0_3] : memref<1x16x2x16x256xbf16, #tpu.memory_space<vmem>>, vector<1x16x1x16x256xbf16>
    %1 = vector.shape_cast %0 : vector<1x16x1x16x256xbf16> to vector<16x16x256xbf16>
    %c0_4 = arith.constant 0 : index
    %c0_5 = arith.constant 0 : index
    %c1 = arith.constant 1 : index
    %c0_6 = arith.constant 0 : index
    %c0_7 = arith.constant 0 : index
    %2 = vector.load %arg1[%c0_4, %c0_5, %c1, %c0_6, %c0_7] : memref<1x16x2x16x256xbf16, #tpu.memory_space<vmem>>, vector<1x16x1x16x256xbf16>
    %3 = vector.shape_cast %2 : vector<1x16x1x16x256xbf16> to vector<16x16x256xbf16>
    %4 = arith.maximumf %1, %3 : vector<16x16x256xbf16>
    %5 = vector.extract_strided_slice %4 {offsets = [0, 0, 0], sizes = [16, 16, 128], strides = [1, 1, 1]} : vector<16x16x256xbf16> to vector<16x16x128xbf16>
    %6 = vector.extract_strided_slice %4 {offsets = [0, 0, 128], sizes = [16, 16, 128], strides = [1, 1, 1]} : vector<16x16x256xbf16> to vector<16x16x128xbf16>
    %7 = arith.maximumf %5, %6 : vector<16x16x128xbf16>
    %c0_8 = arith.constant 0 : index
    %c0_9 = arith.constant 0 : index
    %c0_10 = arith.constant 0 : index
    %c0_11 = arith.constant 0 : index
    %8 = vector.load %arg2[%c0_8, %c0_9, %c0_10, %c0_11] : memref<1x16x16x128xbf16, #tpu.memory_space<vmem>>, vector<1x16x16x128xbf16>
    %9 = vector.shape_cast %8 : vector<1x16x16x128xbf16> to vector<16x16x128xbf16>
    %10 = vector.shape_cast %7 : vector<16x16x128xbf16> to vector<1x16x16x128xbf16>
    tpu.vector_store %arg2[%c0_8, %c0_9, %c0_10, %c0_11], %10 {strides = array<i32>} : memref<1x16x16x128xbf16, #tpu.memory_space<vmem>>, vector<1x16x16x128xbf16>,
    return
  }
  func.func @transform_0(%arg0: i32) -> (i32, i32, i32, i32, i32) {
    %c0_i32 = arith.constant 0 : i32
    %c0_i32_0 = arith.constant 0 : i32
    %c0_i32_1 = arith.constant 0 : i32
    %c0_i32_2 = arith.constant 0 : i32
    %c0_i32_3 = arith.constant 0 : i32
    return %arg0, %c0_i32, %c0_i32_0, %c0_i32_1, %c0_i32_2 : i32, i32, i32, i32, i32
  }
  func.func @transform_1(%arg0: i32) -> (i32, i32, i32, i32) {
    %c0_i32 = arith.constant 0 : i32
    %c0_i32_0 = arith.constant 0 : i32
    %c0_i32_1 = arith.constant 0 : i32
    %c0_i32_2 = arith.constant 0 : i32
    return %arg0, %c0_i32, %c0_i32_0, %c0_i32_1 : i32, i32, i32, i32
  }
}

module attributes {stable_mosaic.version = 11 : i64} {
  func.func @kernel(%arg0: i32, %arg1: i32, %arg2: memref<1x18x24x128xbf16, #tpu.memory_space<vmem>>, %arg3: memref<9x128x128xbf16, #tpu.memory_space<vmem>>, %arg4: memref<1x128xf32, #tpu.memory_space<vmem>>, %arg5: memref<1x16x16x128xbf16, #tpu.memory_space<vmem>>) attributes {dimension_semantics = [#tpu.dimension_semantics<parallel>, #tpu.dimension_semantics<parallel>], iteration_bounds = array<i64: 2, 1>, scalar_prefetch = 0 : i64, scratch_operands = 0 : i64, tpu.core_type = #tpu.core_type<tc>, window_params = [{transform_indices = @transform_0, window_bounds = array<i64: 1, 18, 24, 128>}, {transform_indices = @transform_1, window_bounds = array<i64: 9, 128, 128>}, {transform_indices = @transform_2, window_bounds = array<i64: 1, 128>}, {transform_indices = @transform_3, window_bounds = array<i64: 1, 16, 16, 128>}]} {
    %c0 = arith.constant 0 : index
    %c0_0 = arith.constant 0 : index
    %0 = vector.load %arg4[%c0, %c0_0] : memref<1x128xf32, #tpu.memory_space<vmem>>, vector<1x128xf32>
    %c0_1 = arith.constant 0 : index
    %c0_2 = arith.constant 0 : index
    %c0_3 = arith.constant 0 : index
    %c0_4 = arith.constant 0 : index
    %1 = vector.load %arg2[%c0_1, %c0_2, %c0_3, %c0_4] : memref<1x18x24x128xbf16, #tpu.memory_space<vmem>>, vector<1x16x24x128xbf16>
    %2 = vector.shape_cast %1 : vector<1x16x24x128xbf16> to vector<16x24x128xbf16>
    %3 = vector.shape_cast %2 : vector<16x24x128xbf16> to vector<384x128xbf16>
    %c0_5 = arith.constant 0 : index
    %c0_6 = arith.constant 0 : index
    %c0_7 = arith.constant 0 : index
    %4 = vector.load %arg3[%c0_5, %c0_6, %c0_7] : memref<9x128x128xbf16, #tpu.memory_space<vmem>>, vector<1x128x128xbf16>
    %5 = vector.shape_cast %4 : vector<1x128x128xbf16> to vector<128x128xbf16>
    %cst = arith.constant dense<0.000000e+00> : vector<384x128xf32>
    %6 = tpu.matmul %3, %5, %cst {dimension_numbers = #tpu.dot_dimension_numbers<[1], [0], [0], [1], [0, 0, 1, 1], [], []>} : vector<384x128xbf16>, vector<128x128xbf16>, vector<384x128xf32> -> vector<384x128xf32>
    %7 = vector.shape_cast %6 : vector<384x128xf32> to vector<16x24x128xf32>
    %8 = vector.extract_strided_slice %7 {offsets = [0, 0, 0], sizes = [16, 16, 128], strides = [1, 1, 1]} : vector<16x24x128xf32> to vector<16x16x128xf32>
    %c1 = arith.constant 1 : index
    %c0_8 = arith.constant 0 : index
    %c0_9 = arith.constant 0 : index
    %9 = vector.load %arg3[%c1, %c0_8, %c0_9] : memref<9x128x128xbf16, #tpu.memory_space<vmem>>, vector<1x128x128xbf16>
    %10 = vector.shape_cast %9 : vector<1x128x128xbf16> to vector<128x128xbf16>
    %cst_10 = arith.constant dense<0.000000e+00> : vector<384x128xf32>
    %11 = tpu.matmul %3, %10, %cst_10 {dimension_numbers = #tpu.dot_dimension_numbers<[1], [0], [0], [1], [0, 0, 1, 1], [], []>} : vector<384x128xbf16>, vector<128x128xbf16>, vector<384x128xf32> -> vector<384x128xf32>
    %12 = vector.shape_cast %11 : vector<384x128xf32> to vector<16x24x128xf32>
    %13 = vector.extract_strided_slice %12 {offsets = [0, 1, 0], sizes = [16, 16, 128], strides = [1, 1, 1]} : vector<16x24x128xf32> to vector<16x16x128xf32>
    %14 = arith.addf %8, %13 : vector<16x16x128xf32>
    %c2 = arith.constant 2 : index
    %c0_11 = arith.constant 0 : index
    %c0_12 = arith.constant 0 : index
    %15 = vector.load %arg3[%c2, %c0_11, %c0_12] : memref<9x128x128xbf16, #tpu.memory_space<vmem>>, vector<1x128x128xbf16>
    %16 = vector.shape_cast %15 : vector<1x128x128xbf16> to vector<128x128xbf16>
    %cst_13 = arith.constant dense<0.000000e+00> : vector<384x128xf32>
    %17 = tpu.matmul %3, %16, %cst_13 {dimension_numbers = #tpu.dot_dimension_numbers<[1], [0], [0], [1], [0, 0, 1, 1], [], []>} : vector<384x128xbf16>, vector<128x128xbf16>, vector<384x128xf32> -> vector<384x128xf32>
    %18 = vector.shape_cast %17 : vector<384x128xf32> to vector<16x24x128xf32>
    %19 = vector.extract_strided_slice %18 {offsets = [0, 2, 0], sizes = [16, 16, 128], strides = [1, 1, 1]} : vector<16x24x128xf32> to vector<16x16x128xf32>
    %20 = arith.addf %14, %19 : vector<16x16x128xf32>
    %c0_14 = arith.constant 0 : index
    %c1_15 = arith.constant 1 : index
    %c0_16 = arith.constant 0 : index
    %c0_17 = arith.constant 0 : index
    %21 = vector.load %arg2[%c0_14, %c1_15, %c0_16, %c0_17] : memref<1x18x24x128xbf16, #tpu.memory_space<vmem>>, vector<1x16x24x128xbf16>
    %22 = vector.shape_cast %21 : vector<1x16x24x128xbf16> to vector<16x24x128xbf16>
    %23 = vector.shape_cast %22 : vector<16x24x128xbf16> to vector<384x128xbf16>
    %c3 = arith.constant 3 : index
    %c0_18 = arith.constant 0 : index
    %c0_19 = arith.constant 0 : index
    %24 = vector.load %arg3[%c3, %c0_18, %c0_19] : memref<9x128x128xbf16, #tpu.memory_space<vmem>>, vector<1x128x128xbf16>
    %25 = vector.shape_cast %24 : vector<1x128x128xbf16> to vector<128x128xbf16>
    %cst_20 = arith.constant dense<0.000000e+00> : vector<384x128xf32>
    %26 = tpu.matmul %23, %25, %cst_20 {dimension_numbers = #tpu.dot_dimension_numbers<[1], [0], [0], [1], [0, 0, 1, 1], [], []>} : vector<384x128xbf16>, vector<128x128xbf16>, vector<384x128xf32> -> vector<384x128xf32>
    %27 = vector.shape_cast %26 : vector<384x128xf32> to vector<16x24x128xf32>
    %28 = vector.extract_strided_slice %27 {offsets = [0, 0, 0], sizes = [16, 16, 128], strides = [1, 1, 1]} : vector<16x24x128xf32> to vector<16x16x128xf32>
    %29 = arith.addf %20, %28 : vector<16x16x128xf32>
    %c4 = arith.constant 4 : index
    %c0_21 = arith.constant 0 : index
    %c0_22 = arith.constant 0 : index
    %30 = vector.load %arg3[%c4, %c0_21, %c0_22] : memref<9x128x128xbf16, #tpu.memory_space<vmem>>, vector<1x128x128xbf16>
    %31 = vector.shape_cast %30 : vector<1x128x128xbf16> to vector<128x128xbf16>
    %cst_23 = arith.constant dense<0.000000e+00> : vector<384x128xf32>
    %32 = tpu.matmul %23, %31, %cst_23 {dimension_numbers = #tpu.dot_dimension_numbers<[1], [0], [0], [1], [0, 0, 1, 1], [], []>} : vector<384x128xbf16>, vector<128x128xbf16>, vector<384x128xf32> -> vector<384x128xf32>
    %33 = vector.shape_cast %32 : vector<384x128xf32> to vector<16x24x128xf32>
    %34 = vector.extract_strided_slice %33 {offsets = [0, 1, 0], sizes = [16, 16, 128], strides = [1, 1, 1]} : vector<16x24x128xf32> to vector<16x16x128xf32>
    %35 = arith.addf %29, %34 : vector<16x16x128xf32>
    %c5 = arith.constant 5 : index
    %c0_24 = arith.constant 0 : index
    %c0_25 = arith.constant 0 : index
    %36 = vector.load %arg3[%c5, %c0_24, %c0_25] : memref<9x128x128xbf16, #tpu.memory_space<vmem>>, vector<1x128x128xbf16>
    %37 = vector.shape_cast %36 : vector<1x128x128xbf16> to vector<128x128xbf16>
    %cst_26 = arith.constant dense<0.000000e+00> : vector<384x128xf32>
    %38 = tpu.matmul %23, %37, %cst_26 {dimension_numbers = #tpu.dot_dimension_numbers<[1], [0], [0], [1], [0, 0, 1, 1], [], []>} : vector<384x128xbf16>, vector<128x128xbf16>, vector<384x128xf32> -> vector<384x128xf32>
    %39 = vector.shape_cast %38 : vector<384x128xf32> to vector<16x24x128xf32>
    %40 = vector.extract_strided_slice %39 {offsets = [0, 2, 0], sizes = [16, 16, 128], strides = [1, 1, 1]} : vector<16x24x128xf32> to vector<16x16x128xf32>
    %41 = arith.addf %35, %40 : vector<16x16x128xf32>
    %c0_27 = arith.constant 0 : index
    %c2_28 = arith.constant 2 : index
    %c0_29 = arith.constant 0 : index
    %c0_30 = arith.constant 0 : index
    %42 = vector.load %arg2[%c0_27, %c2_28, %c0_29, %c0_30] : memref<1x18x24x128xbf16, #tpu.memory_space<vmem>>, vector<1x16x24x128xbf16>
    %43 = vector.shape_cast %42 : vector<1x16x24x128xbf16> to vector<16x24x128xbf16>
    %44 = vector.shape_cast %43 : vector<16x24x128xbf16> to vector<384x128xbf16>
    %c6 = arith.constant 6 : index
    %c0_31 = arith.constant 0 : index
    %c0_32 = arith.constant 0 : index
    %45 = vector.load %arg3[%c6, %c0_31, %c0_32] : memref<9x128x128xbf16, #tpu.memory_space<vmem>>, vector<1x128x128xbf16>
    %46 = vector.shape_cast %45 : vector<1x128x128xbf16> to vector<128x128xbf16>
    %cst_33 = arith.constant dense<0.000000e+00> : vector<384x128xf32>
    %47 = tpu.matmul %44, %46, %cst_33 {dimension_numbers = #tpu.dot_dimension_numbers<[1], [0], [0], [1], [0, 0, 1, 1], [], []>} : vector<384x128xbf16>, vector<128x128xbf16>, vector<384x128xf32> -> vector<384x128xf32>
    %48 = vector.shape_cast %47 : vector<384x128xf32> to vector<16x24x128xf32>
    %49 = vector.extract_strided_slice %48 {offsets = [0, 0, 0], sizes = [16, 16, 128], strides = [1, 1, 1]} : vector<16x24x128xf32> to vector<16x16x128xf32>
    %50 = arith.addf %41, %49 : vector<16x16x128xf32>
    %c7 = arith.constant 7 : index
    %c0_34 = arith.constant 0 : index
    %c0_35 = arith.constant 0 : index
    %51 = vector.load %arg3[%c7, %c0_34, %c0_35] : memref<9x128x128xbf16, #tpu.memory_space<vmem>>, vector<1x128x128xbf16>
    %52 = vector.shape_cast %51 : vector<1x128x128xbf16> to vector<128x128xbf16>
    %cst_36 = arith.constant dense<0.000000e+00> : vector<384x128xf32>
    %53 = tpu.matmul %44, %52, %cst_36 {dimension_numbers = #tpu.dot_dimension_numbers<[1], [0], [0], [1], [0, 0, 1, 1], [], []>} : vector<384x128xbf16>, vector<128x128xbf16>, vector<384x128xf32> -> vector<384x128xf32>
    %54 = vector.shape_cast %53 : vector<384x128xf32> to vector<16x24x128xf32>
    %55 = vector.extract_strided_slice %54 {offsets = [0, 1, 0], sizes = [16, 16, 128], strides = [1, 1, 1]} : vector<16x24x128xf32> to vector<16x16x128xf32>
    %56 = arith.addf %50, %55 : vector<16x16x128xf32>
    %c8 = arith.constant 8 : index
    %c0_37 = arith.constant 0 : index
    %c0_38 = arith.constant 0 : index
    %57 = vector.load %arg3[%c8, %c0_37, %c0_38] : memref<9x128x128xbf16, #tpu.memory_space<vmem>>, vector<1x128x128xbf16>
    %58 = vector.shape_cast %57 : vector<1x128x128xbf16> to vector<128x128xbf16>
    %cst_39 = arith.constant dense<0.000000e+00> : vector<384x128xf32>
    %59 = tpu.matmul %44, %58, %cst_39 {dimension_numbers = #tpu.dot_dimension_numbers<[1], [0], [0], [1], [0, 0, 1, 1], [], []>} : vector<384x128xbf16>, vector<128x128xbf16>, vector<384x128xf32> -> vector<384x128xf32>
    %60 = vector.shape_cast %59 : vector<384x128xf32> to vector<16x24x128xf32>
    %61 = vector.extract_strided_slice %60 {offsets = [0, 2, 0], sizes = [16, 16, 128], strides = [1, 1, 1]} : vector<16x24x128xf32> to vector<16x16x128xf32>
    %62 = arith.addf %56, %61 : vector<16x16x128xf32>
    %63 = vector.shape_cast %0 : vector<1x128xf32> to vector<1x1x128xf32>
    %64 = vector.broadcast %63 : vector<1x1x128xf32> to vector<16x16x128xf32>
    %65 = arith.addf %62, %64 : vector<16x16x128xf32>
    %cst_40 = arith.constant 0.000000e+00 : f32
    %66 = vector.broadcast %cst_40 : f32 to vector<16x16x128xf32>
    %67 = arith.maximumf %65, %66 : vector<16x16x128xf32>
    %68 = arith.truncf %67 : vector<16x16x128xf32> to vector<16x16x128xbf16>
    %c0_41 = arith.constant 0 : index
    %c0_42 = arith.constant 0 : index
    %c0_43 = arith.constant 0 : index
    %c0_44 = arith.constant 0 : index
    %69 = vector.load %arg5[%c0_41, %c0_42, %c0_43, %c0_44] : memref<1x16x16x128xbf16, #tpu.memory_space<vmem>>, vector<1x16x16x128xbf16>
    %70 = vector.shape_cast %69 : vector<1x16x16x128xbf16> to vector<16x16x128xbf16>
    %71 = vector.shape_cast %68 : vector<16x16x128xbf16> to vector<1x16x16x128xbf16>
    tpu.vector_store %arg5[%c0_41, %c0_42, %c0_43, %c0_44], %71 {strides = array<i32>} : memref<1x16x16x128xbf16, #tpu.memory_space<vmem>>, vector<1x16x16x128xbf16>,
    return
  }
  func.func @transform_0(%arg0: i32, %arg1: i32) -> (i32, i32, i32, i32) {
    %c0_i32 = arith.constant 0 : i32
    %c0_i32_0 = arith.constant 0 : i32
    %c0_i32_1 = arith.constant 0 : i32
    %c0_i32_2 = arith.constant 0 : i32
    return %arg0, %c0_i32, %c0_i32_0, %c0_i32_1 : i32, i32, i32, i32
  }
  func.func @transform_1(%arg0: i32, %arg1: i32) -> (i32, i32, i32) {
    %c0_i32 = arith.constant 0 : i32
    %c0_i32_0 = arith.constant 0 : i32
    %c0_i32_1 = arith.constant 0 : i32
    return %c0_i32, %c0_i32_0, %arg1 : i32, i32, i32
  }
  func.func @transform_2(%arg0: i32, %arg1: i32) -> (i32, i32) {
    %c0_i32 = arith.constant 0 : i32
    %c0_i32_0 = arith.constant 0 : i32
    return %c0_i32, %arg1 : i32, i32
  }
  func.func @transform_3(%arg0: i32, %arg1: i32) -> (i32, i32, i32, i32) {
    %c0_i32 = arith.constant 0 : i32
    %c0_i32_0 = arith.constant 0 : i32
    %c0_i32_1 = arith.constant 0 : i32
    return %arg0, %c0_i32, %c0_i32_0, %arg1 : i32, i32, i32, i32
  }
}

module attributes {stable_mosaic.version = 11 : i64} {
  func.func @_maxpool_kernel(%arg0: i32, %arg1: memref<1x8x2x8x256xbf16, #tpu.memory_space<vmem>>, %arg2: memref<1x8x8x128xbf16, #tpu.memory_space<vmem>>) attributes {dimension_semantics = [#tpu.dimension_semantics<parallel>], iteration_bounds = array<i64: 2>, scalar_prefetch = 0 : i64, scratch_operands = 0 : i64, tpu.core_type = #tpu.core_type<tc>, window_params = [{transform_indices = @transform_0, window_bounds = array<i64: 1, 8, 2, 8, 256>}, {transform_indices = @transform_1, window_bounds = array<i64: 1, 8, 8, 128>}]} {
    %c0 = arith.constant 0 : index
    %c0_0 = arith.constant 0 : index
    %c0_1 = arith.constant 0 : index
    %c0_2 = arith.constant 0 : index
    %c0_3 = arith.constant 0 : index
    %0 = vector.load %arg1[%c0, %c0_0, %c0_1, %c0_2, %c0_3] : memref<1x8x2x8x256xbf16, #tpu.memory_space<vmem>>, vector<1x8x1x8x256xbf16>
    %1 = vector.shape_cast %0 : vector<1x8x1x8x256xbf16> to vector<8x8x256xbf16>
    %c0_4 = arith.constant 0 : index
    %c0_5 = arith.constant 0 : index
    %c1 = arith.constant 1 : index
    %c0_6 = arith.constant 0 : index
    %c0_7 = arith.constant 0 : index
    %2 = vector.load %arg1[%c0_4, %c0_5, %c1, %c0_6, %c0_7] : memref<1x8x2x8x256xbf16, #tpu.memory_space<vmem>>, vector<1x8x1x8x256xbf16>
    %3 = vector.shape_cast %2 : vector<1x8x1x8x256xbf16> to vector<8x8x256xbf16>
    %4 = arith.maximumf %1, %3 : vector<8x8x256xbf16>
    %5 = vector.extract_strided_slice %4 {offsets = [0, 0, 0], sizes = [8, 8, 128], strides = [1, 1, 1]} : vector<8x8x256xbf16> to vector<8x8x128xbf16>
    %6 = vector.extract_strided_slice %4 {offsets = [0, 0, 128], sizes = [8, 8, 128], strides = [1, 1, 1]} : vector<8x8x256xbf16> to vector<8x8x128xbf16>
    %7 = arith.maximumf %5, %6 : vector<8x8x128xbf16>
    %c0_8 = arith.constant 0 : index
    %c0_9 = arith.constant 0 : index
    %c0_10 = arith.constant 0 : index
    %c0_11 = arith.constant 0 : index
    %8 = vector.load %arg2[%c0_8, %c0_9, %c0_10, %c0_11] : memref<1x8x8x128xbf16, #tpu.memory_space<vmem>>, vector<1x8x8x128xbf16>
    %9 = vector.shape_cast %8 : vector<1x8x8x128xbf16> to vector<8x8x128xbf16>
    %10 = vector.shape_cast %7 : vector<8x8x128xbf16> to vector<1x8x8x128xbf16>
    tpu.vector_store %arg2[%c0_8, %c0_9, %c0_10, %c0_11], %10 {strides = array<i32>} : memref<1x8x8x128xbf16, #tpu.memory_space<vmem>>, vector<1x8x8x128xbf16>,
    return
  }
  func.func @transform_0(%arg0: i32) -> (i32, i32, i32, i32, i32) {
    %c0_i32 = arith.constant 0 : i32
    %c0_i32_0 = arith.constant 0 : i32
    %c0_i32_1 = arith.constant 0 : i32
    %c0_i32_2 = arith.constant 0 : i32
    %c0_i32_3 = arith.constant 0 : i32
    return %arg0, %c0_i32, %c0_i32_0, %c0_i32_1, %c0_i32_2 : i32, i32, i32, i32, i32
  }
  func.func @transform_1(%arg0: i32) -> (i32, i32, i32, i32) {
    %c0_i32 = arith.constant 0 : i32
    %c0_i32_0 = arith.constant 0 : i32
    %c0_i32_1 = arith.constant 0 : i32
    %c0_i32_2 = arith.constant 0 : i32
    return %arg0, %c0_i32, %c0_i32_0, %c0_i32_1 : i32, i32, i32, i32
  }
}

module attributes {stable_mosaic.version = 11 : i64} {
  func.func @kernel(%arg0: i32, %arg1: i32, %arg2: memref<1x10x16x128xbf16, #tpu.memory_space<vmem>>, %arg3: memref<9x128x128xbf16, #tpu.memory_space<vmem>>, %arg4: memref<1x128xf32, #tpu.memory_space<vmem>>, %arg5: memref<1x8x8x128xbf16, #tpu.memory_space<vmem>>) attributes {dimension_semantics = [#tpu.dimension_semantics<parallel>, #tpu.dimension_semantics<parallel>], iteration_bounds = array<i64: 2, 2>, scalar_prefetch = 0 : i64, scratch_operands = 0 : i64, tpu.core_type = #tpu.core_type<tc>, window_params = [{transform_indices = @transform_0, window_bounds = array<i64: 1, 10, 16, 128>}, {transform_indices = @transform_1, window_bounds = array<i64: 9, 128, 128>}, {transform_indices = @transform_2, window_bounds = array<i64: 1, 128>}, {transform_indices = @transform_3, window_bounds = array<i64: 1, 8, 8, 128>}]} {
    %c0 = arith.constant 0 : index
    %c0_0 = arith.constant 0 : index
    %0 = vector.load %arg4[%c0, %c0_0] : memref<1x128xf32, #tpu.memory_space<vmem>>, vector<1x128xf32>
    %c0_1 = arith.constant 0 : index
    %c0_2 = arith.constant 0 : index
    %c0_3 = arith.constant 0 : index
    %c0_4 = arith.constant 0 : index
    %1 = vector.load %arg2[%c0_1, %c0_2, %c0_3, %c0_4] : memref<1x10x16x128xbf16, #tpu.memory_space<vmem>>, vector<1x8x16x128xbf16>
    %2 = vector.shape_cast %1 : vector<1x8x16x128xbf16> to vector<8x16x128xbf16>
    %3 = vector.shape_cast %2 : vector<8x16x128xbf16> to vector<128x128xbf16>
    %c0_5 = arith.constant 0 : index
    %c0_6 = arith.constant 0 : index
    %c0_7 = arith.constant 0 : index
    %4 = vector.load %arg3[%c0_5, %c0_6, %c0_7] : memref<9x128x128xbf16, #tpu.memory_space<vmem>>, vector<1x128x128xbf16>
    %5 = vector.shape_cast %4 : vector<1x128x128xbf16> to vector<128x128xbf16>
    %cst = arith.constant dense<0.000000e+00> : vector<128x128xf32>
    %6 = tpu.matmul %3, %5, %cst {dimension_numbers = #tpu.dot_dimension_numbers<[1], [0], [0], [1], [0, 0, 1, 1], [], []>} : vector<128x128xbf16>, vector<128x128xbf16>, vector<128x128xf32> -> vector<128x128xf32>
    %7 = vector.shape_cast %6 : vector<128x128xf32> to vector<8x16x128xf32>
    %8 = vector.extract_strided_slice %7 {offsets = [0, 0, 0], sizes = [8, 8, 128], strides = [1, 1, 1]} : vector<8x16x128xf32> to vector<8x8x128xf32>
    %c1 = arith.constant 1 : index
    %c0_8 = arith.constant 0 : index
    %c0_9 = arith.constant 0 : index
    %9 = vector.load %arg3[%c1, %c0_8, %c0_9] : memref<9x128x128xbf16, #tpu.memory_space<vmem>>, vector<1x128x128xbf16>
    %10 = vector.shape_cast %9 : vector<1x128x128xbf16> to vector<128x128xbf16>
    %cst_10 = arith.constant dense<0.000000e+00> : vector<128x128xf32>
    %11 = tpu.matmul %3, %10, %cst_10 {dimension_numbers = #tpu.dot_dimension_numbers<[1], [0], [0], [1], [0, 0, 1, 1], [], []>} : vector<128x128xbf16>, vector<128x128xbf16>, vector<128x128xf32> -> vector<128x128xf32>
    %12 = vector.shape_cast %11 : vector<128x128xf32> to vector<8x16x128xf32>
    %13 = vector.extract_strided_slice %12 {offsets = [0, 1, 0], sizes = [8, 8, 128], strides = [1, 1, 1]} : vector<8x16x128xf32> to vector<8x8x128xf32>
    %14 = arith.addf %8, %13 : vector<8x8x128xf32>
    %c2 = arith.constant 2 : index
    %c0_11 = arith.constant 0 : index
    %c0_12 = arith.constant 0 : index
    %15 = vector.load %arg3[%c2, %c0_11, %c0_12] : memref<9x128x128xbf16, #tpu.memory_space<vmem>>, vector<1x128x128xbf16>
    %16 = vector.shape_cast %15 : vector<1x128x128xbf16> to vector<128x128xbf16>
    %cst_13 = arith.constant dense<0.000000e+00> : vector<128x128xf32>
    %17 = tpu.matmul %3, %16, %cst_13 {dimension_numbers = #tpu.dot_dimension_numbers<[1], [0], [0], [1], [0, 0, 1, 1], [], []>} : vector<128x128xbf16>, vector<128x128xbf16>, vector<128x128xf32> -> vector<128x128xf32>
    %18 = vector.shape_cast %17 : vector<128x128xf32> to vector<8x16x128xf32>
    %19 = vector.extract_strided_slice %18 {offsets = [0, 2, 0], sizes = [8, 8, 128], strides = [1, 1, 1]} : vector<8x16x128xf32> to vector<8x8x128xf32>
    %20 = arith.addf %14, %19 : vector<8x8x128xf32>
    %c0_14 = arith.constant 0 : index
    %c1_15 = arith.constant 1 : index
    %c0_16 = arith.constant 0 : index
    %c0_17 = arith.constant 0 : index
    %21 = vector.load %arg2[%c0_14, %c1_15, %c0_16, %c0_17] : memref<1x10x16x128xbf16, #tpu.memory_space<vmem>>, vector<1x8x16x128xbf16>
    %22 = vector.shape_cast %21 : vector<1x8x16x128xbf16> to vector<8x16x128xbf16>
    %23 = vector.shape_cast %22 : vector<8x16x128xbf16> to vector<128x128xbf16>
    %c3 = arith.constant 3 : index
    %c0_18 = arith.constant 0 : index
    %c0_19 = arith.constant 0 : index
    %24 = vector.load %arg3[%c3, %c0_18, %c0_19] : memref<9x128x128xbf16, #tpu.memory_space<vmem>>, vector<1x128x128xbf16>
    %25 = vector.shape_cast %24 : vector<1x128x128xbf16> to vector<128x128xbf16>
    %cst_20 = arith.constant dense<0.000000e+00> : vector<128x128xf32>
    %26 = tpu.matmul %23, %25, %cst_20 {dimension_numbers = #tpu.dot_dimension_numbers<[1], [0], [0], [1], [0, 0, 1, 1], [], []>} : vector<128x128xbf16>, vector<128x128xbf16>, vector<128x128xf32> -> vector<128x128xf32>
    %27 = vector.shape_cast %26 : vector<128x128xf32> to vector<8x16x128xf32>
    %28 = vector.extract_strided_slice %27 {offsets = [0, 0, 0], sizes = [8, 8, 128], strides = [1, 1, 1]} : vector<8x16x128xf32> to vector<8x8x128xf32>
    %29 = arith.addf %20, %28 : vector<8x8x128xf32>
    %c4 = arith.constant 4 : index
    %c0_21 = arith.constant 0 : index
    %c0_22 = arith.constant 0 : index
    %30 = vector.load %arg3[%c4, %c0_21, %c0_22] : memref<9x128x128xbf16, #tpu.memory_space<vmem>>, vector<1x128x128xbf16>
    %31 = vector.shape_cast %30 : vector<1x128x128xbf16> to vector<128x128xbf16>
    %cst_23 = arith.constant dense<0.000000e+00> : vector<128x128xf32>
    %32 = tpu.matmul %23, %31, %cst_23 {dimension_numbers = #tpu.dot_dimension_numbers<[1], [0], [0], [1], [0, 0, 1, 1], [], []>} : vector<128x128xbf16>, vector<128x128xbf16>, vector<128x128xf32> -> vector<128x128xf32>
    %33 = vector.shape_cast %32 : vector<128x128xf32> to vector<8x16x128xf32>
    %34 = vector.extract_strided_slice %33 {offsets = [0, 1, 0], sizes = [8, 8, 128], strides = [1, 1, 1]} : vector<8x16x128xf32> to vector<8x8x128xf32>
    %35 = arith.addf %29, %34 : vector<8x8x128xf32>
    %c5 = arith.constant 5 : index
    %c0_24 = arith.constant 0 : index
    %c0_25 = arith.constant 0 : index
    %36 = vector.load %arg3[%c5, %c0_24, %c0_25] : memref<9x128x128xbf16, #tpu.memory_space<vmem>>, vector<1x128x128xbf16>
    %37 = vector.shape_cast %36 : vector<1x128x128xbf16> to vector<128x128xbf16>
    %cst_26 = arith.constant dense<0.000000e+00> : vector<128x128xf32>
    %38 = tpu.matmul %23, %37, %cst_26 {dimension_numbers = #tpu.dot_dimension_numbers<[1], [0], [0], [1], [0, 0, 1, 1], [], []>} : vector<128x128xbf16>, vector<128x128xbf16>, vector<128x128xf32> -> vector<128x128xf32>
    %39 = vector.shape_cast %38 : vector<128x128xf32> to vector<8x16x128xf32>
    %40 = vector.extract_strided_slice %39 {offsets = [0, 2, 0], sizes = [8, 8, 128], strides = [1, 1, 1]} : vector<8x16x128xf32> to vector<8x8x128xf32>
    %41 = arith.addf %35, %40 : vector<8x8x128xf32>
    %c0_27 = arith.constant 0 : index
    %c2_28 = arith.constant 2 : index
    %c0_29 = arith.constant 0 : index
    %c0_30 = arith.constant 0 : index
    %42 = vector.load %arg2[%c0_27, %c2_28, %c0_29, %c0_30] : memref<1x10x16x128xbf16, #tpu.memory_space<vmem>>, vector<1x8x16x128xbf16>
    %43 = vector.shape_cast %42 : vector<1x8x16x128xbf16> to vector<8x16x128xbf16>
    %44 = vector.shape_cast %43 : vector<8x16x128xbf16> to vector<128x128xbf16>
    %c6 = arith.constant 6 : index
    %c0_31 = arith.constant 0 : index
    %c0_32 = arith.constant 0 : index
    %45 = vector.load %arg3[%c6, %c0_31, %c0_32] : memref<9x128x128xbf16, #tpu.memory_space<vmem>>, vector<1x128x128xbf16>
    %46 = vector.shape_cast %45 : vector<1x128x128xbf16> to vector<128x128xbf16>
    %cst_33 = arith.constant dense<0.000000e+00> : vector<128x128xf32>
    %47 = tpu.matmul %44, %46, %cst_33 {dimension_numbers = #tpu.dot_dimension_numbers<[1], [0], [0], [1], [0, 0, 1, 1], [], []>} : vector<128x128xbf16>, vector<128x128xbf16>, vector<128x128xf32> -> vector<128x128xf32>
    %48 = vector.shape_cast %47 : vector<128x128xf32> to vector<8x16x128xf32>
    %49 = vector.extract_strided_slice %48 {offsets = [0, 0, 0], sizes = [8, 8, 128], strides = [1, 1, 1]} : vector<8x16x128xf32> to vector<8x8x128xf32>
    %50 = arith.addf %41, %49 : vector<8x8x128xf32>
    %c7 = arith.constant 7 : index
    %c0_34 = arith.constant 0 : index
    %c0_35 = arith.constant 0 : index
    %51 = vector.load %arg3[%c7, %c0_34, %c0_35] : memref<9x128x128xbf16, #tpu.memory_space<vmem>>, vector<1x128x128xbf16>
    %52 = vector.shape_cast %51 : vector<1x128x128xbf16> to vector<128x128xbf16>
    %cst_36 = arith.constant dense<0.000000e+00> : vector<128x128xf32>
    %53 = tpu.matmul %44, %52, %cst_36 {dimension_numbers = #tpu.dot_dimension_numbers<[1], [0], [0], [1], [0, 0, 1, 1], [], []>} : vector<128x128xbf16>, vector<128x128xbf16>, vector<128x128xf32> -> vector<128x128xf32>
    %54 = vector.shape_cast %53 : vector<128x128xf32> to vector<8x16x128xf32>
    %55 = vector.extract_strided_slice %54 {offsets = [0, 1, 0], sizes = [8, 8, 128], strides = [1, 1, 1]} : vector<8x16x128xf32> to vector<8x8x128xf32>
    %56 = arith.addf %50, %55 : vector<8x8x128xf32>
    %c8 = arith.constant 8 : index
    %c0_37 = arith.constant 0 : index
    %c0_38 = arith.constant 0 : index
    %57 = vector.load %arg3[%c8, %c0_37, %c0_38] : memref<9x128x128xbf16, #tpu.memory_space<vmem>>, vector<1x128x128xbf16>
    %58 = vector.shape_cast %57 : vector<1x128x128xbf16> to vector<128x128xbf16>
    %cst_39 = arith.constant dense<0.000000e+00> : vector<128x128xf32>
    %59 = tpu.matmul %44, %58, %cst_39 {dimension_numbers = #tpu.dot_dimension_numbers<[1], [0], [0], [1], [0, 0, 1, 1], [], []>} : vector<128x128xbf16>, vector<128x128xbf16>, vector<128x128xf32> -> vector<128x128xf32>
    %60 = vector.shape_cast %59 : vector<128x128xf32> to vector<8x16x128xf32>
    %61 = vector.extract_strided_slice %60 {offsets = [0, 2, 0], sizes = [8, 8, 128], strides = [1, 1, 1]} : vector<8x16x128xf32> to vector<8x8x128xf32>
    %62 = arith.addf %56, %61 : vector<8x8x128xf32>
    %63 = vector.shape_cast %0 : vector<1x128xf32> to vector<1x1x128xf32>
    %64 = vector.broadcast %63 : vector<1x1x128xf32> to vector<8x8x128xf32>
    %65 = arith.addf %62, %64 : vector<8x8x128xf32>
    %cst_40 = arith.constant 0.000000e+00 : f32
    %66 = vector.broadcast %cst_40 : f32 to vector<8x8x128xf32>
    %67 = arith.maximumf %65, %66 : vector<8x8x128xf32>
    %68 = arith.truncf %67 : vector<8x8x128xf32> to vector<8x8x128xbf16>
    %c0_41 = arith.constant 0 : index
    %c0_42 = arith.constant 0 : index
    %c0_43 = arith.constant 0 : index
    %c0_44 = arith.constant 0 : index
    %69 = vector.load %arg5[%c0_41, %c0_42, %c0_43, %c0_44] : memref<1x8x8x128xbf16, #tpu.memory_space<vmem>>, vector<1x8x8x128xbf16>
    %70 = vector.shape_cast %69 : vector<1x8x8x128xbf16> to vector<8x8x128xbf16>
    %71 = vector.shape_cast %68 : vector<8x8x128xbf16> to vector<1x8x8x128xbf16>
    tpu.vector_store %arg5[%c0_41, %c0_42, %c0_43, %c0_44], %71 {strides = array<i32>} : memref<1x8x8x128xbf16, #tpu.memory_space<vmem>>, vector<1x8x8x128xbf16>,
    return
  }
  func.func @transform_0(%arg0: i32, %arg1: i32) -> (i32, i32, i32, i32) {
    %c0_i32 = arith.constant 0 : i32
    %c0_i32_0 = arith.constant 0 : i32
    %c0_i32_1 = arith.constant 0 : i32
    %c0_i32_2 = arith.constant 0 : i32
    return %arg0, %c0_i32, %c0_i32_0, %c0_i32_1 : i32, i32, i32, i32
  }
  func.func @transform_1(%arg0: i32, %arg1: i32) -> (i32, i32, i32) {
    %c0_i32 = arith.constant 0 : i32
    %c0_i32_0 = arith.constant 0 : i32
    %c0_i32_1 = arith.constant 0 : i32
    return %c0_i32, %c0_i32_0, %arg1 : i32, i32, i32
  }
  func.func @transform_2(%arg0: i32, %arg1: i32) -> (i32, i32) {
    %c0_i32 = arith.constant 0 : i32
    %c0_i32_0 = arith.constant 0 : i32
    return %c0_i32, %arg1 : i32, i32
  }
  func.func @transform_3(%arg0: i32, %arg1: i32) -> (i32, i32, i32, i32) {
    %c0_i32 = arith.constant 0 : i32
    %c0_i32_0 = arith.constant 0 : i32
    %c0_i32_1 = arith.constant 0 : i32
    return %arg0, %c0_i32, %c0_i32_0, %arg1 : i32, i32, i32, i32
  }
}

module attributes {stable_mosaic.version = 11 : i64} {
  func.func @kernel(%arg0: i32, %arg1: i32, %arg2: memref<1x10x16x256xbf16, #tpu.memory_space<vmem>>, %arg3: memref<9x256x128xbf16, #tpu.memory_space<vmem>>, %arg4: memref<1x128xf32, #tpu.memory_space<vmem>>, %arg5: memref<1x8x8x128xbf16, #tpu.memory_space<vmem>>) attributes {dimension_semantics = [#tpu.dimension_semantics<parallel>, #tpu.dimension_semantics<parallel>], iteration_bounds = array<i64: 2, 1>, scalar_prefetch = 0 : i64, scratch_operands = 0 : i64, tpu.core_type = #tpu.core_type<tc>, window_params = [{transform_indices = @transform_0, window_bounds = array<i64: 1, 10, 16, 256>}, {transform_indices = @transform_1, window_bounds = array<i64: 9, 256, 128>}, {transform_indices = @transform_2, window_bounds = array<i64: 1, 128>}, {transform_indices = @transform_3, window_bounds = array<i64: 1, 8, 8, 128>}]} {
    %c0 = arith.constant 0 : index
    %c0_0 = arith.constant 0 : index
    %0 = vector.load %arg4[%c0, %c0_0] : memref<1x128xf32, #tpu.memory_space<vmem>>, vector<1x128xf32>
    %c0_1 = arith.constant 0 : index
    %c0_2 = arith.constant 0 : index
    %c0_3 = arith.constant 0 : index
    %c0_4 = arith.constant 0 : index
    %1 = vector.load %arg2[%c0_1, %c0_2, %c0_3, %c0_4] : memref<1x10x16x256xbf16, #tpu.memory_space<vmem>>, vector<1x8x16x256xbf16>
    %2 = vector.shape_cast %1 : vector<1x8x16x256xbf16> to vector<8x16x256xbf16>
    %3 = vector.shape_cast %2 : vector<8x16x256xbf16> to vector<128x256xbf16>
    %c0_5 = arith.constant 0 : index
    %c0_6 = arith.constant 0 : index
    %c0_7 = arith.constant 0 : index
    %4 = vector.load %arg3[%c0_5, %c0_6, %c0_7] : memref<9x256x128xbf16, #tpu.memory_space<vmem>>, vector<1x256x128xbf16>
    %5 = vector.shape_cast %4 : vector<1x256x128xbf16> to vector<256x128xbf16>
    %cst = arith.constant dense<0.000000e+00> : vector<128x128xf32>
    %6 = tpu.matmul %3, %5, %cst {dimension_numbers = #tpu.dot_dimension_numbers<[1], [0], [0], [1], [0, 0, 1, 1], [], []>} : vector<128x256xbf16>, vector<256x128xbf16>, vector<128x128xf32> -> vector<128x128xf32>
    %7 = vector.shape_cast %6 : vector<128x128xf32> to vector<8x16x128xf32>
    %8 = vector.extract_strided_slice %7 {offsets = [0, 0, 0], sizes = [8, 8, 128], strides = [1, 1, 1]} : vector<8x16x128xf32> to vector<8x8x128xf32>
    %c1 = arith.constant 1 : index
    %c0_8 = arith.constant 0 : index
    %c0_9 = arith.constant 0 : index
    %9 = vector.load %arg3[%c1, %c0_8, %c0_9] : memref<9x256x128xbf16, #tpu.memory_space<vmem>>, vector<1x256x128xbf16>
    %10 = vector.shape_cast %9 : vector<1x256x128xbf16> to vector<256x128xbf16>
    %cst_10 = arith.constant dense<0.000000e+00> : vector<128x128xf32>
    %11 = tpu.matmul %3, %10, %cst_10 {dimension_numbers = #tpu.dot_dimension_numbers<[1], [0], [0], [1], [0, 0, 1, 1], [], []>} : vector<128x256xbf16>, vector<256x128xbf16>, vector<128x128xf32> -> vector<128x128xf32>
    %12 = vector.shape_cast %11 : vector<128x128xf32> to vector<8x16x128xf32>
    %13 = vector.extract_strided_slice %12 {offsets = [0, 1, 0], sizes = [8, 8, 128], strides = [1, 1, 1]} : vector<8x16x128xf32> to vector<8x8x128xf32>
    %14 = arith.addf %8, %13 : vector<8x8x128xf32>
    %c2 = arith.constant 2 : index
    %c0_11 = arith.constant 0 : index
    %c0_12 = arith.constant 0 : index
    %15 = vector.load %arg3[%c2, %c0_11, %c0_12] : memref<9x256x128xbf16, #tpu.memory_space<vmem>>, vector<1x256x128xbf16>
    %16 = vector.shape_cast %15 : vector<1x256x128xbf16> to vector<256x128xbf16>
    %cst_13 = arith.constant dense<0.000000e+00> : vector<128x128xf32>
    %17 = tpu.matmul %3, %16, %cst_13 {dimension_numbers = #tpu.dot_dimension_numbers<[1], [0], [0], [1], [0, 0, 1, 1], [], []>} : vector<128x256xbf16>, vector<256x128xbf16>, vector<128x128xf32> -> vector<128x128xf32>
    %18 = vector.shape_cast %17 : vector<128x128xf32> to vector<8x16x128xf32>
    %19 = vector.extract_strided_slice %18 {offsets = [0, 2, 0], sizes = [8, 8, 128], strides = [1, 1, 1]} : vector<8x16x128xf32> to vector<8x8x128xf32>
    %20 = arith.addf %14, %19 : vector<8x8x128xf32>
    %c0_14 = arith.constant 0 : index
    %c1_15 = arith.constant 1 : index
    %c0_16 = arith.constant 0 : index
    %c0_17 = arith.constant 0 : index
    %21 = vector.load %arg2[%c0_14, %c1_15, %c0_16, %c0_17] : memref<1x10x16x256xbf16, #tpu.memory_space<vmem>>, vector<1x8x16x256xbf16>
    %22 = vector.shape_cast %21 : vector<1x8x16x256xbf16> to vector<8x16x256xbf16>
    %23 = vector.shape_cast %22 : vector<8x16x256xbf16> to vector<128x256xbf16>
    %c3 = arith.constant 3 : index
    %c0_18 = arith.constant 0 : index
    %c0_19 = arith.constant 0 : index
    %24 = vector.load %arg3[%c3, %c0_18, %c0_19] : memref<9x256x128xbf16, #tpu.memory_space<vmem>>, vector<1x256x128xbf16>
    %25 = vector.shape_cast %24 : vector<1x256x128xbf16> to vector<256x128xbf16>
    %cst_20 = arith.constant dense<0.000000e+00> : vector<128x128xf32>
    %26 = tpu.matmul %23, %25, %cst_20 {dimension_numbers = #tpu.dot_dimension_numbers<[1], [0], [0], [1], [0, 0, 1, 1], [], []>} : vector<128x256xbf16>, vector<256x128xbf16>, vector<128x128xf32> -> vector<128x128xf32>
    %27 = vector.shape_cast %26 : vector<128x128xf32> to vector<8x16x128xf32>
    %28 = vector.extract_strided_slice %27 {offsets = [0, 0, 0], sizes = [8, 8, 128], strides = [1, 1, 1]} : vector<8x16x128xf32> to vector<8x8x128xf32>
    %29 = arith.addf %20, %28 : vector<8x8x128xf32>
    %c4 = arith.constant 4 : index
    %c0_21 = arith.constant 0 : index
    %c0_22 = arith.constant 0 : index
    %30 = vector.load %arg3[%c4, %c0_21, %c0_22] : memref<9x256x128xbf16, #tpu.memory_space<vmem>>, vector<1x256x128xbf16>
    %31 = vector.shape_cast %30 : vector<1x256x128xbf16> to vector<256x128xbf16>
    %cst_23 = arith.constant dense<0.000000e+00> : vector<128x128xf32>
    %32 = tpu.matmul %23, %31, %cst_23 {dimension_numbers = #tpu.dot_dimension_numbers<[1], [0], [0], [1], [0, 0, 1, 1], [], []>} : vector<128x256xbf16>, vector<256x128xbf16>, vector<128x128xf32> -> vector<128x128xf32>
    %33 = vector.shape_cast %32 : vector<128x128xf32> to vector<8x16x128xf32>
    %34 = vector.extract_strided_slice %33 {offsets = [0, 1, 0], sizes = [8, 8, 128], strides = [1, 1, 1]} : vector<8x16x128xf32> to vector<8x8x128xf32>
    %35 = arith.addf %29, %34 : vector<8x8x128xf32>
    %c5 = arith.constant 5 : index
    %c0_24 = arith.constant 0 : index
    %c0_25 = arith.constant 0 : index
    %36 = vector.load %arg3[%c5, %c0_24, %c0_25] : memref<9x256x128xbf16, #tpu.memory_space<vmem>>, vector<1x256x128xbf16>
    %37 = vector.shape_cast %36 : vector<1x256x128xbf16> to vector<256x128xbf16>
    %cst_26 = arith.constant dense<0.000000e+00> : vector<128x128xf32>
    %38 = tpu.matmul %23, %37, %cst_26 {dimension_numbers = #tpu.dot_dimension_numbers<[1], [0], [0], [1], [0, 0, 1, 1], [], []>} : vector<128x256xbf16>, vector<256x128xbf16>, vector<128x128xf32> -> vector<128x128xf32>
    %39 = vector.shape_cast %38 : vector<128x128xf32> to vector<8x16x128xf32>
    %40 = vector.extract_strided_slice %39 {offsets = [0, 2, 0], sizes = [8, 8, 128], strides = [1, 1, 1]} : vector<8x16x128xf32> to vector<8x8x128xf32>
    %41 = arith.addf %35, %40 : vector<8x8x128xf32>
    %c0_27 = arith.constant 0 : index
    %c2_28 = arith.constant 2 : index
    %c0_29 = arith.constant 0 : index
    %c0_30 = arith.constant 0 : index
    %42 = vector.load %arg2[%c0_27, %c2_28, %c0_29, %c0_30] : memref<1x10x16x256xbf16, #tpu.memory_space<vmem>>, vector<1x8x16x256xbf16>
    %43 = vector.shape_cast %42 : vector<1x8x16x256xbf16> to vector<8x16x256xbf16>
    %44 = vector.shape_cast %43 : vector<8x16x256xbf16> to vector<128x256xbf16>
    %c6 = arith.constant 6 : index
    %c0_31 = arith.constant 0 : index
    %c0_32 = arith.constant 0 : index
    %45 = vector.load %arg3[%c6, %c0_31, %c0_32] : memref<9x256x128xbf16, #tpu.memory_space<vmem>>, vector<1x256x128xbf16>
    %46 = vector.shape_cast %45 : vector<1x256x128xbf16> to vector<256x128xbf16>
    %cst_33 = arith.constant dense<0.000000e+00> : vector<128x128xf32>
    %47 = tpu.matmul %44, %46, %cst_33 {dimension_numbers = #tpu.dot_dimension_numbers<[1], [0], [0], [1], [0, 0, 1, 1], [], []>} : vector<128x256xbf16>, vector<256x128xbf16>, vector<128x128xf32> -> vector<128x128xf32>
    %48 = vector.shape_cast %47 : vector<128x128xf32> to vector<8x16x128xf32>
    %49 = vector.extract_strided_slice %48 {offsets = [0, 0, 0], sizes = [8, 8, 128], strides = [1, 1, 1]} : vector<8x16x128xf32> to vector<8x8x128xf32>
    %50 = arith.addf %41, %49 : vector<8x8x128xf32>
    %c7 = arith.constant 7 : index
    %c0_34 = arith.constant 0 : index
    %c0_35 = arith.constant 0 : index
    %51 = vector.load %arg3[%c7, %c0_34, %c0_35] : memref<9x256x128xbf16, #tpu.memory_space<vmem>>, vector<1x256x128xbf16>
    %52 = vector.shape_cast %51 : vector<1x256x128xbf16> to vector<256x128xbf16>
    %cst_36 = arith.constant dense<0.000000e+00> : vector<128x128xf32>
    %53 = tpu.matmul %44, %52, %cst_36 {dimension_numbers = #tpu.dot_dimension_numbers<[1], [0], [0], [1], [0, 0, 1, 1], [], []>} : vector<128x256xbf16>, vector<256x128xbf16>, vector<128x128xf32> -> vector<128x128xf32>
    %54 = vector.shape_cast %53 : vector<128x128xf32> to vector<8x16x128xf32>
    %55 = vector.extract_strided_slice %54 {offsets = [0, 1, 0], sizes = [8, 8, 128], strides = [1, 1, 1]} : vector<8x16x128xf32> to vector<8x8x128xf32>
    %56 = arith.addf %50, %55 : vector<8x8x128xf32>
    %c8 = arith.constant 8 : index
    %c0_37 = arith.constant 0 : index
    %c0_38 = arith.constant 0 : index
    %57 = vector.load %arg3[%c8, %c0_37, %c0_38] : memref<9x256x128xbf16, #tpu.memory_space<vmem>>, vector<1x256x128xbf16>
    %58 = vector.shape_cast %57 : vector<1x256x128xbf16> to vector<256x128xbf16>
    %cst_39 = arith.constant dense<0.000000e+00> : vector<128x128xf32>
    %59 = tpu.matmul %44, %58, %cst_39 {dimension_numbers = #tpu.dot_dimension_numbers<[1], [0], [0], [1], [0, 0, 1, 1], [], []>} : vector<128x256xbf16>, vector<256x128xbf16>, vector<128x128xf32> -> vector<128x128xf32>
    %60 = vector.shape_cast %59 : vector<128x128xf32> to vector<8x16x128xf32>
    %61 = vector.extract_strided_slice %60 {offsets = [0, 2, 0], sizes = [8, 8, 128], strides = [1, 1, 1]} : vector<8x16x128xf32> to vector<8x8x128xf32>
    %62 = arith.addf %56, %61 : vector<8x8x128xf32>
    %63 = vector.shape_cast %0 : vector<1x128xf32> to vector<1x1x128xf32>
    %64 = vector.broadcast %63 : vector<1x1x128xf32> to vector<8x8x128xf32>
    %65 = arith.addf %62, %64 : vector<8x8x128xf32>
    %cst_40 = arith.constant 0.000000e+00 : f32
    %66 = vector.broadcast %cst_40 : f32 to vector<8x8x128xf32>
    %67 = arith.maximumf %65, %66 : vector<8x8x128xf32>
    %68 = arith.truncf %67 : vector<8x8x128xf32> to vector<8x8x128xbf16>
    %c0_41 = arith.constant 0 : index
    %c0_42 = arith.constant 0 : index
    %c0_43 = arith.constant 0 : index
    %c0_44 = arith.constant 0 : index
    %69 = vector.load %arg5[%c0_41, %c0_42, %c0_43, %c0_44] : memref<1x8x8x128xbf16, #tpu.memory_space<vmem>>, vector<1x8x8x128xbf16>
    %70 = vector.shape_cast %69 : vector<1x8x8x128xbf16> to vector<8x8x128xbf16>
    %71 = vector.shape_cast %68 : vector<8x8x128xbf16> to vector<1x8x8x128xbf16>
    tpu.vector_store %arg5[%c0_41, %c0_42, %c0_43, %c0_44], %71 {strides = array<i32>} : memref<1x8x8x128xbf16, #tpu.memory_space<vmem>>, vector<1x8x8x128xbf16>,
    return
  }
  func.func @transform_0(%arg0: i32, %arg1: i32) -> (i32, i32, i32, i32) {
    %c0_i32 = arith.constant 0 : i32
    %c0_i32_0 = arith.constant 0 : i32
    %c0_i32_1 = arith.constant 0 : i32
    %c0_i32_2 = arith.constant 0 : i32
    return %arg0, %c0_i32, %c0_i32_0, %c0_i32_1 : i32, i32, i32, i32
  }
  func.func @transform_1(%arg0: i32, %arg1: i32) -> (i32, i32, i32) {
    %c0_i32 = arith.constant 0 : i32
    %c0_i32_0 = arith.constant 0 : i32
    %c0_i32_1 = arith.constant 0 : i32
    return %c0_i32, %c0_i32_0, %arg1 : i32, i32, i32
  }
  func.func @transform_2(%arg0: i32, %arg1: i32) -> (i32, i32) {
    %c0_i32 = arith.constant 0 : i32
    %c0_i32_0 = arith.constant 0 : i32
    return %c0_i32, %arg1 : i32, i32
  }
  func.func @transform_3(%arg0: i32, %arg1: i32) -> (i32, i32, i32, i32) {
    %c0_i32 = arith.constant 0 : i32
    %c0_i32_0 = arith.constant 0 : i32
    %c0_i32_1 = arith.constant 0 : i32
    return %arg0, %c0_i32, %c0_i32_0, %arg1 : i32, i32, i32, i32
  }
}

</mosaic_0001>

<bundles_post_ra>
// kernel: vgg_forward.6
= control target key start
LH: loop header
LB: loop body
LE: loop exit
PB: predicated region body
PF: predicated region fallthrough
CT: control target
= control target key end

     0   :  { %s3554_s12 = smov 0   ;;  %s3556_s13 = smov 0   ;;  %s3929_s0 = inlined_call_operand.vmem [shape: bf16[2,32,32,32], index: 0, kind: input, shape index: {}]   ;;  %s3930_s1 = inlined_call_operand.vmem [shape: bf16[1,32,128], index: 1, kind: input, shape index: {}]   ;;  %s3931_s2 = inlined_call_operand.vmem [shape: f32[1,128], index: 2, kind: input, shape index: {}]   ;;  %s3932_s3 = inlined_call_operand.vmem [shape: bf16[2,32,32,128], index: 3, kind: output, shape index: {}]  }
   0x1   :  { %s3558_s14 = smov 0  }
   0x2 LB: > { %s25_s15 = sadd.s32 1, %s3528_s13  ;;  %p2439_p0 = scmp.ge.s32.totalorder %s3532_s14, 1  ;;  %s3532_s14 = sphi %s3558_s14, %s13_s14   ;;  %s3528_s13 = sphi %s3556_s13, %s3934_s13   ;;  %s3524_s12 = sphi %s3554_s12, %s3933_s12  }
   0x3   : > { %p27_p1 = scmp.ge.s32.totalorder %s25_s15, 2  ;;  %p168_p2 = scmp.lt.s32.totalorder %s3532_s14, 3 }
   0x5   : > { %s3936_s15 = smov (%p27_p1, %s25_s15), 0  ;;  %p169_p3 = pnand %p2439_p0, %p168_p2 }
   0x6   : > { %p202_p4 = scmp.lt.s32.totalorder (!%p169_p3), %s3524_s12, 1 }
   0x7   : > { %172 = sbr.rel (%p169_p3) target bundleno = 347 (0x15b), region = 32 }
   0xc   : > { %v3444_v0 = vld [vmem:[%s3930_s1 + $0x8] sm:$0xff]   ;;  %v3445_v1 = vld [vmem:[%s3930_s1] sm:$0xff]   ;;  %s3938_s12 = smov (!%p202_p4, %s3524_s12), 1  ;;  %vm688_vm0 = vcmask 261120  }
   0xd   : > { %3284 = vmatprep.subr.bf16.mxu0 %v3444_v0  ;;  %3416 = vmatprep.subr.bf16.mxu1 %v3444_v0  ;;  %s2705_s20 = sshll.u32 %s3938_s12, 9 }
   0xe   : > { %3285 = vmatpush3.bf16.msra.mxu0 %v3444_v0  ;;  %3418 = vmatpush3.bf16.msra.mxu1 %v3444_v0  ;;  %s3586_s23 = scalar_lea.vmem %s3929_s0, %s2705_s20  ;;  %s3733_s28 = scalar_lea.vmem %s3932_s3, %s2705_s20 }
   0xf   : > { %3286 = vmatprep.subr.bf16.mxu0 %v3445_v1  ;;  %3417 = vmatprep.subr.bf16.mxu1 %v3445_v1  ;;  %v3446_v2 = vld [vmem:[%s3586_s23] sm:$0xff]   ;;  %v3448_v4 = vld [vmem:[%s3586_s23 + $0x8] sm:$0xff]   ;;  %v3450_v6 = vld [vmem:[%s3586_s23 + $0x10] sm:$0xff]  }
  0x10   : > { %v3447_v3 = vld [vmem:[%s3586_s23 + $0x100] sm:$0xff]   ;;  %3288 = vmatprep.mubr.msk.bf16.mxu0 %vm688_vm0, %v3446_v2  ;;  %v3449_v5 = vld [vmem:[%s3586_s23 + $0x108] sm:$0xff]   ;;  %v3451_v7 = vld [vmem:[%s3586_s23 + $0x110] sm:$0xff]  }
  0x11   : > { %3352 = vmatprep.mubr.msk.bf16.mxu1 %vm688_vm0, %v3447_v3  ;;  %v3452_v8 = vld [vmem:[%s3586_s23 + $0x18] sm:$0xff]   ;;  %v3454_v10 = vld [vmem:[%s3586_s23 + $0x20] sm:$0xff]   ;;  %v3456_v12 = vld [vmem:[%s3586_s23 + $0x28] sm:$0xff]  }
  0x12   : > { %3287 = vmatpush3.bf16.msra.mxu0 %v3445_v1  ;;  %3419 = vmatpush3.bf16.msra.mxu1 %v3445_v1  ;;  %v3453_v9 = vld [vmem:[%s3586_s23 + $0x118] sm:$0xff]   ;;  %v3455_v11 = vld [vmem:[%s3586_s23 + $0x120] sm:$0xff]   ;;  %v3457_v13 = vld [vmem:[%s3586_s23 + $0x128] sm:$0xff]  }
  0x13   : > { %v3458_v14 = vld [vmem:[%s3586_s23 + $0x30] sm:$0xff]   ;;  %v3460_v16 = vld [vmem:[%s3586_s23 + $0x38] sm:$0xff]   ;;  %v3462_v18 = vld [vmem:[%s3586_s23 + $0x40] sm:$0xff]  }
  0x14   : > { %v3459_v15 = vld [vmem:[%s3586_s23 + $0x130] sm:$0xff]   ;;  %v3461_v17 = vld [vmem:[%s3586_s23 + $0x138] sm:$0xff]   ;;  %v3463_v19 = vld [vmem:[%s3586_s23 + $0x140] sm:$0xff]  }
  0x15   : > { %3289 = vmatmul.mubr.msk.bf16.vlgmr.msra.gmra.mxu0 %vm688_vm0, %v3448_v4  ;;  %3353 = vmatmul.mubr.msk.bf16.vlgmr.msra.gmra.mxu1 %vm688_vm0, %v3449_v5  ;;  %v3464_v20 = vld [vmem:[%s3586_s23 + $0x48] sm:$0xff]   ;;  %v3466_v22 = vld [vmem:[%s3586_s23 + $0x50] sm:$0xff]   ;;  %v3468_v24 = vld [vmem:[%s3586_s23 + $0x58] sm:$0xff]  }
  0x16   : > { %3292 = vmatprep.mubr.msk.bf16.mxu0 %vm688_vm0, %v3450_v6  ;;  %3356 = vmatprep.mubr.msk.bf16.mxu1 %vm688_vm0, %v3451_v7  ;;  %v3465_v21 = vld [vmem:[%s3586_s23 + $0x148] sm:$0xff]   ;;  %v3467_v23 = vld [vmem:[%s3586_s23 + $0x150] sm:$0xff]   ;;  %v3469_v25 = vld [vmem:[%s3586_s23 + $0x158] sm:$0xff]  }
  0x17   : > { %v3470_v26 = vld [vmem:[%s3586_s23 + $0x60] sm:$0xff]   ;;  %v3472_v28 = vld [vmem:[%s3586_s23 + $0x68] sm:$0xff]   ;;  %v3474_v30 = vld [vmem:[%s3586_s23 + $0x70] sm:$0xff]  }
  0x18   : > { %v3471_v27 = vld [vmem:[%s3586_s23 + $0x160] sm:$0xff]   ;;  %v3473_v29 = vld [vmem:[%s3586_s23 + $0x168] sm:$0xff]   ;;  %v3475_v31 = vld [vmem:[%s3586_s23 + $0x170] sm:$0xff]  }
  0x19   : > { %v3476_v32 = vld [vmem:[%s3586_s23 + $0x78] sm:$0xff]   ;;  %v3478_v34 = vld [vmem:[%s3586_s23 + $0x80] sm:$0xff]   ;;  %v3480_v36 = vld [vmem:[%s3586_s23 + $0x88] sm:$0xff]  }
  0x1a   : > { %v3477_v33 = vld [vmem:[%s3586_s23 + $0x178] sm:$0xff]   ;;  %v3479_v35 = vld [vmem:[%s3586_s23 + $0x180] sm:$0xff]   ;;  %v3481_v37 = vld [vmem:[%s3586_s23 + $0x188] sm:$0xff]  }
  0x1b   : > { %v3482_v38 = vld [vmem:[%s3586_s23 + $0x90] sm:$0xff]   ;;  %v3484_v40 = vld [vmem:[%s3586_s23 + $0x98] sm:$0xff]   ;;  %v3486_v42 = vld [vmem:[%s3586_s23 + $0xa0] sm:$0xff]  }
  0x1c   : > { %v3483_v39 = vld [vmem:[%s3586_s23 + $0x190] sm:$0xff]   ;;  %v3485_v41 = vld [vmem:[%s3586_s23 + $0x198] sm:$0xff]   ;;  %v3487_v43 = vld [vmem:[%s3586_s23 + $0x1a0] sm:$0xff]  }
  0x1d   : > { %3293 = vmatmul.mubr.msk.bf16.gmra.mxu0 %vm688_vm0, %v3452_v8  ;;  %3357 = vmatmul.mubr.msk.bf16.gmra.mxu1 %vm688_vm0, %v3453_v9  ;;  %v3488_v44 = vld [vmem:[%s3586_s23 + $0xa8] sm:$0xff]   ;;  %v3490_v46 = vld [vmem:[%s3586_s23 + $0xb0] sm:$0xff]   ;;  %v3492_v48 = vld [vmem:[%s3586_s23 + $0xb8] sm:$0xff]  }
  0x1e   : > { %3296 = vmatprep.mubr.msk.bf16.mxu0 %vm688_vm0, %v3454_v10  ;;  %3360 = vmatprep.mubr.msk.bf16.mxu1 %vm688_vm0, %v3455_v11  ;;  %v3489_v45 = vld [vmem:[%s3586_s23 + $0x1a8] sm:$0xff]   ;;  %v3491_v47 = vld [vmem:[%s3586_s23 + $0x1b0] sm:$0xff]   ;;  %v3493_v49 = vld [vmem:[%s3586_s23 + $0x1b8] sm:$0xff]  }
  0x1f   : > { %v3494_v50 = vld [vmem:[%s3586_s23 + $0xc0] sm:$0xff]   ;;  %v3496_v52 = vld [vmem:[%s3586_s23 + $0xc8] sm:$0xff]   ;;  %v3498_v54 = vld [vmem:[%s3586_s23 + $0xd0] sm:$0xff]  }
  0x20   : > { %v3495_v51 = vld [vmem:[%s3586_s23 + $0x1c0] sm:$0xff]   ;;  %v3497_v53 = vld [vmem:[%s3586_s23 + $0x1c8] sm:$0xff]   ;;  %v3499_v55 = vld [vmem:[%s3586_s23 + $0x1d0] sm:$0xff]  }
  0x21   : > { %v3500_v56 = vld [vmem:[%s3586_s23 + $0xd8] sm:$0xff]   ;;  %v3502_v58 = vld [vmem:[%s3586_s23 + $0xe0] sm:$0xff]   ;;  %v3504_v60 = vld [vmem:[%s3586_s23 + $0xe8] sm:$0xff]  }
  0x22   : > { %v3501_v57 = vld [vmem:[%s3586_s23 + $0x1d8] sm:$0xff]   ;;  %v3503_v59 = vld [vmem:[%s3586_s23 + $0x1e0] sm:$0xff]   ;;  %v3505_v61 = vld [vmem:[%s3586_s23 + $0x1e8] sm:$0xff]  }
  0x23   : > { %v3506_v62 = vld [vmem:[%s3586_s23 + $0xf0] sm:$0xff]   ;;  %v3508_v0 = vld [vmem:[%s3586_s23 + $0xf8] sm:$0xff]   ;;  %v3719_v2 = vld [vmem:[%s3931_s2] ss:$0 sm:$0xff] }
  0x24   : > { %v3507_v63 = vld [vmem:[%s3586_s23 + $0x1f0] sm:$0xff]   ;;  %v3509_v1 = vld [vmem:[%s3586_s23 + $0x1f8] sm:$0xff]  }
  0x25   : > { %3297 = vmatmul.mubr.msk.bf16.gmra.mxu0 %vm688_vm0, %v3456_v12  ;;  %3361 = vmatmul.mubr.msk.bf16.gmra.mxu1 %vm688_vm0, %v3457_v13 }
  0x26   : > { %3300 = vmatprep.mubr.msk.bf16.mxu0 %vm688_vm0, %v3458_v14  ;;  %3364 = vmatprep.mubr.msk.bf16.mxu1 %vm688_vm0, %v3459_v15 }
  0x2d   : > { %3301 = vmatmul.mubr.msk.bf16.gmra.mxu0 %vm688_vm0, %v3460_v16  ;;  %3365 = vmatmul.mubr.msk.bf16.gmra.mxu1 %vm688_vm0, %v3461_v17 }
  0x2e   : > { %3304 = vmatprep.mubr.msk.bf16.mxu0 %vm688_vm0, %v3462_v18  ;;  %3368 = vmatprep.mubr.msk.bf16.mxu1 %vm688_vm0, %v3463_v19 }
  0x35   : > { %3305 = vmatmul.mubr.msk.bf16.gmra.mxu0 %vm688_vm0, %v3464_v20  ;;  %3369 = vmatmul.mubr.msk.bf16.gmra.mxu1 %vm688_vm0, %v3465_v21 }
  0x36   : > { %3308 = vmatprep.mubr.msk.bf16.mxu0 %vm688_vm0, %v3466_v22  ;;  %3372 = vmatprep.mubr.msk.bf16.mxu1 %vm688_vm0, %v3467_v23 }
  0x3d   : > { %3309 = vmatmul.mubr.msk.bf16.gmra.mxu0 %vm688_vm0, %v3468_v24  ;;  %3373 = vmatmul.mubr.msk.bf16.gmra.mxu1 %vm688_vm0, %v3469_v25 }
  0x3e   : > { %3312 = vmatprep.mubr.msk.bf16.mxu0 %vm688_vm0, %v3470_v26  ;;  %3376 = vmatprep.mubr.msk.bf16.mxu1 %vm688_vm0, %v3471_v27 }
  0x45   : > { %3313 = vmatmul.mubr.msk.bf16.gmra.mxu0 %vm688_vm0, %v3472_v28  ;;  %3377 = vmatmul.mubr.msk.bf16.gmra.mxu1 %vm688_vm0, %v3473_v29 }
  0x46   : > { %3316 = vmatprep.mubr.msk.bf16.mxu0 %vm688_vm0, %v3474_v30  ;;  %3380 = vmatprep.mubr.msk.bf16.mxu1 %vm688_vm0, %v3475_v31 }
  0x4d   : > { %3317 = vmatmul.mubr.msk.bf16.gmra.mxu0 %vm688_vm0, %v3476_v32  ;;  %3381 = vmatmul.mubr.msk.bf16.gmra.mxu1 %vm688_vm0, %v3477_v33 }
  0x4e   : > { %3320 = vmatprep.mubr.msk.bf16.mxu0 %vm688_vm0, %v3478_v34  ;;  %3384 = vmatprep.mubr.msk.bf16.mxu1 %vm688_vm0, %v3479_v35 }
  0x55   : > { %3321 = vmatmul.mubr.msk.bf16.gmra.mxu0 %vm688_vm0, %v3480_v36  ;;  %3385 = vmatmul.mubr.msk.bf16.gmra.mxu1 %vm688_vm0, %v3481_v37 }
  0x56   : > { %3324 = vmatprep.mubr.msk.bf16.mxu0 %vm688_vm0, %v3482_v38  ;;  %3388 = vmatprep.mubr.msk.bf16.mxu1 %vm688_vm0, %v3483_v39 }
  0x5d   : > { %3325 = vmatmul.mubr.msk.bf16.gmra.mxu0 %vm688_vm0, %v3484_v40  ;;  %3389 = vmatmul.mubr.msk.bf16.gmra.mxu1 %vm688_vm0, %v3485_v41 }
  0x5e   : > { %3328 = vmatprep.mubr.msk.bf16.mxu0 %vm688_vm0, %v3486_v42  ;;  %3392 = vmatprep.mubr.msk.bf16.mxu1 %vm688_vm0, %v3487_v43 }
  0x65   : > { %3329 = vmatmul.mubr.msk.bf16.gmra.mxu0 %vm688_vm0, %v3488_v44  ;;  %3393 = vmatmul.mubr.msk.bf16.gmra.mxu1 %vm688_vm0, %v3489_v45 }
  0x66   : > { %3332 = vmatprep.mubr.msk.bf16.mxu0 %vm688_vm0, %v3490_v46  ;;  %3396 = vmatprep.mubr.msk.bf16.mxu1 %vm688_vm0, %v3491_v47 }
  0x6d   : > { %3333 = vmatmul.mubr.msk.bf16.gmra.mxu0 %vm688_vm0, %v3492_v48  ;;  %3397 = vmatmul.mubr.msk.bf16.gmra.mxu1 %vm688_vm0, %v3493_v49 }
  0x6e   : > { %3336 = vmatprep.mubr.msk.bf16.mxu0 %vm688_vm0, %v3494_v50  ;;  %3400 = vmatprep.mubr.msk.bf16.mxu1 %vm688_vm0, %v3495_v51 }
  0x75   : > { %3337 = vmatmul.mubr.msk.bf16.gmra.mxu0 %vm688_vm0, %v3496_v52  ;;  %3401 = vmatmul.mubr.msk.bf16.gmra.mxu1 %vm688_vm0, %v3497_v53 }
  0x76   : > { %3340 = vmatprep.mubr.msk.bf16.mxu0 %vm688_vm0, %v3498_v54  ;;  %3404 = vmatprep.mubr.msk.bf16.mxu1 %vm688_vm0, %v3499_v55 }
  0x7d   : > { %3341 = vmatmul.mubr.msk.bf16.gmra.mxu0 %vm688_vm0, %v3500_v56  ;;  %3405 = vmatmul.mubr.msk.bf16.gmra.mxu1 %vm688_vm0, %v3501_v57 }
  0x7e   : > { %3344 = vmatprep.mubr.msk.bf16.mxu0 %vm688_vm0, %v3502_v58  ;;  %3408 = vmatprep.mubr.msk.bf16.mxu1 %vm688_vm0, %v3503_v59 }
  0x85   : > { %3345 = vmatmul.mubr.msk.bf16.gmra.mxu0 %vm688_vm0, %v3504_v60  ;;  %3409 = vmatmul.mubr.msk.bf16.gmra.mxu1 %vm688_vm0, %v3505_v61 }
  0x86   : > { %3348 = vmatprep.mubr.msk.bf16.mxu0 %vm688_vm0, %v3506_v62  ;;  %3412 = vmatprep.mubr.msk.bf16.mxu1 %vm688_vm0, %v3507_v63 }
  0x8d   : > { %3349 = vmatmul.mubr.msk.bf16.gmra.mxu0 %vm688_vm0, %v3508_v0  ;;  %3413 = vmatmul.mubr.msk.bf16.gmra.mxu1 %vm688_vm0, %v3509_v1 }
  0xd5   : > { %v3290_v3 = vpop.f32.mrf.mxu0  ;;  %v3354_v4 = vpop.f32.mrf.mxu1 }
  0xd6   : > { %v1434_v6 = vadd.f32 %v3290_v3, %v3719_v2  ;;  %v1498_v8 = vadd.f32 %v3354_v4, %v3719_v2 }
  0xd7   : > { %v915_v5 = vpop.f32.mrf.mxu0  ;;  %v1171_v7 = vpop.f32.mrf.mxu1 }
  0xd8   : > { %v1432_v10 = vadd.f32 %v3719_v2, %v915_v5  ;;  %v1496_v13 = vadd.f32 %v3719_v2, %v1171_v7  ;;  %v1562_v16 = vmax.f32 %v1434_v6, 0.0  ;;  %v1626_v20 = vmax.f32 %v1498_v8, 0.0 }
  0xd9   : > { %v3291_v9 = vpop.f32.mrf.mxu0  ;;  %v3355_v12 = vpop.f32.mrf.mxu1 }
  0xda   : > { %v1435_v11 = vadd.f32 %v3291_v9, %v3719_v2  ;;  %v1499_v14 = vadd.f32 %v3355_v12, %v3719_v2  ;;  %v1560_v24 = vmax.f32 %v1432_v10, 0.0  ;;  %v1624_v28 = vmax.f32 %v1496_v13, 0.0 }
  0xdb   : > { %v918_v15 = vpop.f32.mrf.mxu0  ;;  %v1174_v19 = vpop.f32.mrf.mxu1 }
  0xdc   : > { %v1563_v17 = vmax.f32 %v1435_v11, 0.0  ;;  %v1433_v18 = vadd.f32 %v3719_v2, %v918_v15  ;;  %v1627_v21 = vmax.f32 %v1499_v14, 0.0  ;;  %v1497_v22 = vadd.f32 %v3719_v2, %v1174_v19 }
  0xdd   : > { %v3294_v23 = vpop.f32.mrf.mxu0  ;;  %v3358_v27 = vpop.f32.mrf.mxu1 }
  0xde   : > { %v2843_v25 = vpack.c.bf16 %v1563_v17, %v1562_v16  ;;  %v1561_v26 = vmax.f32 %v1433_v18, 0.0  ;;  %v3003_v29 = vpack.c.bf16 %v1627_v21, %v1626_v20  ;;  %v1625_v30 = vmax.f32 %v1497_v22, 0.0 }
  0xdf   : > { %v931_v31 = vpop.f32.mrf.mxu0  ;;  %v1438_v33 = vadd.f32 %v3294_v23, %v3719_v2  ;;  %v1187_v34 = vpop.f32.mrf.mxu1  ;;  %v1502_v36 = vadd.f32 %v3358_v27, %v3719_v2 }
  0xe0   : > { %3155 = vst [vmem:[%s3733_s28 + $0x8] sm:$0xff] %v2843_v25   ;;  %v2838_v32 = vpack.c.bf16 %v1561_v26, %v1560_v24  ;;  %3187 = vst [vmem:[%s3733_s28 + $0x108] sm:$0xff] %v3003_v29   ;;  %v2998_v35 = vpack.c.bf16 %v1625_v30, %v1624_v28  ;;  %v1436_v38 = vadd.f32 %v3719_v2, %v931_v31 }
  0xe1   : > { %v3295_v37 = vpop.f32.mrf.mxu0  ;;  %v3359_v40 = vpop.f32.mrf.mxu1  ;;  %v1500_v41 = vadd.f32 %v3719_v2, %v1187_v34  ;;  %v1566_v44 = vmax.f32 %v1438_v33, 0.0  ;;  %v1630_v48 = vmax.f32 %v1502_v36, 0.0 }
  0xe2   : > { %2839 = vst [vmem:[%s3733_s28] sm:$0xff] %v2838_v32   ;;  %v1439_v39 = vadd.f32 %v3295_v37, %v3719_v2  ;;  %3186 = vst [vmem:[%s3733_s28 + $0x100] sm:$0xff] %v2998_v35   ;;  %v1503_v42 = vadd.f32 %v3359_v40, %v3719_v2  ;;  %v1564_v52 = vmax.f32 %v1436_v38, 0.0 }
  0xe3   : > { %v934_v43 = vpop.f32.mrf.mxu0  ;;  %v1190_v47 = vpop.f32.mrf.mxu1  ;;  %v1628_v56 = vmax.f32 %v1500_v41, 0.0 }
  0xe4   : > { %v1567_v45 = vmax.f32 %v1439_v39, 0.0  ;;  %v1437_v46 = vadd.f32 %v3719_v2, %v934_v43  ;;  %v1631_v49 = vmax.f32 %v1503_v42, 0.0  ;;  %v1501_v50 = vadd.f32 %v3719_v2, %v1190_v47 }
  0xe5   : > { %v3298_v51 = vpop.f32.mrf.mxu0  ;;  %v3362_v55 = vpop.f32.mrf.mxu1 }
  0xe6   : > { %v2853_v53 = vpack.c.bf16 %v1567_v45, %v1566_v44  ;;  %v1565_v54 = vmax.f32 %v1437_v46, 0.0  ;;  %v3013_v57 = vpack.c.bf16 %v1631_v49, %v1630_v48  ;;  %v1629_v58 = vmax.f32 %v1501_v50, 0.0 }
  0xe7   : > { %v947_v59 = vpop.f32.mrf.mxu0  ;;  %v1442_v61 = vadd.f32 %v3298_v51, %v3719_v2  ;;  %v1203_v62 = vpop.f32.mrf.mxu1  ;;  %v1506_v0 = vadd.f32 %v3362_v55, %v3719_v2 }
  0xe8   : > { %3157 = vst [vmem:[%s3733_s28 + $0x18] sm:$0xff] %v2853_v53   ;;  %v2848_v60 = vpack.c.bf16 %v1565_v54, %v1564_v52  ;;  %3189 = vst [vmem:[%s3733_s28 + $0x118] sm:$0xff] %v3013_v57   ;;  %v3008_v63 = vpack.c.bf16 %v1629_v58, %v1628_v56  ;;  %v1440_v3 = vadd.f32 %v3719_v2, %v947_v59 }
  0xe9   : > { %v3299_v1 = vpop.f32.mrf.mxu0  ;;  %v3363_v5 = vpop.f32.mrf.mxu1  ;;  %v1504_v6 = vadd.f32 %v3719_v2, %v1203_v62  ;;  %v1570_v9 = vmax.f32 %v1442_v61, 0.0  ;;  %v1634_v13 = vmax.f32 %v1506_v0, 0.0 }
  0xea   : > { %3156 = vst [vmem:[%s3733_s28 + $0x10] sm:$0xff] %v2848_v60   ;;  %v1443_v4 = vadd.f32 %v3299_v1, %v3719_v2  ;;  %3188 = vst [vmem:[%s3733_s28 + $0x110] sm:$0xff] %v3008_v63   ;;  %v1507_v7 = vadd.f32 %v3363_v5, %v3719_v2  ;;  %v1568_v17 = vmax.f32 %v1440_v3, 0.0 }
  0xeb   : > { %v950_v8 = vpop.f32.mrf.mxu0  ;;  %v1206_v12 = vpop.f32.mrf.mxu1  ;;  %v1632_v21 = vmax.f32 %v1504_v6, 0.0 }
  0xec   : > { %v1571_v10 = vmax.f32 %v1443_v4, 0.0  ;;  %v1441_v11 = vadd.f32 %v3719_v2, %v950_v8  ;;  %v1635_v14 = vmax.f32 %v1507_v7, 0.0  ;;  %v1505_v15 = vadd.f32 %v3719_v2, %v1206_v12 }
  0xed   : > { %v3302_v16 = vpop.f32.mrf.mxu0  ;;  %v3366_v20 = vpop.f32.mrf.mxu1 }
  0xee   : > { %v2863_v18 = vpack.c.bf16 %v1571_v10, %v1570_v9  ;;  %v1569_v19 = vmax.f32 %v1441_v11, 0.0  ;;  %v3023_v22 = vpack.c.bf16 %v1635_v14, %v1634_v13  ;;  %v1633_v23 = vmax.f32 %v1505_v15, 0.0 }
  0xef   : > { %v963_v24 = vpop.f32.mrf.mxu0  ;;  %v1446_v26 = vadd.f32 %v3302_v16, %v3719_v2  ;;  %v1219_v27 = vpop.f32.mrf.mxu1  ;;  %v1510_v29 = vadd.f32 %v3366_v20, %v3719_v2 }
  0xf0   : > { %3159 = vst [vmem:[%s3733_s28 + $0x28] sm:$0xff] %v2863_v18   ;;  %v2858_v25 = vpack.c.bf16 %v1569_v19, %v1568_v17  ;;  %3191 = vst [vmem:[%s3733_s28 + $0x128] sm:$0xff] %v3023_v22   ;;  %v3018_v28 = vpack.c.bf16 %v1633_v23, %v1632_v21  ;;  %v1444_v31 = vadd.f32 %v3719_v2, %v963_v24 }
  0xf1   : > { %v3303_v30 = vpop.f32.mrf.mxu0  ;;  %v3367_v33 = vpop.f32.mrf.mxu1  ;;  %v1508_v34 = vadd.f32 %v3719_v2, %v1219_v27  ;;  %v1574_v37 = vmax.f32 %v1446_v26, 0.0  ;;  %v1638_v41 = vmax.f32 %v1510_v29, 0.0 }
  0xf2   : > { %3158 = vst [vmem:[%s3733_s28 + $0x20] sm:$0xff] %v2858_v25   ;;  %v1447_v32 = vadd.f32 %v3303_v30, %v3719_v2  ;;  %3190 = vst [vmem:[%s3733_s28 + $0x120] sm:$0xff] %v3018_v28   ;;  %v1511_v35 = vadd.f32 %v3367_v33, %v3719_v2  ;;  %v1572_v45 = vmax.f32 %v1444_v31, 0.0 }
  0xf3   : > { %v966_v36 = vpop.f32.mrf.mxu0  ;;  %v1222_v40 = vpop.f32.mrf.mxu1  ;;  %v1636_v49 = vmax.f32 %v1508_v34, 0.0 }
  0xf4   : > { %v1575_v38 = vmax.f32 %v1447_v32, 0.0  ;;  %v1445_v39 = vadd.f32 %v3719_v2, %v966_v36  ;;  %v1639_v42 = vmax.f32 %v1511_v35, 0.0  ;;  %v1509_v43 = vadd.f32 %v3719_v2, %v1222_v40 }
  0xf5   : > { %v3306_v44 = vpop.f32.mrf.mxu0  ;;  %v3370_v48 = vpop.f32.mrf.mxu1 }
  0xf6   : > { %v2873_v46 = vpack.c.bf16 %v1575_v38, %v1574_v37  ;;  %v1573_v47 = vmax.f32 %v1445_v39, 0.0  ;;  %v3033_v50 = vpack.c.bf16 %v1639_v42, %v1638_v41  ;;  %v1637_v51 = vmax.f32 %v1509_v43, 0.0 }
  0xf7   : > { %v979_v52 = vpop.f32.mrf.mxu0  ;;  %v1450_v54 = vadd.f32 %v3306_v44, %v3719_v2  ;;  %v1235_v55 = vpop.f32.mrf.mxu1  ;;  %v1514_v57 = vadd.f32 %v3370_v48, %v3719_v2 }
  0xf8   : > { %3161 = vst [vmem:[%s3733_s28 + $0x38] sm:$0xff] %v2873_v46   ;;  %v2868_v53 = vpack.c.bf16 %v1573_v47, %v1572_v45  ;;  %3193 = vst [vmem:[%s3733_s28 + $0x138] sm:$0xff] %v3033_v50   ;;  %v3028_v56 = vpack.c.bf16 %v1637_v51, %v1636_v49  ;;  %v1448_v59 = vadd.f32 %v3719_v2, %v979_v52 }
  0xf9   : > { %v3307_v58 = vpop.f32.mrf.mxu0  ;;  %v3371_v61 = vpop.f32.mrf.mxu1  ;;  %v1512_v62 = vadd.f32 %v3719_v2, %v1235_v55  ;;  %v1578_v1 = vmax.f32 %v1450_v54, 0.0  ;;  %v1642_v6 = vmax.f32 %v1514_v57, 0.0 }
  0xfa   : > { %3160 = vst [vmem:[%s3733_s28 + $0x30] sm:$0xff] %v2868_v53   ;;  %v1451_v60 = vadd.f32 %v3307_v58, %v3719_v2  ;;  %3192 = vst [vmem:[%s3733_s28 + $0x130] sm:$0xff] %v3028_v56   ;;  %v1515_v63 = vadd.f32 %v3371_v61, %v3719_v2  ;;  %v1576_v10 = vmax.f32 %v1448_v59, 0.0 }
  0xfb   : > { %v982_v0 = vpop.f32.mrf.mxu0  ;;  %v1238_v5 = vpop.f32.mrf.mxu1  ;;  %v1640_v14 = vmax.f32 %v1512_v62, 0.0 }
  0xfc   : > { %v1579_v3 = vmax.f32 %v1451_v60, 0.0  ;;  %v1449_v4 = vadd.f32 %v3719_v2, %v982_v0  ;;  %v1643_v7 = vmax.f32 %v1515_v63, 0.0  ;;  %v1513_v8 = vadd.f32 %v3719_v2, %v1238_v5 }
  0xfd   : > { %v3310_v9 = vpop.f32.mrf.mxu0  ;;  %v3374_v13 = vpop.f32.mrf.mxu1 }
  0xfe   : > { %v2883_v11 = vpack.c.bf16 %v1579_v3, %v1578_v1  ;;  %v1577_v12 = vmax.f32 %v1449_v4, 0.0  ;;  %v3043_v15 = vpack.c.bf16 %v1643_v7, %v1642_v6  ;;  %v1641_v16 = vmax.f32 %v1513_v8, 0.0 }
  0xff   : > { %v995_v17 = vpop.f32.mrf.mxu0  ;;  %v1454_v19 = vadd.f32 %v3310_v9, %v3719_v2  ;;  %v1251_v20 = vpop.f32.mrf.mxu1  ;;  %v1518_v22 = vadd.f32 %v3374_v13, %v3719_v2 }
 0x100   : > { %3163 = vst [vmem:[%s3733_s28 + $0x48] sm:$0xff] %v2883_v11   ;;  %v2878_v18 = vpack.c.bf16 %v1577_v12, %v1576_v10  ;;  %3195 = vst [vmem:[%s3733_s28 + $0x148] sm:$0xff] %v3043_v15   ;;  %v3038_v21 = vpack.c.bf16 %v1641_v16, %v1640_v14  ;;  %v1452_v24 = vadd.f32 %v3719_v2, %v995_v17 }
 0x101   : > { %v3311_v23 = vpop.f32.mrf.mxu0  ;;  %v3375_v26 = vpop.f32.mrf.mxu1  ;;  %v1516_v27 = vadd.f32 %v3719_v2, %v1251_v20  ;;  %v1582_v30 = vmax.f32 %v1454_v19, 0.0  ;;  %v1646_v34 = vmax.f32 %v1518_v22, 0.0 }
 0x102   : > { %3162 = vst [vmem:[%s3733_s28 + $0x40] sm:$0xff] %v2878_v18   ;;  %v1455_v25 = vadd.f32 %v3311_v23, %v3719_v2  ;;  %3194 = vst [vmem:[%s3733_s28 + $0x140] sm:$0xff] %v3038_v21   ;;  %v1519_v28 = vadd.f32 %v3375_v26, %v3719_v2  ;;  %v1580_v38 = vmax.f32 %v1452_v24, 0.0 }
 0x103   : > { %v998_v29 = vpop.f32.mrf.mxu0  ;;  %v1254_v33 = vpop.f32.mrf.mxu1  ;;  %v1644_v42 = vmax.f32 %v1516_v27, 0.0 }
 0x104   : > { %v1583_v31 = vmax.f32 %v1455_v25, 0.0  ;;  %v1453_v32 = vadd.f32 %v3719_v2, %v998_v29  ;;  %v1647_v35 = vmax.f32 %v1519_v28, 0.0  ;;  %v1517_v36 = vadd.f32 %v3719_v2, %v1254_v33 }
 0x105   : > { %v3314_v37 = vpop.f32.mrf.mxu0  ;;  %v3378_v41 = vpop.f32.mrf.mxu1 }
 0x106   : > { %v2893_v39 = vpack.c.bf16 %v1583_v31, %v1582_v30  ;;  %v1581_v40 = vmax.f32 %v1453_v32, 0.0  ;;  %v3053_v43 = vpack.c.bf16 %v1647_v35, %v1646_v34  ;;  %v1645_v44 = vmax.f32 %v1517_v36, 0.0 }
 0x107   : > { %v1011_v45 = vpop.f32.mrf.mxu0  ;;  %v1458_v47 = vadd.f32 %v3314_v37, %v3719_v2  ;;  %v1267_v48 = vpop.f32.mrf.mxu1  ;;  %v1522_v50 = vadd.f32 %v3378_v41, %v3719_v2 }
 0x108   : > { %3165 = vst [vmem:[%s3733_s28 + $0x58] sm:$0xff] %v2893_v39   ;;  %v2888_v46 = vpack.c.bf16 %v1581_v40, %v1580_v38  ;;  %3197 = vst [vmem:[%s3733_s28 + $0x158] sm:$0xff] %v3053_v43   ;;  %v3048_v49 = vpack.c.bf16 %v1645_v44, %v1644_v42  ;;  %v1456_v52 = vadd.f32 %v3719_v2, %v1011_v45 }
 0x109   : > { %v3315_v51 = vpop.f32.mrf.mxu0  ;;  %v3379_v54 = vpop.f32.mrf.mxu1  ;;  %v1520_v55 = vadd.f32 %v3719_v2, %v1267_v48  ;;  %v1586_v58 = vmax.f32 %v1458_v47, 0.0  ;;  %v1650_v62 = vmax.f32 %v1522_v50, 0.0 }
 0x10a   : > { %3164 = vst [vmem:[%s3733_s28 + $0x50] sm:$0xff] %v2888_v46   ;;  %v1459_v53 = vadd.f32 %v3315_v51, %v3719_v2  ;;  %3196 = vst [vmem:[%s3733_s28 + $0x150] sm:$0xff] %v3048_v49   ;;  %v1523_v56 = vadd.f32 %v3379_v54, %v3719_v2  ;;  %v1584_v3 = vmax.f32 %v1456_v52, 0.0 }
 0x10b   : > { %v1014_v57 = vpop.f32.mrf.mxu0  ;;  %v1270_v61 = vpop.f32.mrf.mxu1  ;;  %v1648_v7 = vmax.f32 %v1520_v55, 0.0 }
 0x10c   : > { %v1587_v59 = vmax.f32 %v1459_v53, 0.0  ;;  %v1457_v60 = vadd.f32 %v3719_v2, %v1014_v57  ;;  %v1651_v63 = vmax.f32 %v1523_v56, 0.0  ;;  %v1521_v0 = vadd.f32 %v3719_v2, %v1270_v61 }
 0x10d   : > { %v3318_v1 = vpop.f32.mrf.mxu0  ;;  %v3382_v6 = vpop.f32.mrf.mxu1 }
 0x10e   : > { %v2903_v4 = vpack.c.bf16 %v1587_v59, %v1586_v58  ;;  %v1585_v5 = vmax.f32 %v1457_v60, 0.0  ;;  %v3063_v8 = vpack.c.bf16 %v1651_v63, %v1650_v62  ;;  %v1649_v9 = vmax.f32 %v1521_v0, 0.0 }
 0x10f   : > { %v1027_v10 = vpop.f32.mrf.mxu0  ;;  %v1462_v12 = vadd.f32 %v3318_v1, %v3719_v2  ;;  %v1283_v13 = vpop.f32.mrf.mxu1  ;;  %v1526_v15 = vadd.f32 %v3382_v6, %v3719_v2 }
 0x110   : > { %3167 = vst [vmem:[%s3733_s28 + $0x68] sm:$0xff] %v2903_v4   ;;  %v2898_v11 = vpack.c.bf16 %v1585_v5, %v1584_v3  ;;  %3199 = vst [vmem:[%s3733_s28 + $0x168] sm:$0xff] %v3063_v8   ;;  %v3058_v14 = vpack.c.bf16 %v1649_v9, %v1648_v7  ;;  %v1460_v17 = vadd.f32 %v3719_v2, %v1027_v10 }
 0x111   : > { %v3319_v16 = vpop.f32.mrf.mxu0  ;;  %v3383_v19 = vpop.f32.mrf.mxu1  ;;  %v1524_v20 = vadd.f32 %v3719_v2, %v1283_v13  ;;  %v1590_v23 = vmax.f32 %v1462_v12, 0.0  ;;  %v1654_v27 = vmax.f32 %v1526_v15, 0.0 }
 0x112   : > { %3166 = vst [vmem:[%s3733_s28 + $0x60] sm:$0xff] %v2898_v11   ;;  %v1463_v18 = vadd.f32 %v3319_v16, %v3719_v2  ;;  %3198 = vst [vmem:[%s3733_s28 + $0x160] sm:$0xff] %v3058_v14   ;;  %v1527_v21 = vadd.f32 %v3383_v19, %v3719_v2  ;;  %v1588_v31 = vmax.f32 %v1460_v17, 0.0 }
 0x113   : > { %v1030_v22 = vpop.f32.mrf.mxu0  ;;  %v1286_v26 = vpop.f32.mrf.mxu1  ;;  %v1652_v35 = vmax.f32 %v1524_v20, 0.0 }
 0x114   : > { %v1591_v24 = vmax.f32 %v1463_v18, 0.0  ;;  %v1461_v25 = vadd.f32 %v3719_v2, %v1030_v22  ;;  %v1655_v28 = vmax.f32 %v1527_v21, 0.0  ;;  %v1525_v29 = vadd.f32 %v3719_v2, %v1286_v26 }
 0x115   : > { %v3322_v30 = vpop.f32.mrf.mxu0  ;;  %v3386_v34 = vpop.f32.mrf.mxu1 }
 0x116   : > { %v2913_v32 = vpack.c.bf16 %v1591_v24, %v1590_v23  ;;  %v1589_v33 = vmax.f32 %v1461_v25, 0.0  ;;  %v3073_v36 = vpack.c.bf16 %v1655_v28, %v1654_v27  ;;  %v1653_v37 = vmax.f32 %v1525_v29, 0.0 }
 0x117   : > { %v1043_v38 = vpop.f32.mrf.mxu0  ;;  %v1466_v40 = vadd.f32 %v3322_v30, %v3719_v2  ;;  %v1299_v41 = vpop.f32.mrf.mxu1  ;;  %v1530_v43 = vadd.f32 %v3386_v34, %v3719_v2 }
 0x118   : > { %3169 = vst [vmem:[%s3733_s28 + $0x78] sm:$0xff] %v2913_v32   ;;  %v2908_v39 = vpack.c.bf16 %v1589_v33, %v1588_v31  ;;  %3201 = vst [vmem:[%s3733_s28 + $0x178] sm:$0xff] %v3073_v36   ;;  %v3068_v42 = vpack.c.bf16 %v1653_v37, %v1652_v35  ;;  %v1464_v45 = vadd.f32 %v3719_v2, %v1043_v38 }
 0x119   : > { %v3323_v44 = vpop.f32.mrf.mxu0  ;;  %v3387_v47 = vpop.f32.mrf.mxu1  ;;  %v1528_v48 = vadd.f32 %v3719_v2, %v1299_v41  ;;  %v1594_v51 = vmax.f32 %v1466_v40, 0.0  ;;  %v1658_v55 = vmax.f32 %v1530_v43, 0.0 }
 0x11a   : > { %3168 = vst [vmem:[%s3733_s28 + $0x70] sm:$0xff] %v2908_v39   ;;  %v1467_v46 = vadd.f32 %v3323_v44, %v3719_v2  ;;  %3200 = vst [vmem:[%s3733_s28 + $0x170] sm:$0xff] %v3068_v42   ;;  %v1531_v49 = vadd.f32 %v3387_v47, %v3719_v2  ;;  %v1592_v59 = vmax.f32 %v1464_v45, 0.0 }
 0x11b   : > { %v1046_v50 = vpop.f32.mrf.mxu0  ;;  %v1302_v54 = vpop.f32.mrf.mxu1  ;;  %v1656_v63 = vmax.f32 %v1528_v48, 0.0 }
 0x11c   : > { %v1595_v52 = vmax.f32 %v1467_v46, 0.0  ;;  %v1465_v53 = vadd.f32 %v3719_v2, %v1046_v50  ;;  %v1659_v56 = vmax.f32 %v1531_v49, 0.0  ;;  %v1529_v57 = vadd.f32 %v3719_v2, %v1302_v54 }
 0x11d   : > { %v3326_v58 = vpop.f32.mrf.mxu0  ;;  %v3390_v62 = vpop.f32.mrf.mxu1 }
 0x11e   : > { %v2923_v60 = vpack.c.bf16 %v1595_v52, %v1594_v51  ;;  %v1593_v61 = vmax.f32 %v1465_v53, 0.0  ;;  %v3083_v0 = vpack.c.bf16 %v1659_v56, %v1658_v55  ;;  %v1657_v1 = vmax.f32 %v1529_v57, 0.0 }
 0x11f   : > { %v1059_v3 = vpop.f32.mrf.mxu0  ;;  %v1470_v5 = vadd.f32 %v3326_v58, %v3719_v2  ;;  %v1315_v6 = vpop.f32.mrf.mxu1  ;;  %v1534_v8 = vadd.f32 %v3390_v62, %v3719_v2 }
 0x120   : > { %3171 = vst [vmem:[%s3733_s28 + $0x88] sm:$0xff] %v2923_v60   ;;  %v2918_v4 = vpack.c.bf16 %v1593_v61, %v1592_v59  ;;  %3203 = vst [vmem:[%s3733_s28 + $0x188] sm:$0xff] %v3083_v0   ;;  %v3078_v7 = vpack.c.bf16 %v1657_v1, %v1656_v63  ;;  %v1468_v10 = vadd.f32 %v3719_v2, %v1059_v3 }
 0x121   : > { %v3327_v9 = vpop.f32.mrf.mxu0  ;;  %v3391_v12 = vpop.f32.mrf.mxu1  ;;  %v1532_v13 = vadd.f32 %v3719_v2, %v1315_v6  ;;  %v1598_v16 = vmax.f32 %v1470_v5, 0.0  ;;  %v1662_v20 = vmax.f32 %v1534_v8, 0.0 }
 0x122   : > { %3170 = vst [vmem:[%s3733_s28 + $0x80] sm:$0xff] %v2918_v4   ;;  %v1471_v11 = vadd.f32 %v3327_v9, %v3719_v2  ;;  %3202 = vst [vmem:[%s3733_s28 + $0x180] sm:$0xff] %v3078_v7   ;;  %v1535_v14 = vadd.f32 %v3391_v12, %v3719_v2  ;;  %v1596_v24 = vmax.f32 %v1468_v10, 0.0 }
 0x123   : > { %v1062_v15 = vpop.f32.mrf.mxu0  ;;  %v1318_v19 = vpop.f32.mrf.mxu1  ;;  %v1660_v28 = vmax.f32 %v1532_v13, 0.0 }
 0x124   : > { %v1599_v17 = vmax.f32 %v1471_v11, 0.0  ;;  %v1469_v18 = vadd.f32 %v3719_v2, %v1062_v15  ;;  %v1663_v21 = vmax.f32 %v1535_v14, 0.0  ;;  %v1533_v22 = vadd.f32 %v3719_v2, %v1318_v19 }
 0x125   : > { %v3330_v23 = vpop.f32.mrf.mxu0  ;;  %v3394_v27 = vpop.f32.mrf.mxu1 }
 0x126   : > { %v2933_v25 = vpack.c.bf16 %v1599_v17, %v1598_v16  ;;  %v1597_v26 = vmax.f32 %v1469_v18, 0.0  ;;  %v3093_v29 = vpack.c.bf16 %v1663_v21, %v1662_v20  ;;  %v1661_v30 = vmax.f32 %v1533_v22, 0.0 }
 0x127   : > { %v1075_v31 = vpop.f32.mrf.mxu0  ;;  %v1474_v33 = vadd.f32 %v3330_v23, %v3719_v2  ;;  %v1331_v34 = vpop.f32.mrf.mxu1  ;;  %v1538_v36 = vadd.f32 %v3394_v27, %v3719_v2 }
 0x128   : > { %3173 = vst [vmem:[%s3733_s28 + $0x98] sm:$0xff] %v2933_v25   ;;  %v2928_v32 = vpack.c.bf16 %v1597_v26, %v1596_v24  ;;  %3205 = vst [vmem:[%s3733_s28 + $0x198] sm:$0xff] %v3093_v29   ;;  %v3088_v35 = vpack.c.bf16 %v1661_v30, %v1660_v28  ;;  %v1472_v38 = vadd.f32 %v3719_v2, %v1075_v31 }
 0x129   : > { %v3331_v37 = vpop.f32.mrf.mxu0  ;;  %v3395_v40 = vpop.f32.mrf.mxu1  ;;  %v1536_v41 = vadd.f32 %v3719_v2, %v1331_v34  ;;  %v1602_v44 = vmax.f32 %v1474_v33, 0.0  ;;  %v1666_v48 = vmax.f32 %v1538_v36, 0.0 }
 0x12a   : > { %3172 = vst [vmem:[%s3733_s28 + $0x90] sm:$0xff] %v2928_v32   ;;  %v1475_v39 = vadd.f32 %v3331_v37, %v3719_v2  ;;  %3204 = vst [vmem:[%s3733_s28 + $0x190] sm:$0xff] %v3088_v35   ;;  %v1539_v42 = vadd.f32 %v3395_v40, %v3719_v2  ;;  %v1600_v52 = vmax.f32 %v1472_v38, 0.0 }
 0x12b   : > { %v1078_v43 = vpop.f32.mrf.mxu0  ;;  %v1334_v47 = vpop.f32.mrf.mxu1  ;;  %v1664_v56 = vmax.f32 %v1536_v41, 0.0 }
 0x12c   : > { %v1603_v45 = vmax.f32 %v1475_v39, 0.0  ;;  %v1473_v46 = vadd.f32 %v3719_v2, %v1078_v43  ;;  %v1667_v49 = vmax.f32 %v1539_v42, 0.0  ;;  %v1537_v50 = vadd.f32 %v3719_v2, %v1334_v47 }
 0x12d   : > { %v3334_v51 = vpop.f32.mrf.mxu0  ;;  %v3398_v55 = vpop.f32.mrf.mxu1 }
 0x12e   : > { %v2943_v53 = vpack.c.bf16 %v1603_v45, %v1602_v44  ;;  %v1601_v54 = vmax.f32 %v1473_v46, 0.0  ;;  %v3103_v57 = vpack.c.bf16 %v1667_v49, %v1666_v48  ;;  %v1665_v58 = vmax.f32 %v1537_v50, 0.0 }
 0x12f   : > { %v1091_v59 = vpop.f32.mrf.mxu0  ;;  %v1478_v61 = vadd.f32 %v3334_v51, %v3719_v2  ;;  %v1347_v62 = vpop.f32.mrf.mxu1  ;;  %v1542_v0 = vadd.f32 %v3398_v55, %v3719_v2 }
 0x130   : > { %3175 = vst [vmem:[%s3733_s28 + $0xa8] sm:$0xff] %v2943_v53   ;;  %v2938_v60 = vpack.c.bf16 %v1601_v54, %v1600_v52  ;;  %3207 = vst [vmem:[%s3733_s28 + $0x1a8] sm:$0xff] %v3103_v57   ;;  %v3098_v63 = vpack.c.bf16 %v1665_v58, %v1664_v56  ;;  %v1476_v3 = vadd.f32 %v3719_v2, %v1091_v59 }
 0x131   : > { %v3335_v1 = vpop.f32.mrf.mxu0  ;;  %v3399_v5 = vpop.f32.mrf.mxu1  ;;  %v1540_v6 = vadd.f32 %v3719_v2, %v1347_v62  ;;  %v1606_v9 = vmax.f32 %v1478_v61, 0.0  ;;  %v1670_v13 = vmax.f32 %v1542_v0, 0.0 }
 0x132   : > { %3174 = vst [vmem:[%s3733_s28 + $0xa0] sm:$0xff] %v2938_v60   ;;  %v1479_v4 = vadd.f32 %v3335_v1, %v3719_v2  ;;  %3206 = vst [vmem:[%s3733_s28 + $0x1a0] sm:$0xff] %v3098_v63   ;;  %v1543_v7 = vadd.f32 %v3399_v5, %v3719_v2  ;;  %v1604_v17 = vmax.f32 %v1476_v3, 0.0 }
 0x133   : > { %v1094_v8 = vpop.f32.mrf.mxu0  ;;  %v1350_v12 = vpop.f32.mrf.mxu1  ;;  %v1668_v21 = vmax.f32 %v1540_v6, 0.0 }
 0x134   : > { %v1607_v10 = vmax.f32 %v1479_v4, 0.0  ;;  %v1477_v11 = vadd.f32 %v3719_v2, %v1094_v8  ;;  %v1671_v14 = vmax.f32 %v1543_v7, 0.0  ;;  %v1541_v15 = vadd.f32 %v3719_v2, %v1350_v12 }
 0x135   : > { %v3338_v16 = vpop.f32.mrf.mxu0  ;;  %v3402_v20 = vpop.f32.mrf.mxu1 }
 0x136   : > { %v2953_v18 = vpack.c.bf16 %v1607_v10, %v1606_v9  ;;  %v1605_v19 = vmax.f32 %v1477_v11, 0.0  ;;  %v3113_v22 = vpack.c.bf16 %v1671_v14, %v1670_v13  ;;  %v1669_v23 = vmax.f32 %v1541_v15, 0.0 }
 0x137   : > { %v1107_v24 = vpop.f32.mrf.mxu0  ;;  %v1482_v26 = vadd.f32 %v3338_v16, %v3719_v2  ;;  %v1363_v27 = vpop.f32.mrf.mxu1  ;;  %v1546_v29 = vadd.f32 %v3402_v20, %v3719_v2 }
 0x138   : > { %3177 = vst [vmem:[%s3733_s28 + $0xb8] sm:$0xff] %v2953_v18   ;;  %v2948_v25 = vpack.c.bf16 %v1605_v19, %v1604_v17  ;;  %3209 = vst [vmem:[%s3733_s28 + $0x1b8] sm:$0xff] %v3113_v22   ;;  %v3108_v28 = vpack.c.bf16 %v1669_v23, %v1668_v21  ;;  %v1480_v31 = vadd.f32 %v3719_v2, %v1107_v24 }
 0x139   : > { %v3339_v30 = vpop.f32.mrf.mxu0  ;;  %v3403_v33 = vpop.f32.mrf.mxu1  ;;  %v1544_v34 = vadd.f32 %v3719_v2, %v1363_v27  ;;  %v1610_v37 = vmax.f32 %v1482_v26, 0.0  ;;  %v1674_v41 = vmax.f32 %v1546_v29, 0.0 }
 0x13a   : > { %3176 = vst [vmem:[%s3733_s28 + $0xb0] sm:$0xff] %v2948_v25   ;;  %v1483_v32 = vadd.f32 %v3339_v30, %v3719_v2  ;;  %3208 = vst [vmem:[%s3733_s28 + $0x1b0] sm:$0xff] %v3108_v28   ;;  %v1547_v35 = vadd.f32 %v3403_v33, %v3719_v2  ;;  %v1608_v45 = vmax.f32 %v1480_v31, 0.0 }
 0x13b   : > { %v1110_v36 = vpop.f32.mrf.mxu0  ;;  %v1366_v40 = vpop.f32.mrf.mxu1  ;;  %v1672_v49 = vmax.f32 %v1544_v34, 0.0 }
 0x13c   : > { %v1611_v38 = vmax.f32 %v1483_v32, 0.0  ;;  %v1481_v39 = vadd.f32 %v3719_v2, %v1110_v36  ;;  %v1675_v42 = vmax.f32 %v1547_v35, 0.0  ;;  %v1545_v43 = vadd.f32 %v3719_v2, %v1366_v40 }
 0x13d   : > { %v3342_v44 = vpop.f32.mrf.mxu0  ;;  %v3406_v48 = vpop.f32.mrf.mxu1 }
 0x13e   : > { %v2963_v46 = vpack.c.bf16 %v1611_v38, %v1610_v37  ;;  %v1609_v47 = vmax.f32 %v1481_v39, 0.0  ;;  %v3123_v50 = vpack.c.bf16 %v1675_v42, %v1674_v41  ;;  %v1673_v51 = vmax.f32 %v1545_v43, 0.0 }
 0x13f   : > { %v1123_v52 = vpop.f32.mrf.mxu0  ;;  %v1486_v54 = vadd.f32 %v3342_v44, %v3719_v2  ;;  %v1379_v55 = vpop.f32.mrf.mxu1  ;;  %v1550_v57 = vadd.f32 %v3406_v48, %v3719_v2 }
 0x140   : > { %3179 = vst [vmem:[%s3733_s28 + $0xc8] sm:$0xff] %v2963_v46   ;;  %v2958_v53 = vpack.c.bf16 %v1609_v47, %v1608_v45  ;;  %3211 = vst [vmem:[%s3733_s28 + $0x1c8] sm:$0xff] %v3123_v50   ;;  %v3118_v56 = vpack.c.bf16 %v1673_v51, %v1672_v49  ;;  %v1484_v59 = vadd.f32 %v3719_v2, %v1123_v52 }
 0x141   : > { %v3343_v58 = vpop.f32.mrf.mxu0  ;;  %v3407_v61 = vpop.f32.mrf.mxu1  ;;  %v1548_v62 = vadd.f32 %v3719_v2, %v1379_v55  ;;  %v1614_v1 = vmax.f32 %v1486_v54, 0.0  ;;  %v1678_v6 = vmax.f32 %v1550_v57, 0.0 }
 0x142   : > { %3178 = vst [vmem:[%s3733_s28 + $0xc0] sm:$0xff] %v2958_v53   ;;  %v1487_v60 = vadd.f32 %v3343_v58, %v3719_v2  ;;  %3210 = vst [vmem:[%s3733_s28 + $0x1c0] sm:$0xff] %v3118_v56   ;;  %v1551_v63 = vadd.f32 %v3407_v61, %v3719_v2  ;;  %v1612_v10 = vmax.f32 %v1484_v59, 0.0 }
 0x143   : > { %v1126_v0 = vpop.f32.mrf.mxu0  ;;  %v1382_v5 = vpop.f32.mrf.mxu1  ;;  %v1676_v14 = vmax.f32 %v1548_v62, 0.0 }
 0x144   : > { %v1615_v3 = vmax.f32 %v1487_v60, 0.0  ;;  %v1485_v4 = vadd.f32 %v3719_v2, %v1126_v0  ;;  %v1679_v7 = vmax.f32 %v1551_v63, 0.0  ;;  %v1549_v8 = vadd.f32 %v3719_v2, %v1382_v5 }
 0x145   : > { %v3346_v9 = vpop.f32.mrf.mxu0  ;;  %v3410_v13 = vpop.f32.mrf.mxu1 }
 0x146   : > { %v2973_v11 = vpack.c.bf16 %v1615_v3, %v1614_v1  ;;  %v1613_v12 = vmax.f32 %v1485_v4, 0.0  ;;  %v3133_v15 = vpack.c.bf16 %v1679_v7, %v1678_v6  ;;  %v1677_v16 = vmax.f32 %v1549_v8, 0.0 }
 0x147   : > { %v1139_v17 = vpop.f32.mrf.mxu0  ;;  %v1490_v19 = vadd.f32 %v3346_v9, %v3719_v2  ;;  %v1395_v20 = vpop.f32.mrf.mxu1  ;;  %v1554_v22 = vadd.f32 %v3410_v13, %v3719_v2 }
 0x148   : > { %3181 = vst [vmem:[%s3733_s28 + $0xd8] sm:$0xff] %v2973_v11   ;;  %v2968_v18 = vpack.c.bf16 %v1613_v12, %v1612_v10  ;;  %3213 = vst [vmem:[%s3733_s28 + $0x1d8] sm:$0xff] %v3133_v15   ;;  %v3128_v21 = vpack.c.bf16 %v1677_v16, %v1676_v14  ;;  %v1488_v24 = vadd.f32 %v3719_v2, %v1139_v17 }
 0x149   : > { %v3347_v23 = vpop.f32.mrf.mxu0  ;;  %v3411_v26 = vpop.f32.mrf.mxu1  ;;  %v1552_v27 = vadd.f32 %v3719_v2, %v1395_v20  ;;  %v1618_v30 = vmax.f32 %v1490_v19, 0.0  ;;  %v1682_v34 = vmax.f32 %v1554_v22, 0.0 }
 0x14a   : > { %3180 = vst [vmem:[%s3733_s28 + $0xd0] sm:$0xff] %v2968_v18   ;;  %v1491_v25 = vadd.f32 %v3347_v23, %v3719_v2  ;;  %3212 = vst [vmem:[%s3733_s28 + $0x1d0] sm:$0xff] %v3128_v21   ;;  %v1555_v28 = vadd.f32 %v3411_v26, %v3719_v2  ;;  %v1616_v38 = vmax.f32 %v1488_v24, 0.0 }
 0x14b   : > { %v1142_v29 = vpop.f32.mrf.mxu0  ;;  %v1398_v33 = vpop.f32.mrf.mxu1  ;;  %v1680_v42 = vmax.f32 %v1552_v27, 0.0 }
 0x14c   : > { %v1619_v31 = vmax.f32 %v1491_v25, 0.0  ;;  %v1489_v32 = vadd.f32 %v3719_v2, %v1142_v29  ;;  %v1683_v35 = vmax.f32 %v1555_v28, 0.0  ;;  %v1553_v36 = vadd.f32 %v3719_v2, %v1398_v33 }
 0x14d   : > { %v3350_v37 = vpop.f32.mrf.mxu0  ;;  %v3414_v41 = vpop.f32.mrf.mxu1 }
 0x14e   : > { %v2983_v39 = vpack.c.bf16 %v1619_v31, %v1618_v30  ;;  %v1617_v40 = vmax.f32 %v1489_v32, 0.0  ;;  %v3143_v43 = vpack.c.bf16 %v1683_v35, %v1682_v34  ;;  %v1681_v44 = vmax.f32 %v1553_v36, 0.0 }
 0x14f   : > { %v1155_v45 = vpop.f32.mrf.mxu0  ;;  %v1494_v47 = vadd.f32 %v3350_v37, %v3719_v2  ;;  %v1411_v48 = vpop.f32.mrf.mxu1  ;;  %v1558_v50 = vadd.f32 %v3414_v41, %v3719_v2 }
 0x150   : > { %3183 = vst [vmem:[%s3733_s28 + $0xe8] sm:$0xff] %v2983_v39   ;;  %v2978_v46 = vpack.c.bf16 %v1617_v40, %v1616_v38  ;;  %3215 = vst [vmem:[%s3733_s28 + $0x1e8] sm:$0xff] %v3143_v43   ;;  %v3138_v49 = vpack.c.bf16 %v1681_v44, %v1680_v42  ;;  %v1492_v52 = vadd.f32 %v3719_v2, %v1155_v45 }
 0x151   : > { %v3351_v51 = vpop.f32.mrf.mxu0  ;;  %v3415_v54 = vpop.f32.mrf.mxu1  ;;  %v1556_v55 = vadd.f32 %v3719_v2, %v1411_v48  ;;  %v1622_v58 = vmax.f32 %v1494_v47, 0.0  ;;  %v1686_v62 = vmax.f32 %v1558_v50, 0.0 }
 0x152   : > { %3182 = vst [vmem:[%s3733_s28 + $0xe0] sm:$0xff] %v2978_v46   ;;  %v1495_v53 = vadd.f32 %v3351_v51, %v3719_v2  ;;  %3214 = vst [vmem:[%s3733_s28 + $0x1e0] sm:$0xff] %v3138_v49   ;;  %v1559_v56 = vadd.f32 %v3415_v54, %v3719_v2  ;;  %v1620_v1 = vmax.f32 %v1492_v52, 0.0 }
 0x153   : > { %v1158_v57 = vpop.f32.mrf.mxu0  ;;  %v1414_v61 = vpop.f32.mrf.mxu1  ;;  %v1684_v5 = vmax.f32 %v1556_v55, 0.0 }
 0x154   : > { %v1623_v59 = vmax.f32 %v1495_v53, 0.0  ;;  %v1493_v60 = vadd.f32 %v3719_v2, %v1158_v57  ;;  %v1687_v63 = vmax.f32 %v1559_v56, 0.0  ;;  %v1557_v0 = vadd.f32 %v3719_v2, %v1414_v61 }
 0x156   : > { %v2993_v3 = vpack.c.bf16 %v1623_v59, %v1622_v58  ;;  %v1621_v4 = vmax.f32 %v1493_v60, 0.0  ;;  %v3153_v6 = vpack.c.bf16 %v1687_v63, %v1686_v62  ;;  %v1685_v7 = vmax.f32 %v1557_v0, 0.0 }
 0x158   : > { %3185 = vst [vmem:[%s3733_s28 + $0xf8] sm:$0xff] %v2993_v3   ;;  %v2988_v8 = vpack.c.bf16 %v1621_v4, %v1620_v1  ;;  %3217 = vst [vmem:[%s3733_s28 + $0x1f8] sm:$0xff] %v3153_v6   ;;  %v3148_v9 = vpack.c.bf16 %v1685_v7, %v1684_v5 }
 0x15a   : > { %3184 = vst [vmem:[%s3733_s28 + $0xf0] sm:$0xff] %v2988_v8   ;;  %3216 = vst [vmem:[%s3733_s28 + $0x1f0] sm:$0xff] %v3148_v9  }
 0x15b PF: > { %s13_s14 = sadd.s32 1, %s3532_s14   ;;  %s3933_s12 = smov %s3528_s13 }
 0x15c   : > { %p10_p5 = scmp.ge.s32.totalorder %s13_s14, 4   ;;  %s3934_s13 = smov %s3936_s15 }
 0x15e   :  { %12 = sbr.rel (!%p10_p5) target bundleno = 2 (0x2), region = 68 }

// kernel: vgg_forward.7
= control target key start
LH: loop header
LB: loop body
LE: loop exit
PB: predicated region body
PF: predicated region fallthrough
CT: control target
= control target key end

     0   :  { %s611_s6 = smov 0   ;;  %s716_s0 = inlined_call_operand.vmem [shape: bf16[2,16,2,16,256], index: 0, kind: input, shape index: {}]   ;;  %s717_s1 = inlined_call_operand.vmem [shape: bf16[2,16,16,128], index: 1, kind: output, shape index: {}]  }
   0x1 LB: > { %s429_s7 = sadd.s32 4294967295, %s599_s6   ;;  %p433_p0 = scmp.ge.s32.totalorder %s599_s6, 1  ;;  %s599_s6 = sphi %s611_s6, %s11_s6  }
   0x2   : > { %p87_p1 = scmp.lt.s32.totalorder %s599_s6, 3 }
   0x4   : > { %p88_p2 = pnand %p433_p0, %p87_p1 }
   0x5   : > { %p107_p3 = scmp.lt.s32.totalorder (!%p88_p2), %s429_s7, 1 }
   0x6   : > { %91 = sbr.rel (%p88_p2) target bundleno = 50 (0x32), region = 24 }
   0xb   : > { %s719_s7 = smov (!%p107_p3, %s429_s7), 1 }
   0xc   : > { %s472_s8 = sshll.u32 %s719_s7, 9  ;;  %s473_s12 = sshll.u32 %s719_s7, 7 }
   0xd   : > { %s625_s11 = scalar_lea.vmem %s716_s0, %s472_s8  ;;  %s652_s15 = scalar_lea.vmem %s717_s1, %s473_s12 }
   0xe   : > { %v117_v0 = vld [vmem:[%s625_s11] sm:$0xff]  ;;  %v118_v1 = vld [vmem:[%s625_s11 + $0x8] sm:$0xff]  ;;  %v438_v2 = vld [vmem:[%s625_s11 + $0x10] sm:$0xff] }
   0xf   : > { %v439_v3 = vld [vmem:[%s625_s11 + $0x18] sm:$0xff]  ;;  %v182_v4 = vmax.bf16 %v438_v2, %v117_v0  ;;  %v119_v5 = vld [vmem:[%s625_s11 + $0x20] sm:$0xff]  ;;  %v120_v6 = vld [vmem:[%s625_s11 + $0x28] sm:$0xff] }
  0x10   : > { %v183_v7 = vmax.bf16 %v439_v3, %v118_v1  ;;  %v440_v8 = vld [vmem:[%s625_s11 + $0x30] sm:$0xff]  ;;  %v441_v9 = vld [vmem:[%s625_s11 + $0x38] sm:$0xff]  ;;  %v121_v10 = vld [vmem:[%s625_s11 + $0x40] sm:$0xff] }
  0x11   : > { %v246_v11 = vrot.slane %v182_v4, 4  ;;  %v184_v12 = vmax.bf16 %v440_v8, %v119_v5  ;;  %v185_v13 = vmax.bf16 %v441_v9, %v120_v6  ;;  %v122_v14 = vld [vmem:[%s625_s11 + $0x48] sm:$0xff]  ;;  %v442_v15 = vld [vmem:[%s625_s11 + $0x50] sm:$0xff]  ;;  %v443_v16 = vld [vmem:[%s625_s11 + $0x58] sm:$0xff] }
  0x12   : > { %v247_v17 = vrot.slane %v183_v7, 4  ;;  %v186_v18 = vmax.bf16 %v442_v15, %v121_v10  ;;  %v187_v19 = vmax.bf16 %v443_v16, %v122_v14  ;;  %v123_v20 = vld [vmem:[%s625_s11 + $0x60] sm:$0xff]  ;;  %v124_v21 = vld [vmem:[%s625_s11 + $0x68] sm:$0xff]  ;;  %v444_v22 = vld [vmem:[%s625_s11 + $0x70] sm:$0xff] }
  0x13   : > { %v310_v23 = vmax.bf16 %v246_v11, %v182_v4  ;;  %v248_v24 = vrot.slane %v184_v12, 4  ;;  %v249_v25 = vrot.slane %v185_v13, 4  ;;  %v445_v26 = vld [vmem:[%s625_s11 + $0x78] sm:$0xff]  ;;  %v188_v27 = vmax.bf16 %v444_v22, %v123_v20  ;;  %v125_v28 = vld [vmem:[%s625_s11 + $0x80] sm:$0xff]  ;;  %v126_v29 = vld [vmem:[%s625_s11 + $0x88] sm:$0xff] }
  0x14   : > { %v311_v30 = vmax.bf16 %v247_v17, %v183_v7  ;;  %v250_v31 = vrot.slane %v186_v18, 4  ;;  %v251_v32 = vrot.slane %v187_v19, 4  ;;  %v189_v33 = vmax.bf16 %v445_v26, %v124_v21  ;;  %v446_v34 = vld [vmem:[%s625_s11 + $0x90] sm:$0xff]  ;;  %v447_v35 = vld [vmem:[%s625_s11 + $0x98] sm:$0xff]  ;;  %v127_v36 = vld [vmem:[%s625_s11 + $0xa0] sm:$0xff] }
  0x15   : > { %v312_v37 = vmax.bf16 %v248_v24, %v184_v12  ;;  %v313_v38 = vmax.bf16 %v249_v25, %v185_v13  ;;  %v252_v39 = vrot.slane %v188_v27, 4  ;;  %v190_v40 = vmax.bf16 %v446_v34, %v125_v28  ;;  %v128_v41 = vld [vmem:[%s625_s11 + $0xa8] sm:$0xff]  ;;  %v448_v42 = vld [vmem:[%s625_s11 + $0xb0] sm:$0xff]  ;;  %v449_v43 = vld [vmem:[%s625_s11 + $0xb8] sm:$0xff] }
  0x16   : > { %v554_v44 = vcombine.low %v310_v23, %v311_v30  ;;  %v314_v45 = vmax.bf16 %v250_v31, %v186_v18  ;;  %v315_v46 = vmax.bf16 %v251_v32, %v187_v19  ;;  %v253_v47 = vrot.slane %v189_v33, 4  ;;  %v129_v48 = vld [vmem:[%s625_s11 + $0xc0] sm:$0xff]  ;;  %v130_v49 = vld [vmem:[%s625_s11 + $0xc8] sm:$0xff]  ;;  %v450_v50 = vld [vmem:[%s625_s11 + $0xd0] sm:$0xff] }
  0x17   : > { %v555_v51 = vcombine.low %v312_v37, %v313_v38  ;;  %v316_v52 = vmax.bf16 %v252_v39, %v188_v27  ;;  %v191_v53 = vmax.bf16 %v447_v35, %v126_v29  ;;  %v254_v54 = vrot.slane %v190_v40, 4  ;;  %v451_v55 = vld [vmem:[%s625_s11 + $0xd8] sm:$0xff]  ;;  %v131_v56 = vld [vmem:[%s625_s11 + $0xe0] sm:$0xff]  ;;  %v132_v61 = vld [vmem:[%s625_s11 + $0xe8] sm:$0xff] }
  0x18   : > { %478 = vst [vmem:[%s652_s15] sm:$0xff] %v554_v44   ;;  %v557_v57 = vcombine.low %v314_v45, %v315_v46  ;;  %v317_v58 = vmax.bf16 %v253_v47, %v189_v33  ;;  %v192_v59 = vmax.bf16 %v448_v42, %v127_v36  ;;  %v193_v60 = vmax.bf16 %v449_v43, %v128_v41  ;;  %v452_v62 = vld [vmem:[%s625_s11 + $0xf0] sm:$0xff]  ;;  %v453_v63 = vld [vmem:[%s625_s11 + $0xf8] sm:$0xff]  ;;  %v133_v4 = vld [vmem:[%s625_s11 + $0x100] sm:$0xff] }
  0x19   : > { %556 = vst [vmem:[%s652_s15 + $0x8] sm:$0xff] %v555_v51   ;;  %v255_v0 = vrot.slane %v191_v53, 4  ;;  %v318_v1 = vmax.bf16 %v254_v54, %v190_v40  ;;  %v194_v2 = vmax.bf16 %v450_v50, %v129_v48  ;;  %v195_v3 = vmax.bf16 %v451_v55, %v130_v49  ;;  %v454_v5 = vld [vmem:[%s625_s11 + $0x110] sm:$0xff]  ;;  %v134_v10 = vld [vmem:[%s625_s11 + $0x108] sm:$0xff]  ;;  %v455_v15 = vld [vmem:[%s625_s11 + $0x118] sm:$0xff] }
  0x1a   : > { %558 = vst [vmem:[%s652_s15 + $0x10] sm:$0xff] %v557_v57   ;;  %v559_v6 = vcombine.low %v316_v52, %v317_v58  ;;  %v256_v7 = vrot.slane %v192_v59, 4  ;;  %v257_v8 = vrot.slane %v193_v60, 4  ;;  %v196_v9 = vmax.bf16 %v452_v62, %v131_v56  ;;  %v135_v16 = vld [vmem:[%s625_s11 + $0x120] sm:$0xff]  ;;  %v136_v17 = vld [vmem:[%s625_s11 + $0x128] sm:$0xff]  ;;  %v456_v22 = vld [vmem:[%s625_s11 + $0x130] sm:$0xff] }
  0x1b   : > { %v319_v11 = vmax.bf16 %v255_v0, %v191_v53  ;;  %v258_v12 = vrot.slane %v194_v2, 4  ;;  %v259_v13 = vrot.slane %v195_v3, 4  ;;  %v197_v14 = vmax.bf16 %v453_v63, %v132_v61  ;;  %v457_v23 = vld [vmem:[%s625_s11 + $0x138] sm:$0xff]  ;;  %v137_v24 = vld [vmem:[%s625_s11 + $0x140] sm:$0xff]  ;;  %v138_v29 = vld [vmem:[%s625_s11 + $0x148] sm:$0xff] }
  0x1c   : > { %560 = vst [vmem:[%s652_s15 + $0x18] sm:$0xff] %v559_v6   ;;  %v320_v18 = vmax.bf16 %v256_v7, %v192_v59  ;;  %v321_v19 = vmax.bf16 %v257_v8, %v193_v60  ;;  %v260_v20 = vrot.slane %v196_v9, 4  ;;  %v198_v21 = vmax.bf16 %v454_v5, %v133_v4  ;;  %v458_v30 = vld [vmem:[%s625_s11 + $0x150] sm:$0xff]  ;;  %v459_v31 = vld [vmem:[%s625_s11 + $0x158] sm:$0xff]  ;;  %v139_v36 = vld [vmem:[%s625_s11 + $0x160] sm:$0xff] }
  0x1d   : > { %v561_v25 = vcombine.low %v318_v1, %v319_v11  ;;  %v322_v26 = vmax.bf16 %v258_v12, %v194_v2  ;;  %v323_v27 = vmax.bf16 %v259_v13, %v195_v3  ;;  %v261_v28 = vrot.slane %v197_v14, 4  ;;  %v460_v37 = vld [vmem:[%s625_s11 + $0x170] sm:$0xff]  ;;  %v140_v42 = vld [vmem:[%s625_s11 + $0x168] sm:$0xff]  ;;  %v461_v43 = vld [vmem:[%s625_s11 + $0x178] sm:$0xff] }
  0x1e   : > { %v563_v32 = vcombine.low %v320_v18, %v321_v19  ;;  %v324_v33 = vmax.bf16 %v260_v20, %v196_v9  ;;  %v199_v34 = vmax.bf16 %v455_v15, %v134_v10  ;;  %v262_v35 = vrot.slane %v198_v21, 4  ;;  %v141_v48 = vld [vmem:[%s625_s11 + $0x180] sm:$0xff]  ;;  %v462_v49 = vld [vmem:[%s625_s11 + $0x190] sm:$0xff]  ;;  %v142_v54 = vld [vmem:[%s625_s11 + $0x188] sm:$0xff] }
  0x1f   : > { %562 = vst [vmem:[%s652_s15 + $0x20] sm:$0xff] %v561_v25   ;;  %v565_v38 = vcombine.low %v322_v26, %v323_v27  ;;  %v325_v39 = vmax.bf16 %v261_v28, %v197_v14  ;;  %v200_v40 = vmax.bf16 %v456_v22, %v135_v16  ;;  %v201_v41 = vmax.bf16 %v457_v23, %v136_v17  ;;  %v463_v59 = vld [vmem:[%s625_s11 + $0x198] sm:$0xff]  ;;  %v143_v60 = vld [vmem:[%s625_s11 + $0x1a0] sm:$0xff]  ;;  %v144_v61 = vld [vmem:[%s625_s11 + $0x1a8] sm:$0xff] }
  0x20   : > { %564 = vst [vmem:[%s652_s15 + $0x28] sm:$0xff] %v563_v32   ;;  %v263_v44 = vrot.slane %v199_v34, 4  ;;  %v326_v45 = vmax.bf16 %v262_v35, %v198_v21  ;;  %v202_v46 = vmax.bf16 %v458_v30, %v137_v24  ;;  %v203_v47 = vmax.bf16 %v459_v31, %v138_v29  ;;  %v464_v2 = vld [vmem:[%s625_s11 + $0x1b0] sm:$0xff]  ;;  %v465_v3 = vld [vmem:[%s625_s11 + $0x1b8] sm:$0xff]  ;;  %v145_v4 = vld [vmem:[%s625_s11 + $0x1c0] sm:$0xff] }
  0x21   : > { %566 = vst [vmem:[%s652_s15 + $0x30] sm:$0xff] %v565_v38   ;;  %v567_v50 = vcombine.low %v324_v33, %v325_v39  ;;  %v264_v51 = vrot.slane %v200_v40, 4  ;;  %v265_v52 = vrot.slane %v201_v41, 4  ;;  %v204_v53 = vmax.bf16 %v460_v37, %v139_v36  ;;  %v146_v9 = vld [vmem:[%s625_s11 + $0x1c8] sm:$0xff]  ;;  %v466_v10 = vld [vmem:[%s625_s11 + $0x1d0] sm:$0xff]  ;;  %v467_v11 = vld [vmem:[%s625_s11 + $0x1d8] sm:$0xff] }
  0x22   : > { %v327_v55 = vmax.bf16 %v263_v44, %v199_v34  ;;  %v266_v56 = vrot.slane %v202_v46, 4  ;;  %v267_v57 = vrot.slane %v203_v47, 4  ;;  %v205_v58 = vmax.bf16 %v461_v43, %v140_v42  ;;  %v147_v16 = vld [vmem:[%s625_s11 + $0x1e0] sm:$0xff]  ;;  %v468_v17 = vld [vmem:[%s625_s11 + $0x1f0] sm:$0xff]  ;;  %v148_v22 = vld [vmem:[%s625_s11 + $0x1e8] sm:$0xff] }
  0x23   : > { %568 = vst [vmem:[%s652_s15 + $0x38] sm:$0xff] %v567_v50   ;;  %v328_v62 = vmax.bf16 %v264_v51, %v200_v40  ;;  %v329_v63 = vmax.bf16 %v265_v52, %v201_v41  ;;  %v268_v0 = vrot.slane %v204_v53, 4  ;;  %v206_v1 = vmax.bf16 %v462_v49, %v141_v48  ;;  %v469_v23 = vld [vmem:[%s625_s11 + $0x1f8] sm:$0xff] }
  0x24   : > { %v569_v5 = vcombine.low %v326_v45, %v327_v55  ;;  %v330_v6 = vmax.bf16 %v266_v56, %v202_v46  ;;  %v331_v7 = vmax.bf16 %v267_v57, %v203_v47  ;;  %v269_v8 = vrot.slane %v205_v58, 4 }
  0x25   : > { %v571_v12 = vcombine.low %v328_v62, %v329_v63  ;;  %v332_v13 = vmax.bf16 %v268_v0, %v204_v53  ;;  %v207_v14 = vmax.bf16 %v463_v59, %v142_v54  ;;  %v270_v15 = vrot.slane %v206_v1, 4 }
  0x26   : > { %570 = vst [vmem:[%s652_s15 + $0x40] sm:$0xff] %v569_v5   ;;  %v573_v18 = vcombine.low %v330_v6, %v331_v7  ;;  %v333_v19 = vmax.bf16 %v269_v8, %v205_v58  ;;  %v208_v20 = vmax.bf16 %v464_v2, %v143_v60  ;;  %v209_v21 = vmax.bf16 %v465_v3, %v144_v61 }
  0x27   : > { %572 = vst [vmem:[%s652_s15 + $0x48] sm:$0xff] %v571_v12   ;;  %v271_v24 = vrot.slane %v207_v14, 4  ;;  %v334_v25 = vmax.bf16 %v270_v15, %v206_v1  ;;  %v210_v26 = vmax.bf16 %v466_v10, %v145_v4  ;;  %v211_v27 = vmax.bf16 %v467_v11, %v146_v9 }
  0x28   : > { %574 = vst [vmem:[%s652_s15 + $0x50] sm:$0xff] %v573_v18   ;;  %v575_v28 = vcombine.low %v332_v13, %v333_v19  ;;  %v272_v29 = vrot.slane %v208_v20, 4  ;;  %v273_v30 = vrot.slane %v209_v21, 4  ;;  %v212_v31 = vmax.bf16 %v468_v17, %v147_v16 }
  0x29   : > { %v335_v32 = vmax.bf16 %v271_v24, %v207_v14  ;;  %v274_v33 = vrot.slane %v210_v26, 4  ;;  %v275_v34 = vrot.slane %v211_v27, 4  ;;  %v213_v35 = vmax.bf16 %v469_v23, %v148_v22 }
  0x2a   : > { %576 = vst [vmem:[%s652_s15 + $0x58] sm:$0xff] %v575_v28   ;;  %v336_v36 = vmax.bf16 %v272_v29, %v208_v20  ;;  %v337_v37 = vmax.bf16 %v273_v30, %v209_v21  ;;  %v276_v38 = vrot.slane %v212_v31, 4 }
  0x2b   : > { %v577_v39 = vcombine.low %v334_v25, %v335_v32  ;;  %v338_v40 = vmax.bf16 %v274_v33, %v210_v26  ;;  %v339_v41 = vmax.bf16 %v275_v34, %v211_v27  ;;  %v277_v42 = vrot.slane %v213_v35, 4 }
  0x2c   : > { %v579_v43 = vcombine.low %v336_v36, %v337_v37  ;;  %v340_v44 = vmax.bf16 %v276_v38, %v212_v31 }
  0x2d   : > { %578 = vst [vmem:[%s652_s15 + $0x60] sm:$0xff] %v577_v39   ;;  %v581_v45 = vcombine.low %v338_v40, %v339_v41  ;;  %v341_v46 = vmax.bf16 %v277_v42, %v213_v35 }
  0x2e   : > { %580 = vst [vmem:[%s652_s15 + $0x68] sm:$0xff] %v579_v43  }
  0x2f   : > { %582 = vst [vmem:[%s652_s15 + $0x70] sm:$0xff] %v581_v45   ;;  %v583_v47 = vcombine.low %v340_v44, %v341_v46 }
  0x31   : > { %584 = vst [vmem:[%s652_s15 + $0x78] sm:$0xff] %v583_v47  }
  0x32 PF: > { %s11_s6 = sadd.s32 1, %s599_s6  }
  0x33   : > { %p8_p4 = scmp.ge.s32.totalorder %s11_s6, 4  }
  0x35   :  { %10 = sbr.rel (!%p8_p4) target bundleno = 1 (0x1), region = 55 }

// kernel: vgg_forward.9
= control target key start
LH: loop header
LB: loop body
LE: loop exit
PB: predicated region body
PF: predicated region fallthrough
CT: control target
= control target key end

     0   :  { %s311_s6 = smov 0   ;;  %s332_s0 = inlined_call_operand.vmem [shape: bf16[2,8,2,8,256], index: 0, kind: input, shape index: {}]   ;;  %s333_s1 = inlined_call_operand.vmem [shape: bf16[2,8,8,128], index: 1, kind: output, shape index: {}]  }
   0x1 LB: > { %s237_s7 = sadd.s32 4294967295, %s299_s6   ;;  %p241_p0 = scmp.ge.s32.totalorder %s299_s6, 1  ;;  %s299_s6 = sphi %s311_s6, %s11_s6  }
   0x2   : > { %p87_p1 = scmp.lt.s32.totalorder %s299_s6, 3 }
   0x4   : > { %p88_p2 = pnand %p241_p0, %p87_p1 }
   0x5   : > { %p107_p3 = scmp.lt.s32.totalorder (!%p88_p2), %s237_s7, 1 }
   0x6   : > { %91 = sbr.rel (%p88_p2) target bundleno = 29 (0x1d), region = 24 }
   0xb   : > { %s335_s7 = smov (!%p107_p3, %s237_s7), 1 }
   0xc   : > { %s256_s8 = sshll.u32 %s335_s7, 7  ;;  %s257_s12 = sshll.u32 %s335_s7, 5 }
   0xd   : > { %s111_s11 = scalar_lea.vmem %s332_s0, %s256_s8  ;;  %s116_s15 = scalar_lea.vmem %s333_s1, %s257_s12 }
   0xe   : > { %v117_v0 = vld [vmem:[%s111_s11] sm:$0xff]  ;;  %v118_v1 = vld [vmem:[%s111_s11 + $0x10] sm:$0xff]  ;;  %v246_v2 = vld [vmem:[%s111_s11 + $0x8] sm:$0xff] }
   0xf   : > { %v247_v3 = vld [vmem:[%s111_s11 + $0x18] sm:$0xff]  ;;  %v134_v4 = vmax.bf16 %v246_v2, %v117_v0  ;;  %v119_v5 = vld [vmem:[%s111_s11 + $0x20] sm:$0xff]  ;;  %v120_v6 = vld [vmem:[%s111_s11 + $0x30] sm:$0xff] }
  0x10   : > { %v135_v7 = vmax.bf16 %v247_v3, %v118_v1  ;;  %v248_v8 = vld [vmem:[%s111_s11 + $0x28] sm:$0xff]  ;;  %v249_v9 = vld [vmem:[%s111_s11 + $0x38] sm:$0xff]  ;;  %v121_v10 = vld [vmem:[%s111_s11 + $0x40] sm:$0xff] }
  0x11   : > { %v150_v11 = vrot.slane %v134_v4, 4  ;;  %v136_v12 = vmax.bf16 %v248_v8, %v119_v5  ;;  %v137_v13 = vmax.bf16 %v249_v9, %v120_v6  ;;  %v122_v14 = vld [vmem:[%s111_s11 + $0x50] sm:$0xff]  ;;  %v250_v15 = vld [vmem:[%s111_s11 + $0x48] sm:$0xff]  ;;  %v251_v16 = vld [vmem:[%s111_s11 + $0x58] sm:$0xff] }
  0x12   : > { %v151_v17 = vrot.slane %v135_v7, 4  ;;  %v138_v18 = vmax.bf16 %v250_v15, %v121_v10  ;;  %v139_v19 = vmax.bf16 %v251_v16, %v122_v14  ;;  %v123_v20 = vld [vmem:[%s111_s11 + $0x60] sm:$0xff]  ;;  %v124_v21 = vld [vmem:[%s111_s11 + $0x70] sm:$0xff]  ;;  %v252_v22 = vld [vmem:[%s111_s11 + $0x68] sm:$0xff] }
  0x13   : > { %v166_v23 = vmax.bf16 %v150_v11, %v134_v4  ;;  %v152_v24 = vrot.slane %v136_v12, 4  ;;  %v153_v25 = vrot.slane %v137_v13, 4  ;;  %v253_v26 = vld [vmem:[%s111_s11 + $0x78] sm:$0xff]  ;;  %v140_v27 = vmax.bf16 %v252_v22, %v123_v20 }
  0x14   : > { %v167_v28 = vmax.bf16 %v151_v17, %v135_v7  ;;  %v154_v29 = vrot.slane %v138_v18, 4  ;;  %v155_v30 = vrot.slane %v139_v19, 4  ;;  %v141_v31 = vmax.bf16 %v253_v26, %v124_v21 }
  0x15   : > { %v168_v32 = vmax.bf16 %v152_v24, %v136_v12  ;;  %v169_v33 = vmax.bf16 %v153_v25, %v137_v13  ;;  %v156_v34 = vrot.slane %v140_v27, 4 }
  0x16   : > { %v278_v35 = vcombine.low %v166_v23, %v167_v28  ;;  %v170_v36 = vmax.bf16 %v154_v29, %v138_v18  ;;  %v171_v37 = vmax.bf16 %v155_v30, %v139_v19  ;;  %v157_v38 = vrot.slane %v141_v31, 4 }
  0x17   : > { %v279_v39 = vcombine.low %v168_v32, %v169_v33  ;;  %v172_v40 = vmax.bf16 %v156_v34, %v140_v27 }
  0x18   : > { %262 = vst [vmem:[%s116_s15] sm:$0xff] %v278_v35   ;;  %v281_v41 = vcombine.low %v170_v36, %v171_v37  ;;  %v173_v42 = vmax.bf16 %v157_v38, %v141_v31 }
  0x19   : > { %280 = vst [vmem:[%s116_s15 + $0x8] sm:$0xff] %v279_v39  }
  0x1a   : > { %282 = vst [vmem:[%s116_s15 + $0x10] sm:$0xff] %v281_v41   ;;  %v283_v43 = vcombine.low %v172_v40, %v173_v42 }
  0x1c   : > { %284 = vst [vmem:[%s116_s15 + $0x18] sm:$0xff] %v283_v43  }
  0x1d PF: > { %s11_s6 = sadd.s32 1, %s299_s6  }
  0x1e   : > { %p8_p4 = scmp.ge.s32.totalorder %s11_s6, 4  }
  0x20   :  { %10 = sbr.rel (!%p8_p4) target bundleno = 1 (0x1), region = 55 }

// kernel: vgg_forward.10
= control target key start
LH: loop header
LB: loop body
LE: loop exit
PB: predicated region body
PF: predicated region fallthrough
CT: control target
= control target key end

     0   :  { %s4024_s12 = smov 0   ;;  %s4026_s13 = smov 0   ;;  %s4897_s0 = inlined_call_operand.vmem [shape: bf16[2,10,16,128], index: 0, kind: input, shape index: {}]   ;;  %s4898_s1 = inlined_call_operand.vmem [shape: bf16[9,128,256], index: 1, kind: input, shape index: {}]   ;;  %s4899_s2 = inlined_call_operand.vmem [shape: f32[1,256], index: 2, kind: input, shape index: {}]   ;;  %s4900_s3 = inlined_call_operand.vmem [shape: bf16[2,8,8,256], index: 3, kind: output, shape index: {}]  }
   0x1   :  { %s4028_s14 = smov 0   ;;  %s4030_s15 = smov 0  }
   0x2   :  { %s4032_s16 = smov 0   ;;  %s4034_s17 = smov 0  }
   0x3   :  { %s4036_s18 = smov 0   ;;  %s4038_s19 = smov 0  }
   0x4   :  { %s4040_s20 = smov 0  }
   0x5 LB: > { %s3020_s21 = sadd.s32 4294967295, %s4002_s20   ;;  %s22_s22 = sadd.s32 1, %s3994_s18  ;;  %s4002_s20 = sphi %s4040_s20, %s13_s20   ;;  %s3998_s19 = sphi %s4038_s19, %s4909_s19   ;;  %s3994_s18 = sphi %s4036_s18, %s4908_s18   ;;  %s3990_s17 = sphi %s4034_s17, %s4907_s17   ;;  %s3986_s16 = sphi %s4032_s16, %s4906_s16   ;;  %s3982_s15 = sphi %s4030_s15, %s4905_s15   ;;  %s3978_s14 = sphi %s4028_s14, %s4904_s14   ;;  %s3974_s13 = sphi %s4026_s13, %s4903_s13   ;;  %s3970_s12 = sphi %s4024_s12, %s4902_s12  }
   0x6   : > { %p23_p0 = scmp.ge.s32.totalorder %s22_s22, 2  ;;  %s25_s23 = sadd.s32 1, %s3998_s19 }
   0x7   : > { %s58_s24 = sadd.s32 1, %s3982_s15  ;;  %p65_p1 = scmp.ne.s32.totalorder %s3982_s15, %s3978_s14 }
   0x8   : > { %s4911_s22 = smov (%p23_p0, %s22_s22), 0  ;;  %s4913_s23 = smov (!%p23_p0, %s25_s23), %s3998_s19 }
   0x9   : > { %s55_s25 = ssub.s32 %s3994_s18, %s4911_s22  ;;  %p66_p2 = scmp.eq.s32.totalorder %s4002_s20, 0 }
   0xa   : > { %p27_p3 = scmp.ge.s32.totalorder %s4913_s23, 2  ;;  %p56_p4 = scmp.eq.s32.totalorder %s55_s25, 0 }
   0xb   : > { %p67_p5 = por %p66_p2, %p65_p1  ;;  %s112_s26 = sadd.s32 1, %s3974_s13 }
   0xc   : > { %s4915_s23 = smov (%p27_p3, %s4913_s23), 0  ;;  %p122_p6 = scmp.ne.s32.totalorder %s3974_s13, %s3970_s12 }
   0xd   : > { %s4085_s27 = scalar_select %p56_p4, %s3982_s15, %s58_s24  }
   0xe   : > { %s107_s28 = ssub.s32 %s3998_s19, %s4915_s23  ;;  %p123_p7 = scmp.eq.s32.totalorder %s3020_s21, 3 }
   0xf   : > { %s109_s29 = sor.u32 %s107_s28, %s55_s25  ;;  %p3023_p10 = scmp.ge.s32.totalorder %s4002_s20, 4 }
  0x10   : > { %p110_p8 = scmp.eq.s32.totalorder %s109_s29, 0  ;;  %p4091_p9 = por %p123_p7, %p122_p6 }
  0x11   : > { %145 = sbr.rel (%p3023_p10) target bundleno = 122 (0x7a), region = 16 }
  0x12   : > { %s4096_s4 = scalar_select %p110_p8, %s3974_s13, %s112_s26  }
  0x16   : > { %156 = sbr.rel (!%p67_p5) target bundleno = 122 (0x7a), region = 24  ;;  %s158_s5 = sand.u32 (%p67_p5), 1, %s3982_s15  }
  0x17   : > { %s3024_s6 = sshll.u32 (%p67_p5), %s3994_s18, 2  ;;  %s3761_s7 = smul.u32 (%p67_p5), 576, %s158_s5 }
  0x18   : > { %s4104_s10 = scalar_lea.vmem (%p67_p5), %s4898_s1, %s3024_s6 }
  0x19   : > { %v179_v0 = vld [vmem:[%s4104_s10] sm:$0xf] (%p67_p5)  ;;  %v181_v1 = vld [vmem:[%s4104_s10 + $0x8] sm:$0xf] (%p67_p5)  ;;  %v183_v2 = vld [vmem:[%s4104_s10 + $0x10] sm:$0xf] (%p67_p5) }
  0x1a   : > { %v185_v3 = vld [vmem:[%s4104_s10 + $0x18] sm:$0xf] (%p67_p5)  ;;  %v187_v4 = vld [vmem:[%s4104_s10 + $0x20] sm:$0xf] (%p67_p5)  ;;  %s4111_s11 = scalar_lea.vmem (%p67_p5), [#allocation2], %s3761_s7 }
  0x1b   : > { %180 = vst [vmem:[%s4111_s11] sm:$0xf] %v179_v0  ;;  %182 = vst [vmem:[%s4111_s11 + $0x4] sm:$0xf] %v181_v1  ;;  %v189_v5 = vld [vmem:[%s4104_s10 + $0x28] sm:$0xf] }
  0x1c   : > { %184 = vst [vmem:[%s4111_s11 + $0x8] sm:$0xf] %v183_v2  ;;  %186 = vst [vmem:[%s4111_s11 + $0xc] sm:$0xf] %v185_v3  ;;  %v191_v6 = vld [vmem:[%s4104_s10 + $0x30] sm:$0xf] }
  0x1d   : > { %188 = vst [vmem:[%s4111_s11 + $0x10] sm:$0xf] %v187_v4  ;;  %v193_v7 = vld [vmem:[%s4104_s10 + $0x38] sm:$0xf]  ;;  %190 = vst [vmem:[%s4111_s11 + $0x14] sm:$0xf] %v189_v5 }
  0x1e   : > { %192 = vst [vmem:[%s4111_s11 + $0x18] sm:$0xf] %v191_v6  ;;  %194 = vst [vmem:[%s4111_s11 + $0x1c] sm:$0xf] %v193_v7  ;;  %v195_v8 = vld [vmem:[%s4104_s10 + $0x40] sm:$0xf] }
  0x1f   : > { %v197_v9 = vld [vmem:[%s4104_s10 + $0x48] sm:$0xf]  ;;  %v199_v10 = vld [vmem:[%s4104_s10 + $0x50] sm:$0xf]  ;;  %196 = vst [vmem:[%s4111_s11 + $0x20] sm:$0xf] %v195_v8 }
  0x20   : > { %198 = vst [vmem:[%s4111_s11 + $0x24] sm:$0xf] %v197_v9  ;;  %200 = vst [vmem:[%s4111_s11 + $0x28] sm:$0xf] %v199_v10  ;;  %v201_v11 = vld [vmem:[%s4104_s10 + $0x58] sm:$0xf] }
  0x21   : > { %v203_v12 = vld [vmem:[%s4104_s10 + $0x60] sm:$0xf]  ;;  %v205_v13 = vld [vmem:[%s4104_s10 + $0x68] sm:$0xf]  ;;  %202 = vst [vmem:[%s4111_s11 + $0x2c] sm:$0xf] %v201_v11 }
  0x22   : > { %204 = vst [vmem:[%s4111_s11 + $0x30] sm:$0xf] %v203_v12  ;;  %206 = vst [vmem:[%s4111_s11 + $0x34] sm:$0xf] %v205_v13  ;;  %v207_v14 = vld [vmem:[%s4104_s10 + $0x70] sm:$0xf] }
  0x23   : > { %v209_v15 = vld [vmem:[%s4104_s10 + $0x78] sm:$0xf]  ;;  %v211_v16 = vld [vmem:[%s4104_s10 + $0x80] sm:$0xf]  ;;  %208 = vst [vmem:[%s4111_s11 + $0x38] sm:$0xf] %v207_v14 }
  0x24   : > { %210 = vst [vmem:[%s4111_s11 + $0x3c] sm:$0xf] %v209_v15  ;;  %212 = vst [vmem:[%s4111_s11 + $0x40] sm:$0xf] %v211_v16  ;;  %v213_v17 = vld [vmem:[%s4104_s10 + $0x88] sm:$0xf] }
  0x25   : > { %v215_v18 = vld [vmem:[%s4104_s10 + $0x90] sm:$0xf]  ;;  %v217_v19 = vld [vmem:[%s4104_s10 + $0x98] sm:$0xf]  ;;  %214 = vst [vmem:[%s4111_s11 + $0x44] sm:$0xf] %v213_v17 }
  0x26   : > { %216 = vst [vmem:[%s4111_s11 + $0x48] sm:$0xf] %v215_v18  ;;  %218 = vst [vmem:[%s4111_s11 + $0x4c] sm:$0xf] %v217_v19  ;;  %v219_v20 = vld [vmem:[%s4104_s10 + $0xa0] sm:$0xf] }
  0x27   : > { %v221_v21 = vld [vmem:[%s4104_s10 + $0xa8] sm:$0xf]  ;;  %v223_v22 = vld [vmem:[%s4104_s10 + $0xb0] sm:$0xf]  ;;  %220 = vst [vmem:[%s4111_s11 + $0x50] sm:$0xf] %v219_v20 }
  0x28   : > { %222 = vst [vmem:[%s4111_s11 + $0x54] sm:$0xf] %v221_v21  ;;  %224 = vst [vmem:[%s4111_s11 + $0x58] sm:$0xf] %v223_v22  ;;  %v225_v23 = vld [vmem:[%s4104_s10 + $0xb8] sm:$0xf] }
  0x29   : > { %v227_v24 = vld [vmem:[%s4104_s10 + $0xc0] sm:$0xf]  ;;  %v229_v25 = vld [vmem:[%s4104_s10 + $0xc8] sm:$0xf]  ;;  %226 = vst [vmem:[%s4111_s11 + $0x5c] sm:$0xf] %v225_v23 }
  0x2a   : > { %228 = vst [vmem:[%s4111_s11 + $0x60] sm:$0xf] %v227_v24  ;;  %230 = vst [vmem:[%s4111_s11 + $0x64] sm:$0xf] %v229_v25  ;;  %v231_v26 = vld [vmem:[%s4104_s10 + $0xd0] sm:$0xf] }
  0x2b   : > { %v233_v27 = vld [vmem:[%s4104_s10 + $0xd8] sm:$0xf]  ;;  %v235_v28 = vld [vmem:[%s4104_s10 + $0xe0] sm:$0xf]  ;;  %232 = vst [vmem:[%s4111_s11 + $0x68] sm:$0xf] %v231_v26 }
  0x2c   : > { %234 = vst [vmem:[%s4111_s11 + $0x6c] sm:$0xf] %v233_v27  ;;  %236 = vst [vmem:[%s4111_s11 + $0x70] sm:$0xf] %v235_v28  ;;  %v237_v29 = vld [vmem:[%s4104_s10 + $0xe8] sm:$0xf] }
  0x2d   : > { %v239_v30 = vld [vmem:[%s4104_s10 + $0xf0] sm:$0xf]  ;;  %v241_v31 = vld [vmem:[%s4104_s10 + $0xf8] sm:$0xf]  ;;  %238 = vst [vmem:[%s4111_s11 + $0x74] sm:$0xf] %v237_v29 }
  0x2e   : > { %240 = vst [vmem:[%s4111_s11 + $0x78] sm:$0xf] %v239_v30  ;;  %242 = vst [vmem:[%s4111_s11 + $0x7c] sm:$0xf] %v241_v31  ;;  %v243_v32 = vld [vmem:[%s4104_s10 + $0x100] sm:$0xf] }
  0x2f   : > { %v245_v33 = vld [vmem:[%s4104_s10 + $0x108] sm:$0xf]  ;;  %v247_v34 = vld [vmem:[%s4104_s10 + $0x110] sm:$0xf]  ;;  %244 = vst [vmem:[%s4111_s11 + $0x80] sm:$0xf] %v243_v32 }
  0x30   : > { %246 = vst [vmem:[%s4111_s11 + $0x84] sm:$0xf] %v245_v33  ;;  %248 = vst [vmem:[%s4111_s11 + $0x88] sm:$0xf] %v247_v34  ;;  %v249_v35 = vld [vmem:[%s4104_s10 + $0x118] sm:$0xf] }
  0x31   : > { %v251_v36 = vld [vmem:[%s4104_s10 + $0x120] sm:$0xf]  ;;  %v253_v37 = vld [vmem:[%s4104_s10 + $0x128] sm:$0xf]  ;;  %250 = vst [vmem:[%s4111_s11 + $0x8c] sm:$0xf] %v249_v35 }
  0x32   : > { %252 = vst [vmem:[%s4111_s11 + $0x90] sm:$0xf] %v251_v36  ;;  %254 = vst [vmem:[%s4111_s11 + $0x94] sm:$0xf] %v253_v37  ;;  %v255_v38 = vld [vmem:[%s4104_s10 + $0x130] sm:$0xf] }
  0x33   : > { %v257_v39 = vld [vmem:[%s4104_s10 + $0x138] sm:$0xf]  ;;  %v259_v40 = vld [vmem:[%s4104_s10 + $0x140] sm:$0xf]  ;;  %256 = vst [vmem:[%s4111_s11 + $0x98] sm:$0xf] %v255_v38 }
  0x34   : > { %258 = vst [vmem:[%s4111_s11 + $0x9c] sm:$0xf] %v257_v39  ;;  %260 = vst [vmem:[%s4111_s11 + $0xa0] sm:$0xf] %v259_v40  ;;  %v261_v41 = vld [vmem:[%s4104_s10 + $0x148] sm:$0xf] }
  0x35   : > { %v263_v42 = vld [vmem:[%s4104_s10 + $0x150] sm:$0xf]  ;;  %v265_v43 = vld [vmem:[%s4104_s10 + $0x158] sm:$0xf]  ;;  %262 = vst [vmem:[%s4111_s11 + $0xa4] sm:$0xf] %v261_v41 }
  0x36   : > { %264 = vst [vmem:[%s4111_s11 + $0xa8] sm:$0xf] %v263_v42  ;;  %266 = vst [vmem:[%s4111_s11 + $0xac] sm:$0xf] %v265_v43  ;;  %v267_v44 = vld [vmem:[%s4104_s10 + $0x160] sm:$0xf] }
  0x37   : > { %v269_v45 = vld [vmem:[%s4104_s10 + $0x168] sm:$0xf]  ;;  %v271_v46 = vld [vmem:[%s4104_s10 + $0x170] sm:$0xf]  ;;  %268 = vst [vmem:[%s4111_s11 + $0xb0] sm:$0xf] %v267_v44 }
  0x38   : > { %270 = vst [vmem:[%s4111_s11 + $0xb4] sm:$0xf] %v269_v45  ;;  %272 = vst [vmem:[%s4111_s11 + $0xb8] sm:$0xf] %v271_v46  ;;  %v273_v47 = vld [vmem:[%s4104_s10 + $0x178] sm:$0xf] }
  0x39   : > { %v275_v48 = vld [vmem:[%s4104_s10 + $0x180] sm:$0xf]  ;;  %v277_v49 = vld [vmem:[%s4104_s10 + $0x188] sm:$0xf]  ;;  %274 = vst [vmem:[%s4111_s11 + $0xbc] sm:$0xf] %v273_v47 }
  0x3a   : > { %276 = vst [vmem:[%s4111_s11 + $0xc0] sm:$0xf] %v275_v48  ;;  %278 = vst [vmem:[%s4111_s11 + $0xc4] sm:$0xf] %v277_v49  ;;  %v279_v50 = vld [vmem:[%s4104_s10 + $0x190] sm:$0xf] }
  0x3b   : > { %v281_v51 = vld [vmem:[%s4104_s10 + $0x198] sm:$0xf]  ;;  %v283_v52 = vld [vmem:[%s4104_s10 + $0x1a0] sm:$0xf]  ;;  %280 = vst [vmem:[%s4111_s11 + $0xc8] sm:$0xf] %v279_v50 }
  0x3c   : > { %282 = vst [vmem:[%s4111_s11 + $0xcc] sm:$0xf] %v281_v51  ;;  %284 = vst [vmem:[%s4111_s11 + $0xd0] sm:$0xf] %v283_v52  ;;  %v285_v53 = vld [vmem:[%s4104_s10 + $0x1a8] sm:$0xf] }
  0x3d   : > { %v287_v54 = vld [vmem:[%s4104_s10 + $0x1b0] sm:$0xf]  ;;  %v289_v55 = vld [vmem:[%s4104_s10 + $0x1b8] sm:$0xf]  ;;  %286 = vst [vmem:[%s4111_s11 + $0xd4] sm:$0xf] %v285_v53 }
  0x3e   : > { %288 = vst [vmem:[%s4111_s11 + $0xd8] sm:$0xf] %v287_v54  ;;  %290 = vst [vmem:[%s4111_s11 + $0xdc] sm:$0xf] %v289_v55  ;;  %v291_v56 = vld [vmem:[%s4104_s10 + $0x1c0] sm:$0xf] }
  0x3f   : > { %v293_v57 = vld [vmem:[%s4104_s10 + $0x1c8] sm:$0xf]  ;;  %v295_v58 = vld [vmem:[%s4104_s10 + $0x1d0] sm:$0xf]  ;;  %292 = vst [vmem:[%s4111_s11 + $0xe0] sm:$0xf] %v291_v56 }
  0x40   : > { %294 = vst [vmem:[%s4111_s11 + $0xe4] sm:$0xf] %v293_v57  ;;  %296 = vst [vmem:[%s4111_s11 + $0xe8] sm:$0xf] %v295_v58  ;;  %v297_v59 = vld [vmem:[%s4104_s10 + $0x1d8] sm:$0xf] }
  0x41   : > { %v299_v60 = vld [vmem:[%s4104_s10 + $0x1e0] sm:$0xf]  ;;  %v301_v61 = vld [vmem:[%s4104_s10 + $0x1e8] sm:$0xf]  ;;  %298 = vst [vmem:[%s4111_s11 + $0xec] sm:$0xf] %v297_v59 }
  0x42   : > { %300 = vst [vmem:[%s4111_s11 + $0xf0] sm:$0xf] %v299_v60  ;;  %302 = vst [vmem:[%s4111_s11 + $0xf4] sm:$0xf] %v301_v61  ;;  %v303_v62 = vld [vmem:[%s4104_s10 + $0x1f0] sm:$0xf] }
  0x43   : > { %v305_v63 = vld [vmem:[%s4104_s10 + $0x1f8] sm:$0xf]  ;;  %v307_v0 = vld [vmem:[%s4104_s10 + $0x200] sm:$0xf]  ;;  %304 = vst [vmem:[%s4111_s11 + $0xf8] sm:$0xf] %v303_v62 }
  0x44   : > { %306 = vst [vmem:[%s4111_s11 + $0xfc] sm:$0xf] %v305_v63  ;;  %308 = vst [vmem:[%s4111_s11 + $0x100] sm:$0xf] %v307_v0  ;;  %v309_v1 = vld [vmem:[%s4104_s10 + $0x208] sm:$0xf] }
  0x45   : > { %v311_v2 = vld [vmem:[%s4104_s10 + $0x210] sm:$0xf]  ;;  %v313_v3 = vld [vmem:[%s4104_s10 + $0x218] sm:$0xf]  ;;  %310 = vst [vmem:[%s4111_s11 + $0x104] sm:$0xf] %v309_v1 }
  0x46   : > { %312 = vst [vmem:[%s4111_s11 + $0x108] sm:$0xf] %v311_v2  ;;  %314 = vst [vmem:[%s4111_s11 + $0x10c] sm:$0xf] %v313_v3  ;;  %v315_v4 = vld [vmem:[%s4104_s10 + $0x220] sm:$0xf] }
  0x47   : > { %v317_v5 = vld [vmem:[%s4104_s10 + $0x228] sm:$0xf]  ;;  %v319_v6 = vld [vmem:[%s4104_s10 + $0x230] sm:$0xf]  ;;  %316 = vst [vmem:[%s4111_s11 + $0x110] sm:$0xf] %v315_v4 }
  0x48   : > { %318 = vst [vmem:[%s4111_s11 + $0x114] sm:$0xf] %v317_v5  ;;  %320 = vst [vmem:[%s4111_s11 + $0x118] sm:$0xf] %v319_v6  ;;  %v321_v7 = vld [vmem:[%s4104_s10 + $0x238] sm:$0xf] }
  0x49   : > { %v323_v8 = vld [vmem:[%s4104_s10 + $0x240] sm:$0xf]  ;;  %v325_v9 = vld [vmem:[%s4104_s10 + $0x248] sm:$0xf]  ;;  %322 = vst [vmem:[%s4111_s11 + $0x11c] sm:$0xf] %v321_v7 }
  0x4a   : > { %324 = vst [vmem:[%s4111_s11 + $0x120] sm:$0xf] %v323_v8  ;;  %326 = vst [vmem:[%s4111_s11 + $0x124] sm:$0xf] %v325_v9  ;;  %v327_v10 = vld [vmem:[%s4104_s10 + $0x250] sm:$0xf] }
  0x4b   : > { %v329_v11 = vld [vmem:[%s4104_s10 + $0x258] sm:$0xf]  ;;  %v331_v12 = vld [vmem:[%s4104_s10 + $0x260] sm:$0xf]  ;;  %328 = vst [vmem:[%s4111_s11 + $0x128] sm:$0xf] %v327_v10 }
  0x4c   : > { %330 = vst [vmem:[%s4111_s11 + $0x12c] sm:$0xf] %v329_v11  ;;  %332 = vst [vmem:[%s4111_s11 + $0x130] sm:$0xf] %v331_v12  ;;  %v333_v13 = vld [vmem:[%s4104_s10 + $0x268] sm:$0xf] }
  0x4d   : > { %v335_v14 = vld [vmem:[%s4104_s10 + $0x270] sm:$0xf]  ;;  %v337_v15 = vld [vmem:[%s4104_s10 + $0x278] sm:$0xf]  ;;  %334 = vst [vmem:[%s4111_s11 + $0x134] sm:$0xf] %v333_v13 }
  0x4e   : > { %336 = vst [vmem:[%s4111_s11 + $0x138] sm:$0xf] %v335_v14  ;;  %338 = vst [vmem:[%s4111_s11 + $0x13c] sm:$0xf] %v337_v15  ;;  %v339_v16 = vld [vmem:[%s4104_s10 + $0x280] sm:$0xf] }
  0x4f   : > { %v341_v17 = vld [vmem:[%s4104_s10 + $0x288] sm:$0xf]  ;;  %v343_v18 = vld [vmem:[%s4104_s10 + $0x290] sm:$0xf]  ;;  %340 = vst [vmem:[%s4111_s11 + $0x140] sm:$0xf] %v339_v16 }
  0x50   : > { %342 = vst [vmem:[%s4111_s11 + $0x144] sm:$0xf] %v341_v17  ;;  %344 = vst [vmem:[%s4111_s11 + $0x148] sm:$0xf] %v343_v18  ;;  %v345_v19 = vld [vmem:[%s4104_s10 + $0x298] sm:$0xf] }
  0x51   : > { %v347_v20 = vld [vmem:[%s4104_s10 + $0x2a0] sm:$0xf]  ;;  %v349_v21 = vld [vmem:[%s4104_s10 + $0x2a8] sm:$0xf]  ;;  %346 = vst [vmem:[%s4111_s11 + $0x14c] sm:$0xf] %v345_v19 }
  0x52   : > { %348 = vst [vmem:[%s4111_s11 + $0x150] sm:$0xf] %v347_v20  ;;  %350 = vst [vmem:[%s4111_s11 + $0x154] sm:$0xf] %v349_v21  ;;  %v351_v22 = vld [vmem:[%s4104_s10 + $0x2b0] sm:$0xf] }
  0x53   : > { %v353_v23 = vld [vmem:[%s4104_s10 + $0x2b8] sm:$0xf]  ;;  %v355_v24 = vld [vmem:[%s4104_s10 + $0x2c0] sm:$0xf]  ;;  %352 = vst [vmem:[%s4111_s11 + $0x158] sm:$0xf] %v351_v22 }
  0x54   : > { %354 = vst [vmem:[%s4111_s11 + $0x15c] sm:$0xf] %v353_v23  ;;  %356 = vst [vmem:[%s4111_s11 + $0x160] sm:$0xf] %v355_v24  ;;  %v357_v25 = vld [vmem:[%s4104_s10 + $0x2c8] sm:$0xf] }
  0x55   : > { %v359_v26 = vld [vmem:[%s4104_s10 + $0x2d0] sm:$0xf]  ;;  %v361_v27 = vld [vmem:[%s4104_s10 + $0x2d8] sm:$0xf]  ;;  %358 = vst [vmem:[%s4111_s11 + $0x164] sm:$0xf] %v357_v25 }
  0x56   : > { %360 = vst [vmem:[%s4111_s11 + $0x168] sm:$0xf] %v359_v26  ;;  %362 = vst [vmem:[%s4111_s11 + $0x16c] sm:$0xf] %v361_v27  ;;  %v363_v28 = vld [vmem:[%s4104_s10 + $0x2e0] sm:$0xf] }
  0x57   : > { %v365_v29 = vld [vmem:[%s4104_s10 + $0x2e8] sm:$0xf]  ;;  %v367_v30 = vld [vmem:[%s4104_s10 + $0x2f0] sm:$0xf]  ;;  %364 = vst [vmem:[%s4111_s11 + $0x170] sm:$0xf] %v363_v28 }
  0x58   : > { %366 = vst [vmem:[%s4111_s11 + $0x174] sm:$0xf] %v365_v29  ;;  %368 = vst [vmem:[%s4111_s11 + $0x178] sm:$0xf] %v367_v30  ;;  %v369_v31 = vld [vmem:[%s4104_s10 + $0x2f8] sm:$0xf] }
  0x59   : > { %v371_v32 = vld [vmem:[%s4104_s10 + $0x300] sm:$0xf]  ;;  %v373_v33 = vld [vmem:[%s4104_s10 + $0x308] sm:$0xf]  ;;  %370 = vst [vmem:[%s4111_s11 + $0x17c] sm:$0xf] %v369_v31 }
  0x5a   : > { %372 = vst [vmem:[%s4111_s11 + $0x180] sm:$0xf] %v371_v32  ;;  %374 = vst [vmem:[%s4111_s11 + $0x184] sm:$0xf] %v373_v33  ;;  %v375_v34 = vld [vmem:[%s4104_s10 + $0x310] sm:$0xf] }
  0x5b   : > { %v377_v35 = vld [vmem:[%s4104_s10 + $0x318] sm:$0xf]  ;;  %v379_v36 = vld [vmem:[%s4104_s10 + $0x320] sm:$0xf]  ;;  %376 = vst [vmem:[%s4111_s11 + $0x188] sm:$0xf] %v375_v34 }
  0x5c   : > { %378 = vst [vmem:[%s4111_s11 + $0x18c] sm:$0xf] %v377_v35  ;;  %380 = vst [vmem:[%s4111_s11 + $0x190] sm:$0xf] %v379_v36  ;;  %v381_v37 = vld [vmem:[%s4104_s10 + $0x328] sm:$0xf] }
  0x5d   : > { %v383_v38 = vld [vmem:[%s4104_s10 + $0x330] sm:$0xf]  ;;  %v385_v39 = vld [vmem:[%s4104_s10 + $0x338] sm:$0xf]  ;;  %382 = vst [vmem:[%s4111_s11 + $0x194] sm:$0xf] %v381_v37 }
  0x5e   : > { %384 = vst [vmem:[%s4111_s11 + $0x198] sm:$0xf] %v383_v38  ;;  %386 = vst [vmem:[%s4111_s11 + $0x19c] sm:$0xf] %v385_v39  ;;  %v387_v40 = vld [vmem:[%s4104_s10 + $0x340] sm:$0xf] }
  0x5f   : > { %v389_v41 = vld [vmem:[%s4104_s10 + $0x348] sm:$0xf]  ;;  %v391_v42 = vld [vmem:[%s4104_s10 + $0x350] sm:$0xf]  ;;  %388 = vst [vmem:[%s4111_s11 + $0x1a0] sm:$0xf] %v387_v40 }
  0x60   : > { %390 = vst [vmem:[%s4111_s11 + $0x1a4] sm:$0xf] %v389_v41  ;;  %392 = vst [vmem:[%s4111_s11 + $0x1a8] sm:$0xf] %v391_v42  ;;  %v393_v43 = vld [vmem:[%s4104_s10 + $0x358] sm:$0xf] }
  0x61   : > { %v395_v44 = vld [vmem:[%s4104_s10 + $0x360] sm:$0xf]  ;;  %v397_v45 = vld [vmem:[%s4104_s10 + $0x368] sm:$0xf]  ;;  %394 = vst [vmem:[%s4111_s11 + $0x1ac] sm:$0xf] %v393_v43 }
  0x62   : > { %396 = vst [vmem:[%s4111_s11 + $0x1b0] sm:$0xf] %v395_v44  ;;  %398 = vst [vmem:[%s4111_s11 + $0x1b4] sm:$0xf] %v397_v45  ;;  %v399_v46 = vld [vmem:[%s4104_s10 + $0x370] sm:$0xf] }
  0x63   : > { %v401_v47 = vld [vmem:[%s4104_s10 + $0x378] sm:$0xf]  ;;  %v403_v48 = vld [vmem:[%s4104_s10 + $0x380] sm:$0xf]  ;;  %400 = vst [vmem:[%s4111_s11 + $0x1b8] sm:$0xf] %v399_v46 }
  0x64   : > { %402 = vst [vmem:[%s4111_s11 + $0x1bc] sm:$0xf] %v401_v47  ;;  %404 = vst [vmem:[%s4111_s11 + $0x1c0] sm:$0xf] %v403_v48  ;;  %v405_v49 = vld [vmem:[%s4104_s10 + $0x388] sm:$0xf] }
  0x65   : > { %v407_v50 = vld [vmem:[%s4104_s10 + $0x390] sm:$0xf]  ;;  %v409_v51 = vld [vmem:[%s4104_s10 + $0x398] sm:$0xf]  ;;  %406 = vst [vmem:[%s4111_s11 + $0x1c4] sm:$0xf] %v405_v49 }
  0x66   : > { %408 = vst [vmem:[%s4111_s11 + $0x1c8] sm:$0xf] %v407_v50  ;;  %410 = vst [vmem:[%s4111_s11 + $0x1cc] sm:$0xf] %v409_v51  ;;  %v411_v52 = vld [vmem:[%s4104_s10 + $0x3a0] sm:$0xf] }
  0x67   : > { %v413_v53 = vld [vmem:[%s4104_s10 + $0x3a8] sm:$0xf]  ;;  %v415_v54 = vld [vmem:[%s4104_s10 + $0x3b0] sm:$0xf]  ;;  %412 = vst [vmem:[%s4111_s11 + $0x1d0] sm:$0xf] %v411_v52 }
  0x68   : > { %414 = vst [vmem:[%s4111_s11 + $0x1d4] sm:$0xf] %v413_v53  ;;  %416 = vst [vmem:[%s4111_s11 + $0x1d8] sm:$0xf] %v415_v54  ;;  %v417_v55 = vld [vmem:[%s4104_s10 + $0x3b8] sm:$0xf] }
  0x69   : > { %v419_v56 = vld [vmem:[%s4104_s10 + $0x3c0] sm:$0xf]  ;;  %v421_v57 = vld [vmem:[%s4104_s10 + $0x3c8] sm:$0xf]  ;;  %418 = vst [vmem:[%s4111_s11 + $0x1dc] sm:$0xf] %v417_v55 }
  0x6a   : > { %420 = vst [vmem:[%s4111_s11 + $0x1e0] sm:$0xf] %v419_v56  ;;  %422 = vst [vmem:[%s4111_s11 + $0x1e4] sm:$0xf] %v421_v57  ;;  %v423_v58 = vld [vmem:[%s4104_s10 + $0x3d0] sm:$0xf] }
  0x6b   : > { %v425_v59 = vld [vmem:[%s4104_s10 + $0x3d8] sm:$0xf]  ;;  %v427_v60 = vld [vmem:[%s4104_s10 + $0x3e0] sm:$0xf]  ;;  %424 = vst [vmem:[%s4111_s11 + $0x1e8] sm:$0xf] %v423_v58 }
  0x6c   : > { %426 = vst [vmem:[%s4111_s11 + $0x1ec] sm:$0xf] %v425_v59  ;;  %428 = vst [vmem:[%s4111_s11 + $0x1f0] sm:$0xf] %v427_v60  ;;  %v429_v61 = vld [vmem:[%s4104_s10 + $0x3e8] sm:$0xf] }
  0x6d   : > { %v431_v62 = vld [vmem:[%s4104_s10 + $0x3f0] sm:$0xf]  ;;  %v433_v63 = vld [vmem:[%s4104_s10 + $0x3f8] sm:$0xf]  ;;  %430 = vst [vmem:[%s4111_s11 + $0x1f4] sm:$0xf] %v429_v61 }
  0x6e   : > { %432 = vst [vmem:[%s4111_s11 + $0x1f8] sm:$0xf] %v431_v62  ;;  %434 = vst [vmem:[%s4111_s11 + $0x1fc] sm:$0xf] %v433_v63  ;;  %v435_v0 = vld [vmem:[%s4104_s10 + $0x400] sm:$0xf] }
  0x6f   : > { %v437_v1 = vld [vmem:[%s4104_s10 + $0x408] sm:$0xf]  ;;  %v439_v2 = vld [vmem:[%s4104_s10 + $0x410] sm:$0xf]  ;;  %436 = vst [vmem:[%s4111_s11 + $0x200] sm:$0xf] %v435_v0 }
  0x70   : > { %438 = vst [vmem:[%s4111_s11 + $0x204] sm:$0xf] %v437_v1  ;;  %440 = vst [vmem:[%s4111_s11 + $0x208] sm:$0xf] %v439_v2  ;;  %v441_v3 = vld [vmem:[%s4104_s10 + $0x418] sm:$0xf] }
  0x71   : > { %v443_v4 = vld [vmem:[%s4104_s10 + $0x420] sm:$0xf]  ;;  %v445_v5 = vld [vmem:[%s4104_s10 + $0x428] sm:$0xf]  ;;  %442 = vst [vmem:[%s4111_s11 + $0x20c] sm:$0xf] %v441_v3 }
  0x72   : > { %444 = vst [vmem:[%s4111_s11 + $0x210] sm:$0xf] %v443_v4  ;;  %446 = vst [vmem:[%s4111_s11 + $0x214] sm:$0xf] %v445_v5  ;;  %v447_v6 = vld [vmem:[%s4104_s10 + $0x430] sm:$0xf] }
  0x73   : > { %v449_v7 = vld [vmem:[%s4104_s10 + $0x438] sm:$0xf]  ;;  %v451_v8 = vld [vmem:[%s4104_s10 + $0x440] sm:$0xf]  ;;  %448 = vst [vmem:[%s4111_s11 + $0x218] sm:$0xf] %v447_v6 }
  0x74   : > { %450 = vst [vmem:[%s4111_s11 + $0x21c] sm:$0xf] %v449_v7  ;;  %452 = vst [vmem:[%s4111_s11 + $0x220] sm:$0xf] %v451_v8  ;;  %v453_v9 = vld [vmem:[%s4104_s10 + $0x448] sm:$0xf] }
  0x75   : > { %v455_v10 = vld [vmem:[%s4104_s10 + $0x450] sm:$0xf]  ;;  %v457_v11 = vld [vmem:[%s4104_s10 + $0x458] sm:$0xf]  ;;  %454 = vst [vmem:[%s4111_s11 + $0x224] sm:$0xf] %v453_v9 }
  0x76   : > { %456 = vst [vmem:[%s4111_s11 + $0x228] sm:$0xf] %v455_v10  ;;  %458 = vst [vmem:[%s4111_s11 + $0x22c] sm:$0xf] %v457_v11  ;;  %v459_v12 = vld [vmem:[%s4104_s10 + $0x460] sm:$0xf] }
  0x77   : > { %v461_v13 = vld [vmem:[%s4104_s10 + $0x468] sm:$0xf]  ;;  %v463_v14 = vld [vmem:[%s4104_s10 + $0x470] sm:$0xf]  ;;  %460 = vst [vmem:[%s4111_s11 + $0x230] sm:$0xf] %v459_v12 }
  0x78   : > { %462 = vst [vmem:[%s4111_s11 + $0x234] sm:$0xf] %v461_v13  ;;  %464 = vst [vmem:[%s4111_s11 + $0x238] sm:$0xf] %v463_v14  ;;  %v465_v15 = vld [vmem:[%s4104_s10 + $0x478] sm:$0xf] }
  0x79   : > { %466 = vst [vmem:[%s4111_s11 + $0x23c] sm:$0xf] %v465_v15 }
  0x7a PF: > { %p3025_p11 = scmp.ge.s32.totalorder %s4002_s20, 1  ;;  %p783_p12 = scmp.lt.s32.totalorder %s4002_s20, 5 }
  0x7c   : > { %p784_p13 = pnand %p3025_p11, %p783_p12 }
  0x7d   : > { %s790_s21 = sand.u32 (!%p784_p13), 1, %s3978_s14   ;;  %p820_p0 = scmp.lt.s32.totalorder (!%p784_p13), %s3990_s17, 1 }
  0x7e   : > { %787 = sbr.rel (%p784_p13) target bundleno = 521 (0x209), region = 69  ;;  %p825_p1 = scmp.lt.s32.totalorder (!%p784_p13), %s3986_s16, 1 }
  0x7f   : > { %s3762_s24 = smul.u32 (!%p784_p13), 576, %s790_s21  ;;  %s817_s10 = sand.u32 (!%p784_p13), 1, %s3970_s12  }
  0x80   : > { %s3026_s12 = sshll.u32 (!%p784_p13), %s817_s10, 5 }
  0x81   : > { %s4399_s25 = scalar_lea.vmem (!%p784_p13), [#allocation2], %s3762_s24  ;;  %s4844_s11 = scalar_lea.vmem (!%p784_p13), [#allocation3], %s3026_s12 }
  0x83   : > { %v3836_v16 = vld [vmem:[%s4399_s25 + $0x38] sm:$0xff]   ;;  %v3838_v18 = vld [vmem:[%s4399_s25 + $0x30] sm:$0xff]   ;;  %v3840_v20 = vld [vmem:[%s4399_s25 + $0x28] sm:$0xff]   ;;  %s821_s14 = scalar_select %p820_p0, %s3990_s17, 1  ;;  %vm1225_vm0 = vcmask 1046528   ;;  %vm1444_vm1 = vcmask 1045504  }
  0x84   : > { %v3837_v17 = vld [vmem:[%s4399_s25 + $0x78] sm:$0xff]   ;;  %3457 = vmatprep.subr.bf16.mxu0 %v3836_v16  ;;  %v3839_v19 = vld [vmem:[%s4399_s25 + $0x70] sm:$0xff]   ;;  %v3841_v21 = vld [vmem:[%s4399_s25 + $0x68] sm:$0xff]   ;;  %s4802_s6 = scalar_select %p825_p1, %s3986_s16, 1 }
  0x85   : > { %3489 = vmatprep.subr.bf16.mxu1 %v3837_v17  ;;  %3458 = vmatpush3.bf16.msra.mxu0 %v3836_v16  ;;  %v3842_v22 = vld [vmem:[%s4399_s25 + $0x20] sm:$0xff]   ;;  %s3763_s26 = smul.u32 80, %s821_s14  ;;  %v3844_v24 = vld [vmem:[%s4399_s25 + $0x18] sm:$0xff]   ;;  %v3846_v26 = vld [vmem:[%s4399_s25 + $0x10] sm:$0xff]   ;;  %s3286_s21 = sshll.u32 (%p4091_p9), %s3990_s17, 4 }
  0x86   : > { %3490 = vmatpush3.bf16.msra.mxu1 %v3837_v17  ;;  %3459 = vmatprep.subr.bf16.mxu0 %v3838_v18  ;;  %v3843_v23 = vld [vmem:[%s4399_s25 + $0x60] sm:$0xff]   ;;  %v3845_v25 = vld [vmem:[%s4399_s25 + $0x58] sm:$0xff]   ;;  %v3847_v28 = vld [vmem:[%s4399_s25 + $0x50] sm:$0xff]   ;;  %s827_s9 = scalar_lea.vmem %s4899_s2, %s4802_s6  ;;  %s2857_s24 = sadd.s32 (%p4091_p9), %s3986_s16, %s3286_s21 }
  0x87   : > { %3491 = vmatprep.subr.bf16.mxu1 %v3839_v19  ;;  %s4416_s5 = scalar_lea.vmem %s4897_s0, %s3763_s26  ;;  %v3848_v29 = vld [vmem:[%s4399_s25 + $0x8] sm:$0xff]   ;;  %v3850_v31 = vld [vmem:[%s4399_s25] sm:$0xff]   ;;  %v3854_v33 = vld [vmem:[%s4399_s25 + $0xb8] sm:$0xff]  }
  0x88   : > { %v4420_v27 = vld [vmem:[%s4416_s5] sm:$0xff]   ;;  %v3849_v30 = vld [vmem:[%s4399_s25 + $0x48] sm:$0xff]   ;;  %v3855_v34 = vld [vmem:[%s4399_s25 + $0xf8] sm:$0xff]  }
  0x89   : > { %3460 = vmatpush3.bf16.msra.mxu0 %v3838_v18  ;;  %3473 = vmatprep.mubr.bf16.mxu0 %v4420_v27  ;;  %v3851_v32 = vld [vmem:[%s4399_s25 + $0x40] sm:$0xff]   ;;  %v4432_v35 = vld [vmem:[%s4416_s5 + $0x8] sm:$0xff]   ;;  %v3856_v36 = vld [vmem:[%s4399_s25 + $0xb0] sm:$0xff]  }
  0x8a   : > { %3492 = vmatpush3.bf16.msra.mxu1 %v3839_v19  ;;  %3461 = vmatprep.subr.bf16.mxu0 %v3840_v20  ;;  %v3857_v37 = vld [vmem:[%s4399_s25 + $0xf0] sm:$0xff]   ;;  %v3860_v39 = vld [vmem:[%s4399_s25 + $0xa8] sm:$0xff]   ;;  %v4446_v41 = vld [vmem:[%s4416_s5 + $0x18] sm:$0xff]  }
  0x8b   : > { %3493 = vmatprep.subr.bf16.mxu1 %v3841_v21  ;;  %3505 = vmatprep.mubr.bf16.mxu1 %v4420_v27  ;;  %v4437_v38 = vld [vmem:[%s4416_s5 + $0x10] sm:$0xff]   ;;  %v3861_v40 = vld [vmem:[%s4399_s25 + $0xe8] sm:$0xff]   ;;  %v3862_v42 = vld [vmem:[%s4399_s25 + $0xa0] sm:$0xff]  }
  0x8c   : > { %v3863_v43 = vld [vmem:[%s4399_s25 + $0xe0] sm:$0xff]   ;;  %v3866_v45 = vld [vmem:[%s4399_s25 + $0x98] sm:$0xff]   ;;  %v4460_v47 = vld [vmem:[%s4416_s5 + $0x28] sm:$0xff]  }
  0x8d   : > { %3462 = vmatpush3.bf16.msra.mxu0 %v3840_v20  ;;  %v4451_v44 = vld [vmem:[%s4416_s5 + $0x20] sm:$0xff]   ;;  %v3867_v46 = vld [vmem:[%s4399_s25 + $0xd8] sm:$0xff]   ;;  %v3868_v48 = vld [vmem:[%s4399_s25 + $0x90] sm:$0xff]  }
  0x8e   : > { %3494 = vmatpush3.bf16.msra.mxu1 %v3841_v21  ;;  %3463 = vmatprep.subr.bf16.mxu0 %v3842_v22  ;;  %v3869_v49 = vld [vmem:[%s4399_s25 + $0xd0] sm:$0xff]   ;;  %v3872_v51 = vld [vmem:[%s4399_s25 + $0x88] sm:$0xff]   ;;  %v4474_v53 = vld [vmem:[%s4416_s5 + $0x38] sm:$0xff]  }
  0x8f   : > { %3495 = vmatprep.subr.bf16.mxu1 %v3843_v23  ;;  %v4465_v50 = vld [vmem:[%s4416_s5 + $0x30] sm:$0xff]   ;;  %v3873_v52 = vld [vmem:[%s4399_s25 + $0xc8] sm:$0xff]   ;;  %v3874_v54 = vld [vmem:[%s4399_s25 + $0x80] sm:$0xff]  }
  0x90   : > { %v3875_v55 = vld [vmem:[%s4399_s25 + $0xc0] sm:$0xff]   ;;  %v4480_v56 = vld [vmem:[%s4416_s5 + $0x8] sm:$0xff]   ;;  %v3878_v57 = vld [vmem:[%s4399_s25 + $0x138] sm:$0xff]  }
  0x91   : > { %3464 = vmatpush3.bf16.msra.mxu0 %v3842_v22  ;;  %v3879_v58 = vld [vmem:[%s4399_s25 + $0x178] sm:$0xff]   ;;  %v4488_v59 = vld [vmem:[%s4416_s5 + $0x10] sm:$0xff]   ;;  %v3884_v63 = vld [vmem:[%s4399_s25 + $0x128] sm:$0xff]  }
  0x92   : > { %3496 = vmatpush3.bf16.msra.mxu1 %v3843_v23  ;;  %3465 = vmatprep.subr.bf16.mxu0 %v3844_v24  ;;  %v3880_v60 = vld [vmem:[%s4399_s25 + $0x130] sm:$0xff]   ;;  %v4494_v62 = vld [vmem:[%s4416_s5 + $0x18] sm:$0xff]   ;;  %v3885_v0 = vld [vmem:[%s4399_s25 + $0x168] sm:$0xff]  }
  0x93   : > { %3497 = vmatprep.subr.bf16.mxu1 %v3845_v25  ;;  %v3881_v61 = vld [vmem:[%s4399_s25 + $0x170] sm:$0xff]   ;;  %v4502_v1 = vld [vmem:[%s4416_s5 + $0x20] sm:$0xff]   ;;  %v4508_v4 = vld [vmem:[%s4416_s5 + $0x28] sm:$0xff]  }
  0x94   : > { %v3886_v2 = vld [vmem:[%s4399_s25 + $0x120] sm:$0xff]   ;;  %v3890_v5 = vld [vmem:[%s4399_s25 + $0x118] sm:$0xff]   ;;  %v4516_v7 = vld [vmem:[%s4416_s5 + $0x30] sm:$0xff]  }
  0x95   : > { %3466 = vmatpush3.bf16.msra.mxu0 %v3844_v24  ;;  %v3887_v3 = vld [vmem:[%s4399_s25 + $0x160] sm:$0xff]   ;;  %v3891_v6 = vld [vmem:[%s4399_s25 + $0x158] sm:$0xff]   ;;  %v3892_v8 = vld [vmem:[%s4399_s25 + $0x110] sm:$0xff]  }
  0x96   : > { %3498 = vmatpush3.bf16.msra.mxu1 %v3845_v25  ;;  %3467 = vmatprep.subr.bf16.mxu0 %v3846_v26  ;;  %v3893_v9 = vld [vmem:[%s4399_s25 + $0x150] sm:$0xff]   ;;  %v4522_v10 = vld [vmem:[%s4416_s5 + $0x38] sm:$0xff]   ;;  %v3896_v11 = vld [vmem:[%s4399_s25 + $0x108] sm:$0xff]  }
  0x97   : > { %3499 = vmatprep.subr.bf16.mxu1 %v3847_v28  ;;  %v3897_v12 = vld [vmem:[%s4399_s25 + $0x148] sm:$0xff]   ;;  %v4530_v13 = vld [vmem:[%s4416_s5 + $0x40] sm:$0xff]   ;;  %v3900_v16 = vld [vmem:[%s4399_s25 + $0x1b8] sm:$0xff]  }
  0x98   : > { %v3898_v14 = vld [vmem:[%s4399_s25 + $0x100] sm:$0xff]   ;;  %v3901_v17 = vld [vmem:[%s4399_s25 + $0x1f8] sm:$0xff]   ;;  %v3902_v18 = vld [vmem:[%s4399_s25 + $0x1b0] sm:$0xff]  }
  0x99   : > { %3468 = vmatpush3.bf16.msra.mxu0 %v3846_v26  ;;  %v3899_v15 = vld [vmem:[%s4399_s25 + $0x140] sm:$0xff]   ;;  %v3903_v19 = vld [vmem:[%s4399_s25 + $0x1f0] sm:$0xff]   ;;  %v3904_v20 = vld [vmem:[%s4399_s25 + $0x1a8] sm:$0xff]  }
  0x9a   : > { %3500 = vmatpush3.bf16.msra.mxu1 %v3847_v28  ;;  %3469 = vmatprep.subr.bf16.mxu0 %v3848_v29  ;;  %v3905_v21 = vld [vmem:[%s4399_s25 + $0x1e8] sm:$0xff]   ;;  %v3906_v22 = vld [vmem:[%s4399_s25 + $0x1a0] sm:$0xff]   ;;  %v3908_v24 = vld [vmem:[%s4399_s25 + $0x198] sm:$0xff]  }
  0x9b   : > { %3501 = vmatprep.subr.bf16.mxu1 %v3849_v30  ;;  %v3907_v23 = vld [vmem:[%s4399_s25 + $0x1e0] sm:$0xff]   ;;  %v3909_v25 = vld [vmem:[%s4399_s25 + $0x1d8] sm:$0xff]   ;;  %v3910_v26 = vld [vmem:[%s4399_s25 + $0x190] sm:$0xff]  }
  0x9c   : > { %v3912_v28 = vld [vmem:[%s4399_s25 + $0x188] sm:$0xff]  }
  0x9d   : > { %3470 = vmatpush3.bf16.msra.mxu0 %v3848_v29  ;;  %v3913_v29 = vld [vmem:[%s4399_s25 + $0x1c8] sm:$0xff]  }
  0x9e   : > { %3502 = vmatpush3.bf16.msra.mxu1 %v3849_v30  ;;  %3471 = vmatprep.subr.bf16.mxu0 %v3850_v31  ;;  %v3914_v30 = vld [vmem:[%s4399_s25 + $0x180] sm:$0xff]  }
  0x9f   : > { %3503 = vmatprep.subr.bf16.mxu1 %v3851_v32 }
  0xa1   : > { %3472 = vmatpush3.bf16.msra.mxu0 %v3850_v31  ;;  %v3915_v31 = vld [vmem:[%s4399_s25 + $0x1c0] sm:$0xff]  }
  0xa2   : > { %3504 = vmatpush3.bf16.msra.mxu1 %v3851_v32  ;;  %3521 = vmatprep.subr.bf16.mxu0 %v3854_v33  ;;  %v4567_v32 = vld [vmem:[%s4416_s5 + $0x10] sm:$0xff]  }
  0xa3   : > { %3553 = vmatprep.subr.bf16.mxu1 %v3855_v34 }
  0xa4   : > { %3474 = vmatmul.mubr.bf16.vlgmr.msra.gmra.mxu0 %v4432_v35 }
  0xa5   : > { %3506 = vmatmul.mubr.bf16.vlgmr.msra.gmra.mxu1 %v4432_v35  ;;  %3522 = vmatpush3.bf16.msra.mxu0 %v3854_v33  ;;  %v3918_v33 = vld [vmem:[%s4399_s25 + $0x238] sm:$0xff]  }
  0xa6   : > { %3554 = vmatpush3.bf16.msra.mxu1 %v3855_v34  ;;  %3523 = vmatprep.subr.bf16.mxu0 %v3856_v36  ;;  %v4575_v34 = vld [vmem:[%s4416_s5 + $0x18] sm:$0xff]  }
  0xa7   : > { %3555 = vmatprep.subr.bf16.mxu1 %v3857_v37  ;;  %3477 = vmatprep.mubr.bf16.mxu0 %v4437_v38 }
  0xa8   : > { %3509 = vmatprep.mubr.bf16.mxu1 %v4437_v38 }
  0xa9   : > { %3524 = vmatpush3.bf16.msra.mxu0 %v3856_v36  ;;  %v3920_v36 = vld [vmem:[%s4416_s5 + $0x20] sm:$0xff]  }
  0xaa   : > { %3556 = vmatpush3.bf16.msra.mxu1 %v3857_v37  ;;  %3525 = vmatprep.subr.bf16.mxu0 %v3860_v39  ;;  %v3922_v37 = vld [vmem:[%s4399_s25 + $0x228] sm:$0xff]  }
  0xab   : > { %3557 = vmatprep.subr.bf16.mxu1 %v3861_v40 }
  0xac   : > { %3478 = vmatmul.mubr.bf16.gmra.mxu0 %v4446_v41 }
  0xad   : > { %3510 = vmatmul.mubr.bf16.gmra.mxu1 %v4446_v41  ;;  %3526 = vmatpush3.bf16.msra.mxu0 %v3860_v39  ;;  %v3923_v39 = vld [vmem:[%s4399_s25 + $0x220] sm:$0xff]  }
  0xae   : > { %3558 = vmatpush3.bf16.msra.mxu1 %v3861_v40  ;;  %3527 = vmatprep.subr.bf16.mxu0 %v3862_v42  ;;  %v3924_v40 = vld [vmem:[%s4416_s5 + $0x30] sm:$0xff]  }
  0xaf   : > { %3559 = vmatprep.subr.bf16.mxu1 %v3863_v43  ;;  %3481 = vmatprep.mubr.bf16.mxu0 %v4451_v44 }
  0xb0   : > { %3513 = vmatprep.mubr.bf16.mxu1 %v4451_v44 }
  0xb1   : > { %3528 = vmatpush3.bf16.msra.mxu0 %v3862_v42  ;;  %v3925_v42 = vld [vmem:[%s4416_s5 + $0x38] sm:$0xff]  }
  0xb2   : > { %3560 = vmatpush3.bf16.msra.mxu1 %v3863_v43  ;;  %3529 = vmatprep.subr.bf16.mxu0 %v3866_v45  ;;  %v3927_v43 = vld [vmem:[%s4399_s25 + $0x210] sm:$0xff]  }
  0xb3   : > { %3561 = vmatprep.subr.bf16.mxu1 %v3867_v46 }
  0xb4   : > { %3482 = vmatmul.mubr.bf16.gmra.mxu0 %v4460_v47 }
  0xb5   : > { %3514 = vmatmul.mubr.bf16.gmra.mxu1 %v4460_v47  ;;  %3530 = vmatpush3.bf16.msra.mxu0 %v3866_v45  ;;  %v3930_v45 = vld [vmem:[%s4399_s25 + $0x208] sm:$0xff]  }
  0xb6   : > { %3562 = vmatpush3.bf16.msra.mxu1 %v3867_v46  ;;  %3531 = vmatprep.subr.bf16.mxu0 %v3868_v48  ;;  %v3929_v46 = vld [vmem:[%s4416_s5 + $0x48] sm:$0xff]  }
  0xb7   : > { %3563 = vmatprep.subr.bf16.mxu1 %v3869_v49  ;;  %3485 = vmatprep.mubr.bf16.mxu0 %v4465_v50 }
  0xb8   : > { %3517 = vmatprep.mubr.bf16.mxu1 %v4465_v50 }
  0xb9   : > { %3532 = vmatpush3.bf16.msra.mxu0 %v3868_v48 }
  0xba   : > { %3564 = vmatpush3.bf16.msra.mxu1 %v3869_v49  ;;  %3533 = vmatprep.subr.bf16.mxu0 %v3872_v51 }
  0xbb   : > { %3565 = vmatprep.subr.bf16.mxu1 %v3873_v52 }
  0xbc   : > { %3486 = vmatmul.mubr.bf16.gmra.mxu0 %v4474_v53 }
  0xbd   : > { %3518 = vmatmul.mubr.bf16.gmra.mxu1 %v4474_v53  ;;  %3534 = vmatpush3.bf16.msra.mxu0 %v3872_v51 }
  0xbe   : > { %3566 = vmatpush3.bf16.msra.mxu1 %v3873_v52  ;;  %3535 = vmatprep.subr.bf16.mxu0 %v3874_v54 }
  0xbf   : > { %3567 = vmatprep.subr.bf16.mxu1 %v3875_v55  ;;  %3537 = vmatprep.mubr.bf16.mxu0 %v4420_v27  ;;  %v3911_v27 = vld [vmem:[%s4399_s25 + $0x1d0] sm:$0xff]  }
  0xc0   : > { %3569 = vmatprep.mubr.bf16.mxu1 %v4480_v56 }
  0xc1   : > { %3536 = vmatpush3.bf16.msra.mxu0 %v3874_v54 }
  0xc2   : > { %3568 = vmatpush3.bf16.msra.mxu1 %v3875_v55  ;;  %3585 = vmatprep.subr.bf16.mxu0 %v3878_v57 }
  0xc3   : > { %3617 = vmatprep.subr.bf16.mxu1 %v3879_v58 }
  0xc4   : > { %3538 = vmatmul.mubr.bf16.vlgmr.msra.gmra.mxu0 %v4432_v35  ;;  %v3919_v35 = vld [vmem:[%s4399_s25 + $0x230] sm:$0xff]  }
  0xc5   : > { %3570 = vmatmul.mubr.bf16.vlgmr.msra.gmra.mxu1 %v4488_v59  ;;  %3586 = vmatpush3.bf16.msra.mxu0 %v3878_v57 }
  0xc6   : > { %3618 = vmatpush3.bf16.msra.mxu1 %v3879_v58  ;;  %3587 = vmatprep.subr.bf16.mxu0 %v3880_v60 }
  0xc7   : > { %3619 = vmatprep.subr.bf16.mxu1 %v3881_v61  ;;  %3541 = vmatprep.mubr.bf16.mxu0 %v4437_v38  ;;  %v3921_v38 = vld [vmem:[%s4416_s5 + $0x28] sm:$0xff]  }
  0xc8   : > { %3573 = vmatprep.mubr.bf16.mxu1 %v4494_v62 }
  0xc9   : > { %3588 = vmatpush3.bf16.msra.mxu0 %v3880_v60 }
  0xca   : > { %3620 = vmatpush3.bf16.msra.mxu1 %v3881_v61  ;;  %3589 = vmatprep.subr.bf16.mxu0 %v3884_v63 }
  0xcb   : > { %3621 = vmatprep.subr.bf16.mxu1 %v3885_v0 }
  0xcc   : > { %3542 = vmatmul.mubr.bf16.gmra.mxu0 %v4446_v41  ;;  %v3926_v41 = vld [vmem:[%s4399_s25 + $0x218] sm:$0xff]  }
  0xcd   : > { %3574 = vmatmul.mubr.bf16.gmra.mxu1 %v4502_v1  ;;  %3590 = vmatpush3.bf16.msra.mxu0 %v3884_v63 }
  0xce   : > { %3622 = vmatpush3.bf16.msra.mxu1 %v3885_v0  ;;  %3591 = vmatprep.subr.bf16.mxu0 %v3886_v2 }
  0xcf   : > { %3623 = vmatprep.subr.bf16.mxu1 %v3887_v3  ;;  %3545 = vmatprep.mubr.bf16.mxu0 %v4451_v44  ;;  %v3928_v44 = vld [vmem:[%s4416_s5 + $0x40] sm:$0xff]  }
  0xd0   : > { %3577 = vmatprep.mubr.bf16.mxu1 %v4508_v4 }
  0xd1   : > { %3592 = vmatpush3.bf16.msra.mxu0 %v3886_v2 }
  0xd2   : > { %3624 = vmatpush3.bf16.msra.mxu1 %v3887_v3  ;;  %3593 = vmatprep.subr.bf16.mxu0 %v3890_v5 }
  0xd3   : > { %3625 = vmatprep.subr.bf16.mxu1 %v3891_v6 }
  0xd4   : > { %3546 = vmatmul.mubr.bf16.gmra.mxu0 %v4460_v47  ;;  %v3931_v47 = vld [vmem:[%s4399_s25 + $0x200] sm:$0xff]   ;;  %s3287_s25 = sshll.u32 (%p4091_p9), %s2857_s24, 2 }
  0xd5   : > { %3578 = vmatmul.mubr.bf16.gmra.mxu1 %v4516_v7  ;;  %3594 = vmatpush3.bf16.msra.mxu0 %v3890_v5  ;;  %s2859_s26 = scalar_lea.vmem (%p4091_p9), %s4900_s3, %s3287_s25 }
  0xd6   : > { %3626 = vmatpush3.bf16.msra.mxu1 %v3891_v6  ;;  %3595 = vmatprep.subr.bf16.mxu0 %v3892_v8 }
  0xd7   : > { %3627 = vmatprep.subr.bf16.mxu1 %v3893_v9  ;;  %3549 = vmatprep.mubr.bf16.mxu0 %v4465_v50 }
  0xd8   : > { %3581 = vmatprep.mubr.bf16.mxu1 %v4522_v10 }
  0xd9   : > { %3596 = vmatpush3.bf16.msra.mxu0 %v3892_v8 }
  0xda   : > { %3628 = vmatpush3.bf16.msra.mxu1 %v3893_v9  ;;  %3597 = vmatprep.subr.bf16.mxu0 %v3896_v11 }
  0xdb   : > { %3629 = vmatprep.subr.bf16.mxu1 %v3897_v12 }
  0xdc   : > { %3550 = vmatmul.mubr.bf16.gmra.mxu0 %v4474_v53 }
  0xdd   : > { %3582 = vmatmul.mubr.bf16.gmra.mxu1 %v4530_v13  ;;  %3598 = vmatpush3.bf16.msra.mxu0 %v3896_v11 }
  0xde   : > { %3630 = vmatpush3.bf16.msra.mxu1 %v3897_v12  ;;  %3599 = vmatprep.subr.bf16.mxu0 %v3898_v14 }
  0xdf   : > { %3631 = vmatprep.subr.bf16.mxu1 %v3899_v15  ;;  %3601 = vmatprep.mubr.bf16.mxu0 %v4480_v56 }
  0xe0   : > { %3633 = vmatprep.mubr.bf16.mxu1 %v4480_v56 }
  0xe1   : > { %3600 = vmatpush3.bf16.msra.mxu0 %v3898_v14 }
  0xe2   : > { %3632 = vmatpush3.bf16.msra.mxu1 %v3899_v15  ;;  %3649 = vmatprep.subr.bf16.mxu0 %v3900_v16 }
  0xe3   : > { %3681 = vmatprep.subr.bf16.mxu1 %v3901_v17 }
  0xe4   : > { %3602 = vmatmul.mubr.bf16.vlgmr.msra.gmra.mxu0 %v4488_v59 }
  0xe5   : > { %3634 = vmatmul.mubr.bf16.vlgmr.msra.gmra.mxu1 %v4488_v59  ;;  %3650 = vmatpush3.bf16.msra.mxu0 %v3900_v16 }
  0xe6   : > { %3682 = vmatpush3.bf16.msra.mxu1 %v3901_v17  ;;  %3651 = vmatprep.subr.bf16.mxu0 %v3902_v18 }
  0xe7   : > { %3683 = vmatprep.subr.bf16.mxu1 %v3903_v19  ;;  %3605 = vmatprep.mubr.bf16.mxu0 %v4494_v62 }
  0xe8   : > { %3637 = vmatprep.mubr.bf16.mxu1 %v4494_v62 }
  0xe9   : > { %3652 = vmatpush3.bf16.msra.mxu0 %v3902_v18 }
  0xea   : > { %3684 = vmatpush3.bf16.msra.mxu1 %v3903_v19  ;;  %3653 = vmatprep.subr.bf16.mxu0 %v3904_v20 }
  0xeb   : > { %3685 = vmatprep.subr.bf16.mxu1 %v3905_v21 }
  0xec   : > { %3606 = vmatmul.mubr.bf16.gmra.mxu0 %v4502_v1 }
  0xed   : > { %3638 = vmatmul.mubr.bf16.gmra.mxu1 %v4502_v1  ;;  %3654 = vmatpush3.bf16.msra.mxu0 %v3904_v20 }
  0xee   : > { %3686 = vmatpush3.bf16.msra.mxu1 %v3905_v21  ;;  %3655 = vmatprep.subr.bf16.mxu0 %v3906_v22 }
  0xef   : > { %3687 = vmatprep.subr.bf16.mxu1 %v3907_v23  ;;  %3609 = vmatprep.mubr.bf16.mxu0 %v4508_v4 }
  0xf0   : > { %3641 = vmatprep.mubr.bf16.mxu1 %v4508_v4 }
  0xf1   : > { %3656 = vmatpush3.bf16.msra.mxu0 %v3906_v22 }
  0xf2   : > { %3688 = vmatpush3.bf16.msra.mxu1 %v3907_v23  ;;  %3657 = vmatprep.subr.bf16.mxu0 %v3908_v24 }
  0xf3   : > { %3689 = vmatprep.subr.bf16.mxu1 %v3909_v25 }
  0xf4   : > { %3610 = vmatmul.mubr.bf16.gmra.mxu0 %v4516_v7 }
  0xf5   : > { %3642 = vmatmul.mubr.bf16.gmra.mxu1 %v4516_v7  ;;  %3658 = vmatpush3.bf16.msra.mxu0 %v3908_v24 }
  0xf6   : > { %3690 = vmatpush3.bf16.msra.mxu1 %v3909_v25  ;;  %3659 = vmatprep.subr.bf16.mxu0 %v3910_v26 }
  0xf7   : > { %3691 = vmatprep.subr.bf16.mxu1 %v3911_v27  ;;  %3613 = vmatprep.mubr.bf16.mxu0 %v4522_v10 }
  0xf8   : > { %3645 = vmatprep.mubr.bf16.mxu1 %v4522_v10 }
  0xf9   : > { %3660 = vmatpush3.bf16.msra.mxu0 %v3910_v26 }
  0xfa   : > { %3692 = vmatpush3.bf16.msra.mxu1 %v3911_v27  ;;  %3661 = vmatprep.subr.bf16.mxu0 %v3912_v28 }
  0xfb   : > { %3693 = vmatprep.subr.bf16.mxu1 %v3913_v29 }
  0xfc   : > { %3614 = vmatmul.mubr.bf16.gmra.mxu0 %v4530_v13 }
  0xfd   : > { %3646 = vmatmul.mubr.bf16.gmra.mxu1 %v4530_v13  ;;  %3662 = vmatpush3.bf16.msra.mxu0 %v3912_v28 }
  0xfe   : > { %3694 = vmatpush3.bf16.msra.mxu1 %v3913_v29  ;;  %3663 = vmatprep.subr.bf16.mxu0 %v3914_v30 }
  0xff   : > { %3695 = vmatprep.subr.bf16.mxu1 %v3915_v31  ;;  %3665 = vmatprep.mubr.bf16.mxu0 %v4567_v32 }
 0x100   : > { %3697 = vmatprep.mubr.bf16.mxu1 %v4567_v32 }
 0x101   : > { %3664 = vmatpush3.bf16.msra.mxu0 %v3914_v30 }
 0x102   : > { %3696 = vmatpush3.bf16.msra.mxu1 %v3915_v31  ;;  %3713 = vmatprep.subr.bf16.mxu0 %v3918_v33 }
 0x103   : > { %3745 = vmatprep.subr.bf16.mxu1 %v3918_v33 }
 0x104   : > { %3666 = vmatmul.mubr.bf16.vlgmr.msra.gmra.mxu0 %v4575_v34 }
 0x105   : > { %3698 = vmatmul.mubr.bf16.vlgmr.msra.gmra.mxu1 %v4575_v34  ;;  %3714 = vmatpush3.bf16.msra.mxu0 %v3918_v33 }
 0x106   : > { %3753 = vmatpush3.bf16.msra.mxu1 %v3918_v33  ;;  %3715 = vmatprep.subr.bf16.mxu0 %v3919_v35 }
 0x107   : > { %3746 = vmatprep.subr.bf16.mxu1 %v3919_v35  ;;  %3669 = vmatprep.mubr.bf16.mxu0 %v3920_v36 }
 0x108   : > { %3701 = vmatprep.mubr.bf16.mxu1 %v3920_v36 }
 0x109   : > { %3716 = vmatpush3.bf16.msra.mxu0 %v3919_v35 }
 0x10a   : > { %3754 = vmatpush3.bf16.msra.mxu1 %v3919_v35  ;;  %3717 = vmatprep.subr.bf16.mxu0 %v3922_v37 }
 0x10b   : > { %3747 = vmatprep.subr.bf16.mxu1 %v3922_v37 }
 0x10c   : > { %3670 = vmatmul.mubr.bf16.gmra.mxu0 %v3921_v38 }
 0x10d   : > { %3702 = vmatmul.mubr.bf16.gmra.mxu1 %v3921_v38  ;;  %3718 = vmatpush3.bf16.msra.mxu0 %v3922_v37 }
 0x10e   : > { %3755 = vmatpush3.bf16.msra.mxu1 %v3922_v37  ;;  %3719 = vmatprep.subr.bf16.mxu0 %v3923_v39 }
 0x10f   : > { %3748 = vmatprep.subr.bf16.mxu1 %v3923_v39  ;;  %3673 = vmatprep.mubr.bf16.mxu0 %v3924_v40 }
 0x110   : > { %3705 = vmatprep.mubr.bf16.mxu1 %v3924_v40 }
 0x111   : > { %3720 = vmatpush3.bf16.msra.mxu0 %v3923_v39 }
 0x112   : > { %3756 = vmatpush3.bf16.msra.mxu1 %v3923_v39  ;;  %3721 = vmatprep.subr.bf16.mxu0 %v3926_v41 }
 0x113   : > { %3749 = vmatprep.subr.bf16.mxu1 %v3926_v41 }
 0x114   : > { %3674 = vmatmul.mubr.bf16.gmra.mxu0 %v3925_v42 }
 0x115   : > { %3706 = vmatmul.mubr.bf16.gmra.mxu1 %v3925_v42  ;;  %3722 = vmatpush3.bf16.msra.mxu0 %v3926_v41 }
 0x116   : > { %3757 = vmatpush3.bf16.msra.mxu1 %v3926_v41  ;;  %3723 = vmatprep.subr.bf16.mxu0 %v3927_v43 }
 0x117   : > { %3750 = vmatprep.subr.bf16.mxu1 %v3927_v43  ;;  %3677 = vmatprep.mubr.bf16.mxu0 %v3928_v44 }
 0x118   : > { %3709 = vmatprep.mubr.bf16.mxu1 %v3928_v44 }
 0x119   : > { %3724 = vmatpush3.bf16.msra.mxu0 %v3927_v43 }
 0x11a   : > { %3758 = vmatpush3.bf16.msra.mxu1 %v3927_v43  ;;  %3725 = vmatprep.subr.bf16.mxu0 %v3930_v45 }
 0x11b   : > { %3751 = vmatprep.subr.bf16.mxu1 %v3930_v45 }
 0x11c   : > { %3678 = vmatmul.mubr.bf16.gmra.mxu0 %v3929_v46 }
 0x11d   : > { %3710 = vmatmul.mubr.bf16.gmra.mxu1 %v3929_v46  ;;  %3726 = vmatpush3.bf16.msra.mxu0 %v3930_v45 }
 0x11e   : > { %3759 = vmatpush3.bf16.msra.mxu1 %v3930_v45  ;;  %3727 = vmatprep.subr.bf16.mxu0 %v3931_v47 }
 0x11f   : > { %3752 = vmatprep.subr.bf16.mxu1 %v3931_v47  ;;  %3729 = vmatprep.mubr.bf16.mxu0 %v4567_v32 }
 0x120   : > { %3737 = vmatprep.mubr.bf16.mxu1 %v3924_v40 }
 0x121   : > { %3728 = vmatpush3.bf16.msra.mxu0 %v3931_v47 }
 0x122   : > { %3760 = vmatpush3.bf16.msra.mxu1 %v3931_v47 }
 0x124   : > { %3730 = vmatmul.mubr.bf16.vlgmr.msra.gmra.mxu0 %v4575_v34 }
 0x125   : > { %3738 = vmatmul.mubr.bf16.vlgmr.msra.gmra.mxu1 %v3925_v42  ;;  %3733 = vmatprep.mubr.bf16.mxu0 %v3920_v36 }
 0x126   : > { %3741 = vmatprep.mubr.bf16.mxu1 %v3928_v44 }
 0x12c   : > { %3734 = vmatmul.mubr.bf16.gmra.mxu0 %v3921_v38 }
 0x12d   : > { %3742 = vmatmul.mubr.bf16.gmra.mxu1 %v3929_v46 }
 0x164   : > { %v3475_v48 = vpop.f32.mrf.mxu0 }
 0x165   : > { %v3507_v49 = vpop.f32.mrf.mxu1 }
 0x166   : > { %v992_v50 = vpop.f32.mrf.mxu0  ;;  %v1229_v54 = vrot.slane %v3507_v49, 1 }
 0x167   : > { %v1146_v51 = vpop.f32.mrf.mxu1 }
 0x168   : > { %v3476_v52 = vpop.f32.mrf.mxu0  ;;  %v1226_v58 = vrot.slane %v1146_v51, 1 }
 0x169   : > { %v3508_v53 = vpop.f32.mrf.mxu1 }
 0x16a   : > { %v1230_v55 = vrot.slane %v3508_v53, 1  ;;  %v995_v56 = vpop.f32.mrf.mxu0 }
 0x16b   : > { %v1149_v57 = vpop.f32.mrf.mxu1 }
 0x16c   : > { %v1231_v59 = vsel %vm1225_vm0, %v1229_v54, %v1230_v55  ;;  %v1227_v60 = vrot.slane %v1149_v57, 1  ;;  %v3479_v61 = vpop.f32.mrf.mxu0 }
 0x16d   : > { %v4595_v62 = vadd.f32 %v3475_v48, %v1231_v59  ;;  %v3511_v63 = vpop.f32.mrf.mxu1 }
 0x16e   : > { %v1228_v0 = vsel %vm1225_vm0, %v1226_v58, %v1227_v60  ;;  %v1006_v1 = vpop.f32.mrf.mxu0  ;;  %v1235_v6 = vrot.slane %v3511_v63, 1 }
 0x16f   : > { %v4598_v2 = vadd.f32 %v1228_v0, %v992_v50  ;;  %v1162_v3 = vpop.f32.mrf.mxu1 }
 0x170   : > { %v3480_v4 = vpop.f32.mrf.mxu0  ;;  %v1232_v10 = vrot.slane %v1162_v3, 1 }
 0x171   : > { %v3512_v5 = vpop.f32.mrf.mxu1 }
 0x172   : > { %v1236_v7 = vrot.slane %v3512_v5, 1  ;;  %v1009_v8 = vpop.f32.mrf.mxu0 }
 0x173   : > { %v1165_v9 = vpop.f32.mrf.mxu1 }
 0x174   : > { %v1237_v11 = vsel %vm1225_vm0, %v1235_v6, %v1236_v7  ;;  %v1233_v12 = vrot.slane %v1165_v9, 1  ;;  %v3483_v13 = vpop.f32.mrf.mxu0 }
 0x175   : > { %v4601_v14 = vadd.f32 %v3479_v61, %v1237_v11  ;;  %v3515_v15 = vpop.f32.mrf.mxu1 }
 0x176   : > { %v1234_v16 = vsel %vm1225_vm0, %v1232_v10, %v1233_v12  ;;  %v1020_v17 = vpop.f32.mrf.mxu0  ;;  %v1241_v22 = vrot.slane %v3515_v15, 1 }
 0x177   : > { %v4604_v18 = vadd.f32 %v1234_v16, %v1006_v1  ;;  %v1178_v19 = vpop.f32.mrf.mxu1 }
 0x178   : > { %v3484_v20 = vpop.f32.mrf.mxu0  ;;  %v1238_v26 = vrot.slane %v1178_v19, 1 }
 0x179   : > { %v3516_v21 = vpop.f32.mrf.mxu1 }
 0x17a   : > { %v1242_v23 = vrot.slane %v3516_v21, 1  ;;  %v1023_v24 = vpop.f32.mrf.mxu0 }
 0x17b   : > { %v1181_v25 = vpop.f32.mrf.mxu1 }
 0x17c   : > { %v1243_v27 = vsel %vm1225_vm0, %v1241_v22, %v1242_v23  ;;  %v1239_v28 = vrot.slane %v1181_v25, 1  ;;  %v3487_v29 = vpop.f32.mrf.mxu0 }
 0x17d   : > { %v4607_v30 = vadd.f32 %v3483_v13, %v1243_v27  ;;  %v3519_v31 = vpop.f32.mrf.mxu1 }
 0x17e   : > { %v1240_v32 = vsel %vm1225_vm0, %v1238_v26, %v1239_v28  ;;  %v1034_v33 = vpop.f32.mrf.mxu0  ;;  %v1247_v38 = vrot.slane %v3519_v31, 1 }
 0x17f   : > { %v4610_v34 = vadd.f32 %v1240_v32, %v1020_v17  ;;  %v1194_v35 = vpop.f32.mrf.mxu1 }
 0x180   : > { %v3488_v36 = vpop.f32.mrf.mxu0  ;;  %v1244_v42 = vrot.slane %v1194_v35, 1 }
 0x181   : > { %v3520_v37 = vpop.f32.mrf.mxu1 }
 0x182   : > { %v1248_v39 = vrot.slane %v3520_v37, 1  ;;  %v1037_v40 = vpop.f32.mrf.mxu0 }
 0x183   : > { %v1197_v41 = vpop.f32.mrf.mxu1 }
 0x184   : > { %v1249_v43 = vsel %vm1225_vm0, %v1247_v38, %v1248_v39  ;;  %v1245_v44 = vrot.slane %v1197_v41, 1  ;;  %v3539_v45 = vpop.f32.mrf.mxu0 }
 0x185   : > { %v4613_v46 = vadd.f32 %v3487_v29, %v1249_v43  ;;  %v3571_v47 = vpop.f32.mrf.mxu1  ;;  %v1448_v53 = vrot.slane %v3539_v45, 2 }
 0x186   : > { %v1246_v48 = vsel %vm1225_vm0, %v1244_v42, %v1245_v44  ;;  %v1365_v49 = vpop.f32.mrf.mxu0 }
 0x187   : > { %v4616_v50 = vadd.f32 %v1246_v48, %v1034_v33  ;;  %v1649_v51 = vpop.f32.mrf.mxu1  ;;  %v1445_v57 = vrot.slane %v1365_v49, 2 }
 0x188   : > { %v3540_v52 = vpop.f32.mrf.mxu0 }
 0x189   : > { %v1449_v54 = vrot.slane %v3540_v52, 2  ;;  %v3572_v55 = vpop.f32.mrf.mxu1 }
 0x18a   : > { %v1368_v56 = vpop.f32.mrf.mxu0 }
 0x18b   : > { %v1450_v58 = vsel %vm1444_vm1, %v1448_v53, %v1449_v54  ;;  %v1446_v59 = vrot.slane %v1368_v56, 2  ;;  %v1652_v60 = vpop.f32.mrf.mxu1 }
 0x18c   : > { %v1478_v61 = vadd.f32 %v1450_v58, %v4595_v62  ;;  %v3543_v63 = vpop.f32.mrf.mxu0 }
 0x18d   : > { %v1447_v0 = vsel %vm1444_vm1, %v1445_v57, %v1446_v59  ;;  %v3575_v1 = vpop.f32.mrf.mxu1  ;;  %v1454_v9 = vrot.slane %v3543_v63, 2 }
 0x18e   : > { %v1477_v3 = vadd.f32 %v1447_v0, %v4598_v2  ;;  %v1381_v4 = vpop.f32.mrf.mxu0  ;;  %v4622_v5 = vadd.f32 %v3571_v47, %v1478_v61 }
 0x18f   : > { %v1663_v6 = vpop.f32.mrf.mxu1  ;;  %v1451_v13 = vrot.slane %v1381_v4, 2 }
 0x190   : > { %v3544_v7 = vpop.f32.mrf.mxu0  ;;  %v4624_v8 = vadd.f32 %v1649_v51, %v1477_v3 }
 0x191   : > { %v1455_v10 = vrot.slane %v3544_v7, 2  ;;  %v3576_v11 = vpop.f32.mrf.mxu1 }
 0x192   : > { %v1384_v12 = vpop.f32.mrf.mxu0 }
 0x193   : > { %v1456_v62 = vsel %vm1444_vm1, %v1454_v9, %v1455_v10  ;;  %v1452_v15 = vrot.slane %v1384_v12, 2  ;;  %v1666_v16 = vpop.f32.mrf.mxu1 }
 0x194   : > { %v1480_v17 = vadd.f32 %v1456_v62, %v4601_v14  ;;  %v3547_v19 = vpop.f32.mrf.mxu0 }
 0x195   : > { %v1453_v2 = vsel %vm1444_vm1, %v1451_v13, %v1452_v15  ;;  %v3579_v20 = vpop.f32.mrf.mxu1  ;;  %v1460_v27 = vrot.slane %v3547_v19, 2 }
 0x196   : > { %v1479_v21 = vadd.f32 %v1453_v2, %v4604_v18  ;;  %v1397_v22 = vpop.f32.mrf.mxu0  ;;  %v4630_v23 = vadd.f32 %v3575_v1, %v1480_v17 }
 0x197   : > { %v1677_v24 = vpop.f32.mrf.mxu1  ;;  %v1457_v32 = vrot.slane %v1397_v22, 2 }
 0x198   : > { %v3548_v25 = vpop.f32.mrf.mxu0  ;;  %v4632_v26 = vadd.f32 %v1663_v6, %v1479_v21 }
 0x199   : > { %v1461_v28 = vrot.slane %v3548_v25, 2  ;;  %v3580_v29 = vpop.f32.mrf.mxu1 }
 0x19a   : > { %v1400_v31 = vpop.f32.mrf.mxu0 }
 0x19b   : > { %v1462_v14 = vsel %vm1444_vm1, %v1460_v27, %v1461_v28  ;;  %v1458_v33 = vrot.slane %v1400_v31, 2  ;;  %v1680_v35 = vpop.f32.mrf.mxu1 }
 0x19c   : > { %v1482_v36 = vadd.f32 %v1462_v14, %v4607_v30  ;;  %v3551_v37 = vpop.f32.mrf.mxu0 }
 0x19d   : > { %v1459_v18 = vsel %vm1444_vm1, %v1457_v32, %v1458_v33  ;;  %v3583_v38 = vpop.f32.mrf.mxu1  ;;  %v1466_v45 = vrot.slane %v3551_v37, 2 }
 0x19e   : > { %v1481_v39 = vadd.f32 %v1459_v18, %v4610_v34  ;;  %v1413_v40 = vpop.f32.mrf.mxu0  ;;  %v4638_v41 = vadd.f32 %v3579_v20, %v1482_v36 }
 0x19f   : > { %v1691_v42 = vpop.f32.mrf.mxu1  ;;  %v1463_v51 = vrot.slane %v1413_v40, 2 }
 0x1a0   : > { %v3552_v43 = vpop.f32.mrf.mxu0  ;;  %v4640_v44 = vadd.f32 %v1677_v24, %v1481_v39 }
 0x1a1   : > { %v1467_v47 = vrot.slane %v3552_v43, 2  ;;  %v3584_v48 = vpop.f32.mrf.mxu1 }
 0x1a2   : > { %v1416_v49 = vpop.f32.mrf.mxu0 }
 0x1a3   : > { %v1468_v30 = vsel %vm1444_vm1, %v1466_v45, %v1467_v47  ;;  %v1464_v52 = vrot.slane %v1416_v49, 2  ;;  %v1694_v53 = vpop.f32.mrf.mxu1 }
 0x1a4   : > { %v1484_v54 = vadd.f32 %v1468_v30, %v4613_v46  ;;  %v3603_v55 = vpop.f32.mrf.mxu0 }
 0x1a5   : > { %v1465_v34 = vsel %vm1444_vm1, %v1463_v51, %v1464_v52  ;;  %v4645_v56 = vpop.f32.mrf.mxu1  ;;  %v1893_v43 = vrot.slane %v3603_v55, 1 }
 0x1a6   : > { %v1483_v57 = vadd.f32 %v1465_v34, %v4616_v50  ;;  %v1811_v58 = vpop.f32.mrf.mxu0  ;;  %v4648_v59 = vadd.f32 %v3583_v38, %v1484_v54  ;;  %v2111_v34 = vrot.slane %v4645_v56, 2 }
 0x1a7   : > { %v4650_v60 = vpop.f32.mrf.mxu1  ;;  %v1890_v30 = vrot.slane %v1811_v58, 1 }
 0x1a8   : > { %v3604_v61 = vpop.f32.mrf.mxu0  ;;  %v4652_v63 = vadd.f32 %v1691_v42, %v1483_v57 }
 0x1a9   : > { %v4654_v0 = vpop.f32.mrf.mxu1  ;;  %v1894_v39 = vrot.slane %v3604_v61, 1 }
 0x1aa   : > { %v1814_v1 = vpop.f32.mrf.mxu0  ;;  %v2112_v52 = vrot.slane %v4654_v0, 2 }
 0x1ab   : > { %v4656_v3 = vpop.f32.mrf.mxu1  ;;  %v1891_v47 = vrot.slane %v1814_v1, 1  ;;  %v1895_v49 = vsel %vm1225_vm0, %v1893_v43, %v1894_v39 }
 0x1ac   : > { %v3607_v46 = vpop.f32.mrf.mxu0  ;;  %v1923_v1 = vadd.f32 %v1895_v49, %v4622_v5  ;;  %v2109_v39 = vrot.slane %v4656_v3, 2  ;;  %v2113_v43 = vsel %vm1444_vm1, %v2111_v34, %v2112_v52 }
 0x1ad   : > { %v4658_v4 = vpop.f32.mrf.mxu1  ;;  %v1892_v55 = vsel %vm1225_vm0, %v1890_v30, %v1891_v47 }
 0x1ae   : > { %v4660_v6 = vpop.f32.mrf.mxu0  ;;  %v1922_v3 = vadd.f32 %v1892_v55, %v4624_v8  ;;  %v2141_v30 = vadd.f32 %v2113_v43, %v1923_v1 }
 0x1af   : > { %v4662_v7 = vpop.f32.mrf.mxu1  ;;  %v1896_v58 = vrot.slane %v4660_v6, 1 }
 0x1b0   : > { %v3608_v50 = vpop.f32.mrf.mxu0 }
 0x1b1   : > { %v4664_v9 = vpop.f32.mrf.mxu1  ;;  %v1900_v53 = vrot.slane %v3608_v50, 1  ;;  %v2108_v50 = vrot.slane %v4650_v60, 2 }
 0x1b2   : > { %v1830_v10 = vpop.f32.mrf.mxu0  ;;  %v2118_v5 = vrot.slane %v4664_v9, 2 }
 0x1b3   : > { %v4666_v11 = vpop.f32.mrf.mxu1  ;;  %v1897_v57 = vrot.slane %v1830_v10, 1  ;;  %v2110_v9 = vsel %vm1444_vm1, %v2108_v50, %v2109_v39 }
 0x1b4   : > { %v3611_v12 = vpop.f32.mrf.mxu0 }
 0x1b5   : > { %v4668_v13 = vpop.f32.mrf.mxu1  ;;  %v1905_v10 = vrot.slane %v3611_v12, 1 }
 0x1b6   : > { %v4670_v62 = vpop.f32.mrf.mxu0 }
 0x1b7   : > { %v4672_v15 = vpop.f32.mrf.mxu1  ;;  %v1902_v8 = vrot.slane %v4670_v62, 1 }
 0x1b8   : > { %v3612_v16 = vpop.f32.mrf.mxu0 }
 0x1b9   : > { %v4674_v17 = vpop.f32.mrf.mxu1 }
 0x1ba   : > { %v4676_v19 = vpop.f32.mrf.mxu0 }
 0x1bb   : > { %v4678_v2 = vpop.f32.mrf.mxu1  ;;  %v1903_v60 = vrot.slane %v4676_v19, 1 }
 0x1bc   : > { %v4680_v20 = vpop.f32.mrf.mxu0 }
 0x1bd   : > { %v4682_v21 = vpop.f32.mrf.mxu1  ;;  %v1911_v55 = vrot.slane %v4680_v20, 1  ;;  %v1904_v62 = vsel %vm1225_vm0, %v1902_v8, %v1903_v60 }
 0x1be   : > { %v4684_v22 = vpop.f32.mrf.mxu0 }
 0x1bf   : > { %v4686_v24 = vpop.f32.mrf.mxu1 }
 0x1c0   : > { %v4688_v25 = vpop.f32.mrf.mxu0 }
 0x1c1   : > { %v4690_v27 = vpop.f32.mrf.mxu1  ;;  %v1912_v12 = vrot.slane %v4688_v25, 1 }
 0x1c2   : > { %v4692_v28 = vpop.f32.mrf.mxu0 }
 0x1c3   : > { %v4694_v29 = vpop.f32.mrf.mxu1  ;;  %v1913_v20 = vsel %vm1225_vm0, %v1911_v55, %v1912_v12  ;;  %v2126_v12 = vrot.slane %v4686_v24, 2 }
 0x1c4   : > { %v4696_v31 = vpop.f32.mrf.mxu0 }
 0x1c5   : > { %v4698_v32 = vpop.f32.mrf.mxu1 }
 0x1c6   : > { %v4700_v14 = vpop.f32.mrf.mxu0 }
 0x1c7   : > { %v4702_v33 = vpop.f32.mrf.mxu1 }
 0x1c8   : > { %v3668_v35 = vpop.f32.mrf.mxu0 }
 0x1c9   : > { %v4704_v36 = vpop.f32.mrf.mxu1  ;;  %v1899_v35 = vrot.slane %v3607_v46, 1  ;;  %v2117_v46 = vrot.slane %v4658_v4, 2  ;;  %v2115_v4 = vrot.slane %v4666_v11, 2 }
 0x1ca   : > { %v2315_v37 = vpop.f32.mrf.mxu0 }
 0x1cb   : > { %v4706_v18 = vpop.f32.mrf.mxu1  ;;  %v1906_v37 = vrot.slane %v3612_v16, 1  ;;  %v1901_v56 = vsel %vm1225_vm0, %v1899_v35, %v1900_v53  ;;  %v1898_v16 = vsel %vm1225_vm0, %v1896_v58, %v1897_v57  ;;  %v2114_v53 = vrot.slane %v4662_v7, 2 }
 0x1cc   : > { %v4708_v38 = vpop.f32.mrf.mxu0  ;;  %v2124_v57 = vrot.slane %v4674_v17, 2  ;;  %v1924_v19 = vadd.f32 %v1898_v16, %v4632_v26  ;;  %v1909_v35 = vrot.slane %v4692_v28, 1  ;;  %v2119_v7 = vsel %vm1444_vm1, %v2117_v46, %v2118_v5 }
 0x1cd   : > { %v4710_v40 = vpop.f32.mrf.mxu1  ;;  %v1907_v49 = vsel %vm1225_vm0, %v1905_v10, %v1906_v37  ;;  %v2140_v37 = vadd.f32 %v2110_v9, %v1922_v3  ;;  %v2121_v17 = vrot.slane %v4678_v2, 2  ;;  %v1908_v26 = vrot.slane %v4684_v22, 1 }
 0x1ce   : > { %v4712_v42 = vpop.f32.mrf.mxu0  ;;  %v1927_v11 = vadd.f32 %v1907_v49, %v4638_v41  ;;  %v2130_v28 = vrot.slane %v4690_v27, 2  ;;  %v2116_v50 = vsel %vm1444_vm1, %v2114_v53, %v2115_v4  ;;  %v1926_v27 = vadd.f32 %v1904_v62, %v4640_v44 }
 0x1cf   : > { %v4714_v45 = vpop.f32.mrf.mxu1  ;;  %v2142_v10 = vadd.f32 %v2116_v50, %v1924_v19  ;;  %v1910_v46 = vsel %vm1225_vm0, %v1908_v26, %v1909_v35  ;;  %v1929_v5 = vadd.f32 %v1913_v20, %v4648_v59  ;;  %v2557_v3 = vrot.slane %v4704_v36, 1 }
 0x1d0   : > { %v3672_v48 = vpop.f32.mrf.mxu0  ;;  %v2556_v36 = vrot.slane %v4698_v32, 1  ;;  %v1928_v4 = vadd.f32 %v1910_v46, %v4652_v63  ;;  %v2367_v63 = vadd.f32 %v4700_v14, %v2140_v37 }
 0x1d1   : > { %v4717_v51 = vpop.f32.mrf.mxu1  ;;  %v2369_v14 = vadd.f32 %v4712_v42, %v2142_v10 }
 0x1d2   : > { %v2329_v54 = vpop.f32.mrf.mxu0 }
 0x1d3   : > { %v4721_v61 = vpop.f32.mrf.mxu1  ;;  %v1925_v54 = vadd.f32 %v1901_v56, %v4630_v23  ;;  %v2123_v23 = vrot.slane %v4668_v13, 2  ;;  %v2120_v13 = vrot.slane %v4672_v15, 2  ;;  %v2129_v56 = vrot.slane %v4682_v21, 2 }
 0x1d4   : > { %v4725_v48 = vpop.f32.mrf.mxu0  ;;  %v2554_v15 = vrot.slane %v4706_v18, 1  ;;  %v2563_v21 = vrot.slane %v4717_v51, 1  ;;  %v2553_v18 = vrot.slane %v4702_v33, 1  ;;  %v2562_v51 = vrot.slane %v4710_v40, 1 }
 0x1d5   : > { %v4729_v0 = vpop.f32.mrf.mxu1  ;;  %v2143_v58 = vadd.f32 %v2119_v7, %v1925_v54  ;;  %v2125_v2 = vsel %vm1444_vm1, %v2123_v23, %v2124_v57  ;;  %v2122_v49 = vsel %vm1444_vm1, %v2120_v13, %v2121_v17  ;;  %v2131_v44 = vsel %vm1444_vm1, %v2129_v56, %v2130_v28 }
 0x1d6   : > { %v4734_v47 = vpop.f32.mrf.mxu0  ;;  %v2145_v22 = vadd.f32 %v2125_v2, %v1927_v11  ;;  %v2368_v54 = vadd.f32 %v4696_v31, %v2141_v30  ;;  %v2568_v24 = vrot.slane %v4729_v0, 1  ;;  %v2558_v57 = vsel %vm1225_vm0, %v2556_v36, %v2557_v3 }
 0x1d7   : > { %v4740_v6 = vpop.f32.mrf.mxu1  ;;  %v2555_v55 = vsel %vm1225_vm0, %v2553_v18, %v2554_v15  ;;  %v2564_v32 = vsel %vm1225_vm0, %v2562_v51, %v2563_v21  ;;  %v2560_v33 = vrot.slane %v4721_v61, 1  ;;  %v2370_v31 = vadd.f32 %v4708_v38, %v2143_v58 }
 0x1d8   : > { %v3676_v52 = vpop.f32.mrf.mxu0  ;;  %v2372_v35 = vadd.f32 %v4725_v48, %v2145_v22  ;;  %v2586_v23 = vadd.f32 %v2558_v57, %v2368_v54  ;;  %v2585_v62 = vadd.f32 %v2555_v55, %v2367_v63  ;;  %v2565_v26 = vrot.slane %v4740_v6, 1  ;;  %v4825_v22 = vld [vmem:[%s827_s9] ss:$0 sm:$0xff] }
 0x1d9   : > { %v3708_v34 = vpop.f32.mrf.mxu1  ;;  %v2127_v52 = vrot.slane %v4694_v29, 2  ;;  %v2144_v29 = vadd.f32 %v2122_v49, %v1926_v27  ;;  %v4812_v37 = vadd.f32 %v2564_v32, %v2370_v31 }
 0x1da   : > { %v2343_v25 = vpop.f32.mrf.mxu0  ;;  %v2569_v53 = vrot.slane %v3708_v34, 1  ;;  %v2147_v34 = vadd.f32 %v2131_v44, %v1929_v5 }
 0x1db   : > { %v4756_v1 = vpop.f32.mrf.mxu1  ;;  %v2128_v30 = vsel %vm1444_vm1, %v2126_v12, %v2127_v52  ;;  %v2559_v25 = vrot.slane %v4714_v45, 1  ;;  %v2371_v20 = vadd.f32 %v4734_v47, %v2144_v29 }
 0x1dc   : > { %v4762_v39 = vpop.f32.mrf.mxu0  ;;  %v2570_v0 = vsel %vm1225_vm0, %v2568_v24, %v2569_v53  ;;  %v2566_v61 = vrot.slane %v4756_v1, 1  ;;  %v2146_v7 = vadd.f32 %v2128_v30, %v1928_v4 }
 0x1dd   : > { %v4767_v41 = vpop.f32.mrf.mxu1  ;;  %v2561_v17 = vsel %vm1225_vm0, %v2559_v25, %v2560_v33  ;;  %v2590_v45 = vadd.f32 %v2570_v0, %v2372_v35  ;;  %v2374_v1 = vadd.f32 %v4762_v39, %v2147_v34 }
 0x1de   : > { %v4772_v43 = vpop.f32.mrf.mxu0  ;;  %v2567_v13 = vsel %vm1225_vm0, %v2565_v26, %v2566_v61  ;;  %v2574_v56 = vrot.slane %v4767_v41, 1 }
 0x1df   : > { %v4777_v16 = vpop.f32.mrf.mxu1  ;;  %v2589_v41 = vadd.f32 %v2567_v13, %v2371_v20  ;;  %v2373_v54 = vadd.f32 %v4772_v43, %v2146_v7 }
 0x1e0   : > { %v3680_v60 = vpop.f32.mrf.mxu0 }
 0x1e1   : > { %v3712_v59 = vpop.f32.mrf.mxu1 }
 0x1e2   : > { %v2357_v9 = vpop.f32.mrf.mxu0  ;;  %v2575_v28 = vrot.slane %v3712_v59, 1  ;;  %v2571_v59 = vrot.slane %v4777_v16, 1 }
 0x1e3   : > { %v4793_v8 = vpop.f32.mrf.mxu1  ;;  %v2587_v9 = vadd.f32 %v2561_v17, %v2369_v14 }
 0x1e4   : > { %v3731_v40 = vpop.f32.mrf.mxu0  ;;  %v2572_v2 = vrot.slane %v4793_v8, 1  ;;  %v2576_v12 = vsel %vm1225_vm0, %v2574_v56, %v2575_v28 }
 0x1e5   : > { %v3739_v19 = vpop.f32.mrf.mxu1  ;;  %v2774_v58 = vrot.slane %v3731_v40, 2  ;;  %v2592_v8 = vadd.f32 %v2576_v12, %v2374_v1 }
 0x1e6   : > { %v2692_v11 = vpop.f32.mrf.mxu0  ;;  %v2786_v10 = vrot.slane %v3739_v19, 2  ;;  %v2573_v57 = vsel %vm1225_vm0, %v2571_v59, %v2572_v2 }
 0x1e7   : > { %v2724_v38 = vpop.f32.mrf.mxu1  ;;  %v2771_v46 = vrot.slane %v2692_v11, 2  ;;  %v2591_v26 = vadd.f32 %v2573_v57, %v2373_v54 }
 0x1e8   : > { %v3732_v48 = vpop.f32.mrf.mxu0  ;;  %v2783_v3 = vrot.slane %v2724_v38, 2 }
 0x1e9   : > { %v2775_v42 = vrot.slane %v3732_v48, 2  ;;  %v3740_v50 = vpop.f32.mrf.mxu1 }
 0x1ea   : > { %v2787_v47 = vrot.slane %v3740_v50, 2  ;;  %v2695_v6 = vpop.f32.mrf.mxu0 }
 0x1eb   : > { %v2776_v27 = vsel %vm1444_vm1, %v2774_v58, %v2775_v42  ;;  %v2772_v39 = vrot.slane %v2695_v6, 2  ;;  %v2727_v5 = vpop.f32.mrf.mxu1 }
 0x1ec   : > { %v2804_v15 = vadd.f32 %v2776_v27, %v2586_v23  ;;  %v2788_v21 = vsel %vm1444_vm1, %v2786_v10, %v2787_v47  ;;  %v2784_v49 = vrot.slane %v2727_v5, 2  ;;  %v3735_v60 = vpop.f32.mrf.mxu0 }
 0x1ed   : > { %v2808_v52 = vadd.f32 %v2788_v21, %v2590_v45  ;;  %v2773_v53 = vsel %vm1444_vm1, %v2771_v46, %v2772_v39  ;;  %v3743_v44 = vpop.f32.mrf.mxu1  ;;  %v2780_v16 = vrot.slane %v3735_v60, 2 }
 0x1ee   : > { %v2818_v36 = vadd.f32 %v4825_v22, %v2804_v15  ;;  %v2803_v18 = vadd.f32 %v2773_v53, %v2585_v62  ;;  %v2785_v51 = vsel %vm1444_vm1, %v2783_v3, %v2784_v49  ;;  %v2708_v4 = vpop.f32.mrf.mxu0  ;;  %v2792_v40 = vrot.slane %v3743_v44, 2 }
 0x1ef   : > { %v2822_v24 = vadd.f32 %v4825_v22, %v2808_v52  ;;  %v2807_v29 = vadd.f32 %v2785_v51, %v2589_v41  ;;  %v2740_v34 = vpop.f32.mrf.mxu1  ;;  %v2777_v63 = vrot.slane %v2708_v4, 2 }
 0x1f0   : > { %v2817_v55 = vadd.f32 %v4825_v22, %v2803_v18  ;;  %v3736_v32 = vpop.f32.mrf.mxu0  ;;  %v2826_v30 = vmax.f32 %v2818_v36, 0.0  ;;  %v2789_v19 = vrot.slane %v2740_v34, 2 }
 0x1f1   : > { %v2821_v33 = vadd.f32 %v4825_v22, %v2807_v29  ;;  %v2781_v31 = vrot.slane %v3736_v32, 2  ;;  %v3744_v0 = vpop.f32.mrf.mxu1  ;;  %v2830_v61 = vmax.f32 %v2822_v24, 0.0 }
 0x1f2   : > { %v2825_v43 = vmax.f32 %v2817_v55, 0.0  ;;  %v2793_v25 = vrot.slane %v3744_v0, 2  ;;  %v2711_v35 = vpop.f32.mrf.mxu0 }
 0x1f3   : > { %v2829_v7 = vmax.f32 %v2821_v33, 0.0  ;;  %v2782_v11 = vsel %vm1444_vm1, %v2780_v16, %v2781_v31  ;;  %v2778_v23 = vrot.slane %v2711_v35, 2  ;;  %v2743_v62 = vpop.f32.mrf.mxu1 }
 0x1f4   : > { %v3293_v14 = vpack.c.bf16 %v2826_v30, %v2825_v43  ;;  %v2806_v38 = vadd.f32 %v2782_v11, %v4812_v37  ;;  %v2794_v17 = vsel %vm1444_vm1, %v2792_v40, %v2793_v25  ;;  %v2790_v20 = vrot.slane %v2743_v62, 2 }
 0x1f5   : > { %v3303_v45 = vpack.c.bf16 %v2830_v61, %v2829_v7  ;;  %v2810_v48 = vadd.f32 %v2794_v17, %v2592_v8  ;;  %v2779_v1 = vsel %vm1444_vm1, %v2777_v63, %v2778_v23 }
 0x1f6   : > { %3294 = vst [vmem:[%s4844_s11] sm:$0xff] %v3293_v14   ;;  %v2820_v28 = vadd.f32 %v4825_v22, %v2806_v38  ;;  %v2805_v58 = vadd.f32 %v2779_v1, %v2587_v9  ;;  %v2791_v37 = vsel %vm1444_vm1, %v2789_v19, %v2790_v20 }
 0x1f7   : > { %3311 = vst [vmem:[%s4844_s11 + $0x10] sm:$0xff] %v3303_v45   ;;  %v2824_v42 = vadd.f32 %v4825_v22, %v2810_v48  ;;  %v2809_v50 = vadd.f32 %v2791_v37, %v2591_v26 }
 0x1f8   : > { %v2819_v13 = vadd.f32 %v4825_v22, %v2805_v58  ;;  %v2828_v10 = vmax.f32 %v2820_v28, 0.0 }
 0x1f9   : > { %v2823_v56 = vadd.f32 %v4825_v22, %v2809_v50  ;;  %v2832_v6 = vmax.f32 %v2824_v42, 0.0 }
 0x1fa   : > { %v2827_v47 = vmax.f32 %v2819_v13, 0.0 }
 0x1fb   : > { %v2831_v2 = vmax.f32 %v2823_v56, 0.0  ;;  %2855 = sbr.rel (!%p4091_p9) target bundleno = 521 (0x209), region = 77 }
 0x1fc   : > { %v3298_v46 = vpack.c.bf16 %v2828_v10, %v2827_v47 }
 0x1fd   : > { %v3308_v27 = vpack.c.bf16 %v2832_v6, %v2831_v2  ;;  %v2876_v22 = vld [vmem:[%s4844_s11] sm:$0xf] (%p4091_p9)  ;;  %v2878_v39 = vld [vmem:[%s4844_s11 + $0x4] sm:$0xf] (%p4091_p9) }
 0x1fe   : > { %3310 = vst [vmem:[%s4844_s11 + $0x8] sm:$0xff] %v3298_v46   ;;  %v2884_v15 = vld [vmem:[%s4844_s11 + $0x10] sm:$0xf] (%p4091_p9)  ;;  %v2886_v21 = vld [vmem:[%s4844_s11 + $0x14] sm:$0xf] (%p4091_p9)  ;;  %2877 = vst [vmem:[%s2859_s26] sm:$0xf] (%p4091_p9), %v2876_v22 }
 0x1ff   : > { %3312 = vst [vmem:[%s4844_s11 + $0x18] sm:$0xff] %v3308_v27   ;;  %2879 = vst [vmem:[%s2859_s26 + $0x8] sm:$0xf] (%p4091_p9), %v2878_v39 }
 0x200   : > { %2885 = vst [vmem:[%s2859_s26 + $0x20] sm:$0xf] %v2884_v15  ;;  %2887 = vst [vmem:[%s2859_s26 + $0x28] sm:$0xf] %v2886_v21 }
 0x205   : > { %v2880_v5 = vld [vmem:[%s4844_s11 + $0x8] sm:$0xf]  ;;  %v2882_v3 = vld [vmem:[%s4844_s11 + $0xc] sm:$0xf] }
 0x206   : > { %v2888_v49 = vld [vmem:[%s4844_s11 + $0x18] sm:$0xf]  ;;  %v2890_v60 = vld [vmem:[%s4844_s11 + $0x1c] sm:$0xf]  ;;  %2881 = vst [vmem:[%s2859_s26 + $0x10] sm:$0xf] %v2880_v5 }
 0x207   : > { %2883 = vst [vmem:[%s2859_s26 + $0x18] sm:$0xf] %v2882_v3  ;;  %2889 = vst [vmem:[%s2859_s26 + $0x30] sm:$0xf] %v2888_v49 }
 0x208   : > { %2891 = vst [vmem:[%s2859_s26 + $0x38] sm:$0xf] %v2890_v60 }
 0x209 PF: > { %s13_s20 = sadd.s32 1, %s4002_s20   ;;  %s4902_s12 = smov %s3974_s13 }
 0x20a   : > { %p10_p2 = scmp.ge.s32.totalorder %s13_s20, 6   ;;  %s4903_s13 = smov %s4096_s4 }
 0x20b   : > { %s4904_s14 = smov %s3982_s15  ;;  %s4905_s15 = smov %s4085_s27 }
 0x20c   : > { %s4906_s16 = smov %s3994_s18  ;;  %s4907_s17 = smov %s3998_s19 }
 0x20d   : > { %s4908_s18 = smov %s4911_s22  ;;  %s4909_s19 = smov %s4915_s23 }
 0x20e   :  { %12 = sbr.rel (!%p10_p2) target bundleno = 5 (0x5), region = 165 }

// kernel: vgg_forward.8
= control target key start
LH: loop header
LB: loop body
LE: loop exit
PB: predicated region body
PF: predicated region fallthrough
CT: control target
= control target key end

     0   :  { %s6550_s12 = smov 0   ;;  %s6552_s13 = smov 0   ;;  %s7876_s0 = inlined_call_operand.vmem [shape: bf16[2,18,24,128], index: 0, kind: input, shape index: {}]   ;;  %s7877_s1 = inlined_call_operand.vmem [shape: bf16[9,128,128], index: 1, kind: input, shape index: {}]   ;;  %s7878_s2 = inlined_call_operand.vmem [shape: f32[1,128], index: 2, kind: input, shape index: {}]   ;;  %s7879_s3 = inlined_call_operand.vmem [shape: bf16[2,16,16,128], index: 3, kind: output, shape index: {}]  }
   0x1   :  { %s6554_s14 = smov 0  }
   0x2 LB: > { %s25_s15 = sadd.s32 1, %s6524_s13  ;;  %p4922_p0 = scmp.ge.s32.totalorder %s6528_s14, 1  ;;  %s6528_s14 = sphi %s6554_s14, %s13_s14   ;;  %s6524_s13 = sphi %s6552_s13, %s7961_s13   ;;  %s6520_s12 = sphi %s6550_s12, %s7960_s12  }
   0x3   : > { %p27_p1 = scmp.ge.s32.totalorder %s25_s15, 2  ;;  %p168_p2 = scmp.lt.s32.totalorder %s6528_s14, 3 }
   0x5   : > { %s7963_s15 = smov (%p27_p1, %s25_s15), 0  ;;  %p169_p3 = pnand %p4922_p0, %p168_p2 }
   0x7   : > { %172 = sbr.rel (%p169_p3) target bundleno = 682 (0x2aa), region = 32 }
   0xc   : > { %v6362_v0 = vld [vmem:[%s7877_s1 + $0x38] sm:$0xff]   ;;  %p202_p4 = scmp.lt.s32.totalorder %s6520_s12, 1  ;;  %v6363_v1 = vld [vmem:[%s7877_s1 + $0x30] sm:$0xff]   ;;  %v6364_v2 = vld [vmem:[%s7877_s1 + $0x28] sm:$0xff]   ;;  %vm1027_vm0 = vcmask 1046528   ;;  %vm1510_vm1 = vcmask 1045504  }
   0xd   : > { %5745 = vmatprep.subr.bf16.mxu0 %v6362_v0  ;;  %6321 = vmatprep.subr.bf16.mxu1 %v6362_v0  ;;  %v6365_v3 = vld [vmem:[%s7877_s1 + $0x20] sm:$0xff]   ;;  %v6366_v6 = vld [vmem:[%s7877_s1 + $0x18] sm:$0xff]   ;;  %v6367_v7 = vld [vmem:[%s7877_s1 + $0x10] sm:$0xff]  }
   0xe   : > { %s7965_s12 = smov (!%p202_p4, %s6520_s12), 1  ;;  %5746 = vmatpush3.bf16.msra.mxu0 %v6362_v0  ;;  %6329 = vmatpush3.bf16.msra.mxu1 %v6362_v0  ;;  %v6368_v8 = vld [vmem:[%s7877_s1 + $0x8] sm:$0xff]   ;;  %v6369_v9 = vld [vmem:[%s7877_s1] sm:$0xff]   ;;  %v6374_v10 = vld [vmem:[%s7877_s1 + $0x78] sm:$0xff]  }
   0xf   : > { %5747 = vmatprep.subr.bf16.mxu0 %v6363_v1  ;;  %6322 = vmatprep.subr.bf16.mxu1 %v6363_v1  ;;  %s6337_s22 = smul.u32 216, %s7965_s12  ;;  %v6375_v12 = vld [vmem:[%s7877_s1 + $0xb8] sm:$0xff]   ;;  %v6376_v14 = vld [vmem:[%s7877_s1 + $0x70] sm:$0xff]   ;;  %v6382_v18 = vld [vmem:[%s7877_s1 + $0x68] sm:$0xff]   ;;  %s5329_s6 = sshll.u32 %s7965_s12, 7 }
  0x10   : > { %v6381_v17 = vld [vmem:[%s7877_s1 + $0xb0] sm:$0xff]   ;;  %v6383_v20 = vld [vmem:[%s7877_s1 + $0xa8] sm:$0xff]   ;;  %v6388_v24 = vld [vmem:[%s7877_s1 + $0x60] sm:$0xff]   ;;  %s7734_s8 = scalar_lea.vmem %s7879_s3, %s5329_s6 }
  0x11   : > { %s6583_s25 = scalar_lea.vmem %s7876_s0, %s6337_s22  ;;  %v6389_v25 = vld [vmem:[%s7877_s1 + $0xa0] sm:$0xff]   ;;  %v6394_v28 = vld [vmem:[%s7877_s1 + $0x58] sm:$0xff]   ;;  %v6396_v32 = vld [vmem:[%s7877_s1 + $0x50] sm:$0xff]  }
  0x12   : > { %5748 = vmatpush3.bf16.msra.mxu0 %v6363_v1  ;;  %6330 = vmatpush3.bf16.msra.mxu1 %v6363_v1  ;;  %v6589_v4 = vld [vmem:[%s6583_s25] sm:$0xff]   ;;  %v6612_v11 = vld [vmem:[%s6583_s25 + $0x8] sm:$0xff]   ;;  %v6624_v15 = vld [vmem:[%s6583_s25 + $0x10] sm:$0xff]  }
  0x13   : > { %5749 = vmatprep.subr.bf16.mxu0 %v6364_v2  ;;  %6323 = vmatprep.subr.bf16.mxu1 %v6364_v2  ;;  %v6592_v5 = vld [vmem:[%s6583_s25 + $0x60] sm:$0xff]   ;;  %v6618_v13 = vld [vmem:[%s6583_s25 + $0x68] sm:$0xff]   ;;  %v6627_v16 = vld [vmem:[%s6583_s25 + $0x70] sm:$0xff]  }
  0x14   : > { %5761 = vmatprep.mubr.bf16.mxu0 %v6589_v4  ;;  %5785 = vmatprep.mubr.bf16.mxu1 %v6592_v5  ;;  %v6639_v19 = vld [vmem:[%s6583_s25 + $0x18] sm:$0xff]   ;;  %v6649_v22 = vld [vmem:[%s6583_s25 + $0x20] sm:$0xff]   ;;  %v6665_v26 = vld [vmem:[%s6583_s25 + $0x28] sm:$0xff]  }
  0x15   : > { %v6646_v21 = vld [vmem:[%s6583_s25 + $0x78] sm:$0xff]   ;;  %v6652_v23 = vld [vmem:[%s6583_s25 + $0x80] sm:$0xff]   ;;  %v6668_v27 = vld [vmem:[%s6583_s25 + $0x88] sm:$0xff]  }
  0x16   : > { %5750 = vmatpush3.bf16.msra.mxu0 %v6364_v2  ;;  %6331 = vmatpush3.bf16.msra.mxu1 %v6364_v2  ;;  %v6395_v29 = vld [vmem:[%s7877_s1 + $0x98] sm:$0xff]   ;;  %v6677_v30 = vld [vmem:[%s6583_s25 + $0x30] sm:$0xff]   ;;  %v6402_v36 = vld [vmem:[%s7877_s1 + $0x48] sm:$0xff]  }
  0x17   : > { %5751 = vmatprep.subr.bf16.mxu0 %v6365_v3  ;;  %6324 = vmatprep.subr.bf16.mxu1 %v6365_v3  ;;  %v6680_v31 = vld [vmem:[%s6583_s25 + $0x90] sm:$0xff]   ;;  %v6693_v34 = vld [vmem:[%s6583_s25 + $0x38] sm:$0xff]   ;;  %v6403_v37 = vld [vmem:[%s7877_s1 + $0x88] sm:$0xff]  }
  0x18   : > { %v6401_v33 = vld [vmem:[%s7877_s1 + $0x90] sm:$0xff]   ;;  %v6696_v35 = vld [vmem:[%s6583_s25 + $0x98] sm:$0xff]   ;;  %v6705_v38 = vld [vmem:[%s6583_s25 + $0x40] sm:$0xff]  }
  0x19   : > { %v6708_v39 = vld [vmem:[%s6583_s25 + $0xa0] sm:$0xff]   ;;  %v6721_v42 = vld [vmem:[%s6583_s25 + $0x48] sm:$0xff]   ;;  %v6410_v44 = vld [vmem:[%s7877_s1 + $0xf8] sm:$0xff]  }
  0x1a   : > { %5752 = vmatpush3.bf16.msra.mxu0 %v6365_v3  ;;  %6332 = vmatpush3.bf16.msra.mxu1 %v6365_v3  ;;  %v6408_v40 = vld [vmem:[%s7877_s1 + $0x40] sm:$0xff]   ;;  %v6724_v43 = vld [vmem:[%s6583_s25 + $0xa8] sm:$0xff]   ;;  %v6411_v45 = vld [vmem:[%s7877_s1 + $0x138] sm:$0xff]  }
  0x1b   : > { %5753 = vmatprep.subr.bf16.mxu0 %v6366_v6  ;;  %6325 = vmatprep.subr.bf16.mxu1 %v6366_v6  ;;  %v6409_v41 = vld [vmem:[%s7877_s1 + $0x80] sm:$0xff]   ;;  %v6733_v46 = vld [vmem:[%s6583_s25 + $0x50] sm:$0xff]   ;;  %v6743_v48 = vld [vmem:[%s6583_s25 + $0x58] sm:$0xff]  }
  0x1c   : > { %v6736_v47 = vld [vmem:[%s6583_s25 + $0xb0] sm:$0xff]   ;;  %v6746_v49 = vld [vmem:[%s6583_s25 + $0xb8] sm:$0xff]   ;;  %v6414_v52 = vld [vmem:[%s7877_s1 + $0xe8] sm:$0xff]  }
  0x1d   : > { %v6412_v50 = vld [vmem:[%s7877_s1 + $0xf0] sm:$0xff]   ;;  %v6415_v53 = vld [vmem:[%s7877_s1 + $0x128] sm:$0xff]   ;;  %v6416_v54 = vld [vmem:[%s7877_s1 + $0xe0] sm:$0xff]  }
  0x1e   : > { %5754 = vmatpush3.bf16.msra.mxu0 %v6366_v6  ;;  %6333 = vmatpush3.bf16.msra.mxu1 %v6366_v6  ;;  %v6413_v51 = vld [vmem:[%s7877_s1 + $0x130] sm:$0xff]   ;;  %v6417_v55 = vld [vmem:[%s7877_s1 + $0x120] sm:$0xff]   ;;  %v6418_v56 = vld [vmem:[%s7877_s1 + $0xd8] sm:$0xff]  }
  0x1f   : > { %5755 = vmatprep.subr.bf16.mxu0 %v6367_v7  ;;  %6326 = vmatprep.subr.bf16.mxu1 %v6367_v7  ;;  %v6419_v57 = vld [vmem:[%s7877_s1 + $0x118] sm:$0xff]   ;;  %v6420_v58 = vld [vmem:[%s7877_s1 + $0xd0] sm:$0xff]   ;;  %v6422_v60 = vld [vmem:[%s7877_s1 + $0xc8] sm:$0xff]  }
  0x20   : > { %v6421_v59 = vld [vmem:[%s7877_s1 + $0x110] sm:$0xff]   ;;  %v6423_v61 = vld [vmem:[%s7877_s1 + $0x108] sm:$0xff]   ;;  %v6424_v62 = vld [vmem:[%s7877_s1 + $0xc0] sm:$0xff]  }
  0x21   : > { %v6425_v63 = vld [vmem:[%s7877_s1 + $0x100] sm:$0xff]   ;;  %v6428_v0 = vld [vmem:[%s7877_s1 + $0x178] sm:$0xff]   ;;  %v6845_v2 = vld [vmem:[%s6583_s25 + $0xc] sm:$0xff]  }
  0x22   : > { %5756 = vmatpush3.bf16.msra.mxu0 %v6367_v7  ;;  %6334 = vmatpush3.bf16.msra.mxu1 %v6367_v7  ;;  %v6429_v1 = vld [vmem:[%s7877_s1 + $0x1b8] sm:$0xff]   ;;  %v6433_v6 = vld [vmem:[%s7877_s1 + $0x1b0] sm:$0xff]   ;;  %v6438_v7 = vld [vmem:[%s7877_s1 + $0x168] sm:$0xff]  }
  0x23   : > { %5757 = vmatprep.subr.bf16.mxu0 %v6368_v8  ;;  %6327 = vmatprep.subr.bf16.mxu1 %v6368_v8  ;;  %v6852_v3 = vld [vmem:[%s6583_s25 + $0x14] sm:$0xff]  }
  0x26   : > { %5758 = vmatpush3.bf16.msra.mxu0 %v6368_v8  ;;  %6335 = vmatpush3.bf16.msra.mxu1 %v6368_v8  ;;  %v6439_v8 = vld [vmem:[%s7877_s1 + $0x1a8] sm:$0xff]  }
  0x27   : > { %5759 = vmatprep.subr.bf16.mxu0 %v6369_v9  ;;  %6328 = vmatprep.subr.bf16.mxu1 %v6369_v9 }
  0x2a   : > { %5760 = vmatpush3.bf16.msra.mxu0 %v6369_v9  ;;  %6336 = vmatpush3.bf16.msra.mxu1 %v6369_v9  ;;  %v6874_v9 = vld [vmem:[%s6583_s25 + $0x24] sm:$0xff]  }
  0x2b   : > { %5809 = vmatprep.subr.bf16.mxu1 %v6374_v10  ;;  %5873 = vmatprep.subr.bf16.mxu0 %v6375_v12 }
  0x2d   : > { %5762 = vmatmul.mubr.bf16.vlgmr.msra.gmra.mxu0 %v6612_v11  ;;  %5786 = vmatmul.mubr.bf16.vlgmr.msra.gmra.mxu1 %v6618_v13 }
  0x2e   : > { %5810 = vmatpush3.bf16.msra.mxu1 %v6374_v10  ;;  %5874 = vmatpush3.bf16.msra.mxu0 %v6375_v12  ;;  %v6877_v10 = vld [vmem:[%s6583_s25 + $0x2c] sm:$0xff]   ;;  %v6443_v12 = vld [vmem:[%s7877_s1 + $0x1a0] sm:$0xff]  }
  0x2f   : > { %5811 = vmatprep.subr.bf16.mxu1 %v6376_v14  ;;  %5765 = vmatprep.mubr.bf16.mxu0 %v6624_v15 }
  0x30   : > { %5789 = vmatprep.mubr.bf16.mxu1 %v6627_v16  ;;  %5875 = vmatprep.subr.bf16.mxu0 %v6381_v17 }
  0x32   : > { %5812 = vmatpush3.bf16.msra.mxu1 %v6376_v14  ;;  %5876 = vmatpush3.bf16.msra.mxu0 %v6381_v17  ;;  %v6449_v14 = vld [vmem:[%s7877_s1 + $0x198] sm:$0xff]   ;;  %v6452_v17 = vld [vmem:[%s7877_s1 + $0x150] sm:$0xff]  }
  0x33   : > { %5813 = vmatprep.subr.bf16.mxu1 %v6382_v18  ;;  %5877 = vmatprep.subr.bf16.mxu0 %v6383_v20 }
  0x35   : > { %5766 = vmatmul.mubr.bf16.gmra.mxu0 %v6639_v19  ;;  %5790 = vmatmul.mubr.bf16.gmra.mxu1 %v6646_v21 }
  0x36   : > { %5814 = vmatpush3.bf16.msra.mxu1 %v6382_v18  ;;  %5769 = vmatprep.mubr.bf16.mxu0 %v6649_v22  ;;  %v6453_v18 = vld [vmem:[%s7877_s1 + $0x190] sm:$0xff]  }
  0x37   : > { %5793 = vmatprep.mubr.bf16.mxu1 %v6652_v23  ;;  %5878 = vmatpush3.bf16.msra.mxu0 %v6383_v20  ;;  %v6459_v20 = vld [vmem:[%s7877_s1 + $0x188] sm:$0xff]  }
  0x38   : > { %5815 = vmatprep.subr.bf16.mxu1 %v6388_v24  ;;  %5879 = vmatprep.subr.bf16.mxu0 %v6389_v25 }
  0x3a   : > { %5816 = vmatpush3.bf16.msra.mxu1 %v6388_v24  ;;  %v6463_v24 = vld [vmem:[%s7877_s1 + $0x180] sm:$0xff]  }
  0x3b   : > { %5880 = vmatpush3.bf16.msra.mxu0 %v6389_v25  ;;  %5817 = vmatprep.subr.bf16.mxu1 %v6394_v28  ;;  %v6936_v25 = vld [vmem:[%s7877_s1 + $0x1f8] sm:$0xff]  }
  0x3c   : > { %5881 = vmatprep.subr.bf16.mxu0 %v6395_v29 }
  0x3d   : > { %5770 = vmatmul.mubr.bf16.gmra.mxu0 %v6665_v26  ;;  %5794 = vmatmul.mubr.bf16.gmra.mxu1 %v6668_v27 }
  0x3e   : > { %5773 = vmatprep.mubr.bf16.mxu0 %v6677_v30  ;;  %5797 = vmatprep.mubr.bf16.mxu1 %v6680_v31 }
  0x3f   : > { %5818 = vmatpush3.bf16.msra.mxu1 %v6394_v28  ;;  %5882 = vmatpush3.bf16.msra.mxu0 %v6395_v29  ;;  %v6947_v28 = vld [vmem:[%s6583_s25 + $0x5c] sm:$0xff]   ;;  %v6956_v29 = vld [vmem:[%s6583_s25 + $0x64] sm:$0xff]  }
  0x40   : > { %5819 = vmatprep.subr.bf16.mxu1 %v6396_v32  ;;  %5883 = vmatprep.subr.bf16.mxu0 %v6401_v33 }
  0x43   : > { %5820 = vmatpush3.bf16.msra.mxu1 %v6396_v32  ;;  %5884 = vmatpush3.bf16.msra.mxu0 %v6401_v33  ;;  %v6969_v32 = vld [vmem:[%s6583_s25 + $0x7c] sm:$0xff]  }
  0x44   : > { %5821 = vmatprep.subr.bf16.mxu1 %v6402_v36  ;;  %5885 = vmatprep.subr.bf16.mxu0 %v6403_v37 }
  0x45   : > { %5774 = vmatmul.mubr.bf16.gmra.mxu0 %v6693_v34  ;;  %5798 = vmatmul.mubr.bf16.gmra.mxu1 %v6696_v35 }
  0x46   : > { %5777 = vmatprep.mubr.bf16.mxu0 %v6705_v38  ;;  %5801 = vmatprep.mubr.bf16.mxu1 %v6708_v39 }
  0x47   : > { %5822 = vmatpush3.bf16.msra.mxu1 %v6402_v36  ;;  %5886 = vmatpush3.bf16.msra.mxu0 %v6403_v37 }
  0x48   : > { %5823 = vmatprep.subr.bf16.mxu1 %v6408_v40  ;;  %5887 = vmatprep.subr.bf16.mxu0 %v6409_v41 }
  0x4b   : > { %5824 = vmatpush3.bf16.msra.mxu1 %v6408_v40  ;;  %5888 = vmatpush3.bf16.msra.mxu0 %v6409_v41  ;;  %v6987_v40 = vld [vmem:[%s6583_s25 + $0x8c] sm:$0xff]  }
  0x4c   : > { %5937 = vmatprep.subr.bf16.mxu1 %v6410_v44  ;;  %6001 = vmatprep.subr.bf16.mxu0 %v6411_v45 }
  0x4d   : > { %5778 = vmatmul.mubr.bf16.gmra.mxu0 %v6721_v42  ;;  %5802 = vmatmul.mubr.bf16.gmra.mxu1 %v6724_v43 }
  0x4e   : > { %5781 = vmatprep.mubr.bf16.mxu0 %v6733_v46  ;;  %5805 = vmatprep.mubr.bf16.mxu1 %v6736_v47 }
  0x55   : > { %5782 = vmatmul.mubr.bf16.gmra.mxu0 %v6743_v48  ;;  %5806 = vmatmul.mubr.bf16.gmra.mxu1 %v6746_v49 }
  0x56   : > { %5825 = vmatprep.mubr.bf16.mxu1 %v6589_v4  ;;  %5889 = vmatprep.mubr.bf16.mxu0 %v6589_v4  ;;  %v6855_v4 = vld [vmem:[%s6583_s25 + $0x1c] sm:$0xff]  }
  0x5d   : > { %5826 = vmatmul.mubr.bf16.vlgmr.msra.gmra.mxu1 %v6612_v11  ;;  %5890 = vmatmul.mubr.bf16.vlgmr.msra.gmra.mxu0 %v6612_v11  ;;  %v6442_v11 = vld [vmem:[%s7877_s1 + $0x160] sm:$0xff]  }
  0x5e   : > { %5938 = vmatpush3.bf16.msra.mxu1 %v6410_v44  ;;  %6002 = vmatpush3.bf16.msra.mxu0 %v6411_v45 }
  0x5f   : > { %5829 = vmatprep.mubr.bf16.mxu1 %v6624_v15  ;;  %5893 = vmatprep.mubr.bf16.mxu0 %v6624_v15  ;;  %v6896_v15 = vld [vmem:[%s6583_s25 + $0x34] sm:$0xff]  }
  0x60   : > { %5939 = vmatprep.subr.bf16.mxu1 %v6412_v50  ;;  %6003 = vmatprep.subr.bf16.mxu0 %v6413_v51 }
  0x62   : > { %5940 = vmatpush3.bf16.msra.mxu1 %v6412_v50  ;;  %6004 = vmatpush3.bf16.msra.mxu0 %v6413_v51  ;;  %v7013_v50 = vld [vmem:[%s6583_s25 + $0x9c] sm:$0xff]  }
  0x63   : > { %5941 = vmatprep.subr.bf16.mxu1 %v6414_v52  ;;  %6005 = vmatprep.subr.bf16.mxu0 %v6415_v53 }
  0x65   : > { %5830 = vmatmul.mubr.bf16.gmra.mxu1 %v6639_v19  ;;  %5894 = vmatmul.mubr.bf16.gmra.mxu0 %v6639_v19  ;;  %v6458_v19 = vld [vmem:[%s7877_s1 + $0x148] sm:$0xff]  }
  0x66   : > { %5833 = vmatprep.mubr.bf16.mxu1 %v6649_v22  ;;  %5897 = vmatprep.mubr.bf16.mxu0 %v6649_v22  ;;  %v6921_v22 = vld [vmem:[%s6583_s25 + $0x4c] sm:$0xff]  }
  0x67   : > { %5942 = vmatpush3.bf16.msra.mxu1 %v6414_v52  ;;  %6006 = vmatpush3.bf16.msra.mxu0 %v6415_v53 }
  0x68   : > { %5943 = vmatprep.subr.bf16.mxu1 %v6416_v54  ;;  %6007 = vmatprep.subr.bf16.mxu0 %v6417_v55 }
  0x6b   : > { %5944 = vmatpush3.bf16.msra.mxu1 %v6416_v54  ;;  %6008 = vmatpush3.bf16.msra.mxu0 %v6417_v55 }
  0x6c   : > { %5945 = vmatprep.subr.bf16.mxu1 %v6418_v56  ;;  %6009 = vmatprep.subr.bf16.mxu0 %v6419_v57 }
  0x6d   : > { %5834 = vmatmul.mubr.bf16.gmra.mxu1 %v6665_v26  ;;  %5898 = vmatmul.mubr.bf16.gmra.mxu0 %v6665_v26  ;;  %v6941_v26 = vld [vmem:[%s7877_s1 + $0x238] sm:$0xff]  }
  0x6e   : > { %5837 = vmatprep.mubr.bf16.mxu1 %v6677_v30  ;;  %5901 = vmatprep.mubr.bf16.mxu0 %v6677_v30  ;;  %v6959_v30 = vld [vmem:[%s6583_s25 + $0x6c] sm:$0xff]  }
  0x6f   : > { %5946 = vmatpush3.bf16.msra.mxu1 %v6418_v56  ;;  %6010 = vmatpush3.bf16.msra.mxu0 %v6419_v57 }
  0x70   : > { %5947 = vmatprep.subr.bf16.mxu1 %v6420_v58  ;;  %6011 = vmatprep.subr.bf16.mxu0 %v6421_v59 }
  0x73   : > { %5948 = vmatpush3.bf16.msra.mxu1 %v6420_v58  ;;  %6012 = vmatpush3.bf16.msra.mxu0 %v6421_v59  ;;  %v7024_v59 = vld [vmem:[%s6583_s25 + $0xa4] sm:$0xff]  }
  0x74   : > { %5949 = vmatprep.subr.bf16.mxu1 %v6422_v60  ;;  %6013 = vmatprep.subr.bf16.mxu0 %v6423_v61 }
  0x75   : > { %5838 = vmatmul.mubr.bf16.gmra.mxu1 %v6693_v34  ;;  %5902 = vmatmul.mubr.bf16.gmra.mxu0 %v6693_v34 }
  0x76   : > { %5841 = vmatprep.mubr.bf16.mxu1 %v6705_v38  ;;  %5905 = vmatprep.mubr.bf16.mxu0 %v6705_v38 }
  0x77   : > { %5950 = vmatpush3.bf16.msra.mxu1 %v6422_v60  ;;  %6014 = vmatpush3.bf16.msra.mxu0 %v6423_v61  ;;  %v7027_v60 = vld [vmem:[%s6583_s25 + $0xac] sm:$0xff]  }
  0x78   : > { %5951 = vmatprep.subr.bf16.mxu1 %v6424_v62  ;;  %6015 = vmatprep.subr.bf16.mxu0 %v6425_v63  ;;  %7907 = vst [vmem:[#allocation3_spill] sm:$0xff] %v7027_v60 }
  0x7b   : > { %5952 = vmatpush3.bf16.msra.mxu1 %v6424_v62  ;;  %6016 = vmatpush3.bf16.msra.mxu0 %v6425_v63 }
  0x7c   : > { %6065 = vmatprep.subr.bf16.mxu1 %v6428_v0  ;;  %6129 = vmatprep.subr.bf16.mxu0 %v6429_v1 }
  0x7d   : > { %5842 = vmatmul.mubr.bf16.gmra.mxu1 %v6721_v42  ;;  %5906 = vmatmul.mubr.bf16.gmra.mxu0 %v6721_v42 }
  0x7e   : > { %5845 = vmatprep.mubr.bf16.mxu1 %v6733_v46  ;;  %5909 = vmatprep.mubr.bf16.mxu0 %v6733_v46 }
  0x85   : > { %5846 = vmatmul.mubr.bf16.gmra.mxu1 %v6743_v48  ;;  %5910 = vmatmul.mubr.bf16.gmra.mxu0 %v6743_v48 }
  0x86   : > { %5849 = vmatprep.mubr.bf16.mxu1 %v6592_v5  ;;  %5913 = vmatprep.mubr.bf16.mxu0 %v6592_v5  ;;  %v6432_v5 = vld [vmem:[%s7877_s1 + $0x170] sm:$0xff]  }
  0x8d   : > { %5850 = vmatmul.mubr.bf16.gmra.mxu1 %v6618_v13  ;;  %5914 = vmatmul.mubr.bf16.gmra.mxu0 %v6618_v13  ;;  %v6448_v13 = vld [vmem:[%s7877_s1 + $0x158] sm:$0xff]  }
  0x8e   : > { %5853 = vmatprep.mubr.bf16.mxu1 %v6627_v16  ;;  %5917 = vmatprep.mubr.bf16.mxu0 %v6627_v16  ;;  %v6899_v16 = vld [vmem:[%s6583_s25 + $0x3c] sm:$0xff]  }
  0x95   : > { %5854 = vmatmul.mubr.bf16.gmra.mxu1 %v6646_v21  ;;  %5918 = vmatmul.mubr.bf16.gmra.mxu0 %v6646_v21  ;;  %v6918_v21 = vld [vmem:[%s6583_s25 + $0x44] sm:$0xff]  }
  0x96   : > { %5857 = vmatprep.mubr.bf16.mxu1 %v6652_v23  ;;  %5921 = vmatprep.mubr.bf16.mxu0 %v6652_v23  ;;  %v6462_v23 = vld [vmem:[%s7877_s1 + $0x140] sm:$0xff]  }
  0x9d   : > { %5858 = vmatmul.mubr.bf16.gmra.mxu1 %v6668_v27  ;;  %5922 = vmatmul.mubr.bf16.gmra.mxu0 %v6668_v27  ;;  %v6944_v27 = vld [vmem:[%s6583_s25 + $0x54] sm:$0xff]  }
  0x9e   : > { %5861 = vmatprep.mubr.bf16.mxu1 %v6680_v31  ;;  %5925 = vmatprep.mubr.bf16.mxu0 %v6680_v31  ;;  %v6966_v31 = vld [vmem:[%s6583_s25 + $0x74] sm:$0xff]  }
  0xa5   : > { %5862 = vmatmul.mubr.bf16.gmra.mxu1 %v6696_v35  ;;  %5926 = vmatmul.mubr.bf16.gmra.mxu0 %v6696_v35 }
  0xa6   : > { %5865 = vmatprep.mubr.bf16.mxu1 %v6708_v39  ;;  %5929 = vmatprep.mubr.bf16.mxu0 %v6708_v39  ;;  %v6984_v39 = vld [vmem:[%s6583_s25 + $0x84] sm:$0xff]  }
  0xad   : > { %5866 = vmatmul.mubr.bf16.gmra.mxu1 %v6724_v43  ;;  %5930 = vmatmul.mubr.bf16.gmra.mxu0 %v6724_v43 }
  0xae   : > { %5869 = vmatprep.mubr.bf16.mxu1 %v6736_v47  ;;  %5933 = vmatprep.mubr.bf16.mxu0 %v6736_v47 }
  0xb5   : > { %5870 = vmatmul.mubr.bf16.gmra.mxu1 %v6746_v49  ;;  %5934 = vmatmul.mubr.bf16.gmra.mxu0 %v6746_v49  ;;  %v7010_v49 = vld [vmem:[%s6583_s25 + $0x94] sm:$0xff]  }
  0xb6   : > { %5953 = vmatprep.mubr.bf16.mxu1 %v6845_v2  ;;  %6017 = vmatprep.mubr.bf16.mxu0 %v6845_v2 }
  0xbd   : > { %5954 = vmatmul.mubr.bf16.vlgmr.msra.gmra.mxu1 %v6852_v3  ;;  %6018 = vmatmul.mubr.bf16.vlgmr.msra.gmra.mxu0 %v6852_v3 }
  0xbe   : > { %6066 = vmatpush3.bf16.msra.mxu1 %v6428_v0  ;;  %6130 = vmatpush3.bf16.msra.mxu0 %v6429_v1 }
  0xbf   : > { %5957 = vmatprep.mubr.bf16.mxu1 %v6855_v4  ;;  %6021 = vmatprep.mubr.bf16.mxu0 %v6855_v4 }
  0xc0   : > { %6067 = vmatprep.subr.bf16.mxu1 %v6432_v5  ;;  %6131 = vmatprep.subr.bf16.mxu0 %v6433_v6 }
  0xc2   : > { %6068 = vmatpush3.bf16.msra.mxu1 %v6432_v5  ;;  %6132 = vmatpush3.bf16.msra.mxu0 %v6433_v6 }
  0xc3   : > { %6069 = vmatprep.subr.bf16.mxu1 %v6438_v7  ;;  %6133 = vmatprep.subr.bf16.mxu0 %v6439_v8 }
  0xc5   : > { %5958 = vmatmul.mubr.bf16.gmra.mxu1 %v6874_v9  ;;  %6022 = vmatmul.mubr.bf16.gmra.mxu0 %v6874_v9 }
  0xc6   : > { %5961 = vmatprep.mubr.bf16.mxu1 %v6877_v10  ;;  %6025 = vmatprep.mubr.bf16.mxu0 %v6877_v10 }
  0xc7   : > { %6070 = vmatpush3.bf16.msra.mxu1 %v6438_v7  ;;  %6134 = vmatpush3.bf16.msra.mxu0 %v6439_v8  ;;  %v7046_v8 = vld [vmem:[%s6583_s25 + $0xb4] sm:$0xff]  }
  0xc8   : > { %6071 = vmatprep.subr.bf16.mxu1 %v6442_v11  ;;  %6135 = vmatprep.subr.bf16.mxu0 %v6443_v12  ;;  %7911 = vst [vmem:[#allocation7_spill] sm:$0xff] %v7046_v8 }
  0xcb   : > { %6072 = vmatpush3.bf16.msra.mxu1 %v6442_v11  ;;  %6136 = vmatpush3.bf16.msra.mxu0 %v6443_v12  ;;  %v7049_v11 = vld [vmem:[%s6583_s25 + $0xbc] sm:$0xff]  }
  0xcc   : > { %6073 = vmatprep.subr.bf16.mxu1 %v6448_v13  ;;  %6137 = vmatprep.subr.bf16.mxu0 %v6449_v14  ;;  %7912 = vst [vmem:[#allocation8_spill] sm:$0xff] %v7049_v11 }
  0xcd   : > { %5962 = vmatmul.mubr.bf16.gmra.mxu1 %v6896_v15  ;;  %6026 = vmatmul.mubr.bf16.gmra.mxu0 %v6896_v15 }
  0xce   : > { %5965 = vmatprep.mubr.bf16.mxu1 %v6899_v16  ;;  %6029 = vmatprep.mubr.bf16.mxu0 %v6899_v16 }
  0xcf   : > { %6074 = vmatpush3.bf16.msra.mxu1 %v6448_v13  ;;  %6138 = vmatpush3.bf16.msra.mxu0 %v6449_v14 }
  0xd0   : > { %6075 = vmatprep.subr.bf16.mxu1 %v6452_v17  ;;  %6139 = vmatprep.subr.bf16.mxu0 %v6453_v18 }
  0xd3   : > { %6076 = vmatpush3.bf16.msra.mxu1 %v6452_v17  ;;  %6140 = vmatpush3.bf16.msra.mxu0 %v6453_v18 }
  0xd4   : > { %6077 = vmatprep.subr.bf16.mxu1 %v6458_v19  ;;  %6141 = vmatprep.subr.bf16.mxu0 %v6459_v20 }
  0xd5   : > { %5966 = vmatmul.mubr.bf16.gmra.mxu1 %v6918_v21  ;;  %6030 = vmatmul.mubr.bf16.gmra.mxu0 %v6918_v21 }
  0xd6   : > { %5969 = vmatprep.mubr.bf16.mxu1 %v6921_v22  ;;  %6033 = vmatprep.mubr.bf16.mxu0 %v6921_v22 }
  0xd7   : > { %6078 = vmatpush3.bf16.msra.mxu1 %v6458_v19  ;;  %6142 = vmatpush3.bf16.msra.mxu0 %v6459_v20 }
  0xd8   : > { %6079 = vmatprep.subr.bf16.mxu1 %v6462_v23  ;;  %6143 = vmatprep.subr.bf16.mxu0 %v6463_v24 }
  0xdb   : > { %6080 = vmatpush3.bf16.msra.mxu1 %v6462_v23  ;;  %6144 = vmatpush3.bf16.msra.mxu0 %v6463_v24  ;;  %v7072_v24 = vld [vmem:[%s6583_s25 + $0xc4] sm:$0xff]  }
  0xdc   : > { %6193 = vmatprep.subr.bf16.mxu1 %v6936_v25  ;;  %6257 = vmatprep.subr.bf16.mxu0 %v6941_v26  ;;  %7917 = vst [vmem:[#allocation13_spill] sm:$0xff] %v7072_v24 }
  0xdd   : > { %5970 = vmatmul.mubr.bf16.gmra.mxu1 %v6944_v27  ;;  %6034 = vmatmul.mubr.bf16.gmra.mxu0 %v6944_v27 }
  0xde   : > { %5973 = vmatprep.mubr.bf16.mxu1 %v6947_v28  ;;  %6037 = vmatprep.mubr.bf16.mxu0 %v6947_v28 }
  0xe5   : > { %5974 = vmatmul.mubr.bf16.gmra.mxu1 %v6956_v29  ;;  %6038 = vmatmul.mubr.bf16.gmra.mxu0 %v6956_v29 }
  0xe6   : > { %5977 = vmatprep.mubr.bf16.mxu1 %v6959_v30  ;;  %6041 = vmatprep.mubr.bf16.mxu0 %v6959_v30 }
  0xed   : > { %v5763_v33 = vpop.f32.mrf.mxu0  ;;  %v5787_v34 = vpop.f32.mrf.mxu1  ;;  %5978 = vmatmul.mubr.bf16.gmra.mxu1 %v6966_v31  ;;  %6042 = vmatmul.mubr.bf16.gmra.mxu0 %v6966_v31 }
  0xee   : > { %5981 = vmatprep.mubr.bf16.mxu1 %v6969_v32  ;;  %6045 = vmatprep.mubr.bf16.mxu0 %v6969_v32  ;;  %v7075_v33 = vld [vmem:[%s6583_s25 + $0x18] sm:$0xff]  }
  0xef   : > { %v6975_v35 = vpop.f32.mrf.mxu0  ;;  %v6977_v36 = vpop.f32.mrf.mxu1  ;;  %7918 = vst [vmem:[#allocation14_spill] sm:$0xff] %v7075_v33 }
  0xf1   : > { %v6979_v37 = vpop.f32.mrf.mxu0  ;;  %v6981_v38 = vpop.f32.mrf.mxu1 }
  0xf3   : > { %v6989_v41 = vpop.f32.mrf.mxu0  ;;  %v6991_v42 = vpop.f32.mrf.mxu1 }
  0xf5   : > { %v6993_v43 = vpop.f32.mrf.mxu0  ;;  %v6995_v44 = vpop.f32.mrf.mxu1  ;;  %5982 = vmatmul.mubr.bf16.gmra.mxu1 %v6984_v39  ;;  %6046 = vmatmul.mubr.bf16.gmra.mxu0 %v6984_v39 }
  0xf6   : > { %5985 = vmatprep.mubr.bf16.mxu1 %v6987_v40  ;;  %6049 = vmatprep.mubr.bf16.mxu0 %v6987_v40 }
  0xf7   : > { %v7001_v45 = vpop.f32.mrf.mxu0  ;;  %v7003_v46 = vpop.f32.mrf.mxu1 }
  0xf9   : > { %v7005_v47 = vpop.f32.mrf.mxu0  ;;  %v7007_v48 = vpop.f32.mrf.mxu1 }
  0xfb   : > { %v532_v51 = vpop.f32.mrf.mxu0  ;;  %v620_v52 = vpop.f32.mrf.mxu1 }
  0xfd   : > { %v7015_v53 = vpop.f32.mrf.mxu0  ;;  %v7017_v54 = vpop.f32.mrf.mxu1  ;;  %5986 = vmatmul.mubr.bf16.gmra.mxu1 %v7010_v49  ;;  %6050 = vmatmul.mubr.bf16.gmra.mxu0 %v7010_v49 }
  0xfe   : > { %7906 = vst [vmem:[#allocation2_spill] sm:$0xff] %v7017_v54  ;;  %5989 = vmatprep.mubr.bf16.mxu1 %v7013_v50  ;;  %6053 = vmatprep.mubr.bf16.mxu0 %v7013_v50 }
  0xff   : > { %v544_v55 = vpop.f32.mrf.mxu0  ;;  %v632_v56 = vpop.f32.mrf.mxu1 }
 0x101   : > { %v5772_v57 = vpop.f32.mrf.mxu0  ;;  %v5796_v58 = vpop.f32.mrf.mxu1 }
 0x103   : > { %v7029_v61 = vpop.f32.mrf.mxu0  ;;  %v7031_v62 = vpop.f32.mrf.mxu1 }
 0x104   : > { %7908 = vst [vmem:[#allocation4_spill] sm:$0xff] %v7031_v62 }
 0x105   : > { %v5775_v63 = vpop.f32.mrf.mxu0  ;;  %v5799_v0 = vpop.f32.mrf.mxu1  ;;  %5990 = vmatmul.mubr.bf16.gmra.mxu1 %v7024_v59  ;;  %6054 = vmatmul.mubr.bf16.gmra.mxu0 %v7024_v59 }
 0x106   : > { %5993 = vmatprep.mubr.bf16.mxu1 %v7027_v60  ;;  %6057 = vmatprep.mubr.bf16.mxu0 %v7027_v60  ;;  %v7086_v0 = vld [vmem:[%s6583_s25 + $0x20] sm:$0xff]  }
 0x107   : > { %v7037_v1 = vpop.f32.mrf.mxu0  ;;  %v7039_v5 = vpop.f32.mrf.mxu1  ;;  %7920 = vst [vmem:[#allocation16_spill] sm:$0xff] %v7086_v0 }
 0x108   : > { %7909 = vst [vmem:[#allocation5_spill] sm:$0xff] %v7039_v5 }
 0x109   : > { %v7041_v6 = vpop.f32.mrf.mxu0  ;;  %v7043_v7 = vpop.f32.mrf.mxu1 }
 0x10a   : > { %7910 = vst [vmem:[#allocation6_spill] sm:$0xff] %v7043_v7 }
 0x10b   : > { %v7051_v12 = vpop.f32.mrf.mxu0  ;;  %v7053_v13 = vpop.f32.mrf.mxu1 }
 0x10c   : > { %7913 = vst [vmem:[#allocation9_spill] sm:$0xff] %v7053_v13  ;;  %v6482_v13 = vld [vmem:[%s7877_s1 + $0x1e0] sm:$0xff]  }
 0x10d   : > { %v7055_v14 = vpop.f32.mrf.mxu0  ;;  %v7057_v17 = vpop.f32.mrf.mxu1  ;;  %5994 = vmatmul.mubr.bf16.gmra.mxu1 %v7046_v8  ;;  %6058 = vmatmul.mubr.bf16.gmra.mxu0 %v7046_v8 }
 0x10e   : > { %7914 = vst [vmem:[#allocation10_spill] sm:$0xff] %v7057_v17  ;;  %5997 = vmatprep.mubr.bf16.mxu1 %v7049_v11  ;;  %6061 = vmatprep.mubr.bf16.mxu0 %v7049_v11 }
 0x10f   : > { %v7063_v18 = vpop.f32.mrf.mxu0  ;;  %v7065_v19 = vpop.f32.mrf.mxu1 }
 0x110   : > { %7915 = vst [vmem:[#allocation11_spill] sm:$0xff] %v7065_v19  ;;  %v7114_v19 = vld [vmem:[%s6583_s25 + $0x30] sm:$0xff]  }
 0x111   : > { %v7067_v20 = vpop.f32.mrf.mxu0  ;;  %v7069_v23 = vpop.f32.mrf.mxu1  ;;  %7923 = vst [vmem:[#allocation19_spill] sm:$0xff] %v7114_v19 }
 0x112   : > { %7916 = vst [vmem:[#allocation12_spill] sm:$0xff] %v7069_v23  ;;  %v7093_v23 = vld [vmem:[%s6583_s25 + $0x28] sm:$0xff]  }
 0x113   : > { %v576_v34 = vpop.f32.mrf.mxu0  ;;  %v664_v51 = vpop.f32.mrf.mxu1  ;;  %7922 = vst [vmem:[#allocation18_spill] sm:$0xff] %v7093_v23 }
 0x115   : > { %v7077_v52 = vpop.f32.mrf.mxu0  ;;  %v7079_v55 = vpop.f32.mrf.mxu1  ;;  %5998 = vmatmul.mubr.bf16.gmra.mxu1 %v7072_v24  ;;  %6062 = vmatmul.mubr.bf16.gmra.mxu0 %v7072_v24 }
 0x116   : > { %7919 = vst [vmem:[#allocation15_spill] sm:$0xff] %v7079_v55  ;;  %6081 = vmatprep.mubr.bf16.mxu1 %v6845_v2  ;;  %6145 = vmatprep.mubr.bf16.mxu0 %v7075_v33  ;;  %v6472_v55 = vld [vmem:[%s7877_s1 + $0x1f0] sm:$0xff]  }
 0x117   : > { %v588_v56 = vpop.f32.mrf.mxu0  ;;  %v676_v57 = vpop.f32.mrf.mxu1  ;;  %v6473_v2 = vld [vmem:[%s7877_s1 + $0x230] sm:$0xff]  }
 0x119   : > { %v5784_v58 = vpop.f32.mrf.mxu0  ;;  %v5808_v63 = vpop.f32.mrf.mxu1 }
 0x11b   : > { %v7088_v34 = vpop.f32.mrf.mxu0  ;;  %v7090_v51 = vpop.f32.mrf.mxu1 }
 0x11c   : > { %7921 = vst [vmem:[#allocation17_spill] sm:$0xff] %v7090_v51  ;;  %v6478_v51 = vld [vmem:[%s7877_s1 + $0x1e8] sm:$0xff]  }
 0x11d   : > { %v5827_v56 = vpop.f32.mrf.mxu1  ;;  %v5891_v57 = vpop.f32.mrf.mxu0  ;;  %6082 = vmatmul.mubr.bf16.vlgmr.msra.gmra.mxu1 %v6852_v3  ;;  %6146 = vmatmul.mubr.bf16.vlgmr.msra.gmra.mxu0 %v7086_v0  ;;  %v6479_v3 = vld [vmem:[%s7877_s1 + $0x228] sm:$0xff]  }
 0x11e   : > { %6194 = vmatpush3.bf16.msra.mxu1 %v6936_v25  ;;  %6258 = vmatpush3.bf16.msra.mxu0 %v6941_v26  ;;  %v7117_v26 = vld [vmem:[%s6583_s25 + $0x38] sm:$0xff]   ;;  %v1031_v33 = vrot.slane %v5827_v56, 1  ;;  %v1514_v8 = vrot.slane %v5891_v57, 2 }
 0x11f   : > { %v788_v58 = vpop.f32.mrf.mxu1  ;;  %v1271_v63 = vpop.f32.mrf.mxu0  ;;  %6085 = vmatprep.mubr.bf16.mxu1 %v6855_v4  ;;  %6149 = vmatprep.mubr.bf16.mxu0 %v7093_v23  ;;  %7924 = vst [vmem:[#allocation20_spill] sm:$0xff] %v7117_v26 }
 0x120   : > { %6195 = vmatprep.subr.bf16.mxu1 %v6472_v55  ;;  %6259 = vmatprep.subr.bf16.mxu0 %v6473_v2  ;;  %v1028_v17 = vrot.slane %v788_v58, 1  ;;  %v1511_v5 = vrot.slane %v1271_v63, 2 }
 0x121   : > { %v5828_v0 = vpop.f32.mrf.mxu1  ;;  %v5892_v25 = vpop.f32.mrf.mxu0 }
 0x122   : > { %6196 = vmatpush3.bf16.msra.mxu1 %v6472_v55  ;;  %6260 = vmatpush3.bf16.msra.mxu0 %v6473_v2  ;;  %v6483_v55 = vld [vmem:[%s7877_s1 + $0x220] sm:$0xff]   ;;  %v1033_v58 = vrot.slane %v5828_v0, 1 }
 0x123   : > { %v791_v4 = vpop.f32.mrf.mxu1  ;;  %v1274_v23 = vpop.f32.mrf.mxu0  ;;  %6197 = vmatprep.subr.bf16.mxu1 %v6478_v51  ;;  %6261 = vmatprep.subr.bf16.mxu0 %v6479_v3 }
 0x124   : > { %v1029_v24 = vrot.slane %v791_v4, 1  ;;  %v1512_v7 = vrot.slane %v1274_v23, 2 }
 0x125   : > { %v5831_v2 = vpop.f32.mrf.mxu1  ;;  %v5895_v11 = vpop.f32.mrf.mxu0  ;;  %6086 = vmatmul.mubr.bf16.gmra.mxu1 %v6874_v9  ;;  %6150 = vmatmul.mubr.bf16.gmra.mxu0 %v7114_v19  ;;  %v1516_v19 = vrot.slane %v5892_v25, 2 }
 0x126   : > { %v1032_v56 = vsel %vm1027_vm0, %v1029_v24, %v1031_v33  ;;  %6089 = vmatprep.mubr.bf16.mxu1 %v6877_v10  ;;  %6153 = vmatprep.mubr.bf16.mxu0 %v7117_v26  ;;  %v1030_v23 = vsel %vm1027_vm0, %v1028_v17, %v1029_v24  ;;  %v1513_v9 = vsel %vm1510_vm1, %v1511_v5, %v1512_v7  ;;  %v6488_v10 = vld [vmem:[%s7877_s1 + $0x1d8] sm:$0xff]   ;;  %v1038_v24 = vrot.slane %v5831_v2, 1 }
 0x127   : > { %v804_v4 = vpop.f32.mrf.mxu1  ;;  %v1287_v62 = vpop.f32.mrf.mxu0  ;;  %6198 = vmatpush3.bf16.msra.mxu1 %v6478_v51  ;;  %6262 = vmatpush3.bf16.msra.mxu0 %v6479_v3  ;;  %v1140_v63 = vadd.f32 %v1030_v23, %v6975_v35  ;;  %v1141_v57 = vadd.f32 %v1032_v56, %v6989_v41  ;;  %v6489_v17 = vld [vmem:[%s7877_s1 + $0x218] sm:$0xff]   ;;  %v1515_v35 = vsel %vm1510_vm1, %v1512_v7, %v1514_v8  ;;  %v1521_v5 = vrot.slane %v5895_v11, 2  ;;  %v7142_v51 = vld [vmem:[%s6583_s25 + $0x40] sm:$0xff]  }
 0x128   : > { %v1034_v33 = vrot.slane %v804_v4, 1  ;;  %v1517_v60 = vrot.slane %v1287_v62, 2  ;;  %6199 = vmatprep.subr.bf16.mxu1 %v6482_v13  ;;  %6263 = vmatprep.subr.bf16.mxu0 %v6483_v55  ;;  %v7150_v4 = vld [vmem:[%s6583_s25 + $0x48] sm:$0xff]  }
 0x129   : > { %v5832_v0 = vpop.f32.mrf.mxu1  ;;  %v5896_v41 = vpop.f32.mrf.mxu0  ;;  %v7144_v62 = vadd.f32 %v1513_v9, %v1140_v63  ;;  %v7146_v3 = vadd.f32 %v1515_v35, %v1141_v57 }
 0x12a   : > { %v1035_v25 = vsel %vm1027_vm0, %v1033_v58, %v1034_v33  ;;  %v1039_v56 = vrot.slane %v5832_v0, 1  ;;  %v1522_v23 = vrot.slane %v5896_v41, 2  ;;  %v1518_v26 = vsel %vm1510_vm1, %v1516_v19, %v1517_v60  ;;  %v6492_v58 = vld [vmem:[%s7877_s1 + $0x1d0] sm:$0xff]  }
 0x12b   : > { %v807_v54 = vpop.f32.mrf.mxu1  ;;  %v1290_v7 = vpop.f32.mrf.mxu0  ;;  %6200 = vmatpush3.bf16.msra.mxu1 %v6482_v13  ;;  %6264 = vmatpush3.bf16.msra.mxu0 %v6483_v55  ;;  %v1142_v8 = vadd.f32 %v6979_v37, %v1035_v25  ;;  %v6493_v19 = vld [vmem:[%s7877_s1 + $0x210] sm:$0xff]  }
 0x12c   : > { %v1040_v11 = vsel %vm1027_vm0, %v1038_v24, %v1039_v56  ;;  %v1036_v2 = vrot.slane %v807_v54, 1  ;;  %v1519_v63 = vrot.slane %v1290_v7, 2  ;;  %6201 = vmatprep.subr.bf16.mxu1 %v6488_v10  ;;  %6265 = vmatprep.subr.bf16.mxu0 %v6489_v17  ;;  %v1523_v9 = vsel %vm1510_vm1, %v1521_v5, %v1522_v23  ;;  %v7181_v25 = vld [vmem:[%s6583_s25 + $0x50] sm:$0xff]  }
 0x12d   : > { %v5835_v13 = vpop.f32.mrf.mxu1  ;;  %v5899_v55 = vpop.f32.mrf.mxu0  ;;  %6090 = vmatmul.mubr.bf16.gmra.mxu1 %v6896_v15  ;;  %6154 = vmatmul.mubr.bf16.gmra.mxu0 %v7142_v51  ;;  %v7164_v37 = vadd.f32 %v1518_v26, %v1142_v8  ;;  %v1144_v54 = vadd.f32 %v6993_v43, %v1040_v11 }
 0x12e   : > { %6093 = vmatprep.mubr.bf16.mxu1 %v6899_v16  ;;  %6157 = vmatprep.mubr.bf16.mxu0 %v7150_v4  ;;  %v1037_v57 = vsel %vm1027_vm0, %v1034_v33, %v1036_v2  ;;  %v1520_v35 = vsel %vm1510_vm1, %v1517_v60, %v1519_v63  ;;  %v6498_v16 = vld [vmem:[%s7877_s1 + $0x1c8] sm:$0xff]   ;;  %v1044_v33 = vrot.slane %v5835_v13, 1  ;;  %v7187_v2 = vld [vmem:[%s6583_s25 + $0x58] sm:$0xff]  }
 0x12f   : > { %v820_v24 = vpop.f32.mrf.mxu1  ;;  %v1303_v5 = vpop.f32.mrf.mxu0  ;;  %6202 = vmatpush3.bf16.msra.mxu1 %v6488_v10  ;;  %6266 = vmatpush3.bf16.msra.mxu0 %v6489_v17  ;;  %v7171_v15 = vadd.f32 %v1523_v9, %v1144_v54  ;;  %v1143_v26 = vadd.f32 %v1037_v57, %v7001_v45  ;;  %v6499_v60 = vld [vmem:[%s7877_s1 + $0x208] sm:$0xff]   ;;  %v1527_v10 = vrot.slane %v5899_v55, 2 }
 0x130   : > { %v1041_v0 = vrot.slane %v820_v24, 1  ;;  %v1524_v43 = vrot.slane %v1303_v5, 2  ;;  %6203 = vmatprep.subr.bf16.mxu1 %v6492_v58  ;;  %6267 = vmatprep.subr.bf16.mxu0 %v6493_v19 }
 0x131   : > { %v5836_v17 = vpop.f32.mrf.mxu1  ;;  %v5900_v41 = vpop.f32.mrf.mxu0  ;;  %v7183_v45 = vadd.f32 %v1520_v35, %v1143_v26 }
 0x132   : > { %v1042_v7 = vsel %vm1027_vm0, %v1039_v56, %v1041_v0  ;;  %v1046_v8 = vrot.slane %v5836_v17, 1  ;;  %v1529_v11 = vrot.slane %v5900_v41, 2  ;;  %v1525_v63 = vsel %vm1510_vm1, %v1522_v23, %v1524_v43  ;;  %v6502_v56 = vld [vmem:[%s7877_s1 + $0x1c0] sm:$0xff]  }
 0x133   : > { %v823_v9 = vpop.f32.mrf.mxu1  ;;  %v1306_v54 = vpop.f32.mrf.mxu0  ;;  %6204 = vmatpush3.bf16.msra.mxu1 %v6492_v58  ;;  %6268 = vmatpush3.bf16.msra.mxu0 %v6493_v19  ;;  %v1145_v13 = vadd.f32 %v7005_v47, %v1042_v7  ;;  %v6503_v23 = vld [vmem:[%s7877_s1 + $0x200] sm:$0xff]  }
 0x134   : > { %v1047_v55 = vsel %vm1027_vm0, %v1044_v33, %v1046_v8  ;;  %v1043_v57 = vrot.slane %v823_v9, 1  ;;  %v1526_v24 = vrot.slane %v1306_v54, 2  ;;  %6205 = vmatprep.subr.bf16.mxu1 %v6498_v16  ;;  %6269 = vmatprep.subr.bf16.mxu0 %v6499_v60  ;;  %v1530_v35 = vsel %vm1510_vm1, %v1527_v10, %v1529_v11 }
 0x135   : > { %v5839_v58 = vpop.f32.mrf.mxu1  ;;  %v5903_v19 = vpop.f32.mrf.mxu0  ;;  %6094 = vmatmul.mubr.bf16.gmra.mxu1 %v6918_v21  ;;  %6158 = vmatmul.mubr.bf16.gmra.mxu0 %v7181_v25  ;;  %v7201_v47 = vadd.f32 %v1525_v63, %v1145_v13  ;;  %v1147_v5 = vadd.f32 %v7015_v53, %v1047_v55 }
 0x136   : > { %v1045_v26 = vsel %vm1027_vm0, %v1043_v57, %v1044_v33  ;;  %6097 = vmatprep.mubr.bf16.mxu1 %v6921_v22  ;;  %6161 = vmatprep.mubr.bf16.mxu0 %v7187_v2  ;;  %v1528_v0 = vsel %vm1510_vm1, %v1526_v24, %v1527_v10  ;;  %v7212_v33 = vld [vmem:[%s6583_s25 + $0x60] sm:$0xff]   ;;  %v7217_v22 = vld [vmem:[%s6583_s25 + $0x68] sm:$0xff]   ;;  %v1534_v54 = vrot.slane %v5903_v19, 2 }
 0x137   : > { %v836_v43 = vpop.f32.mrf.mxu1  ;;  %v1319_v17 = vpop.f32.mrf.mxu0  ;;  %6206 = vmatpush3.bf16.msra.mxu1 %v6498_v16  ;;  %6270 = vmatpush3.bf16.msra.mxu0 %v6499_v60  ;;  %v7208_v21 = vadd.f32 %v1530_v35, %v1147_v5  ;;  %v1146_v41 = vadd.f32 %v1045_v26, %v7029_v61  ;;  %v1051_v16 = vrot.slane %v5839_v58, 1 }
 0x138   : > { %6207 = vmatprep.subr.bf16.mxu1 %v6502_v56  ;;  %6271 = vmatprep.subr.bf16.mxu0 %v6503_v23  ;;  %v1048_v60 = vrot.slane %v836_v43, 1  ;;  %v1531_v61 = vrot.slane %v1319_v17, 2 }
 0x139   : > { %v5840_v53 = vpop.f32.mrf.mxu1  ;;  %v5904_v7 = vpop.f32.mrf.mxu0  ;;  %v7214_v8 = vadd.f32 %v1528_v0, %v1146_v41 }
 0x13a   : > { %v1053_v5 = vrot.slane %v5840_v53, 1  ;;  %v1536_v26 = vrot.slane %v5904_v7, 2 }
 0x13b   : > { %v839_v11 = vpop.f32.mrf.mxu1  ;;  %v1322_v10 = vpop.f32.mrf.mxu0  ;;  %6208 = vmatpush3.bf16.msra.mxu1 %v6502_v56  ;;  %6272 = vmatpush3.bf16.msra.mxu0 %v6503_v23 }
 0x13c   : > { %v1049_v63 = vrot.slane %v839_v11, 1  ;;  %v1532_v9 = vrot.slane %v1322_v10, 2  ;;  %v7230_v10 = vld [vmem:[%s6583_s25 + $0x70] sm:$0xff]  }
 0x13d   : > { %v5843_v13 = vpop.f32.mrf.mxu1  ;;  %v5907_v55 = vpop.f32.mrf.mxu0  ;;  %6098 = vmatmul.mubr.bf16.gmra.mxu1 %v6944_v27  ;;  %6162 = vmatmul.mubr.bf16.gmra.mxu0 %v7212_v33 }
 0x13e   : > { %v1052_v57 = vsel %vm1027_vm0, %v1049_v63, %v1051_v16  ;;  %6101 = vmatprep.mubr.bf16.mxu1 %v6947_v28  ;;  %6165 = vmatprep.mubr.bf16.mxu0 %v7217_v22  ;;  %v1050_v24 = vsel %vm1027_vm0, %v1048_v60, %v1049_v63  ;;  %v1533_v58 = vsel %vm1510_vm1, %v1531_v61, %v1532_v9  ;;  %v1058_v43 = vrot.slane %v5843_v13, 1  ;;  %v7238_v61 = vld [vmem:[%s6583_s25 + $0x78] sm:$0xff]  }
 0x13f   : > { %v852_v56 = vpop.f32.mrf.mxu1  ;;  %v1335_v23 = vpop.f32.mrf.mxu0  ;;  %v1148_v35 = vadd.f32 %v1050_v24, %v7037_v1  ;;  %v1149_v19 = vadd.f32 %v1052_v57, %v7051_v12  ;;  %v1535_v27 = vsel %vm1510_vm1, %v1532_v9, %v1534_v54  ;;  %v1541_v17 = vrot.slane %v5907_v55, 2 }
 0x140   : > { %v1054_v0 = vrot.slane %v852_v56, 1  ;;  %v1537_v28 = vrot.slane %v1335_v23, 2 }
 0x141   : > { %v5844_v41 = vpop.f32.mrf.mxu1  ;;  %v5908_v11 = vpop.f32.mrf.mxu0  ;;  %v7232_v16 = vadd.f32 %v1533_v58, %v1148_v35  ;;  %v7234_v1 = vadd.f32 %v1535_v27, %v1149_v19 }
 0x142   : > { %v1055_v60 = vsel %vm1027_vm0, %v1053_v5, %v1054_v0  ;;  %v1059_v12 = vrot.slane %v5844_v41, 1  ;;  %v1542_v63 = vrot.slane %v5908_v11, 2  ;;  %v1538_v53 = vsel %vm1510_vm1, %v1536_v26, %v1537_v28 }
 0x143   : > { %v855_v7 = vpop.f32.mrf.mxu1  ;;  %v1338_v9 = vpop.f32.mrf.mxu0  ;;  %v1150_v54 = vadd.f32 %v7041_v6, %v1055_v60 }
 0x144   : > { %v1060_v13 = vsel %vm1027_vm0, %v1058_v43, %v1059_v12  ;;  %v1056_v55 = vrot.slane %v855_v7, 1  ;;  %v1539_v57 = vrot.slane %v1338_v9, 2  ;;  %v1543_v24 = vsel %vm1510_vm1, %v1541_v17, %v1542_v63  ;;  %v7263_v9 = vld [vmem:[%s6583_s25 + $0x88] sm:$0xff]  }
 0x145   : > { %v5847_v56 = vpop.f32.mrf.mxu1  ;;  %v5911_v23 = vpop.f32.mrf.mxu0  ;;  %6102 = vmatmul.mubr.bf16.gmra.mxu1 %v6956_v29  ;;  %6166 = vmatmul.mubr.bf16.gmra.mxu0 %v7230_v10  ;;  %v7246_v35 = vadd.f32 %v1538_v53, %v1150_v54  ;;  %v1152_v58 = vadd.f32 %v7055_v14, %v1060_v13 }
 0x146   : > { %6105 = vmatprep.mubr.bf16.mxu1 %v6959_v30  ;;  %6169 = vmatprep.mubr.bf16.mxu0 %v7238_v61  ;;  %v1057_v6 = vsel %vm1027_vm0, %v1054_v0, %v1056_v55  ;;  %v1540_v19 = vsel %vm1510_vm1, %v1537_v28, %v1539_v57  ;;  %v1064_v41 = vrot.slane %v5847_v56, 1  ;;  %v1547_v11 = vrot.slane %v5911_v23, 2  ;;  %v7257_v30 = vld [vmem:[%s6583_s25 + $0x80] sm:$0xff]  }
 0x147   : > { %v868_v27 = vpop.f32.mrf.mxu1  ;;  %v1351_v5 = vpop.f32.mrf.mxu0  ;;  %v7253_v26 = vadd.f32 %v1543_v24, %v1152_v58  ;;  %v1151_v29 = vadd.f32 %v1057_v6, %v7063_v18 }
 0x148   : > { %v1061_v43 = vrot.slane %v868_v27, 1  ;;  %v1544_v17 = vrot.slane %v1351_v5, 2 }
 0x149   : > { %v5848_v14 = vpop.f32.mrf.mxu1  ;;  %v5912_v60 = vpop.f32.mrf.mxu0  ;;  %v7259_v53 = vadd.f32 %v1540_v19, %v1151_v29 }
 0x14a   : > { %v1062_v0 = vsel %vm1027_vm0, %v1059_v12, %v1061_v43  ;;  %v1066_v28 = vrot.slane %v5848_v14, 1  ;;  %v1549_v7 = vrot.slane %v5912_v60, 2  ;;  %v1545_v54 = vsel %vm1510_vm1, %v1542_v63, %v1544_v17  ;;  %v7282_v14 = vld [vmem:[%s6583_s25 + $0x90] sm:$0xff]  }
 0x14b   : > { %v871_v13 = vpop.f32.mrf.mxu1  ;;  %v1354_v18 = vpop.f32.mrf.mxu0  ;;  %v1153_v55 = vadd.f32 %v7067_v20, %v1062_v0 }
 0x14c   : > { %v1067_v57 = vsel %vm1027_vm0, %v1064_v41, %v1066_v28  ;;  %v1063_v24 = vrot.slane %v871_v13, 1  ;;  %v1546_v56 = vrot.slane %v1354_v18, 2  ;;  %v1550_v23 = vsel %vm1510_vm1, %v1547_v11, %v1549_v7 }
 0x14d   : > { %v5851_v58 = vpop.f32.mrf.mxu1  ;;  %v5915_v6 = vpop.f32.mrf.mxu0  ;;  %6106 = vmatmul.mubr.bf16.gmra.mxu1 %v6966_v31  ;;  %6170 = vmatmul.mubr.bf16.gmra.mxu0 %v7257_v30  ;;  %v7271_v12 = vadd.f32 %v1545_v54, %v1153_v55  ;;  %v1155_v63 = vadd.f32 %v7077_v52, %v1067_v57  ;;  %v7287_v52 = vld [vmem:[%s6583_s25 + $0x98] sm:$0xff]  }
 0x14e   : > { %v1065_v20 = vsel %vm1027_vm0, %v1063_v24, %v1064_v41  ;;  %6109 = vmatprep.mubr.bf16.mxu1 %v6969_v32  ;;  %6173 = vmatprep.mubr.bf16.mxu0 %v7263_v9  ;;  %v1548_v19 = vsel %vm1510_vm1, %v1546_v56, %v1547_v11  ;;  %v1071_v0 = vrot.slane %v5851_v58, 1  ;;  %v1554_v54 = vrot.slane %v5915_v6, 2 }
 0x14f   : > { %v884_v27 = vpop.f32.mrf.mxu1  ;;  %v1367_v5 = vpop.f32.mrf.mxu0  ;;  %v7278_v29 = vadd.f32 %v1550_v23, %v1155_v63  ;;  %v1154_v31 = vadd.f32 %v1065_v20, %v7088_v34 }
 0x150   : > { %v1068_v28 = vrot.slane %v884_v27, 1  ;;  %v1551_v13 = vrot.slane %v1367_v5, 2 }
 0x151   : > { %v5852_v43 = vpop.f32.mrf.mxu1  ;;  %v5916_v17 = vpop.f32.mrf.mxu0  ;;  %v7284_v60 = vadd.f32 %v1548_v19, %v1154_v31 }
 0x152   : > { %v1073_v63 = vrot.slane %v5852_v43, 1  ;;  %v1556_v20 = vrot.slane %v5916_v17, 2 }
 0x153   : > { %v887_v41 = vpop.f32.mrf.mxu1  ;;  %v1370_v32 = vpop.f32.mrf.mxu0 }
 0x154   : > { %v1069_v7 = vrot.slane %v887_v41, 1  ;;  %v1552_v11 = vrot.slane %v1370_v32, 2  ;;  %v7300_v32 = vld [vmem:[%s6583_s25 + $0xa0] sm:$0xff]  }
 0x155   : > { %v5855_v18 = vpop.f32.mrf.mxu1  ;;  %v5919_v55 = vpop.f32.mrf.mxu0  ;;  %6110 = vmatmul.mubr.bf16.gmra.mxu1 %v6984_v39  ;;  %6174 = vmatmul.mubr.bf16.gmra.mxu0 %v7282_v14 }
 0x156   : > { %v1072_v34 = vsel %vm1027_vm0, %v1069_v7, %v1071_v0  ;;  %6113 = vmatprep.mubr.bf16.mxu1 %v6987_v40  ;;  %6177 = vmatprep.mubr.bf16.mxu0 %v7287_v52  ;;  %v1070_v57 = vsel %vm1027_vm0, %v1068_v28, %v1069_v7  ;;  %v1553_v58 = vsel %vm1510_vm1, %v1551_v13, %v1552_v11  ;;  %v1078_v27 = vrot.slane %v5855_v18, 1  ;;  %v7308_v13 = vld [vmem:[%s6583_s25 + $0xa8] sm:$0xff]  }
 0x157   : > { %v900_v24 = vpop.f32.mrf.mxu1  ;;  %v1383_v56 = vpop.f32.mrf.mxu0  ;;  %v1156_v23 = vadd.f32 %v1070_v57, %v6977_v36  ;;  %v1157_v6 = vadd.f32 %v1072_v34, %v6991_v42  ;;  %v1555_v39 = vsel %vm1510_vm1, %v1552_v11, %v1554_v54  ;;  %v1561_v5 = vrot.slane %v5919_v55, 2  ;;  %7925 = vst [vmem:[#allocation21_spill] sm:$0xff] %v7308_v13 }
 0x158   : > { %v1074_v19 = vrot.slane %v900_v24, 1  ;;  %v1557_v40 = vrot.slane %v1383_v56, 2 }
 0x159   : > { %v5856_v31 = vpop.f32.mrf.mxu1  ;;  %v5920_v41 = vpop.f32.mrf.mxu0  ;;  %v7302_v0 = vadd.f32 %v1553_v58, %v1156_v23  ;;  %v7304_v36 = vadd.f32 %v1555_v39, %v1157_v6 }
 0x15a   : > { %v1075_v28 = vsel %vm1027_vm0, %v1073_v63, %v1074_v19  ;;  %v1079_v42 = vrot.slane %v5856_v31, 1  ;;  %v1562_v7 = vrot.slane %v5920_v41, 2  ;;  %v1558_v43 = vsel %vm1510_vm1, %v1556_v20, %v1557_v40 }
 0x15b   : > { %v903_v17 = vpop.f32.mrf.mxu1  ;;  %v1386_v11 = vpop.f32.mrf.mxu0  ;;  %v1158_v54 = vadd.f32 %v6981_v38, %v1075_v28 }
 0x15c   : > { %v1080_v18 = vsel %vm1027_vm0, %v1078_v27, %v1079_v42  ;;  %v1076_v55 = vrot.slane %v903_v17, 1  ;;  %v1559_v34 = vrot.slane %v1386_v11, 2  ;;  %v1563_v57 = vsel %vm1510_vm1, %v1561_v5, %v1562_v7  ;;  %v7333_v11 = vld [vmem:[%s6583_s25 + $0xb8] sm:$0xff]  }
 0x15d   : > { %v5859_v24 = vpop.f32.mrf.mxu1  ;;  %v5923_v56 = vpop.f32.mrf.mxu0  ;;  %6114 = vmatmul.mubr.bf16.gmra.mxu1 %v7010_v49  ;;  %6178 = vmatmul.mubr.bf16.gmra.mxu0 %v7300_v32  ;;  %v7316_v23 = vadd.f32 %v1558_v43, %v1158_v54  ;;  %v1160_v58 = vadd.f32 %v6995_v44, %v1080_v18  ;;  %7927 = vst [vmem:[#allocation23_spill] sm:$0xff] %v7333_v11 }
 0x15e   : > { %6117 = vmatprep.mubr.bf16.mxu1 %v7013_v50  ;;  %6181 = vmatprep.mubr.bf16.mxu0 %v7308_v13  ;;  %v1077_v38 = vsel %vm1027_vm0, %v1074_v19, %v1076_v55  ;;  %v1560_v6 = vsel %vm1510_vm1, %v1557_v40, %v1559_v34  ;;  %v1084_v31 = vrot.slane %v5859_v24, 1  ;;  %v1567_v41 = vrot.slane %v5923_v56, 2  ;;  %v7327_v50 = vld [vmem:[%s6583_s25 + $0xb0] sm:$0xff]  }
 0x15f   : > { %v916_v39 = vpop.f32.mrf.mxu1  ;;  %v1399_v63 = vpop.f32.mrf.mxu0  ;;  %v7323_v20 = vadd.f32 %v1563_v57, %v1160_v58  ;;  %v1159_v49 = vadd.f32 %v1077_v38, %v7003_v46  ;;  %7926 = vst [vmem:[#allocation22_spill] sm:$0xff] %v7327_v50  ;;  %v7370_v13 = vld [vmem:[%s6583_s25 + $0xd0] sm:$0xff]  }
 0x160   : > { %v1081_v27 = vrot.slane %v916_v39, 1  ;;  %v1564_v5 = vrot.slane %v1399_v63, 2  ;;  %v7929_v39 = vld [vmem:[#allocation3_spill] sm:$0xff] }
 0x161   : > { %v5860_v44 = vpop.f32.mrf.mxu1  ;;  %v5924_v28 = vpop.f32.mrf.mxu0  ;;  %v7329_v43 = vadd.f32 %v1560_v6, %v1159_v49 }
 0x162   : > { %v1082_v19 = vsel %vm1027_vm0, %v1079_v42, %v1081_v27  ;;  %v1086_v40 = vrot.slane %v5860_v44, 1  ;;  %v1569_v17 = vrot.slane %v5924_v28, 2  ;;  %v1565_v54 = vsel %vm1510_vm1, %v1562_v7, %v1564_v5  ;;  %v7928_v7 = vld [vmem:[#allocation2_spill] sm:$0xff] }
 0x163   : > { %v919_v18 = vpop.f32.mrf.mxu1  ;;  %v1402_v46 = vpop.f32.mrf.mxu0  ;;  %v1161_v55 = vadd.f32 %v7007_v48, %v1082_v19 }
 0x164   : > { %v1087_v34 = vsel %vm1027_vm0, %v1084_v31, %v1086_v40  ;;  %v1083_v57 = vrot.slane %v919_v18, 1  ;;  %v1566_v24 = vrot.slane %v1402_v46, 2  ;;  %v1570_v56 = vsel %vm1510_vm1, %v1567_v41, %v1569_v17  ;;  %v7352_v40 = vld [vmem:[%s6583_s25 + $0xc0] sm:$0xff]  }
 0x165   : > { %v5863_v58 = vpop.f32.mrf.mxu1  ;;  %v5927_v38 = vpop.f32.mrf.mxu0  ;;  %6118 = vmatmul.mubr.bf16.gmra.mxu1 %v7024_v59  ;;  %6182 = vmatmul.mubr.bf16.gmra.mxu0 %v7327_v50  ;;  %v7341_v42 = vadd.f32 %v1565_v54, %v1161_v55  ;;  %v1163_v6 = vadd.f32 %v7928_v7, %v1087_v34  ;;  %v7930_v59 = vld [vmem:[#allocation4_spill] sm:$0xff]  ;;  %7931 = vst [vmem:[#allocation2_spill] sm:$0xff] %v7352_v40  ;;  %v7357_v54 = vld [vmem:[%s6583_s25 + $0xc8] sm:$0xff]  }
 0x166   : > { %6121 = vmatprep.mubr.bf16.mxu1 %v7929_v39  ;;  %6185 = vmatprep.mubr.bf16.mxu0 %v7333_v11  ;;  %v1085_v48 = vsel %vm1027_vm0, %v1083_v57, %v1084_v31  ;;  %v1568_v63 = vsel %vm1510_vm1, %v1566_v24, %v1567_v41  ;;  %7933 = vst [vmem:[#allocation4_spill] sm:$0xff] %v7357_v54  ;;  %v1091_v57 = vrot.slane %v5863_v58, 1  ;;  %v1574_v24 = vrot.slane %v5927_v38, 2  ;;  %v7935_v39 = vld [vmem:[#allocation8_spill] sm:$0xff]  ;;  %v7936_v58 = vld [vmem:[#allocation5_spill] sm:$0xff] }
 0x167   : > { %v932_v49 = vpop.f32.mrf.mxu1  ;;  %v1415_v27 = vpop.f32.mrf.mxu0  ;;  %v7348_v5 = vadd.f32 %v1570_v56, %v1163_v6  ;;  %v1162_v44 = vadd.f32 %v1085_v48, %v7930_v59  ;;  %v7934_v6 = vld [vmem:[#allocation7_spill] sm:$0xff] }
 0x168   : > { %v1088_v55 = vrot.slane %v932_v49, 1  ;;  %v1571_v31 = vrot.slane %v1415_v27, 2  ;;  %7938 = vst [vmem:[#allocation7_spill] sm:$0xff] %v7370_v13 }
 0x169   : > { %v5864_v28 = vpop.f32.mrf.mxu1  ;;  %v5928_v19 = vpop.f32.mrf.mxu0  ;;  %v7354_v17 = vadd.f32 %v1568_v63, %v1162_v44 }
 0x16a   : > { %v1093_v49 = vrot.slane %v5864_v28, 1 }
 0x16b   : > { %7932 = vst [vmem:[#allocation3_spill] sm:$0xff] %v7354_v17  ;;  %v935_v18 = vpop.f32.mrf.mxu1  ;;  %v1418_v46 = vpop.f32.mrf.mxu0 }
 0x16c   : > { %v1089_v34 = vrot.slane %v935_v18, 1  ;;  %v1572_v41 = vrot.slane %v1418_v46, 2  ;;  %v1576_v46 = vrot.slane %v5928_v19, 2 }
 0x16d   : > { %v5867_v56 = vpop.f32.mrf.mxu1  ;;  %v5931_v7 = vpop.f32.mrf.mxu0  ;;  %6122 = vmatmul.mubr.bf16.gmra.mxu1 %v7934_v6  ;;  %6186 = vmatmul.mubr.bf16.gmra.mxu0 %v7352_v40 }
 0x16e   : > { %6125 = vmatprep.mubr.bf16.mxu1 %v7935_v39  ;;  %6189 = vmatprep.mubr.bf16.mxu0 %v7357_v54  ;;  %v1090_v48 = vsel %vm1027_vm0, %v1088_v55, %v1089_v34  ;;  %v1573_v63 = vsel %vm1510_vm1, %v1571_v31, %v1572_v41  ;;  %v1092_v44 = vsel %vm1027_vm0, %v1089_v34, %v1091_v57  ;;  %v7937_v39 = vld [vmem:[#allocation9_spill] sm:$0xff]  ;;  %v1098_v54 = vrot.slane %v5867_v56, 1  ;;  %v7939_v57 = vld [vmem:[#allocation6_spill] sm:$0xff] }
 0x16f   : > { %v948_v27 = vpop.f32.mrf.mxu1  ;;  %v1431_v59 = vpop.f32.mrf.mxu0  ;;  %v1164_v38 = vadd.f32 %v1090_v48, %v7936_v58  ;;  %v1575_v18 = vsel %vm1510_vm1, %v1572_v41, %v1574_v24  ;;  %v1165_v11 = vadd.f32 %v1092_v44, %v7937_v39  ;;  %v1581_v50 = vrot.slane %v5931_v7, 2  ;;  %v7941_v39 = vld [vmem:[#allocation13_spill] sm:$0xff] }
 0x170   : > { %v1094_v6 = vrot.slane %v948_v27, 1  ;;  %v1577_v40 = vrot.slane %v1431_v59, 2 }
 0x171   : > { %v5868_v55 = vpop.f32.mrf.mxu1  ;;  %v5932_v17 = vpop.f32.mrf.mxu0  ;;  %v7372_v28 = vadd.f32 %v1573_v63, %v1164_v38  ;;  %v7377_v27 = vadd.f32 %v1575_v18, %v1165_v11 }
 0x172   : > { %v1095_v31 = vsel %vm1027_vm0, %v1093_v49, %v1094_v6  ;;  %v1099_v48 = vrot.slane %v5868_v55, 1  ;;  %v1582_v58 = vrot.slane %v5932_v17, 2  ;;  %v1578_v34 = vsel %vm1510_vm1, %v1576_v46, %v1577_v40  ;;  %v7942_v49 = vld [vmem:[#allocation10_spill] sm:$0xff] }
 0x173   : > { %v951_v41 = vpop.f32.mrf.mxu1  ;;  %v1434_v19 = vpop.f32.mrf.mxu0  ;;  %v1166_v24 = vadd.f32 %v7939_v57, %v1095_v31  ;;  %7940 = vst [vmem:[#allocation8_spill] sm:$0xff] %v7377_v27  ;;  %v7943_v55 = vld [vmem:[#allocation14_spill] sm:$0xff] }
 0x174   : > { %v1100_v56 = vsel %vm1027_vm0, %v1098_v54, %v1099_v48  ;;  %v1096_v7 = vrot.slane %v951_v41, 1  ;;  %v1579_v59 = vrot.slane %v1434_v19, 2  ;;  %v1583_v44 = vsel %vm1510_vm1, %v1581_v50, %v1582_v58  ;;  %v7944_v41 = vld [vmem:[#allocation11_spill] sm:$0xff] }
 0x175   : > { %v5871_v63 = vpop.f32.mrf.mxu1  ;;  %v5935_v38 = vpop.f32.mrf.mxu0  ;;  %6126 = vmatmul.mubr.bf16.gmra.mxu1 %v7941_v39  ;;  %6190 = vmatmul.mubr.bf16.gmra.mxu0 %v7370_v13  ;;  %v7383_v17 = vadd.f32 %v1578_v34, %v1166_v24  ;;  %v1168_v46 = vadd.f32 %v7942_v49, %v1100_v56 }
 0x176   : > { %6209 = vmatprep.mubr.bf16.mxu1 %v7943_v55  ;;  %6273 = vmatprep.mubr.bf16.mxu0 %v7943_v55  ;;  %v1097_v11 = vsel %vm1027_vm0, %v1094_v6, %v1096_v7  ;;  %v1580_v54 = vsel %vm1510_vm1, %v1577_v40, %v1579_v59  ;;  %v1104_v34 = vrot.slane %v5871_v63, 1  ;;  %v1587_v24 = vrot.slane %v5935_v38, 2 }
 0x177   : > { %v964_v18 = vpop.f32.mrf.mxu1  ;;  %v1447_v50 = vpop.f32.mrf.mxu0  ;;  %v7390_v31 = vadd.f32 %v1583_v44, %v1168_v46  ;;  %v1167_v19 = vadd.f32 %v1097_v11, %v7944_v41  ;;  %v7945_v44 = vld [vmem:[#allocation12_spill] sm:$0xff] }
 0x178   : > { %v1101_v57 = vrot.slane %v964_v18, 1  ;;  %v1584_v39 = vrot.slane %v1447_v50, 2 }
 0x179   : > { %v5872_v13 = vpop.f32.mrf.mxu1  ;;  %v5936_v56 = vpop.f32.mrf.mxu0  ;;  %v7393_v49 = vadd.f32 %v1580_v54, %v1167_v19  ;;  %v7946_v54 = vld [vmem:[#allocation16_spill] sm:$0xff]  ;;  %v7948_v19 = vld [vmem:[#allocation18_spill] sm:$0xff] }
 0x17a   : > { %v1102_v55 = vsel %vm1027_vm0, %v1099_v48, %v1101_v57  ;;  %v1106_v27 = vrot.slane %v5872_v13, 1  ;;  %v1589_v6 = vrot.slane %v5936_v56, 2  ;;  %v1585_v40 = vsel %vm1510_vm1, %v1582_v58, %v1584_v39  ;;  %v7947_v48 = vld [vmem:[#allocation15_spill] sm:$0xff] }
 0x17b   : > { %v967_v7 = vpop.f32.mrf.mxu1  ;;  %v1450_v59 = vpop.f32.mrf.mxu0  ;;  %v1169_v46 = vadd.f32 %v7945_v44, %v1102_v55 }
 0x17c   : > { %v1107_v11 = vsel %vm1027_vm0, %v1104_v34, %v1106_v27  ;;  %v1103_v18 = vrot.slane %v967_v7, 1  ;;  %v1586_v50 = vrot.slane %v1450_v59, 2  ;;  %v1590_v63 = vsel %vm1510_vm1, %v1587_v24, %v1589_v6  ;;  %v7949_v6 = vld [vmem:[#allocation17_spill] sm:$0xff] }
 0x17d   : > { %v5955_v38 = vpop.f32.mrf.mxu1  ;;  %v6019_v41 = vpop.f32.mrf.mxu0  ;;  %6210 = vmatmul.mubr.bf16.vlgmr.msra.gmra.mxu1 %v7946_v54  ;;  %6274 = vmatmul.mubr.bf16.vlgmr.msra.gmra.mxu0 %v7946_v54  ;;  %v7402_v13 = vadd.f32 %v1585_v40, %v1169_v46  ;;  %v1171_v58 = vadd.f32 %v7947_v48, %v1107_v11 }
 0x17e   : > { %6213 = vmatprep.mubr.bf16.mxu1 %v7948_v19  ;;  %6277 = vmatprep.mubr.bf16.mxu0 %v7948_v19  ;;  %v1105_v27 = vsel %vm1027_vm0, %v1103_v18, %v1104_v34  ;;  %v1588_v57 = vsel %vm1510_vm1, %v1586_v50, %v1587_v24  ;;  %v2495_v48 = vrot.slane %v6019_v41, 1 }
 0x17f   : > { %v1947_v39 = vpop.f32.mrf.mxu1  ;;  %v2253_v56 = vpop.f32.mrf.mxu0  ;;  %v7409_v55 = vadd.f32 %v1590_v63, %v1171_v58  ;;  %v1170_v7 = vadd.f32 %v1105_v27, %v7949_v6  ;;  %v7950_v58 = vld [vmem:[#allocation19_spill] sm:$0xff]  ;;  %v7951_v27 = vld [vmem:[#allocation20_spill] sm:$0xff] }
 0x180   : > { %v2122_v59 = vadd.f32 %v1947_v39, %v7144_v62  ;;  %v2492_v34 = vrot.slane %v2253_v56, 1 }
 0x181   : > { %v5956_v40 = vpop.f32.mrf.mxu1  ;;  %v6020_v44 = vpop.f32.mrf.mxu0  ;;  %v7413_v46 = vadd.f32 %v1588_v57, %v1170_v7 }
 0x182   : > { %v2124_v11 = vadd.f32 %v5956_v40, %v7164_v37  ;;  %v2497_v56 = vrot.slane %v6020_v44, 1 }
 0x183   : > { %v1950_v38 = vpop.f32.mrf.mxu1  ;;  %v2256_v54 = vpop.f32.mrf.mxu0 }
 0x184   : > { %v2123_v24 = vadd.f32 %v1950_v38, %v7146_v3  ;;  %v2493_v18 = vrot.slane %v2256_v54, 1 }
 0x185   : > { %v5959_v50 = vpop.f32.mrf.mxu1  ;;  %v6023_v63 = vpop.f32.mrf.mxu0  ;;  %6214 = vmatmul.mubr.bf16.gmra.mxu1 %v7950_v58  ;;  %6278 = vmatmul.mubr.bf16.gmra.mxu0 %v7950_v58 }
 0x186   : > { %v2494_v62 = vsel %vm1027_vm0, %v2492_v34, %v2493_v18  ;;  %v2126_v19 = vadd.f32 %v5959_v50, %v7171_v15  ;;  %6217 = vmatprep.mubr.bf16.mxu1 %v7951_v27  ;;  %6281 = vmatprep.mubr.bf16.mxu0 %v7951_v27  ;;  %v2496_v37 = vsel %vm1027_vm0, %v2493_v18, %v2495_v48  ;;  %v2502_v54 = vrot.slane %v6023_v63, 1 }
 0x187   : > { %v7424_v41 = vadd.f32 %v2494_v62, %v2122_v59  ;;  %v1962_v3 = vpop.f32.mrf.mxu1  ;;  %v2269_v57 = vpop.f32.mrf.mxu0  ;;  %v7426_v39 = vadd.f32 %v2496_v37, %v2123_v24 }
 0x188   : > { %v2125_v6 = vadd.f32 %v1962_v3, %v7183_v45  ;;  %v2498_v7 = vrot.slane %v2269_v57, 1 }
 0x189   : > { %v5960_v40 = vpop.f32.mrf.mxu1  ;;  %v6024_v38 = vpop.f32.mrf.mxu0 }
 0x18a   : > { %v2499_v15 = vsel %vm1027_vm0, %v2497_v56, %v2498_v7  ;;  %v2127_v34 = vadd.f32 %v5960_v40, %v7201_v47  ;;  %v2503_v50 = vrot.slane %v6024_v38, 1 }
 0x18b   : > { %v7431_v58 = vadd.f32 %v2499_v15, %v2124_v11  ;;  %v1965_v59 = vpop.f32.mrf.mxu1  ;;  %v2272_v48 = vpop.f32.mrf.mxu0 }
 0x18c   : > { %v2504_v18 = vsel %vm1027_vm0, %v2502_v54, %v2503_v50  ;;  %v2500_v24 = vrot.slane %v2272_v48, 1 }
 0x18d   : > { %v7434_v62 = vadd.f32 %v2504_v18, %v2126_v19  ;;  %v5963_v44 = vpop.f32.mrf.mxu1  ;;  %v6027_v45 = vpop.f32.mrf.mxu0  ;;  %6218 = vmatmul.mubr.bf16.gmra.mxu1 %v7142_v51  ;;  %6282 = vmatmul.mubr.bf16.gmra.mxu0 %v7142_v51 }
 0x18e   : > { %v2501_v63 = vsel %vm1027_vm0, %v2498_v7, %v2500_v24  ;;  %v2129_v47 = vadd.f32 %v5963_v44, %v7208_v21  ;;  %6221 = vmatprep.mubr.bf16.mxu1 %v7150_v4  ;;  %6285 = vmatprep.mubr.bf16.mxu0 %v7150_v4  ;;  %v2508_v56 = vrot.slane %v6027_v45, 1 }
 0x18f   : > { %v7442_v11 = vadd.f32 %v2501_v63, %v2125_v6  ;;  %v1977_v27 = vpop.f32.mrf.mxu1  ;;  %v2285_v37 = vpop.f32.mrf.mxu0 }
 0x190   : > { %v2505_v19 = vrot.slane %v2285_v37, 1 }
 0x191   : > { %v5964_v3 = vpop.f32.mrf.mxu1  ;;  %v6028_v57 = vpop.f32.mrf.mxu0 }
 0x192   : > { %v2506_v40 = vsel %vm1027_vm0, %v2503_v50, %v2505_v19  ;;  %v2510_v38 = vrot.slane %v6028_v57, 1 }
 0x193   : > { %v7445_v51 = vadd.f32 %v2506_v40, %v2127_v34  ;;  %v1979_v7 = vpop.f32.mrf.mxu1  ;;  %v2288_v54 = vpop.f32.mrf.mxu0 }
 0x194   : > { %v2511_v21 = vsel %vm1027_vm0, %v2508_v56, %v2510_v38  ;;  %v2128_v15 = vadd.f32 %v1979_v7, %v7214_v8  ;;  %v2507_v4 = vrot.slane %v2288_v54, 1 }
 0x195   : > { %v7449_v6 = vadd.f32 %v2511_v21, %v2129_v47  ;;  %v5967_v59 = vpop.f32.mrf.mxu1  ;;  %v6031_v48 = vpop.f32.mrf.mxu0  ;;  %6222 = vmatmul.mubr.bf16.gmra.mxu1 %v7181_v25  ;;  %6286 = vmatmul.mubr.bf16.gmra.mxu0 %v7181_v25 }
 0x196   : > { %6225 = vmatprep.mubr.bf16.mxu1 %v7187_v2  ;;  %6289 = vmatprep.mubr.bf16.mxu0 %v7187_v2  ;;  %v2509_v34 = vsel %vm1027_vm0, %v2507_v4, %v2508_v56  ;;  %v2515_v37 = vrot.slane %v6031_v48, 1 }
 0x197   : > { %v1991_v50 = vpop.f32.mrf.mxu1  ;;  %v2301_v18 = vpop.f32.mrf.mxu0  ;;  %v7456_v24 = vadd.f32 %v2509_v34, %v2128_v15 }
 0x198   : > { %v2130_v8 = vadd.f32 %v1991_v50, %v7232_v16  ;;  %v2512_v25 = vrot.slane %v2301_v18, 1 }
 0x199   : > { %v5968_v44 = vpop.f32.mrf.mxu1  ;;  %v6032_v45 = vpop.f32.mrf.mxu0 }
 0x19a   : > { %v2132_v63 = vadd.f32 %v5968_v44, %v7246_v35  ;;  %v2517_v54 = vrot.slane %v6032_v45, 1 }
 0x19b   : > { %v1994_v47 = vpop.f32.mrf.mxu1  ;;  %v2304_v27 = vpop.f32.mrf.mxu0 }
 0x19c   : > { %v2131_v19 = vadd.f32 %v1994_v47, %v7234_v1  ;;  %v2513_v3 = vrot.slane %v2304_v27, 1 }
 0x19d   : > { %v5971_v2 = vpop.f32.mrf.mxu1  ;;  %v6035_v57 = vpop.f32.mrf.mxu0  ;;  %6226 = vmatmul.mubr.bf16.gmra.mxu1 %v7212_v33  ;;  %6290 = vmatmul.mubr.bf16.gmra.mxu0 %v7212_v33 }
 0x19e   : > { %v2514_v56 = vsel %vm1027_vm0, %v2512_v25, %v2513_v3  ;;  %v2134_v16 = vadd.f32 %v5971_v2, %v7253_v26  ;;  %6229 = vmatprep.mubr.bf16.mxu1 %v7217_v22  ;;  %6293 = vmatprep.mubr.bf16.mxu0 %v7217_v22  ;;  %v2516_v35 = vsel %vm1027_vm0, %v2513_v3, %v2515_v37  ;;  %v2522_v59 = vrot.slane %v6035_v57, 1 }
 0x19f   : > { %v7468_v40 = vadd.f32 %v2514_v56, %v2130_v8  ;;  %v2006_v1 = vpop.f32.mrf.mxu1  ;;  %v2317_v38 = vpop.f32.mrf.mxu0  ;;  %v7470_v7 = vadd.f32 %v2516_v35, %v2131_v19 }
 0x1a0   : > { %v2133_v21 = vadd.f32 %v2006_v1, %v7259_v53  ;;  %v2518_v33 = vrot.slane %v2317_v38, 1 }
 0x1a1   : > { %v5972_v15 = vpop.f32.mrf.mxu1  ;;  %v6036_v4 = vpop.f32.mrf.mxu0 }
 0x1a2   : > { %v2519_v26 = vsel %vm1027_vm0, %v2517_v54, %v2518_v33  ;;  %v2135_v48 = vadd.f32 %v5972_v15, %v7271_v12  ;;  %v2523_v22 = vrot.slane %v6036_v4, 1 }
 0x1a3   : > { %v7475_v34 = vadd.f32 %v2519_v26, %v2132_v63  ;;  %v2009_v50 = vpop.f32.mrf.mxu1  ;;  %v2320_v18 = vpop.f32.mrf.mxu0 }
 0x1a4   : > { %v2524_v8 = vsel %vm1027_vm0, %v2522_v59, %v2523_v22  ;;  %v2520_v44 = vrot.slane %v2320_v18, 1 }
 0x1a5   : > { %v7478_v47 = vadd.f32 %v2524_v8, %v2134_v16  ;;  %v5975_v45 = vpop.f32.mrf.mxu1  ;;  %v6039_v53 = vpop.f32.mrf.mxu0  ;;  %6230 = vmatmul.mubr.bf16.gmra.mxu1 %v7230_v10  ;;  %6294 = vmatmul.mubr.bf16.gmra.mxu0 %v7230_v10 }
 0x1a6   : > { %v2521_v27 = vsel %vm1027_vm0, %v2518_v33, %v2520_v44  ;;  %v2137_v12 = vadd.f32 %v5975_v45, %v7278_v29  ;;  %6233 = vmatprep.mubr.bf16.mxu1 %v7238_v61  ;;  %6297 = vmatprep.mubr.bf16.mxu0 %v7238_v61  ;;  %v2528_v57 = vrot.slane %v6039_v53, 1 }
 0x1a7   : > { %v7486_v63 = vadd.f32 %v2521_v27, %v2133_v21  ;;  %v2021_v37 = vpop.f32.mrf.mxu1  ;;  %v2333_v25 = vpop.f32.mrf.mxu0 }
 0x1a8   : > { %v2525_v19 = vrot.slane %v2333_v25, 1 }
 0x1a9   : > { %v5976_v3 = vpop.f32.mrf.mxu1  ;;  %v6040_v2 = vpop.f32.mrf.mxu0 }
 0x1aa   : > { %v2526_v56 = vsel %vm1027_vm0, %v2523_v22, %v2525_v19  ;;  %v2530_v16 = vrot.slane %v6040_v2, 1 }
 0x1ab   : > { %v7489_v10 = vadd.f32 %v2526_v56, %v2135_v48  ;;  %v2023_v35 = vpop.f32.mrf.mxu1  ;;  %v2336_v1 = vpop.f32.mrf.mxu0 }
 0x1ac   : > { %v2531_v29 = vsel %vm1027_vm0, %v2528_v57, %v2530_v16  ;;  %v2136_v38 = vadd.f32 %v2023_v35, %v7284_v60  ;;  %v2527_v61 = vrot.slane %v2336_v1, 1 }
 0x1ad   : > { %v7493_v54 = vadd.f32 %v2531_v29, %v2137_v12  ;;  %v5979_v21 = vpop.f32.mrf.mxu1  ;;  %v6043_v33 = vpop.f32.mrf.mxu0  ;;  %6234 = vmatmul.mubr.bf16.gmra.mxu1 %v7257_v30  ;;  %6298 = vmatmul.mubr.bf16.gmra.mxu0 %v7257_v30 }
 0x1ae   : > { %6237 = vmatprep.mubr.bf16.mxu1 %v7263_v9  ;;  %6301 = vmatprep.mubr.bf16.mxu0 %v7263_v9  ;;  %v2529_v15 = vsel %vm1027_vm0, %v2527_v61, %v2528_v57  ;;  %v2535_v44 = vrot.slane %v6043_v33, 1 }
 0x1af   : > { %v2035_v4 = vpop.f32.mrf.mxu1  ;;  %v2349_v59 = vpop.f32.mrf.mxu0  ;;  %v7500_v26 = vadd.f32 %v2529_v15, %v2136_v38 }
 0x1b0   : > { %v2138_v60 = vadd.f32 %v2035_v4, %v7302_v0  ;;  %v2532_v30 = vrot.slane %v2349_v59, 1  ;;  %v7952_v59 = vld [vmem:[#allocation21_spill] sm:$0xff] }
 0x1b1   : > { %v5980_v48 = vpop.f32.mrf.mxu1  ;;  %v6044_v22 = vpop.f32.mrf.mxu0 }
 0x1b2   : > { %v2140_v50 = vadd.f32 %v5980_v48, %v7316_v23  ;;  %v2537_v3 = vrot.slane %v6044_v22, 1 }
 0x1b3   : > { %v2038_v18 = vpop.f32.mrf.mxu1  ;;  %v2352_v8 = vpop.f32.mrf.mxu0 }
 0x1b4   : > { %v2139_v45 = vadd.f32 %v2038_v18, %v7304_v36  ;;  %v2533_v53 = vrot.slane %v2352_v8, 1 }
 0x1b5   : > { %v5983_v9 = vpop.f32.mrf.mxu1  ;;  %v6047_v27 = vpop.f32.mrf.mxu0  ;;  %6238 = vmatmul.mubr.bf16.gmra.mxu1 %v7282_v14  ;;  %6302 = vmatmul.mubr.bf16.gmra.mxu0 %v7282_v14 }
 0x1b6   : > { %v2534_v12 = vsel %vm1027_vm0, %v2532_v30, %v2533_v53  ;;  %v2142_v0 = vadd.f32 %v5983_v9, %v7323_v20  ;;  %6241 = vmatprep.mubr.bf16.mxu1 %v7287_v52  ;;  %6305 = vmatprep.mubr.bf16.mxu0 %v7287_v52  ;;  %v2536_v23 = vsel %vm1027_vm0, %v2533_v53, %v2535_v44  ;;  %v2542_v16 = vrot.slane %v6047_v27, 1  ;;  %v7953_v27 = vld [vmem:[#allocation3_spill] sm:$0xff] }
 0x1b7   : > { %v7512_v37 = vadd.f32 %v2534_v12, %v2138_v60  ;;  %v2050_v36 = vpop.f32.mrf.mxu1  ;;  %v2365_v25 = vpop.f32.mrf.mxu0  ;;  %v7514_v19 = vadd.f32 %v2536_v23, %v2139_v45 }
 0x1b8   : > { %v2141_v2 = vadd.f32 %v2050_v36, %v7329_v43  ;;  %v2538_v14 = vrot.slane %v2365_v25, 1 }
 0x1b9   : > { %v5984_v57 = vpop.f32.mrf.mxu1  ;;  %v6048_v56 = vpop.f32.mrf.mxu0 }
 0x1ba   : > { %v2539_v20 = vsel %vm1027_vm0, %v2537_v3, %v2538_v14  ;;  %v2143_v35 = vadd.f32 %v5984_v57, %v7341_v42  ;;  %v2543_v52 = vrot.slane %v6048_v56, 1  ;;  %v7954_v3 = vld [vmem:[#allocation22_spill] sm:$0xff] }
 0x1bb   : > { %v7519_v1 = vadd.f32 %v2539_v20, %v2140_v50  ;;  %v2053_v29 = vpop.f32.mrf.mxu1  ;;  %v2368_v38 = vpop.f32.mrf.mxu0 }
 0x1bc   : > { %v2544_v61 = vsel %vm1027_vm0, %v2542_v16, %v2543_v52  ;;  %v2540_v21 = vrot.slane %v2368_v38, 1 }
 0x1bd   : > { %v7522_v33 = vadd.f32 %v2544_v61, %v2142_v0  ;;  %v5987_v15 = vpop.f32.mrf.mxu1  ;;  %v6051_v43 = vpop.f32.mrf.mxu0  ;;  %6242 = vmatmul.mubr.bf16.gmra.mxu1 %v7300_v32  ;;  %6306 = vmatmul.mubr.bf16.gmra.mxu0 %v7300_v32 }
 0x1be   : > { %v2541_v4 = vsel %vm1027_vm0, %v2538_v14, %v2540_v21  ;;  %v2145_v42 = vadd.f32 %v5987_v15, %v7348_v5  ;;  %6245 = vmatprep.mubr.bf16.mxu1 %v7952_v59  ;;  %6309 = vmatprep.mubr.bf16.mxu0 %v7952_v59  ;;  %v2548_v44 = vrot.slane %v6051_v43, 1  ;;  %v7955_v14 = vld [vmem:[#allocation23_spill] sm:$0xff]  ;;  %v7956_v43 = vld [vmem:[#allocation8_spill] sm:$0xff] }
 0x1bf   : > { %v7530_v60 = vadd.f32 %v2541_v4, %v2141_v2  ;;  %v2065_v48 = vpop.f32.mrf.mxu1  ;;  %v2381_v22 = vpop.f32.mrf.mxu0 }
 0x1c0   : > { %v2545_v50 = vrot.slane %v2381_v22, 1  ;;  %v7957_v22 = vld [vmem:[#allocation2_spill] sm:$0xff] }
 0x1c1   : > { %v5988_v18 = vpop.f32.mrf.mxu1  ;;  %v6052_v8 = vpop.f32.mrf.mxu0 }
 0x1c2   : > { %v2546_v30 = vsel %vm1027_vm0, %v2543_v52, %v2545_v50  ;;  %v2550_v45 = vrot.slane %v6052_v8, 1 }
 0x1c3   : > { %v7533_v32 = vadd.f32 %v2546_v30, %v2143_v35  ;;  %v2067_v53 = vpop.f32.mrf.mxu1  ;;  %v2384_v9 = vpop.f32.mrf.mxu0 }
 0x1c4   : > { %v2551_v5 = vsel %vm1027_vm0, %v2548_v44, %v2550_v45  ;;  %v2144_v12 = vadd.f32 %v2067_v53, %v7953_v27  ;;  %v2547_v0 = vrot.slane %v2384_v9, 1 }
 0x1c5   : > { %v7537_v23 = vadd.f32 %v2551_v5, %v2145_v42  ;;  %v5991_v36 = vpop.f32.mrf.mxu1  ;;  %v6055_v25 = vpop.f32.mrf.mxu0  ;;  %6246 = vmatmul.mubr.bf16.gmra.mxu1 %v7954_v3  ;;  %6310 = vmatmul.mubr.bf16.gmra.mxu0 %v7954_v3 }
 0x1c6   : > { %v2549_v2 = vsel %vm1027_vm0, %v2547_v0, %v2548_v44  ;;  %6249 = vmatprep.mubr.bf16.mxu1 %v7955_v14  ;;  %6313 = vmatprep.mubr.bf16.mxu0 %v7955_v14  ;;  %v2555_v21 = vrot.slane %v6055_v25, 1 }
 0x1c7   : > { %v2079_v57 = vpop.f32.mrf.mxu1  ;;  %v2397_v56 = vpop.f32.mrf.mxu0  ;;  %v7544_v16 = vadd.f32 %v2549_v2, %v2144_v12 }
 0x1c8   : > { %v2146_v20 = vadd.f32 %v2079_v57, %v7372_v28  ;;  %v2552_v15 = vrot.slane %v2397_v56, 1 }
 0x1c9   : > { %v5992_v35 = vpop.f32.mrf.mxu1  ;;  %v6056_v52 = vpop.f32.mrf.mxu0 }
 0x1ca   : > { %v2148_v29 = vadd.f32 %v5992_v35, %v7383_v17  ;;  %v7958_v17 = vld [vmem:[#allocation4_spill] sm:$0xff]  ;;  %v2557_v53 = vrot.slane %v6056_v52, 1  ;;  %v7959_v52 = vld [vmem:[#allocation7_spill] sm:$0xff] }
 0x1cb   : > { %v2082_v38 = vpop.f32.mrf.mxu1  ;;  %v2400_v61 = vpop.f32.mrf.mxu0 }
 0x1cc   : > { %v2147_v4 = vadd.f32 %v2082_v38, %v7956_v43  ;;  %v2553_v42 = vrot.slane %v2400_v61, 1 }
 0x1cd   : > { %v5995_v59 = vpop.f32.mrf.mxu1  ;;  %v6059_v48 = vpop.f32.mrf.mxu0  ;;  %6250 = vmatmul.mubr.bf16.gmra.mxu1 %v7957_v22  ;;  %6314 = vmatmul.mubr.bf16.gmra.mxu0 %v7957_v22 }
 0x1ce   : > { %v2554_v50 = vsel %vm1027_vm0, %v2552_v15, %v2553_v42  ;;  %v2556_v28 = vsel %vm1027_vm0, %v2553_v42, %v2555_v21  ;;  %v2150_v18 = vadd.f32 %v5995_v59, %v7390_v31  ;;  %6253 = vmatprep.mubr.bf16.mxu1 %v7958_v17  ;;  %6317 = vmatprep.mubr.bf16.mxu0 %v7958_v17  ;;  %v2562_v0 = vrot.slane %v6059_v48, 1 }
 0x1cf   : > { %v7556_v8 = vadd.f32 %v2554_v50, %v2146_v20  ;;  %v2094_v44 = vpop.f32.mrf.mxu1  ;;  %v2413_v30 = vpop.f32.mrf.mxu0  ;;  %v7558_v45 = vadd.f32 %v2556_v28, %v2147_v4 }
 0x1d0   : > { %v2149_v9 = vadd.f32 %v2094_v44, %v7393_v49  ;;  %v2558_v5 = vrot.slane %v2413_v30, 1 }
 0x1d1   : > { %v5996_v27 = vpop.f32.mrf.mxu1  ;;  %v6060_v12 = vpop.f32.mrf.mxu0 }
 0x1d2   : > { %v2559_v36 = vsel %vm1027_vm0, %v2557_v53, %v2558_v5  ;;  %v2151_v31 = vadd.f32 %v5996_v27, %v7402_v13  ;;  %v2563_v25 = vrot.slane %v6060_v12, 1 }
 0x1d3   : > { %v7563_v3 = vadd.f32 %v2559_v36, %v2148_v29  ;;  %v2097_v2 = vpop.f32.mrf.mxu1  ;;  %v2416_v14 = vpop.f32.mrf.mxu0 }
 0x1d4   : > { %v2564_v57 = vsel %vm1027_vm0, %v2562_v0, %v2563_v25  ;;  %v2560_v56 = vrot.slane %v2416_v14, 1 }
 0x1d5   : > { %v7566_v20 = vadd.f32 %v2564_v57, %v2150_v18  ;;  %v5999_v35 = vpop.f32.mrf.mxu1  ;;  %v6063_v49 = vpop.f32.mrf.mxu0  ;;  %6254 = vmatmul.mubr.bf16.gmra.mxu1 %v7959_v52  ;;  %6318 = vmatmul.mubr.bf16.gmra.mxu0 %v7959_v52 }
 0x1d6   : > { %v2561_v38 = vsel %vm1027_vm0, %v2558_v5, %v2560_v56  ;;  %v2153_v13 = vadd.f32 %v5999_v35, %v7409_v55  ;;  %v2568_v42 = vrot.slane %v6063_v49, 1 }
 0x1d7   : > { %v7572_v61 = vadd.f32 %v2561_v38, %v2149_v9  ;;  %v2109_v29 = vpop.f32.mrf.mxu1  ;;  %v2429_v21 = vpop.f32.mrf.mxu0 }
 0x1d8   : > { %v2565_v15 = vrot.slane %v2429_v21, 1 }
 0x1d9   : > { %v6000_v43 = vpop.f32.mrf.mxu1  ;;  %v6064_v4 = vpop.f32.mrf.mxu0 }
 0x1da   : > { %v2566_v59 = vsel %vm1027_vm0, %v2563_v25, %v2565_v15  ;;  %v2570_v48 = vrot.slane %v6064_v4, 1 }
 0x1db   : > { %v7575_v22 = vadd.f32 %v2566_v59, %v2151_v31  ;;  %v2111_v50 = vpop.f32.mrf.mxu1  ;;  %v2432_v28 = vpop.f32.mrf.mxu0 }
 0x1dc   : > { %v2571_v18 = vsel %vm1027_vm0, %v2568_v42, %v2570_v48  ;;  %v2152_v17 = vadd.f32 %v2111_v50, %v7413_v46  ;;  %v2567_v55 = vrot.slane %v2432_v28, 1 }
 0x1dd   : > { %v7579_v44 = vadd.f32 %v2571_v18, %v2153_v13  ;;  %v6083_v30 = vpop.f32.mrf.mxu1  ;;  %v6147_v53 = vpop.f32.mrf.mxu0 }
 0x1de   : > { %v2569_v9 = vsel %vm1027_vm0, %v2567_v55, %v2568_v42  ;;  %v2977_v2 = vrot.slane %v6083_v30, 2 }
 0x1df   : > { %v2735_v5 = vpop.f32.mrf.mxu1  ;;  %v3410_v27 = vpop.f32.mrf.mxu0  ;;  %v7582_v12 = vadd.f32 %v2569_v9, %v2152_v17 }
 0x1e0   : > { %v2974_v14 = vrot.slane %v2735_v5, 2 }
 0x1e1   : > { %v6084_v0 = vpop.f32.mrf.mxu1  ;;  %v6148_v36 = vpop.f32.mrf.mxu0 }
 0x1e2   : > { %v2979_v21 = vrot.slane %v6084_v0, 2 }
 0x1e3   : > { %v2738_v31 = vpop.f32.mrf.mxu1  ;;  %v3413_v25 = vpop.f32.mrf.mxu0 }
 0x1e4   : > { %v2975_v57 = vrot.slane %v2738_v31, 2 }
 0x1e5   : > { %v6087_v56 = vpop.f32.mrf.mxu1  ;;  %v6151_v46 = vpop.f32.mrf.mxu0 }
 0x1e6   : > { %v2976_v35 = vsel %vm1510_vm1, %v2974_v14, %v2975_v57  ;;  %v2978_v49 = vsel %vm1510_vm1, %v2975_v57, %v2977_v2  ;;  %v2984_v48 = vrot.slane %v6087_v56, 2 }
 0x1e7   : > { %v3086_v52 = vadd.f32 %v2976_v35, %v7424_v41  ;;  %v3087_v38 = vadd.f32 %v2978_v49, %v7426_v39  ;;  %v2751_v13 = vpop.f32.mrf.mxu1  ;;  %v3425_v29 = vpop.f32.mrf.mxu0 }
 0x1e8   : > { %v2980_v15 = vrot.slane %v2751_v13, 2 }
 0x1e9   : > { %v7588_v43 = vadd.f32 %v3413_v25, %v3087_v38  ;;  %v6088_v4 = vpop.f32.mrf.mxu1  ;;  %v6152_v42 = vpop.f32.mrf.mxu0  ;;  %v7590_v59 = vadd.f32 %v3410_v27, %v3086_v52 }
 0x1ea   : > { %v2981_v50 = vsel %vm1510_vm1, %v2979_v21, %v2980_v15  ;;  %v2985_v28 = vrot.slane %v6088_v4, 2 }
 0x1eb   : > { %v3088_v18 = vadd.f32 %v2981_v50, %v7431_v58  ;;  %v2754_v17 = vpop.f32.mrf.mxu1  ;;  %v3428_v41 = vpop.f32.mrf.mxu0 }
 0x1ec   : > { %v2986_v39 = vsel %vm1510_vm1, %v2984_v48, %v2985_v28  ;;  %v2982_v55 = vrot.slane %v2754_v17, 2 }
 0x1ed   : > { %v3090_v30 = vadd.f32 %v2986_v39, %v7434_v62  ;;  %v6091_v53 = vpop.f32.mrf.mxu1  ;;  %v6155_v9 = vpop.f32.mrf.mxu0  ;;  %v7596_v5 = vadd.f32 %v6148_v36, %v3088_v18 }
 0x1ee   : > { %v2983_v27 = vsel %vm1510_vm1, %v2980_v15, %v2982_v55  ;;  %v2990_v35 = vrot.slane %v6091_v53, 2 }
 0x1ef   : > { %v3089_v0 = vadd.f32 %v2983_v27, %v7442_v11  ;;  %v2767_v31 = vpop.f32.mrf.mxu1  ;;  %v3440_v25 = vpop.f32.mrf.mxu0  ;;  %v7600_v2 = vadd.f32 %v6151_v46, %v3090_v30 }
 0x1f0   : > { %v2987_v58 = vrot.slane %v2767_v31, 2 }
 0x1f1   : > { %v6092_v14 = vpop.f32.mrf.mxu1  ;;  %v6156_v57 = vpop.f32.mrf.mxu0  ;;  %v7602_v56 = vadd.f32 %v3425_v29, %v3089_v0 }
 0x1f2   : > { %v2988_v62 = vsel %vm1510_vm1, %v2985_v28, %v2987_v58  ;;  %v2992_v49 = vrot.slane %v6092_v14, 2 }
 0x1f3   : > { %v3091_v36 = vadd.f32 %v2988_v62, %v7445_v51  ;;  %v2770_v52 = vpop.f32.mrf.mxu1  ;;  %v3442_v38 = vpop.f32.mrf.mxu0 }
 0x1f4   : > { %v2993_v13 = vsel %vm1510_vm1, %v2990_v35, %v2992_v49  ;;  %v2989_v11 = vrot.slane %v2770_v52, 2 }
 0x1f5   : > { %v3093_v21 = vadd.f32 %v2993_v13, %v7449_v6  ;;  %v6095_v46 = vpop.f32.mrf.mxu1  ;;  %v6159_v15 = vpop.f32.mrf.mxu0  ;;  %v7608_v4 = vadd.f32 %v6152_v42, %v3091_v36 }
 0x1f6   : > { %v2991_v29 = vsel %vm1510_vm1, %v2989_v11, %v2990_v35  ;;  %v2997_v30 = vrot.slane %v6095_v46, 2 }
 0x1f7   : > { %v3092_v48 = vadd.f32 %v2991_v29, %v7456_v24  ;;  %v2783_v50 = vpop.f32.mrf.mxu1  ;;  %v3454_v28 = vpop.f32.mrf.mxu0  ;;  %v7612_v18 = vadd.f32 %v6155_v9, %v3093_v21 }
 0x1f8   : > { %v2994_v6 = vrot.slane %v2783_v50, 2 }
 0x1f9   : > { %v7614_v51 = vadd.f32 %v3442_v38, %v3092_v48  ;;  %v6096_v17 = vpop.f32.mrf.mxu1  ;;  %v6160_v41 = vpop.f32.mrf.mxu0 }
 0x1fa   : > { %v2999_v14 = vrot.slane %v6096_v17, 2 }
 0x1fb   : > { %v2786_v39 = vpop.f32.mrf.mxu1  ;;  %v3457_v55 = vpop.f32.mrf.mxu0 }
 0x1fc   : > { %v2995_v53 = vrot.slane %v2786_v39, 2 }
 0x1fd   : > { %v6099_v27 = vpop.f32.mrf.mxu1  ;;  %v6163_v42 = vpop.f32.mrf.mxu0 }
 0x1fe   : > { %v2996_v0 = vsel %vm1510_vm1, %v2994_v6, %v2995_v53  ;;  %v2998_v31 = vsel %vm1510_vm1, %v2995_v53, %v2997_v30  ;;  %v3004_v52 = vrot.slane %v6099_v27, 2 }
 0x1ff   : > { %v3094_v24 = vadd.f32 %v2996_v0, %v7468_v40  ;;  %v3095_v9 = vadd.f32 %v2998_v31, %v7470_v7  ;;  %v2799_v25 = vpop.f32.mrf.mxu1  ;;  %v3469_v58 = vpop.f32.mrf.mxu0 }
 0x200   : > { %v3000_v57 = vrot.slane %v2799_v25, 2 }
 0x201   : > { %v7620_v35 = vadd.f32 %v3457_v55, %v3095_v9  ;;  %v6100_v62 = vpop.f32.mrf.mxu1  ;;  %v6164_v49 = vpop.f32.mrf.mxu0  ;;  %v7622_v36 = vadd.f32 %v3454_v28, %v3094_v24 }
 0x202   : > { %v3001_v38 = vsel %vm1510_vm1, %v2999_v14, %v3000_v57  ;;  %v3005_v13 = vrot.slane %v6100_v62, 2 }
 0x203   : > { %v3096_v11 = vadd.f32 %v3001_v38, %v7475_v34  ;;  %v2802_v21 = vpop.f32.mrf.mxu1  ;;  %v3472_v40 = vpop.f32.mrf.mxu0 }
 0x204   : > { %v3006_v7 = vsel %vm1510_vm1, %v3004_v52, %v3005_v13  ;;  %v3002_v46 = vrot.slane %v2802_v21, 2 }
 0x205   : > { %v3098_v15 = vadd.f32 %v3006_v7, %v7478_v47  ;;  %v6103_v29 = vpop.f32.mrf.mxu1  ;;  %v6167_v48 = vpop.f32.mrf.mxu0  ;;  %v7628_v50 = vadd.f32 %v6160_v41, %v3096_v11 }
 0x206   : > { %v3003_v28 = vsel %vm1510_vm1, %v3000_v57, %v3002_v46  ;;  %v3010_v0 = vrot.slane %v6103_v29, 2 }
 0x207   : > { %v3097_v17 = vadd.f32 %v3003_v28, %v7486_v63  ;;  %v2815_v39 = vpop.f32.mrf.mxu1  ;;  %v3484_v55 = vpop.f32.mrf.mxu0  ;;  %v7632_v30 = vadd.f32 %v6163_v42, %v3098_v15 }
 0x208   : > { %v3007_v34 = vrot.slane %v2815_v39, 2 }
 0x209   : > { %v6104_v6 = vpop.f32.mrf.mxu1  ;;  %v6168_v53 = vpop.f32.mrf.mxu0  ;;  %v7634_v27 = vadd.f32 %v3469_v58, %v3097_v17 }
 0x20a   : > { %v3008_v47 = vsel %vm1510_vm1, %v3005_v13, %v3007_v34  ;;  %v3012_v31 = vrot.slane %v6104_v6, 2 }
 0x20b   : > { %v3099_v41 = vadd.f32 %v3008_v47, %v7489_v10  ;;  %v2818_v24 = vpop.f32.mrf.mxu1  ;;  %v3486_v9 = vpop.f32.mrf.mxu0 }
 0x20c   : > { %v3013_v25 = vsel %vm1510_vm1, %v3010_v0, %v3012_v31  ;;  %v3009_v63 = vrot.slane %v2818_v24, 2 }
 0x20d   : > { %v3101_v14 = vadd.f32 %v3013_v25, %v7493_v54  ;;  %v6107_v42 = vpop.f32.mrf.mxu1  ;;  %v6171_v57 = vpop.f32.mrf.mxu0  ;;  %v7640_v62 = vadd.f32 %v6164_v49, %v3099_v41 }
 0x20e   : > { %v3011_v58 = vsel %vm1510_vm1, %v3009_v63, %v3010_v0  ;;  %v3017_v15 = vrot.slane %v6107_v42, 2 }
 0x20f   : > { %v3100_v52 = vadd.f32 %v3011_v58, %v7500_v26  ;;  %v2831_v38 = vpop.f32.mrf.mxu1  ;;  %v3498_v13 = vpop.f32.mrf.mxu0  ;;  %v7644_v11 = vadd.f32 %v6167_v48, %v3101_v14 }
 0x210   : > { %v3014_v54 = vrot.slane %v2831_v38, 2 }
 0x211   : > { %v7646_v10 = vadd.f32 %v3486_v9, %v3100_v52  ;;  %v6108_v21 = vpop.f32.mrf.mxu1  ;;  %v6172_v40 = vpop.f32.mrf.mxu0 }
 0x212   : > { %v3019_v6 = vrot.slane %v6108_v21, 2 }
 0x213   : > { %v2834_v7 = vpop.f32.mrf.mxu1  ;;  %v3501_v46 = vpop.f32.mrf.mxu0 }
 0x214   : > { %v3015_v29 = vrot.slane %v2834_v7, 2 }
 0x215   : > { %v6111_v28 = vpop.f32.mrf.mxu1  ;;  %v6175_v49 = vpop.f32.mrf.mxu0 }
 0x216   : > { %v3016_v17 = vsel %vm1510_vm1, %v3014_v54, %v3015_v29  ;;  %v3018_v39 = vsel %vm1510_vm1, %v3015_v29, %v3017_v15  ;;  %v3024_v24 = vrot.slane %v6111_v28, 2 }
 0x217   : > { %v3102_v26 = vadd.f32 %v3016_v17, %v7512_v37  ;;  %v3103_v48 = vadd.f32 %v3018_v39, %v7514_v19  ;;  %v2847_v55 = vpop.f32.mrf.mxu1  ;;  %v3513_v34 = vpop.f32.mrf.mxu0 }
 0x218   : > { %v3020_v53 = vrot.slane %v2847_v55, 2 }
 0x219   : > { %v7652_v0 = vadd.f32 %v3501_v46, %v3103_v48  ;;  %v6112_v47 = vpop.f32.mrf.mxu1  ;;  %v6176_v31 = vpop.f32.mrf.mxu0  ;;  %v7654_v41 = vadd.f32 %v3498_v13, %v3102_v26 }
 0x21a   : > { %v3021_v9 = vsel %vm1510_vm1, %v3019_v6, %v3020_v53  ;;  %v3025_v25 = vrot.slane %v6112_v47, 2 }
 0x21b   : > { %v3104_v63 = vadd.f32 %v3021_v9, %v7519_v1  ;;  %v2850_v14 = vpop.f32.mrf.mxu1  ;;  %v3516_v37 = vpop.f32.mrf.mxu0 }
 0x21c   : > { %v3026_v19 = vsel %vm1510_vm1, %v3024_v24, %v3025_v25  ;;  %v3022_v42 = vrot.slane %v2850_v14, 2 }
 0x21d   : > { %v3106_v57 = vadd.f32 %v3026_v19, %v7522_v33  ;;  %v6115_v58 = vpop.f32.mrf.mxu1  ;;  %v6179_v52 = vpop.f32.mrf.mxu0  ;;  %v7660_v38 = vadd.f32 %v6172_v40, %v3104_v63 }
 0x21e   : > { %v3023_v13 = vsel %vm1510_vm1, %v3020_v53, %v3022_v42  ;;  %v3030_v17 = vrot.slane %v6115_v58, 2 }
 0x21f   : > { %v3105_v21 = vadd.f32 %v3023_v13, %v7530_v60  ;;  %v2863_v7 = vpop.f32.mrf.mxu1  ;;  %v3528_v46 = vpop.f32.mrf.mxu0  ;;  %v7664_v15 = vadd.f32 %v6175_v49, %v3106_v57 }
 0x220   : > { %v3027_v1 = vrot.slane %v2863_v7, 2 }
 0x221   : > { %v6116_v54 = vpop.f32.mrf.mxu1  ;;  %v6180_v29 = vpop.f32.mrf.mxu0  ;;  %v7666_v28 = vadd.f32 %v3513_v34, %v3105_v21 }
 0x222   : > { %v3028_v33 = vsel %vm1510_vm1, %v3025_v25, %v3027_v1  ;;  %v3032_v39 = vrot.slane %v6116_v54, 2 }
 0x223   : > { %v3107_v40 = vadd.f32 %v3028_v33, %v7533_v32  ;;  %v2866_v26 = vpop.f32.mrf.mxu1  ;;  %v3530_v48 = vpop.f32.mrf.mxu0 }
 0x224   : > { %v3033_v55 = vsel %vm1510_vm1, %v3030_v17, %v3032_v39  ;;  %v3029_v60 = vrot.slane %v2866_v26, 2 }
 0x225   : > { %v3109_v6 = vadd.f32 %v3033_v55, %v7537_v23  ;;  %v6119_v49 = vpop.f32.mrf.mxu1  ;;  %v6183_v53 = vpop.f32.mrf.mxu0  ;;  %v7672_v47 = vadd.f32 %v6176_v31, %v3107_v40 }
 0x226   : > { %v3031_v34 = vsel %vm1510_vm1, %v3029_v60, %v3030_v17  ;;  %v3037_v57 = vrot.slane %v6119_v49, 2 }
 0x227   : > { %v3108_v24 = vadd.f32 %v3031_v34, %v7544_v16  ;;  %v2879_v9 = vpop.f32.mrf.mxu1  ;;  %v3542_v25 = vpop.f32.mrf.mxu0  ;;  %v7676_v63 = vadd.f32 %v6179_v52, %v3109_v6 }
 0x228   : > { %v3034_v23 = vrot.slane %v2879_v9, 2 }
 0x229   : > { %v7678_v32 = vadd.f32 %v3530_v48, %v3108_v24  ;;  %v6120_v14 = vpop.f32.mrf.mxu1  ;;  %v6184_v37 = vpop.f32.mrf.mxu0 }
 0x22a   : > { %v3039_v54 = vrot.slane %v6120_v14, 2 }
 0x22b   : > { %v2882_v19 = vpop.f32.mrf.mxu1  ;;  %v3545_v42 = vpop.f32.mrf.mxu0 }
 0x22c   : > { %v3035_v58 = vrot.slane %v2882_v19, 2 }
 0x22d   : > { %v6123_v13 = vpop.f32.mrf.mxu1  ;;  %v6187_v31 = vpop.f32.mrf.mxu0 }
 0x22e   : > { %v3036_v21 = vsel %vm1510_vm1, %v3034_v23, %v3035_v58  ;;  %v3038_v7 = vsel %vm1510_vm1, %v3035_v58, %v3037_v57  ;;  %v3044_v26 = vrot.slane %v6123_v13, 2 }
 0x22f   : > { %v3110_v16 = vadd.f32 %v3036_v21, %v7556_v8  ;;  %v3111_v52 = vadd.f32 %v3038_v7, %v7558_v45  ;;  %v2895_v46 = vpop.f32.mrf.mxu1  ;;  %v3557_v1 = vpop.f32.mrf.mxu0 }
 0x230   : > { %v3040_v29 = vrot.slane %v2895_v46, 2 }
 0x231   : > { %v7684_v17 = vadd.f32 %v3545_v42, %v3111_v52  ;;  %v6124_v33 = vpop.f32.mrf.mxu1  ;;  %v6188_v39 = vpop.f32.mrf.mxu0  ;;  %v7686_v40 = vadd.f32 %v3542_v25, %v3110_v16 }
 0x232   : > { %v3041_v48 = vsel %vm1510_vm1, %v3039_v54, %v3040_v29  ;;  %v3045_v55 = vrot.slane %v6124_v33, 2 }
 0x233   : > { %v3112_v60 = vadd.f32 %v3041_v48, %v7563_v3  ;;  %v2898_v6 = vpop.f32.mrf.mxu1  ;;  %v3560_v8 = vpop.f32.mrf.mxu0 }
 0x234   : > { %v3046_v45 = vsel %vm1510_vm1, %v3044_v26, %v3045_v55  ;;  %v3042_v49 = vrot.slane %v2898_v6, 2 }
 0x235   : > { %v3114_v53 = vadd.f32 %v3046_v45, %v7566_v20  ;;  %v6127_v34 = vpop.f32.mrf.mxu1  ;;  %v6191_v24 = vpop.f32.mrf.mxu0  ;;  %v7692_v9 = vadd.f32 %v6184_v37, %v3112_v60 }
 0x236   : > { %v3043_v25 = vsel %vm1510_vm1, %v3040_v29, %v3042_v49  ;;  %v3050_v21 = vrot.slane %v6127_v34, 2 }
 0x237   : > { %v3113_v14 = vadd.f32 %v3043_v25, %v7572_v61  ;;  %v2911_v19 = vpop.f32.mrf.mxu1  ;;  %v3572_v42 = vpop.f32.mrf.mxu0  ;;  %v7696_v57 = vadd.f32 %v6187_v31, %v3114_v53 }
 0x238   : > { %v3047_v3 = vrot.slane %v2911_v19, 2 }
 0x239   : > { %v6128_v23 = vpop.f32.mrf.mxu1  ;;  %v6192_v58 = vpop.f32.mrf.mxu0  ;;  %v7698_v13 = vadd.f32 %v3557_v1, %v3113_v14 }
 0x23a   : > { %v3048_v20 = vsel %vm1510_vm1, %v3045_v55, %v3047_v3  ;;  %v3052_v7 = vrot.slane %v6128_v23, 2 }
 0x23b   : > { %v3115_v37 = vadd.f32 %v3048_v20, %v7575_v22  ;;  %v2914_v16 = vpop.f32.mrf.mxu1  ;;  %v3574_v52 = vpop.f32.mrf.mxu0 }
 0x23c   : > { %v3053_v46 = vsel %vm1510_vm1, %v3050_v21, %v3052_v7  ;;  %v3049_v61 = vrot.slane %v2914_v16, 2  ;;  %v7719_v7 = vld [vmem:[%s7878_s2] ss:$0 sm:$0xff] }
 0x23d   : > { %v3117_v54 = vadd.f32 %v3053_v46, %v7579_v44  ;;  %v6211_v31 = vpop.f32.mrf.mxu1  ;;  %v6275_v29 = vpop.f32.mrf.mxu0  ;;  %v7704_v33 = vadd.f32 %v6188_v39, %v3115_v37 }
 0x23e   : > { %v3051_v1 = vsel %vm1510_vm1, %v3049_v61, %v3050_v21  ;;  %v3958_v53 = vrot.slane %v6211_v31, 1  ;;  %v4440_v19 = vrot.slane %v6275_v29, 2 }
 0x23f   : > { %v3116_v26 = vadd.f32 %v3051_v1, %v7582_v12  ;;  %v3716_v48 = vpop.f32.mrf.mxu1  ;;  %v4198_v55 = vpop.f32.mrf.mxu0  ;;  %v7708_v60 = vadd.f32 %v6191_v24, %v3117_v54 }
 0x240   : > { %v3955_v44 = vrot.slane %v3716_v48, 1  ;;  %v4437_v42 = vrot.slane %v4198_v55, 2 }
 0x241   : > { %v7710_v22 = vadd.f32 %v3574_v52, %v3116_v26  ;;  %v6212_v6 = vpop.f32.mrf.mxu1  ;;  %v6276_v8 = vpop.f32.mrf.mxu0 }
 0x242   : > { %v3960_v24 = vrot.slane %v6212_v6, 1  ;;  %v4442_v61 = vrot.slane %v6276_v8, 2 }
 0x243   : > { %v3719_v45 = vpop.f32.mrf.mxu1  ;;  %v4201_v49 = vpop.f32.mrf.mxu0 }
 0x244   : > { %v3956_v34 = vrot.slane %v3719_v45, 1  ;;  %v4438_v25 = vrot.slane %v4201_v49, 2 }
 0x245   : > { %v6215_v39 = vpop.f32.mrf.mxu1  ;;  %v6279_v14 = vpop.f32.mrf.mxu0 }
 0x246   : > { %v3957_v12 = vsel %vm1027_vm0, %v3955_v44, %v3956_v34  ;;  %v3959_v3 = vsel %vm1027_vm0, %v3956_v34, %v3958_v53  ;;  %v4439_v37 = vsel %vm1510_vm1, %v4437_v42, %v4438_v25  ;;  %v4441_v16 = vsel %vm1510_vm1, %v4438_v25, %v4440_v19 }
 0x247   : > { %v4067_v23 = vadd.f32 %v3957_v12, %v7590_v59  ;;  %v4068_v58 = vadd.f32 %v3959_v3, %v7588_v43  ;;  %v3732_v21 = vpop.f32.mrf.mxu1  ;;  %v4214_v20 = vpop.f32.mrf.mxu0  ;;  %v3965_v43 = vrot.slane %v6215_v39, 1 }
 0x248   : > { %v3961_v52 = vrot.slane %v3732_v21, 1  ;;  %v4443_v46 = vrot.slane %v4214_v20, 2 }
 0x249   : > { %v4549_v54 = vadd.f32 %v4439_v37, %v4067_v23  ;;  %v4550_v31 = vadd.f32 %v4441_v16, %v4068_v58  ;;  %v6216_v59 = vpop.f32.mrf.mxu1  ;;  %v6280_v29 = vpop.f32.mrf.mxu0 }
 0x24a   : > { %v3962_v1 = vsel %vm1027_vm0, %v3960_v24, %v3961_v52  ;;  %v3966_v26 = vrot.slane %v6216_v59, 1  ;;  %v4444_v45 = vsel %vm1510_vm1, %v4442_v61, %v4443_v46  ;;  %v4448_v44 = vrot.slane %v6280_v29, 2 }
 0x24b   : > { %v4587_v48 = vadd.f32 %v7719_v7, %v4549_v54  ;;  %v4588_v55 = vadd.f32 %v7719_v7, %v4550_v31  ;;  %v4069_v6 = vadd.f32 %v3962_v1, %v7596_v5  ;;  %v3735_v49 = vpop.f32.mrf.mxu1  ;;  %v4217_v53 = vpop.f32.mrf.mxu0  ;;  %v4447_v5 = vrot.slane %v6279_v14, 2 }
 0x24c   : > { %v3967_v8 = vsel %vm1027_vm0, %v3965_v43, %v3966_v26  ;;  %v3963_v34 = vrot.slane %v3735_v49, 1  ;;  %v4445_v25 = vrot.slane %v4217_v53, 2 }
 0x24d   : > { %v4619_v39 = vmax.f32 %v4587_v48, 0.0  ;;  %v4620_v19 = vmax.f32 %v4588_v55, 0.0  ;;  %v4551_v42 = vadd.f32 %v4444_v45, %v4069_v6  ;;  %v4071_v12 = vadd.f32 %v3967_v8, %v7600_v2  ;;  %v6219_v3 = vpop.f32.mrf.mxu1  ;;  %v6283_v24 = vpop.f32.mrf.mxu0 }
 0x24e   : > { %v3964_v23 = vsel %vm1027_vm0, %v3961_v52, %v3963_v34  ;;  %v4449_v2 = vsel %vm1510_vm1, %v4447_v5, %v4448_v44  ;;  %v4446_v61 = vsel %vm1510_vm1, %v4443_v46, %v4445_v25  ;;  %v3971_v1 = vrot.slane %v6219_v3, 1 }
 0x24f   : > { %v5365_v58 = vpack.c.bf16 %v4620_v19, %v4619_v39  ;;  %v4589_v21 = vadd.f32 %v7719_v7, %v4551_v42  ;;  %v4070_v20 = vadd.f32 %v3964_v23, %v7602_v56  ;;  %v3748_v37 = vpop.f32.mrf.mxu1  ;;  %v4230_v16 = vpop.f32.mrf.mxu0  ;;  %v4553_v59 = vadd.f32 %v4449_v2, %v4071_v12 }
 0x250   : > { %v3968_v54 = vrot.slane %v3748_v37, 1  ;;  %v4450_v31 = vrot.slane %v4230_v16, 2  ;;  %v4453_v45 = vrot.slane %v6283_v24, 2 }
 0x251   : > { %5366 = vst [vmem:[%s7734_s8] sm:$0xff] %v5365_v58   ;;  %v4552_v29 = vadd.f32 %v4446_v61, %v4070_v20  ;;  %v6220_v43 = vpop.f32.mrf.mxu1  ;;  %v6284_v14 = vpop.f32.mrf.mxu0  ;;  %v4621_v6 = vmax.f32 %v4589_v21, 0.0  ;;  %v4591_v19 = vadd.f32 %v7719_v7, %v4553_v59 }
 0x252   : > { %v3969_v52 = vsel %vm1027_vm0, %v3966_v26, %v3968_v54  ;;  %v3973_v48 = vrot.slane %v6220_v43, 1  ;;  %v4455_v55 = vrot.slane %v6284_v14, 2  ;;  %v4451_v8 = vsel %vm1510_vm1, %v4448_v44, %v4450_v31 }
 0x253   : > { %v4590_v56 = vadd.f32 %v7719_v7, %v4552_v29  ;;  %v4072_v49 = vadd.f32 %v3969_v52, %v7608_v4  ;;  %v3751_v53 = vpop.f32.mrf.mxu1  ;;  %v4233_v46 = vpop.f32.mrf.mxu0  ;;  %v4623_v2 = vmax.f32 %v4591_v19, 0.0 }
 0x254   : > { %v3974_v34 = vsel %vm1027_vm0, %v3971_v1, %v3973_v48  ;;  %v3970_v25 = vrot.slane %v3751_v53, 1  ;;  %v4452_v39 = vrot.slane %v4233_v46, 2  ;;  %v4456_v24 = vsel %vm1510_vm1, %v4453_v45, %v4455_v55 }
 0x255   : > { %v4622_v26 = vmax.f32 %v4590_v56, 0.0  ;;  %v4554_v42 = vadd.f32 %v4451_v8, %v4072_v49  ;;  %v4074_v12 = vadd.f32 %v3974_v34, %v7612_v18  ;;  %v6223_v3 = vpop.f32.mrf.mxu1  ;;  %v6287_v5 = vpop.f32.mrf.mxu0 }
 0x256   : > { %v3972_v4 = vsel %vm1027_vm0, %v3970_v25, %v3971_v1  ;;  %v4454_v16 = vsel %vm1510_vm1, %v4452_v39, %v4453_v45  ;;  %v3978_v52 = vrot.slane %v6223_v3, 1  ;;  %v4460_v53 = vrot.slane %v6287_v5, 2 }
 0x257   : > { %v5370_v23 = vpack.c.bf16 %v4622_v26, %v4621_v6  ;;  %v4592_v44 = vadd.f32 %v7719_v7, %v4554_v42  ;;  %v4556_v58 = vadd.f32 %v4456_v24, %v4074_v12  ;;  %v4073_v21 = vadd.f32 %v3972_v4, %v7614_v51  ;;  %v3764_v20 = vpop.f32.mrf.mxu1  ;;  %v4246_v37 = vpop.f32.mrf.mxu0 }
 0x258   : > { %v3975_v51 = vrot.slane %v3764_v20, 1  ;;  %v4457_v46 = vrot.slane %v4246_v37, 2 }
 0x259   : > { %5442 = vst [vmem:[%s7734_s8 + $0x8] sm:$0xff] %v5370_v23   ;;  %v4624_v18 = vmax.f32 %v4592_v44, 0.0  ;;  %v4594_v61 = vadd.f32 %v7719_v7, %v4556_v58  ;;  %v4555_v54 = vadd.f32 %v4454_v16, %v4073_v21  ;;  %v6224_v31 = vpop.f32.mrf.mxu1  ;;  %v6288_v59 = vpop.f32.mrf.mxu0 }
 0x25a   : > { %v3980_v39 = vrot.slane %v6224_v31, 1  ;;  %v4462_v5 = vrot.slane %v6288_v59, 2 }
 0x25b   : > { %v5375_v29 = vpack.c.bf16 %v4624_v18, %v4623_v2  ;;  %v4593_v43 = vadd.f32 %v7719_v7, %v4555_v54  ;;  %v3767_v14 = vpop.f32.mrf.mxu1  ;;  %v4249_v1 = vpop.f32.mrf.mxu0  ;;  %v4626_v6 = vmax.f32 %v4594_v61, 0.0 }
 0x25c   : > { %v3976_v48 = vrot.slane %v3767_v14, 1  ;;  %v4458_v55 = vrot.slane %v4249_v1, 2 }
 0x25d   : > { %5443 = vst [vmem:[%s7734_s8 + $0x10] sm:$0xff] %v5375_v29   ;;  %v4625_v56 = vmax.f32 %v4593_v43, 0.0  ;;  %v6227_v45 = vpop.f32.mrf.mxu1  ;;  %v6291_v49 = vpop.f32.mrf.mxu0 }
 0x25e   : > { %v3977_v8 = vsel %vm1027_vm0, %v3975_v51, %v3976_v48  ;;  %v3979_v34 = vsel %vm1027_vm0, %v3976_v48, %v3978_v52  ;;  %v4459_v3 = vsel %vm1510_vm1, %v4457_v46, %v4458_v55  ;;  %v4461_v24 = vsel %vm1510_vm1, %v4458_v55, %v4460_v53 }
 0x25f   : > { %v5380_v25 = vpack.c.bf16 %v4626_v6, %v4625_v56  ;;  %v4075_v19 = vadd.f32 %v3977_v8, %v7622_v36  ;;  %v4076_v26 = vadd.f32 %v3979_v34, %v7620_v35  ;;  %v3780_v42 = vpop.f32.mrf.mxu1  ;;  %v4262_v12 = vpop.f32.mrf.mxu0  ;;  %v3985_v37 = vrot.slane %v6227_v45, 1 }
 0x260   : > { %v3981_v4 = vrot.slane %v3780_v42, 1  ;;  %v4463_v23 = vrot.slane %v4262_v12, 2  ;;  %v4467_v56 = vrot.slane %v6291_v49, 2 }
 0x261   : > { %5444 = vst [vmem:[%s7734_s8 + $0x18] sm:$0xff] %v5380_v25   ;;  %v4557_v44 = vadd.f32 %v4459_v3, %v4075_v19  ;;  %v4558_v58 = vadd.f32 %v4461_v24, %v4076_v26  ;;  %v6228_v21 = vpop.f32.mrf.mxu1  ;;  %v6292_v20 = vpop.f32.mrf.mxu0 }
 0x262   : > { %v3982_v16 = vsel %vm1027_vm0, %v3980_v39, %v3981_v4  ;;  %v3986_v36 = vrot.slane %v6228_v21, 1  ;;  %v4464_v61 = vsel %vm1510_vm1, %v4462_v5, %v4463_v23  ;;  %v4468_v29 = vrot.slane %v6292_v20, 2 }
 0x263   : > { %v4595_v35 = vadd.f32 %v7719_v7, %v4557_v44  ;;  %v4596_v2 = vadd.f32 %v7719_v7, %v4558_v58  ;;  %v4077_v18 = vadd.f32 %v3982_v16, %v7628_v50  ;;  %v3783_v54 = vpop.f32.mrf.mxu1  ;;  %v4265_v31 = vpop.f32.mrf.mxu0 }
 0x264   : > { %v3987_v59 = vsel %vm1027_vm0, %v3985_v37, %v3986_v36  ;;  %v3983_v43 = vrot.slane %v3783_v54, 1  ;;  %v4465_v14 = vrot.slane %v4265_v31, 2  ;;  %v4469_v25 = vsel %vm1510_vm1, %v4467_v56, %v4468_v29 }
 0x265   : > { %v4627_v1 = vmax.f32 %v4595_v35, 0.0  ;;  %v4628_v52 = vmax.f32 %v4596_v2, 0.0  ;;  %v4559_v51 = vadd.f32 %v4464_v61, %v4077_v18  ;;  %v4079_v48 = vadd.f32 %v3987_v59, %v7632_v30  ;;  %v6231_v55 = vpop.f32.mrf.mxu1  ;;  %v6295_v6 = vpop.f32.mrf.mxu0 }
 0x266   : > { %v3984_v50 = vsel %vm1027_vm0, %v3981_v4, %v3983_v43  ;;  %v4466_v39 = vsel %vm1510_vm1, %v4463_v23, %v4465_v14  ;;  %v3991_v3 = vrot.slane %v6231_v55, 1  ;;  %v4473_v58 = vrot.slane %v6295_v6, 2 }
 0x267   : > { %v5385_v45 = vpack.c.bf16 %v4628_v52, %v4627_v1  ;;  %v4597_v53 = vadd.f32 %v7719_v7, %v4559_v51  ;;  %v4078_v46 = vadd.f32 %v3984_v50, %v7634_v27  ;;  %v3796_v8 = vpop.f32.mrf.mxu1  ;;  %v4278_v34 = vpop.f32.mrf.mxu0  ;;  %v4561_v30 = vadd.f32 %v4469_v25, %v4079_v48 }
 0x268   : > { %v3988_v19 = vrot.slane %v3796_v8, 1  ;;  %v4470_v26 = vrot.slane %v4278_v34, 2 }
 0x269   : > { %5445 = vst [vmem:[%s7734_s8 + $0x20] sm:$0xff] %v5385_v45   ;;  %v4560_v42 = vadd.f32 %v4466_v39, %v4078_v46  ;;  %v6232_v12 = vpop.f32.mrf.mxu1  ;;  %v6296_v49 = vpop.f32.mrf.mxu0  ;;  %v4629_v44 = vmax.f32 %v4597_v53, 0.0  ;;  %v4599_v18 = vadd.f32 %v7719_v7, %v4561_v30 }
 0x26a   : > { %v3989_v24 = vsel %vm1027_vm0, %v3986_v36, %v3988_v19  ;;  %v3993_v4 = vrot.slane %v6232_v12, 1  ;;  %v4475_v5 = vrot.slane %v6296_v49, 2  ;;  %v4471_v37 = vsel %vm1510_vm1, %v4468_v29, %v4470_v26 }
 0x26b   : > { %v4598_v27 = vadd.f32 %v7719_v7, %v4560_v42  ;;  %v4080_v21 = vadd.f32 %v3989_v24, %v7640_v62  ;;  %v3799_v20 = vpop.f32.mrf.mxu1  ;;  %v4281_v23 = vpop.f32.mrf.mxu0  ;;  %v4631_v6 = vmax.f32 %v4599_v18, 0.0 }
 0x26c   : > { %v3994_v16 = vsel %vm1027_vm0, %v3991_v3, %v3993_v4  ;;  %v3990_v35 = vrot.slane %v3799_v20, 1  ;;  %v4472_v2 = vrot.slane %v4281_v23, 2  ;;  %v4476_v43 = vsel %vm1510_vm1, %v4473_v58, %v4475_v5 }
 0x26d   : > { %v4630_v36 = vmax.f32 %v4598_v27, 0.0  ;;  %v4562_v61 = vadd.f32 %v4471_v37, %v4080_v21  ;;  %v4082_v54 = vadd.f32 %v3994_v16, %v7644_v11  ;;  %v6235_v31 = vpop.f32.mrf.mxu1  ;;  %v6299_v59 = vpop.f32.mrf.mxu0 }
 0x26e   : > { %v3992_v62 = vsel %vm1027_vm0, %v3990_v35, %v3991_v3  ;;  %v4474_v55 = vsel %vm1510_vm1, %v4472_v2, %v4473_v58  ;;  %v3998_v39 = vrot.slane %v6235_v31, 1  ;;  %v4480_v3 = vrot.slane %v6299_v59, 2 }
 0x26f   : > { %v5390_v14 = vpack.c.bf16 %v4630_v36, %v4629_v44  ;;  %v4600_v29 = vadd.f32 %v7719_v7, %v4562_v61  ;;  %v4564_v1 = vadd.f32 %v4476_v43, %v4082_v54  ;;  %v4081_v52 = vadd.f32 %v3992_v62, %v7646_v10  ;;  %v3812_v51 = vpop.f32.mrf.mxu1  ;;  %v4294_v48 = vpop.f32.mrf.mxu0 }
 0x270   : > { %v3995_v10 = vrot.slane %v3812_v51, 1  ;;  %v4477_v24 = vrot.slane %v4294_v48, 2 }
 0x271   : > { %5446 = vst [vmem:[%s7734_s8 + $0x28] sm:$0xff] %v5390_v14   ;;  %v4632_v11 = vmax.f32 %v4600_v29, 0.0  ;;  %v4602_v56 = vadd.f32 %v7719_v7, %v4564_v1  ;;  %v4563_v50 = vadd.f32 %v4474_v55, %v4081_v52  ;;  %v6236_v45 = vpop.f32.mrf.mxu1  ;;  %v6300_v53 = vpop.f32.mrf.mxu0 }
 0x272   : > { %v4000_v27 = vrot.slane %v6236_v45, 1  ;;  %v4482_v18 = vrot.slane %v6300_v53, 2 }
 0x273   : > { %v5395_v46 = vpack.c.bf16 %v4632_v11, %v4631_v6  ;;  %v4601_v8 = vadd.f32 %v7719_v7, %v4563_v50  ;;  %v3815_v34 = vpop.f32.mrf.mxu1  ;;  %v4297_v25 = vpop.f32.mrf.mxu0  ;;  %v4634_v30 = vmax.f32 %v4602_v56, 0.0 }
 0x274   : > { %v3996_v19 = vrot.slane %v3815_v34, 1  ;;  %v4478_v26 = vrot.slane %v4297_v25, 2 }
 0x275   : > { %5447 = vst [vmem:[%s7734_s8 + $0x30] sm:$0xff] %v5395_v46   ;;  %v4633_v42 = vmax.f32 %v4601_v8, 0.0  ;;  %v6239_v12 = vpop.f32.mrf.mxu1  ;;  %v6303_v49 = vpop.f32.mrf.mxu0 }
 0x276   : > { %v3997_v4 = vsel %vm1027_vm0, %v3995_v10, %v3996_v19  ;;  %v3999_v5 = vsel %vm1027_vm0, %v3996_v19, %v3998_v39  ;;  %v4479_v37 = vsel %vm1510_vm1, %v4477_v24, %v4478_v26  ;;  %v4481_v16 = vsel %vm1510_vm1, %v4478_v26, %v4480_v3 }
 0x277   : > { %v5400_v44 = vpack.c.bf16 %v4634_v30, %v4633_v42  ;;  %v4083_v58 = vadd.f32 %v3997_v4, %v7654_v41  ;;  %v4084_v21 = vadd.f32 %v3999_v5, %v7652_v0  ;;  %v3828_v20 = vpop.f32.mrf.mxu1  ;;  %v4310_v23 = vpop.f32.mrf.mxu0  ;;  %v4005_v59 = vrot.slane %v6239_v12, 1 }
 0x278   : > { %v4001_v35 = vrot.slane %v3828_v20, 1  ;;  %v4483_v2 = vrot.slane %v4310_v23, 2  ;;  %v4487_v8 = vrot.slane %v6303_v49, 2 }
 0x279   : > { %5448 = vst [vmem:[%s7734_s8 + $0x38] sm:$0xff] %v5400_v44   ;;  %v4565_v36 = vadd.f32 %v4479_v37, %v4083_v58  ;;  %v4566_v61 = vadd.f32 %v4481_v16, %v4084_v21  ;;  %v6240_v54 = vpop.f32.mrf.mxu1  ;;  %v6304_v31 = vpop.f32.mrf.mxu0 }
 0x27a   : > { %v4002_v43 = vsel %vm1027_vm0, %v4000_v27, %v4001_v35  ;;  %v4006_v41 = vrot.slane %v6240_v54, 1  ;;  %v4484_v29 = vsel %vm1510_vm1, %v4482_v18, %v4483_v2  ;;  %v4488_v48 = vrot.slane %v6304_v31, 2 }
 0x27b   : > { %v4603_v0 = vadd.f32 %v7719_v7, %v4565_v36  ;;  %v4604_v62 = vadd.f32 %v7719_v7, %v4566_v61  ;;  %v4085_v14 = vadd.f32 %v4002_v43, %v7660_v38  ;;  %v3831_v1 = vpop.f32.mrf.mxu1  ;;  %v4313_v52 = vpop.f32.mrf.mxu0 }
 0x27c   : > { %v4007_v51 = vsel %vm1027_vm0, %v4005_v59, %v4006_v41  ;;  %v4003_v55 = vrot.slane %v3831_v1, 1  ;;  %v4485_v6 = vrot.slane %v4313_v52, 2  ;;  %v4489_v26 = vsel %vm1510_vm1, %v4487_v8, %v4488_v48 }
 0x27d   : > { %v4635_v11 = vmax.f32 %v4603_v0, 0.0  ;;  %v4636_v56 = vmax.f32 %v4604_v62, 0.0  ;;  %v4567_v50 = vadd.f32 %v4484_v29, %v4085_v14  ;;  %v4087_v45 = vadd.f32 %v4007_v51, %v7664_v15  ;;  %v6243_v53 = vpop.f32.mrf.mxu1  ;;  %v6307_v46 = vpop.f32.mrf.mxu0 }
 0x27e   : > { %v4004_v38 = vsel %vm1027_vm0, %v4001_v35, %v4003_v55  ;;  %v4486_v30 = vsel %vm1510_vm1, %v4483_v2, %v4485_v6  ;;  %v4011_v4 = vrot.slane %v6243_v53, 1  ;;  %v4493_v21 = vrot.slane %v6307_v46, 2 }
 0x27f   : > { %v5405_v34 = vpack.c.bf16 %v4636_v56, %v4635_v11  ;;  %v4605_v25 = vadd.f32 %v7719_v7, %v4567_v50  ;;  %v4086_v39 = vadd.f32 %v4004_v38, %v7666_v28  ;;  %v3844_v10 = vpop.f32.mrf.mxu1  ;;  %v4326_v19 = vpop.f32.mrf.mxu0  ;;  %v4569_v15 = vadd.f32 %v4489_v26, %v4087_v45 }
 0x280   : > { %v4008_v42 = vrot.slane %v3844_v10, 1  ;;  %v4490_v12 = vrot.slane %v4326_v19, 2 }
 0x281   : > { %5449 = vst [vmem:[%s7734_s8 + $0x40] sm:$0xff] %v5405_v34   ;;  %v4568_v3 = vadd.f32 %v4486_v30, %v4086_v39  ;;  %v6244_v24 = vpop.f32.mrf.mxu1  ;;  %v6308_v49 = vpop.f32.mrf.mxu0  ;;  %v4637_v58 = vmax.f32 %v4605_v25, 0.0  ;;  %v4607_v36 = vadd.f32 %v7719_v7, %v4569_v15 }
 0x282   : > { %v4009_v5 = vsel %vm1027_vm0, %v4006_v41, %v4008_v42  ;;  %v4013_v44 = vrot.slane %v6244_v24, 1  ;;  %v4495_v27 = vrot.slane %v6308_v49, 2  ;;  %v4491_v16 = vsel %vm1510_vm1, %v4488_v48, %v4490_v12 }
 0x283   : > { %v4606_v28 = vadd.f32 %v7719_v7, %v4568_v3  ;;  %v4088_v20 = vadd.f32 %v4009_v5, %v7672_v47  ;;  %v3847_v23 = vpop.f32.mrf.mxu1  ;;  %v4329_v37 = vpop.f32.mrf.mxu0  ;;  %v4639_v48 = vmax.f32 %v4607_v36, 0.0 }
 0x284   : > { %v4014_v35 = vsel %vm1027_vm0, %v4011_v4, %v4013_v44  ;;  %v4010_v2 = vrot.slane %v3847_v23, 1  ;;  %v4492_v18 = vrot.slane %v4329_v37, 2  ;;  %v4496_v41 = vsel %vm1510_vm1, %v4493_v21, %v4495_v27 }
 0x285   : > { %v4638_v61 = vmax.f32 %v4606_v28, 0.0  ;;  %v4570_v54 = vadd.f32 %v4491_v16, %v4088_v20  ;;  %v4090_v31 = vadd.f32 %v4014_v35, %v7676_v63  ;;  %v6247_v59 = vpop.f32.mrf.mxu1  ;;  %v6311_v43 = vpop.f32.mrf.mxu0 }
 0x286   : > { %v4012_v47 = vsel %vm1027_vm0, %v4010_v2, %v4011_v4  ;;  %v4494_v51 = vsel %vm1510_vm1, %v4492_v18, %v4493_v21  ;;  %v4018_v8 = vrot.slane %v6247_v59, 1  ;;  %v4500_v26 = vrot.slane %v6311_v43, 2 }
 0x287   : > { %v5410_v0 = vpack.c.bf16 %v4638_v61, %v4637_v58  ;;  %v4608_v62 = vadd.f32 %v7719_v7, %v4570_v54  ;;  %v4572_v14 = vadd.f32 %v4496_v41, %v4090_v31  ;;  %v4089_v29 = vadd.f32 %v4012_v47, %v7678_v32  ;;  %v3860_v1 = vpop.f32.mrf.mxu1  ;;  %v4342_v52 = vpop.f32.mrf.mxu0 }
 0x288   : > { %v4015_v32 = vrot.slane %v3860_v1, 1  ;;  %v4497_v30 = vrot.slane %v4342_v52, 2 }
 0x289   : > { %5450 = vst [vmem:[%s7734_s8 + $0x48] sm:$0xff] %v5410_v0   ;;  %v4640_v63 = vmax.f32 %v4608_v62, 0.0  ;;  %v4610_v55 = vadd.f32 %v7719_v7, %v4572_v14  ;;  %v4571_v6 = vadd.f32 %v4494_v51, %v4089_v29  ;;  %v6248_v11 = vpop.f32.mrf.mxu1  ;;  %v6312_v56 = vpop.f32.mrf.mxu0 }
 0x28a   : > { %v4020_v3 = vrot.slane %v6248_v11, 1  ;;  %v4502_v21 = vrot.slane %v6312_v56, 2 }
 0x28b   : > { %v5415_v50 = vpack.c.bf16 %v4640_v63, %v4639_v48  ;;  %v4609_v45 = vadd.f32 %v7719_v7, %v4571_v6  ;;  %v3863_v53 = vpop.f32.mrf.mxu1  ;;  %v4345_v46 = vpop.f32.mrf.mxu0  ;;  %v4642_v25 = vmax.f32 %v4610_v55, 0.0 }
 0x28c   : > { %v4016_v38 = vrot.slane %v3863_v53, 1  ;;  %v4498_v34 = vrot.slane %v4345_v46, 2 }
 0x28d   : > { %5451 = vst [vmem:[%s7734_s8 + $0x50] sm:$0xff] %v5415_v50   ;;  %v4641_v39 = vmax.f32 %v4609_v45, 0.0  ;;  %v6251_v10 = vpop.f32.mrf.mxu1  ;;  %v6315_v19 = vpop.f32.mrf.mxu0 }
 0x28e   : > { %v4017_v42 = vsel %vm1027_vm0, %v4015_v32, %v4016_v38  ;;  %v4019_v12 = vsel %vm1027_vm0, %v4016_v38, %v4018_v8  ;;  %v4499_v44 = vsel %vm1510_vm1, %v4497_v30, %v4498_v34  ;;  %v4501_v27 = vsel %vm1510_vm1, %v4498_v34, %v4500_v26 }
 0x28f   : > { %v5420_v15 = vpack.c.bf16 %v4642_v25, %v4641_v39  ;;  %v4091_v24 = vadd.f32 %v4017_v42, %v7686_v40  ;;  %v4092_v49 = vadd.f32 %v4019_v12, %v7684_v17  ;;  %v3876_v4 = vpop.f32.mrf.mxu1  ;;  %v4358_v5 = vpop.f32.mrf.mxu0  ;;  %v4025_v35 = vrot.slane %v6251_v10, 1 }
 0x290   : > { %v4021_v58 = vrot.slane %v3876_v4, 1  ;;  %v4503_v28 = vrot.slane %v4358_v5, 2  ;;  %v4507_v51 = vrot.slane %v6315_v19, 2 }
 0x291   : > { %5452 = vst [vmem:[%s7734_s8 + $0x58] sm:$0xff] %v5420_v15   ;;  %v4573_v20 = vadd.f32 %v4499_v44, %v4091_v24  ;;  %v4574_v23 = vadd.f32 %v4501_v27, %v4092_v49  ;;  %v6252_v37 = vpop.f32.mrf.mxu1  ;;  %v6316_v16 = vpop.f32.mrf.mxu0 }
 0x292   : > { %v4022_v2 = vsel %vm1027_vm0, %v4020_v3, %v4021_v58  ;;  %v4026_v40 = vrot.slane %v6252_v37, 1  ;;  %v4504_v61 = vsel %vm1510_vm1, %v4502_v21, %v4503_v28  ;;  %v4508_v43 = vrot.slane %v6316_v16, 2 }
 0x293   : > { %v4611_v17 = vadd.f32 %v7719_v7, %v4573_v20  ;;  %v4612_v18 = vadd.f32 %v7719_v7, %v4574_v23  ;;  %v4093_v36 = vadd.f32 %v4022_v2, %v7692_v9  ;;  %v3879_v54 = vpop.f32.mrf.mxu1  ;;  %v4361_v31 = vpop.f32.mrf.mxu0 }
 0x294   : > { %v4027_v59 = vsel %vm1027_vm0, %v4025_v35, %v4026_v40  ;;  %v4023_v41 = vrot.slane %v3879_v54, 1  ;;  %v4505_v47 = vrot.slane %v4361_v31, 2  ;;  %v4509_v56 = vsel %vm1510_vm1, %v4507_v51, %v4508_v43 }
 0x295   : > { %v4643_v0 = vmax.f32 %v4611_v17, 0.0  ;;  %v4644_v62 = vmax.f32 %v4612_v18, 0.0  ;;  %v4575_v14 = vadd.f32 %v4504_v61, %v4093_v36  ;;  %v4095_v29 = vadd.f32 %v4027_v59, %v7696_v57  ;;  %v6255_v1 = vpop.f32.mrf.mxu1  ;;  %v6319_v52 = vpop.f32.mrf.mxu0 }
 0x296   : > { %v4024_v9 = vsel %vm1027_vm0, %v4021_v58, %v4023_v41  ;;  %v4506_v50 = vsel %vm1510_vm1, %v4503_v28, %v4505_v47  ;;  %v4031_v38 = vrot.slane %v6255_v1, 1  ;;  %v4513_v19 = vrot.slane %v6319_v52, 2 }
 0x297   : > { %v5425_v48 = vpack.c.bf16 %v4644_v62, %v4643_v0  ;;  %v4613_v63 = vadd.f32 %v7719_v7, %v4575_v14  ;;  %v4094_v55 = vadd.f32 %v4024_v9, %v7698_v13  ;;  %v3892_v6 = vpop.f32.mrf.mxu1  ;;  %v4374_v11 = vpop.f32.mrf.mxu0  ;;  %v4577_v57 = vadd.f32 %v4509_v56, %v4095_v29 }
 0x298   : > { %v4028_v45 = vrot.slane %v3892_v6, 1  ;;  %v4510_v53 = vrot.slane %v4374_v11, 2 }
 0x299   : > { %5453 = vst [vmem:[%s7734_s8 + $0x60] sm:$0xff] %v5425_v48   ;;  %v4576_v46 = vadd.f32 %v4506_v50, %v4094_v55  ;;  %v6256_v8 = vpop.f32.mrf.mxu1  ;;  %v6320_v32 = vpop.f32.mrf.mxu0  ;;  %v4645_v10 = vmax.f32 %v4613_v63, 0.0  ;;  %v4615_v49 = vadd.f32 %v7719_v7, %v4577_v57 }
 0x29a   : > { %v4029_v34 = vsel %vm1027_vm0, %v4026_v40, %v4028_v45  ;;  %v4033_v25 = vrot.slane %v6256_v8, 1  ;;  %v4515_v39 = vrot.slane %v6320_v32, 2  ;;  %v4511_v12 = vsel %vm1510_vm1, %v4508_v43, %v4510_v53 }
 0x29b   : > { %v4614_v13 = vadd.f32 %v7719_v7, %v4576_v46  ;;  %v4096_v26 = vadd.f32 %v4029_v34, %v7704_v33  ;;  %v3895_v30 = vpop.f32.mrf.mxu1  ;;  %v4377_v42 = vpop.f32.mrf.mxu0  ;;  %v4647_v37 = vmax.f32 %v4615_v49, 0.0 }
 0x29c   : > { %v4034_v15 = vsel %vm1027_vm0, %v4031_v38, %v4033_v25  ;;  %v4030_v3 = vrot.slane %v3895_v30, 1  ;;  %v4512_v24 = vrot.slane %v4377_v42, 2  ;;  %v4516_v27 = vsel %vm1510_vm1, %v4513_v19, %v4515_v39 }
 0x29d   : > { %v4646_v4 = vmax.f32 %v4614_v13, 0.0  ;;  %v4578_v5 = vadd.f32 %v4511_v12, %v4096_v26  ;;  %v4098_v44 = vadd.f32 %v4034_v15, %v7708_v60 }
 0x29e   : > { %v4032_v33 = vsel %vm1027_vm0, %v4030_v3, %v4031_v38  ;;  %v4514_v23 = vsel %vm1510_vm1, %v4512_v24, %v4513_v19 }
 0x29f   : > { %v5430_v58 = vpack.c.bf16 %v4646_v4, %v4645_v10  ;;  %v4616_v28 = vadd.f32 %v7719_v7, %v4578_v5  ;;  %v4580_v21 = vadd.f32 %v4516_v27, %v4098_v44  ;;  %v4097_v20 = vadd.f32 %v4032_v33, %v7710_v22 }
 0x2a1   : > { %5454 = vst [vmem:[%s7734_s8 + $0x68] sm:$0xff] %v5430_v58   ;;  %v4648_v16 = vmax.f32 %v4616_v28, 0.0  ;;  %v4618_v35 = vadd.f32 %v7719_v7, %v4580_v21  ;;  %v4579_v2 = vadd.f32 %v4514_v23, %v4097_v20 }
 0x2a3   : > { %v5435_v60 = vpack.c.bf16 %v4648_v16, %v4647_v37  ;;  %v4617_v40 = vadd.f32 %v7719_v7, %v4579_v2  ;;  %v4650_v17 = vmax.f32 %v4618_v35, 0.0 }
 0x2a5   : > { %5455 = vst [vmem:[%s7734_s8 + $0x70] sm:$0xff] %v5435_v60   ;;  %v4649_v18 = vmax.f32 %v4617_v40, 0.0 }
 0x2a7   : > { %v5440_v36 = vpack.c.bf16 %v4650_v17, %v4649_v18 }
 0x2a9   : > { %5456 = vst [vmem:[%s7734_s8 + $0x78] sm:$0xff] %v5440_v36  }
 0x2aa PF: > { %s13_s14 = sadd.s32 1, %s6528_s14   ;;  %s7960_s12 = smov %s6524_s13 }
 0x2ab   : > { %p10_p5 = scmp.ge.s32.totalorder %s13_s14, 4   ;;  %s7961_s13 = smov %s7963_s15 }
 0x2ad   :  { %12 = sbr.rel (!%p10_p5) target bundleno = 2 (0x2), region = 78 }

// kernel: vgg_forward.11
= control target key start
LH: loop header
LB: loop body
LE: loop exit
PB: predicated region body
PF: predicated region fallthrough
CT: control target
= control target key end

     0   :  { %s4398_s12 = smov 0   ;;  %s4400_s13 = smov 0   ;;  %s5259_s0 = inlined_call_operand.vmem [shape: bf16[2,10,16,256], index: 0, kind: input, shape index: {}]   ;;  %s5260_s1 = inlined_call_operand.vmem [shape: bf16[9,256,128], index: 1, kind: input, shape index: {}]   ;;  %s5261_s2 = inlined_call_operand.vmem [shape: f32[1,128], index: 2, kind: input, shape index: {}]   ;;  %s5262_s3 = inlined_call_operand.vmem [shape: bf16[2,8,8,128], index: 3, kind: output, shape index: {}]  }
   0x1   :  { %s4402_s14 = smov 0  }
   0x2 LB: > { %s25_s15 = sadd.s32 1, %s4372_s13  ;;  %p3026_p0 = scmp.ge.s32.totalorder %s4376_s14, 1  ;;  %s4376_s14 = sphi %s4402_s14, %s13_s14   ;;  %s4372_s13 = sphi %s4400_s13, %s5264_s13   ;;  %s4368_s12 = sphi %s4398_s12, %s5263_s12  }
   0x3   : > { %p27_p1 = scmp.ge.s32.totalorder %s25_s15, 2  ;;  %p168_p2 = scmp.lt.s32.totalorder %s4376_s14, 3 }
   0x5   : > { %s5266_s15 = smov (%p27_p1, %s25_s15), 0  ;;  %p169_p3 = pnand %p3026_p0, %p168_p2 }
   0x6   : > { %p202_p4 = scmp.lt.s32.totalorder (!%p169_p3), %s4368_s12, 1 }
   0x7   : > { %172 = sbr.rel (%p169_p3) target bundleno = 540 (0x21c), region = 32 }
   0xc   : > { %v4154_v0 = vld [vmem:[%s5260_s1 + $0x78] sm:$0xff]   ;;  %v4156_v2 = vld [vmem:[%s5260_s1 + $0x70] sm:$0xff]   ;;  %v4158_v4 = vld [vmem:[%s5260_s1 + $0x68] sm:$0xff]   ;;  %s5268_s12 = smov (!%p202_p4, %s4368_s12), 1  ;;  %vm779_vm0 = vcmask 1046528   ;;  %vm1062_vm1 = vcmask 1045504  }
   0xd   : > { %v4155_v1 = vld [vmem:[%s5260_s1 + $0x38] sm:$0xff]   ;;  %3537 = vmatprep.subr.bf16.mxu0 %v4154_v0  ;;  %4113 = vmatprep.subr.bf16.mxu1 %v4154_v0  ;;  %v4157_v3 = vld [vmem:[%s5260_s1 + $0x30] sm:$0xff]   ;;  %v4159_v5 = vld [vmem:[%s5260_s1 + $0x28] sm:$0xff]   ;;  %s4129_s30 = smul.u32 160, %s5268_s12  ;;  %s3513_s22 = sshll.u32 %s5268_s12, 5 }
   0xe   : > { %3538 = vmatpush3.bf16.msra.mxu0 %v4155_v1  ;;  %4121 = vmatpush3.bf16.msra.mxu1 %v4155_v1  ;;  %v4160_v6 = vld [vmem:[%s5260_s1 + $0x60] sm:$0xff]   ;;  %v4162_v8 = vld [vmem:[%s5260_s1 + $0x58] sm:$0xff]   ;;  %v4164_v10 = vld [vmem:[%s5260_s1 + $0x50] sm:$0xff]   ;;  %s5220_s25 = scalar_lea.vmem %s5262_s3, %s3513_s22 }
   0xf   : > { %3539 = vmatprep.subr.bf16.mxu0 %v4156_v2  ;;  %4114 = vmatprep.subr.bf16.mxu1 %v4156_v2  ;;  %v4161_v7 = vld [vmem:[%s5260_s1 + $0x20] sm:$0xff]   ;;  %s4449_s10 = scalar_lea.vmem %s5259_s0, %s4129_s30  ;;  %v4163_v9 = vld [vmem:[%s5260_s1 + $0x18] sm:$0xff]   ;;  %v4165_v13 = vld [vmem:[%s5260_s1 + $0x10] sm:$0xff]  }
  0x10   : > { %v4458_v11 = vld [vmem:[%s4449_s10 + $0x4] ss:$8 sps:$4 sm:$0xff]   ;;  %v4481_v18 = vld [vmem:[%s4449_s10] ss:$8 sps:$4 sm:$0xff]   ;;  %v4176_v20 = vld [vmem:[%s5260_s1 + $0xf8] sm:$0xff]  }
  0x11   : > { %v4461_v12 = vld [vmem:[%s4449_s10 + $0x44] ss:$8 sps:$4 sm:$0xff]   ;;  %480 = vmatprep.mubr.bf16.mxu0 %v4458_v11  ;;  %v4484_v19 = vld [vmem:[%s4449_s10 + $0x40] ss:$8 sps:$4 sm:$0xff]   ;;  %v4177_v21 = vld [vmem:[%s5260_s1 + $0x178] sm:$0xff]  }
  0x12   : > { %3540 = vmatpush3.bf16.msra.mxu0 %v4157_v3  ;;  %4122 = vmatpush3.bf16.msra.mxu1 %v4157_v3  ;;  %v4166_v14 = vld [vmem:[%s5260_s1 + $0x48] sm:$0xff]   ;;  %v4168_v16 = vld [vmem:[%s5260_s1 + $0x40] sm:$0xff]   ;;  %v4178_v22 = vld [vmem:[%s5260_s1 + $0xb8] sm:$0xff]  }
  0x13   : > { %3541 = vmatprep.subr.bf16.mxu0 %v4158_v4  ;;  %4115 = vmatprep.subr.bf16.mxu1 %v4158_v4  ;;  %v4167_v15 = vld [vmem:[%s5260_s1 + $0x8] sm:$0xff]   ;;  %v4169_v17 = vld [vmem:[%s5260_s1] sm:$0xff]   ;;  %v4179_v23 = vld [vmem:[%s5260_s1 + $0x138] sm:$0xff]  }
  0x14   : > { %508 = vmatprep.mubr.bf16.mxu1 %v4461_v12  ;;  %v4180_v24 = vld [vmem:[%s5260_s1 + $0xf0] sm:$0xff]   ;;  %v4190_v30 = vld [vmem:[%s5260_s1 + $0xe8] sm:$0xff]   ;;  %v4194_v36 = vld [vmem:[%s5260_s1 + $0xe0] sm:$0xff]  }
  0x15   : > { %v4181_v25 = vld [vmem:[%s5260_s1 + $0x170] sm:$0xff]   ;;  %v4191_v32 = vld [vmem:[%s5260_s1 + $0x168] sm:$0xff]   ;;  %v4195_v37 = vld [vmem:[%s5260_s1 + $0x160] sm:$0xff]  }
  0x16   : > { %3542 = vmatpush3.bf16.msra.mxu0 %v4159_v5  ;;  %4123 = vmatpush3.bf16.msra.mxu1 %v4159_v5  ;;  %v4505_v26 = vld [vmem:[%s4449_s10 + $0x14] ss:$8 sps:$4 sm:$0xff]   ;;  %v4522_v31 = vld [vmem:[%s4449_s10 + $0x10] ss:$8 sps:$4 sm:$0xff]   ;;  %v4192_v34 = vld [vmem:[%s5260_s1 + $0xa8] sm:$0xff]  }
  0x17   : > { %3543 = vmatprep.subr.bf16.mxu0 %v4160_v6  ;;  %4116 = vmatprep.subr.bf16.mxu1 %v4160_v6  ;;  %v4182_v27 = vld [vmem:[%s5260_s1 + $0xb0] sm:$0xff]   ;;  %v4193_v35 = vld [vmem:[%s5260_s1 + $0x128] sm:$0xff]   ;;  %v4196_v39 = vld [vmem:[%s5260_s1 + $0xa0] sm:$0xff]  }
  0x18   : > { %v4511_v28 = vld [vmem:[%s4449_s10 + $0x54] ss:$8 sps:$4 sm:$0xff]   ;;  %v4530_v33 = vld [vmem:[%s4449_s10 + $0x50] ss:$8 sps:$4 sm:$0xff]   ;;  %v4545_v38 = vld [vmem:[%s4449_s10 + $0x24] ss:$8 sps:$4 sm:$0xff]  }
  0x19   : > { %v4183_v29 = vld [vmem:[%s5260_s1 + $0x130] sm:$0xff]   ;;  %v4551_v40 = vld [vmem:[%s4449_s10 + $0x64] ss:$8 sps:$4 sm:$0xff]   ;;  %v4204_v42 = vld [vmem:[%s5260_s1 + $0xd8] sm:$0xff]  }
  0x1a   : > { %3544 = vmatpush3.bf16.msra.mxu0 %v4161_v7  ;;  %4124 = vmatpush3.bf16.msra.mxu1 %v4161_v7  ;;  %v4197_v41 = vld [vmem:[%s5260_s1 + $0x120] sm:$0xff]   ;;  %v4205_v45 = vld [vmem:[%s5260_s1 + $0x158] sm:$0xff]   ;;  %v4208_v48 = vld [vmem:[%s5260_s1 + $0xd0] sm:$0xff]  }
  0x1b   : > { %3545 = vmatprep.subr.bf16.mxu0 %v4162_v8  ;;  %4117 = vmatprep.subr.bf16.mxu1 %v4162_v8  ;;  %v4562_v43 = vld [vmem:[%s4449_s10 + $0x20] ss:$8 sps:$4 sm:$0xff]   ;;  %v4206_v46 = vld [vmem:[%s5260_s1 + $0x98] sm:$0xff]   ;;  %v4209_v49 = vld [vmem:[%s5260_s1 + $0x150] sm:$0xff]  }
  0x1c   : > { %v4565_v44 = vld [vmem:[%s4449_s10 + $0x60] ss:$8 sps:$4 sm:$0xff]   ;;  %v4207_v47 = vld [vmem:[%s5260_s1 + $0x118] sm:$0xff]   ;;  %v4210_v52 = vld [vmem:[%s5260_s1 + $0x90] sm:$0xff]  }
  0x1d   : > { %v4585_v50 = vld [vmem:[%s4449_s10 + $0x34] ss:$8 sps:$4 sm:$0xff]   ;;  %v4218_v54 = vld [vmem:[%s5260_s1 + $0xc8] sm:$0xff]   ;;  %v4602_v55 = vld [vmem:[%s4449_s10 + $0x30] ss:$8 sps:$4 sm:$0xff]  }
  0x1e   : > { %3546 = vmatpush3.bf16.msra.mxu0 %v4163_v9  ;;  %4125 = vmatpush3.bf16.msra.mxu1 %v4163_v9  ;;  %v4588_v51 = vld [vmem:[%s4449_s10 + $0x74] ss:$8 sps:$4 sm:$0xff]   ;;  %v4605_v56 = vld [vmem:[%s4449_s10 + $0x70] ss:$8 sps:$4 sm:$0xff]   ;;  %v4219_v57 = vld [vmem:[%s5260_s1 + $0x148] sm:$0xff]  }
  0x1f   : > { %3547 = vmatprep.subr.bf16.mxu0 %v4164_v10  ;;  %4118 = vmatprep.subr.bf16.mxu1 %v4164_v10  ;;  %v4211_v53 = vld [vmem:[%s5260_s1 + $0x110] sm:$0xff]   ;;  %v4220_v58 = vld [vmem:[%s5260_s1 + $0x88] sm:$0xff]   ;;  %v4222_v60 = vld [vmem:[%s5260_s1 + $0xc0] sm:$0xff]  }
  0x20   : > { %v4221_v59 = vld [vmem:[%s5260_s1 + $0x108] sm:$0xff]   ;;  %v4223_v61 = vld [vmem:[%s5260_s1 + $0x140] sm:$0xff]   ;;  %v4226_v0 = vld [vmem:[%s5260_s1 + $0x1f8] sm:$0xff]  }
  0x21   : > { %v4224_v62 = vld [vmem:[%s5260_s1 + $0x80] sm:$0xff]   ;;  %v4228_v1 = vld [vmem:[%s5260_s1 + $0x278] sm:$0xff]   ;;  %v4230_v4 = vld [vmem:[%s5260_s1 + $0x1f0] sm:$0xff]  }
  0x22   : > { %3548 = vmatpush3.bf16.msra.mxu0 %v4165_v13  ;;  %4126 = vmatpush3.bf16.msra.mxu1 %v4165_v13  ;;  %v4225_v63 = vld [vmem:[%s5260_s1 + $0x100] sm:$0xff]   ;;  %v4227_v2 = vld [vmem:[%s5260_s1 + $0x1b8] sm:$0xff]   ;;  %v4232_v5 = vld [vmem:[%s5260_s1 + $0x270] sm:$0xff]  }
  0x23   : > { %3549 = vmatprep.subr.bf16.mxu0 %v4166_v14  ;;  %4119 = vmatprep.subr.bf16.mxu1 %v4166_v14  ;;  %v4229_v3 = vld [vmem:[%s5260_s1 + $0x238] sm:$0xff]   ;;  %v4231_v6 = vld [vmem:[%s5260_s1 + $0x1b0] sm:$0xff]   ;;  %v4234_v8 = vld [vmem:[%s5260_s1 + $0x1e8] sm:$0xff]  }
  0x24   : > { %v4233_v7 = vld [vmem:[%s5260_s1 + $0x230] sm:$0xff]   ;;  %v4236_v9 = vld [vmem:[%s5260_s1 + $0x268] sm:$0xff]   ;;  %v4238_v13 = vld [vmem:[%s5260_s1 + $0x1e0] sm:$0xff]  }
  0x25   : > { %v4235_v10 = vld [vmem:[%s5260_s1 + $0x1a8] sm:$0xff]   ;;  %v4240_v14 = vld [vmem:[%s5260_s1 + $0x260] sm:$0xff]  }
  0x26   : > { %3550 = vmatpush3.bf16.msra.mxu0 %v4167_v15  ;;  %4127 = vmatpush3.bf16.msra.mxu1 %v4167_v15  ;;  %v4239_v15 = vld [vmem:[%s5260_s1 + $0x1a0] sm:$0xff]  }
  0x27   : > { %3551 = vmatprep.subr.bf16.mxu0 %v4168_v16  ;;  %4120 = vmatprep.subr.bf16.mxu1 %v4168_v16  ;;  %v4241_v16 = vld [vmem:[%s5260_s1 + $0x220] sm:$0xff]  }
  0x2a   : > { %3552 = vmatpush3.bf16.msra.mxu0 %v4169_v17  ;;  %4128 = vmatpush3.bf16.msra.mxu1 %v4169_v17  ;;  %v4242_v17 = vld [vmem:[%s5260_s1 + $0x1d8] sm:$0xff]  }
  0x2b   : > { %3601 = vmatprep.subr.bf16.mxu1 %v4176_v20  ;;  %3665 = vmatprep.subr.bf16.mxu0 %v4177_v21  ;;  %v4243_v20 = vld [vmem:[%s5260_s1 + $0x198] sm:$0xff]  }
  0x2c   : > { %v4245_v21 = vld [vmem:[%s5260_s1 + $0x218] sm:$0xff]  }
  0x2d   : > { %481 = vmatmul.mubr.bf16.vlgmr.msra.gmra.mxu0 %v4481_v18  ;;  %509 = vmatmul.mubr.bf16.vlgmr.msra.gmra.mxu1 %v4484_v19 }
  0x2e   : > { %3602 = vmatpush3.bf16.msra.mxu1 %v4178_v22  ;;  %3666 = vmatpush3.bf16.msra.mxu0 %v4179_v23  ;;  %v4246_v22 = vld [vmem:[%s5260_s1 + $0x1d0] sm:$0xff]  }
  0x2f   : > { %3603 = vmatprep.subr.bf16.mxu1 %v4180_v24  ;;  %3667 = vmatprep.subr.bf16.mxu0 %v4181_v25  ;;  %v4248_v23 = vld [vmem:[%s5260_s1 + $0x250] sm:$0xff]  }
  0x30   : > { %487 = vmatprep.mubr.bf16.mxu0 %v4505_v26  ;;  %515 = vmatprep.mubr.bf16.mxu1 %v4511_v28  ;;  %v4247_v24 = vld [vmem:[%s5260_s1 + $0x190] sm:$0xff]  }
  0x31   : > { %v4249_v25 = vld [vmem:[%s5260_s1 + $0x210] sm:$0xff]  }
  0x32   : > { %3604 = vmatpush3.bf16.msra.mxu1 %v4182_v27  ;;  %3668 = vmatpush3.bf16.msra.mxu0 %v4183_v29  ;;  %v4250_v27 = vld [vmem:[%s5260_s1 + $0x1c8] sm:$0xff]  }
  0x33   : > { %3605 = vmatprep.subr.bf16.mxu1 %v4190_v30  ;;  %3669 = vmatprep.subr.bf16.mxu0 %v4191_v32  ;;  %v4252_v29 = vld [vmem:[%s5260_s1 + $0x248] sm:$0xff]  }
  0x34   : > { %v4251_v30 = vld [vmem:[%s5260_s1 + $0x188] sm:$0xff]  }
  0x35   : > { %488 = vmatmul.mubr.bf16.gmra.mxu0 %v4522_v31  ;;  %516 = vmatmul.mubr.bf16.gmra.mxu1 %v4530_v33  ;;  %v4253_v32 = vld [vmem:[%s5260_s1 + $0x208] sm:$0xff]  }
  0x36   : > { %3606 = vmatpush3.bf16.msra.mxu1 %v4192_v34  ;;  %3670 = vmatpush3.bf16.msra.mxu0 %v4193_v35  ;;  %v4254_v34 = vld [vmem:[%s5260_s1 + $0x1c0] sm:$0xff]  }
  0x37   : > { %3607 = vmatprep.subr.bf16.mxu1 %v4194_v36  ;;  %3671 = vmatprep.subr.bf16.mxu0 %v4195_v37  ;;  %v4256_v35 = vld [vmem:[%s5260_s1 + $0x240] sm:$0xff]  }
  0x38   : > { %494 = vmatprep.mubr.bf16.mxu0 %v4545_v38  ;;  %522 = vmatprep.mubr.bf16.mxu1 %v4551_v40  ;;  %v4255_v36 = vld [vmem:[%s5260_s1 + $0x180] sm:$0xff]  }
  0x39   : > { %v4257_v37 = vld [vmem:[%s5260_s1 + $0x200] sm:$0xff]  }
  0x3a   : > { %3608 = vmatpush3.bf16.msra.mxu1 %v4196_v39  ;;  %3672 = vmatpush3.bf16.msra.mxu0 %v4197_v41  ;;  %v4258_v39 = vld [vmem:[%s5260_s1 + $0x2f8] sm:$0xff]  }
  0x3b   : > { %3609 = vmatprep.subr.bf16.mxu1 %v4204_v42  ;;  %3673 = vmatprep.subr.bf16.mxu0 %v4205_v45  ;;  %v4260_v41 = vld [vmem:[%s5260_s1 + $0x378] sm:$0xff]   ;;  %v4262_v45 = vld [vmem:[%s5260_s1 + $0x2f0] sm:$0xff]  }
  0x3c   : > { %v4261_v42 = vld [vmem:[%s5260_s1 + $0x338] sm:$0xff]  }
  0x3d   : > { %495 = vmatmul.mubr.bf16.gmra.mxu0 %v4562_v43  ;;  %523 = vmatmul.mubr.bf16.gmra.mxu1 %v4565_v44 }
  0x3e   : > { %3610 = vmatpush3.bf16.msra.mxu1 %v4206_v46  ;;  %3674 = vmatpush3.bf16.msra.mxu0 %v4207_v47  ;;  %v4263_v46 = vld [vmem:[%s5260_s1 + $0x2b0] sm:$0xff]  }
  0x3f   : > { %3611 = vmatprep.subr.bf16.mxu1 %v4208_v48  ;;  %3675 = vmatprep.subr.bf16.mxu0 %v4209_v49  ;;  %v4265_v47 = vld [vmem:[%s5260_s1 + $0x330] sm:$0xff]   ;;  %v4266_v48 = vld [vmem:[%s5260_s1 + $0x2e8] sm:$0xff]  }
  0x40   : > { %501 = vmatprep.mubr.bf16.mxu0 %v4585_v50  ;;  %529 = vmatprep.mubr.bf16.mxu1 %v4588_v51  ;;  %v4268_v49 = vld [vmem:[%s5260_s1 + $0x368] sm:$0xff]  }
  0x42   : > { %3612 = vmatpush3.bf16.msra.mxu1 %v4210_v52  ;;  %3676 = vmatpush3.bf16.msra.mxu0 %v4211_v53  ;;  %v4269_v52 = vld [vmem:[%s5260_s1 + $0x328] sm:$0xff]   ;;  %v4270_v53 = vld [vmem:[%s5260_s1 + $0x2e0] sm:$0xff]  }
  0x43   : > { %3613 = vmatprep.subr.bf16.mxu1 %v4218_v54  ;;  %3677 = vmatprep.subr.bf16.mxu0 %v4219_v57  ;;  %v4272_v54 = vld [vmem:[%s5260_s1 + $0x360] sm:$0xff]  }
  0x44   : > { %v4271_v57 = vld [vmem:[%s5260_s1 + $0x2a0] sm:$0xff]  }
  0x45   : > { %502 = vmatmul.mubr.bf16.gmra.mxu0 %v4602_v55  ;;  %530 = vmatmul.mubr.bf16.gmra.mxu1 %v4605_v56 }
  0x46   : > { %3614 = vmatpush3.bf16.msra.mxu1 %v4220_v58  ;;  %3678 = vmatpush3.bf16.msra.mxu0 %v4221_v59  ;;  %v4273_v58 = vld [vmem:[%s5260_s1 + $0x320] sm:$0xff]   ;;  %v4274_v59 = vld [vmem:[%s5260_s1 + $0x2d8] sm:$0xff]  }
  0x47   : > { %3615 = vmatprep.subr.bf16.mxu1 %v4222_v60  ;;  %3679 = vmatprep.subr.bf16.mxu0 %v4223_v61  ;;  %v4276_v60 = vld [vmem:[%s5260_s1 + $0x358] sm:$0xff]  }
  0x48   : > { %698 = vmatprep.mubr.bf16.mxu1 %v4458_v11  ;;  %981 = vmatprep.mubr.bf16.mxu0 %v4458_v11  ;;  %v4237_v11 = vld [vmem:[%s5260_s1 + $0x228] sm:$0xff]   ;;  %v4275_v61 = vld [vmem:[%s5260_s1 + $0x298] sm:$0xff]  }
  0x4a   : > { %3616 = vmatpush3.bf16.msra.mxu1 %v4224_v62  ;;  %3680 = vmatpush3.bf16.msra.mxu0 %v4225_v63  ;;  %v4277_v62 = vld [vmem:[%s5260_s1 + $0x318] sm:$0xff]   ;;  %v4278_v63 = vld [vmem:[%s5260_s1 + $0x2d0] sm:$0xff]  }
  0x4b   : > { %3729 = vmatprep.subr.bf16.mxu1 %v4226_v0  ;;  %3793 = vmatprep.subr.bf16.mxu0 %v4228_v1  ;;  %v4280_v0 = vld [vmem:[%s5260_s1 + $0x350] sm:$0xff]  }
  0x4c   : > { %v4279_v1 = vld [vmem:[%s5260_s1 + $0x290] sm:$0xff]  }
  0x4d   : > { %699 = vmatmul.mubr.bf16.vlgmr.msra.gmra.mxu1 %v4481_v18  ;;  %982 = vmatmul.mubr.bf16.vlgmr.msra.gmra.mxu0 %v4481_v18  ;;  %v4244_v18 = vld [vmem:[%s5260_s1 + $0x258] sm:$0xff]  }
  0x4e   : > { %3730 = vmatpush3.bf16.msra.mxu1 %v4227_v2  ;;  %3794 = vmatpush3.bf16.msra.mxu0 %v4229_v3  ;;  %v4842_v2 = vld [vmem:[%s4449_s10 + $0x44] ss:$8 sps:$4 sm:$0xff]   ;;  %v4281_v3 = vld [vmem:[%s5260_s1 + $0x310] sm:$0xff]  }
  0x4f   : > { %706 = vmatprep.mubr.bf16.mxu1 %v4505_v26  ;;  %989 = vmatprep.mubr.bf16.mxu0 %v4505_v26 }
  0x50   : > { %3731 = vmatprep.subr.bf16.mxu1 %v4230_v4  ;;  %3795 = vmatprep.subr.bf16.mxu0 %v4232_v5  ;;  %v4282_v4 = vld [vmem:[%s5260_s1 + $0x2c8] sm:$0xff]  }
  0x51   : > { %v4284_v5 = vld [vmem:[%s5260_s1 + $0x348] sm:$0xff]  }
  0x52   : > { %3732 = vmatpush3.bf16.msra.mxu1 %v4231_v6  ;;  %3796 = vmatpush3.bf16.msra.mxu0 %v4233_v7  ;;  %v4283_v6 = vld [vmem:[%s5260_s1 + $0x288] sm:$0xff]  }
  0x53   : > { %3733 = vmatprep.subr.bf16.mxu1 %v4234_v8  ;;  %3797 = vmatprep.subr.bf16.mxu0 %v4236_v9  ;;  %v4285_v7 = vld [vmem:[%s5260_s1 + $0x308] sm:$0xff]   ;;  %v4289_v8 = vld [vmem:[%s5260_s1 + $0x2c0] sm:$0xff]  }
  0x54   : > { %v4291_v9 = vld [vmem:[%s5260_s1 + $0x340] sm:$0xff]  }
  0x55   : > { %707 = vmatmul.mubr.bf16.gmra.mxu1 %v4522_v31  ;;  %990 = vmatmul.mubr.bf16.gmra.mxu0 %v4522_v31 }
  0x56   : > { %714 = vmatprep.mubr.bf16.mxu1 %v4545_v38  ;;  %997 = vmatprep.mubr.bf16.mxu0 %v4545_v38 }
  0x57   : > { %3734 = vmatpush3.bf16.msra.mxu1 %v4235_v10  ;;  %3798 = vmatpush3.bf16.msra.mxu0 %v4237_v11  ;;  %v4290_v10 = vld [vmem:[%s5260_s1 + $0x280] sm:$0xff]  }
  0x58   : > { %3735 = vmatprep.subr.bf16.mxu1 %v4238_v13  ;;  %3799 = vmatprep.subr.bf16.mxu0 %v4240_v14  ;;  %v4292_v11 = vld [vmem:[%s5260_s1 + $0x300] sm:$0xff]   ;;  %v4293_v13 = vld [vmem:[%s5260_s1 + $0x3f8] sm:$0xff]   ;;  %v4299_v14 = vld [vmem:[%s5260_s1 + $0x470] sm:$0xff]  }
  0x5b   : > { %3736 = vmatpush3.bf16.msra.mxu1 %v4239_v15  ;;  %3800 = vmatpush3.bf16.msra.mxu0 %v4241_v16  ;;  %v4342_v15 = vld [vmem:[%s4449_s10 + $0x10] ss:$8 sps:$4 sm:$0xff]  }
  0x5c   : > { %3737 = vmatprep.subr.bf16.mxu1 %v4242_v17  ;;  %3801 = vmatprep.subr.bf16.mxu0 %v4244_v18  ;;  %v4298_v16 = vld [vmem:[%s5260_s1 + $0x3b0] sm:$0xff]   ;;  %v4304_v18 = vld [vmem:[%s5260_s1 + $0x3e8] sm:$0xff]  }
  0x5d   : > { %715 = vmatmul.mubr.bf16.gmra.mxu1 %v4562_v43  ;;  %998 = vmatmul.mubr.bf16.gmra.mxu0 %v4562_v43  ;;  %v4300_v17 = vld [vmem:[%s5260_s1 + $0x430] sm:$0xff]  }
  0x5e   : > { %722 = vmatprep.mubr.bf16.mxu1 %v4585_v50  ;;  %1005 = vmatprep.mubr.bf16.mxu0 %v4585_v50 }
  0x5f   : > { %3738 = vmatpush3.bf16.msra.mxu1 %v4243_v20  ;;  %3802 = vmatpush3.bf16.msra.mxu0 %v4245_v21  ;;  %v4306_v20 = vld [vmem:[%s5260_s1 + $0x468] sm:$0xff]  }
  0x60   : > { %3739 = vmatprep.subr.bf16.mxu1 %v4246_v22  ;;  %3803 = vmatprep.subr.bf16.mxu0 %v4248_v23  ;;  %v4934_v21 = vld [vmem:[%s4449_s10 + $0x44] ss:$8 sps:$4 sm:$0xff]  }
  0x61   : > { %v4307_v22 = vld [vmem:[%s5260_s1 + $0x428] sm:$0xff]   ;;  %v4311_v23 = vld [vmem:[%s5260_s1 + $0x3e0] sm:$0xff]  }
  0x63   : > { %3740 = vmatpush3.bf16.msra.mxu1 %v4247_v24  ;;  %3804 = vmatpush3.bf16.msra.mxu0 %v4249_v25  ;;  %v4313_v24 = vld [vmem:[%s5260_s1 + $0x460] sm:$0xff]  }
  0x64   : > { %3741 = vmatprep.subr.bf16.mxu1 %v4250_v27  ;;  %3805 = vmatprep.subr.bf16.mxu0 %v4252_v29  ;;  %v4312_v25 = vld [vmem:[%s5260_s1 + $0x3a0] sm:$0xff]  }
  0x65   : > { %723 = vmatmul.mubr.bf16.gmra.mxu1 %v4602_v55  ;;  %1006 = vmatmul.mubr.bf16.gmra.mxu0 %v4602_v55  ;;  %v4314_v27 = vld [vmem:[%s5260_s1 + $0x420] sm:$0xff]  }
  0x66   : > { %730 = vmatprep.mubr.bf16.mxu1 %v4461_v12  ;;  %1013 = vmatprep.mubr.bf16.mxu0 %v4461_v12  ;;  %v4259_v12 = vld [vmem:[%s5260_s1 + $0x2b8] sm:$0xff]   ;;  %v4965_v29 = vld [vmem:[%s4449_s10 + $0x40] ss:$8 sps:$4 sm:$0xff]  }
  0x67   : > { %3742 = vmatpush3.bf16.msra.mxu1 %v4251_v30  ;;  %3806 = vmatpush3.bf16.msra.mxu0 %v4253_v32  ;;  %v4968_v30 = vld [vmem:[%s4449_s10 + $0x54] ss:$8 sps:$4 sm:$0xff]  }
  0x68   : > { %3743 = vmatprep.subr.bf16.mxu1 %v4254_v34  ;;  %3807 = vmatprep.subr.bf16.mxu0 %v4256_v35  ;;  %v4319_v32 = vld [vmem:[%s5260_s1 + $0x398] sm:$0xff]   ;;  %v4325_v35 = vld [vmem:[%s5260_s1 + $0x3d0] sm:$0xff]  }
  0x69   : > { %v4321_v34 = vld [vmem:[%s5260_s1 + $0x418] sm:$0xff]  }
  0x6b   : > { %3744 = vmatpush3.bf16.msra.mxu1 %v4255_v36  ;;  %3808 = vmatpush3.bf16.msra.mxu0 %v4257_v37  ;;  %v4327_v36 = vld [vmem:[%s5260_s1 + $0x450] sm:$0xff]  }
  0x6c   : > { %3857 = vmatprep.subr.bf16.mxu1 %v4258_v39  ;;  %3921 = vmatprep.subr.bf16.mxu0 %v4260_v41  ;;  %v4326_v37 = vld [vmem:[%s5260_s1 + $0x390] sm:$0xff]   ;;  %v4331_v41 = vld [vmem:[%s5260_s1 + $0x448] sm:$0xff]  }
  0x6d   : > { %731 = vmatmul.mubr.bf16.gmra.mxu1 %v4484_v19  ;;  %1014 = vmatmul.mubr.bf16.gmra.mxu0 %v4484_v19  ;;  %v4328_v39 = vld [vmem:[%s5260_s1 + $0x410] sm:$0xff]  }
  0x6e   : > { %738 = vmatprep.mubr.bf16.mxu1 %v4511_v28  ;;  %1021 = vmatprep.mubr.bf16.mxu0 %v4511_v28 }
  0x75   : > { %739 = vmatmul.mubr.bf16.gmra.mxu1 %v4530_v33  ;;  %1022 = vmatmul.mubr.bf16.gmra.mxu0 %v4530_v33 }
  0x76   : > { %746 = vmatprep.mubr.bf16.mxu1 %v4551_v40  ;;  %1029 = vmatprep.mubr.bf16.mxu0 %v4551_v40 }
  0x7d   : > { %747 = vmatmul.mubr.bf16.gmra.mxu1 %v4565_v44  ;;  %1030 = vmatmul.mubr.bf16.gmra.mxu0 %v4565_v44 }
  0x7e   : > { %754 = vmatprep.mubr.bf16.mxu1 %v4588_v51  ;;  %1037 = vmatprep.mubr.bf16.mxu0 %v4588_v51 }
  0x85   : > { %755 = vmatmul.mubr.bf16.gmra.mxu1 %v4605_v56  ;;  %1038 = vmatmul.mubr.bf16.gmra.mxu0 %v4605_v56 }
  0x86   : > { %1361 = vmatprep.mubr.bf16.mxu1 %v4505_v26  ;;  %1587 = vmatprep.mubr.bf16.mxu0 %v4505_v26  ;;  %v4264_v26 = vld [vmem:[%s5260_s1 + $0x370] sm:$0xff]  }
  0x8d   : > { %1362 = vmatmul.mubr.bf16.vlgmr.msra.gmra.mxu1 %v4522_v31  ;;  %1588 = vmatmul.mubr.bf16.vlgmr.msra.gmra.mxu0 %v4522_v31  ;;  %v4267_v31 = vld [vmem:[%s5260_s1 + $0x2a8] sm:$0xff]  }
  0x8e   : > { %3858 = vmatpush3.bf16.msra.mxu1 %v4259_v12  ;;  %3922 = vmatpush3.bf16.msra.mxu0 %v4261_v42  ;;  %v4999_v12 = vld [vmem:[%s4449_s10 + $0x50] ss:$8 sps:$4 sm:$0xff]   ;;  %v5002_v42 = vld [vmem:[%s4449_s10 + $0x64] ss:$8 sps:$4 sm:$0xff]  }
  0x8f   : > { %1368 = vmatprep.mubr.bf16.mxu1 %v4545_v38  ;;  %1595 = vmatprep.mubr.bf16.mxu0 %v4545_v38 }
  0x90   : > { %3859 = vmatprep.subr.bf16.mxu1 %v4262_v45  ;;  %3923 = vmatprep.subr.bf16.mxu0 %v4264_v26  ;;  %v4330_v45 = vld [vmem:[%s5260_s1 + $0x388] sm:$0xff]   ;;  %v4336_v26 = vld [vmem:[%s5260_s1 + $0x3c0] sm:$0xff]  }
  0x92   : > { %3860 = vmatpush3.bf16.msra.mxu1 %v4263_v46  ;;  %3924 = vmatpush3.bf16.msra.mxu0 %v4265_v47  ;;  %v4332_v46 = vld [vmem:[%s5260_s1 + $0x408] sm:$0xff]   ;;  %v4338_v47 = vld [vmem:[%s5260_s1 + $0x440] sm:$0xff]  }
  0x93   : > { %3861 = vmatprep.subr.bf16.mxu1 %v4266_v48  ;;  %3925 = vmatprep.subr.bf16.mxu0 %v4268_v49  ;;  %v4343_v48 = vld [vmem:[%s4449_s10 + $0x40] ss:$8 sps:$4 sm:$0xff]   ;;  %v4344_v49 = vld [vmem:[%s4449_s10 + $0x54] ss:$8 sps:$4 sm:$0xff]  }
  0x95   : > { %1369 = vmatmul.mubr.bf16.gmra.mxu1 %v4562_v43  ;;  %1596 = vmatmul.mubr.bf16.gmra.mxu0 %v4562_v43 }
  0x96   : > { %1375 = vmatprep.mubr.bf16.mxu1 %v4585_v50  ;;  %1603 = vmatprep.mubr.bf16.mxu0 %v4585_v50 }
  0x97   : > { %3862 = vmatpush3.bf16.msra.mxu1 %v4267_v31  ;;  %3926 = vmatpush3.bf16.msra.mxu0 %v4269_v52  ;;  %v4337_v31 = vld [vmem:[%s5260_s1 + $0x380] sm:$0xff]  }
  0x98   : > { %3863 = vmatprep.subr.bf16.mxu1 %v4270_v53  ;;  %3927 = vmatprep.subr.bf16.mxu0 %v4272_v54  ;;  %v4339_v52 = vld [vmem:[%s5260_s1 + $0x400] sm:$0xff]   ;;  %v5030_v54 = vld [vmem:[%s4449_s10 + $0x74] ss:$8 sps:$4 sm:$0xff]  }
  0x99   : > { %v5027_v53 = vld [vmem:[%s4449_s10 + $0x60] ss:$8 sps:$4 sm:$0xff]  }
  0x9b   : > { %3864 = vmatpush3.bf16.msra.mxu1 %v4271_v57  ;;  %3928 = vmatpush3.bf16.msra.mxu0 %v4273_v58 }
  0x9c   : > { %3865 = vmatprep.subr.bf16.mxu1 %v4274_v59  ;;  %3929 = vmatprep.subr.bf16.mxu0 %v4276_v60  ;;  %v4345_v59 = vld [vmem:[%s4449_s10 + $0x50] ss:$8 sps:$4 sm:$0xff]   ;;  %v4346_v60 = vld [vmem:[%s4449_s10 + $0x64] ss:$8 sps:$4 sm:$0xff]  }
  0x9d   : > { %1376 = vmatmul.mubr.bf16.gmra.mxu1 %v4602_v55  ;;  %1604 = vmatmul.mubr.bf16.gmra.mxu0 %v4602_v55 }
  0x9e   : > { %1382 = vmatprep.mubr.bf16.mxu1 %v4842_v2  ;;  %1611 = vmatprep.mubr.bf16.mxu0 %v4842_v2 }
  0x9f   : > { %3866 = vmatpush3.bf16.msra.mxu1 %v4275_v61  ;;  %3930 = vmatpush3.bf16.msra.mxu0 %v4277_v62 }
  0xa0   : > { %3867 = vmatprep.subr.bf16.mxu1 %v4278_v63  ;;  %3931 = vmatprep.subr.bf16.mxu0 %v4280_v0 }
  0xa3   : > { %3868 = vmatpush3.bf16.msra.mxu1 %v4279_v1  ;;  %3932 = vmatpush3.bf16.msra.mxu0 %v4281_v3  ;;  %v5041_v3 = vld [vmem:[%s4449_s10 + $0x70] ss:$8 sps:$4 sm:$0xff]  }
  0xa4   : > { %3869 = vmatprep.subr.bf16.mxu1 %v4282_v4  ;;  %3933 = vmatprep.subr.bf16.mxu0 %v4284_v5 }
  0xa5   : > { %1383 = vmatmul.mubr.bf16.gmra.mxu1 %v4484_v19  ;;  %1612 = vmatmul.mubr.bf16.gmra.mxu0 %v4484_v19  ;;  %v4295_v19 = vld [vmem:[%s5260_s1 + $0x478] sm:$0xff]  }
  0xa6   : > { %1389 = vmatprep.mubr.bf16.mxu1 %v4511_v28  ;;  %1619 = vmatprep.mubr.bf16.mxu0 %v4511_v28  ;;  %v4892_v28 = vld [vmem:[%s4449_s10 + $0x84] ss:$8 sps:$4 sm:$0xff]  }
  0xa7   : > { %3870 = vmatpush3.bf16.msra.mxu1 %v4283_v6  ;;  %3934 = vmatpush3.bf16.msra.mxu0 %v4285_v7 }
  0xa8   : > { %3871 = vmatprep.subr.bf16.mxu1 %v4289_v8  ;;  %3935 = vmatprep.subr.bf16.mxu0 %v4291_v9  ;;  %v4347_v8 = vld [vmem:[%s4449_s10 + $0x60] ss:$8 sps:$4 sm:$0xff]   ;;  %v4348_v9 = vld [vmem:[%s4449_s10 + $0x74] ss:$8 sps:$4 sm:$0xff]  }
  0xab   : > { %3872 = vmatpush3.bf16.msra.mxu1 %v4290_v10  ;;  %3936 = vmatpush3.bf16.msra.mxu0 %v4292_v11 }
  0xac   : > { %3985 = vmatprep.subr.bf16.mxu1 %v4293_v13  ;;  %4049 = vmatprep.subr.bf16.mxu0 %v4295_v19 }
  0xad   : > { %1390 = vmatmul.mubr.bf16.gmra.mxu1 %v4530_v33  ;;  %1620 = vmatmul.mubr.bf16.gmra.mxu0 %v4530_v33  ;;  %v4899_v33 = vld [vmem:[%s4449_s10 + $0x80] ss:$8 sps:$4 sm:$0xff]  }
  0xae   : > { %1396 = vmatprep.mubr.bf16.mxu1 %v4551_v40  ;;  %1627 = vmatprep.mubr.bf16.mxu0 %v4551_v40  ;;  %v4341_v40 = vld [vmem:[%s4449_s10 + $0x14] ss:$8 sps:$4 sm:$0xff]  }
  0xb5   : > { %1397 = vmatmul.mubr.bf16.gmra.mxu1 %v4565_v44  ;;  %1628 = vmatmul.mubr.bf16.gmra.mxu0 %v4565_v44  ;;  %v4294_v44 = vld [vmem:[%s5260_s1 + $0x3b8] sm:$0xff]  }
  0xb6   : > { %1403 = vmatprep.mubr.bf16.mxu1 %v4588_v51  ;;  %1635 = vmatprep.mubr.bf16.mxu0 %v4588_v51  ;;  %v4296_v51 = vld [vmem:[%s5260_s1 + $0x438] sm:$0xff]  }
  0xbd   : > { %1404 = vmatmul.mubr.bf16.gmra.mxu1 %v4605_v56  ;;  %1636 = vmatmul.mubr.bf16.gmra.mxu0 %v4605_v56  ;;  %v4297_v56 = vld [vmem:[%s5260_s1 + $0x3f0] sm:$0xff]  }
  0xbe   : > { %1410 = vmatprep.mubr.bf16.mxu1 %v4892_v28  ;;  %1643 = vmatprep.mubr.bf16.mxu0 %v4892_v28 }
  0xc5   : > { %1411 = vmatmul.mubr.bf16.gmra.mxu1 %v4899_v33  ;;  %1644 = vmatmul.mubr.bf16.gmra.mxu0 %v4899_v33 }
  0xc6   : > { %1869 = vmatprep.mubr.bf16.mxu1 %v4341_v40  ;;  %2248 = vmatprep.mubr.bf16.mxu0 %v4545_v38 }
  0xcd   : > { %1870 = vmatmul.mubr.bf16.vlgmr.msra.gmra.mxu1 %v4342_v15  ;;  %2249 = vmatmul.mubr.bf16.vlgmr.msra.gmra.mxu0 %v4562_v43 }
  0xce   : > { %3986 = vmatpush3.bf16.msra.mxu1 %v4294_v44  ;;  %4050 = vmatpush3.bf16.msra.mxu0 %v4296_v51  ;;  %v5052_v51 = vld [vmem:[%s4449_s10 + $0x94] ss:$8 sps:$4 sm:$0xff]  }
  0xcf   : > { %1877 = vmatprep.mubr.bf16.mxu1 %v4545_v38  ;;  %2255 = vmatprep.mubr.bf16.mxu0 %v4585_v50  ;;  %v4305_v38 = vld [vmem:[%s5260_s1 + $0x3a8] sm:$0xff]  }
  0xd0   : > { %3987 = vmatprep.subr.bf16.mxu1 %v4297_v56  ;;  %4051 = vmatprep.subr.bf16.mxu0 %v4299_v14 }
  0xd2   : > { %3988 = vmatpush3.bf16.msra.mxu1 %v4298_v16  ;;  %4052 = vmatpush3.bf16.msra.mxu0 %v4300_v17  ;;  %v4349_v17 = vld [vmem:[%s4449_s10 + $0x70] ss:$8 sps:$4 sm:$0xff]  }
  0xd3   : > { %3989 = vmatprep.subr.bf16.mxu1 %v4304_v18  ;;  %4053 = vmatprep.subr.bf16.mxu0 %v4306_v20 }
  0xd5   : > { %1878 = vmatmul.mubr.bf16.gmra.mxu1 %v4562_v43  ;;  %2256 = vmatmul.mubr.bf16.gmra.mxu0 %v4602_v55  ;;  %v4318_v43 = vld [vmem:[%s5260_s1 + $0x3d8] sm:$0xff]  }
  0xd6   : > { %1885 = vmatprep.mubr.bf16.mxu1 %v4585_v50  ;;  %2262 = vmatprep.mubr.bf16.mxu0 %v4934_v21  ;;  %v4320_v50 = vld [vmem:[%s5260_s1 + $0x458] sm:$0xff]  }
  0xd7   : > { %3990 = vmatpush3.bf16.msra.mxu1 %v4305_v38  ;;  %4054 = vmatpush3.bf16.msra.mxu0 %v4307_v22 }
  0xd8   : > { %3991 = vmatprep.subr.bf16.mxu1 %v4311_v23  ;;  %4055 = vmatprep.subr.bf16.mxu0 %v4313_v24 }
  0xdb   : > { %3992 = vmatpush3.bf16.msra.mxu1 %v4312_v25  ;;  %4056 = vmatpush3.bf16.msra.mxu0 %v4314_v27  ;;  %v5063_v25 = vld [vmem:[%s4449_s10 + $0x90] ss:$8 sps:$4 sm:$0xff]  }
  0xdc   : > { %3993 = vmatprep.subr.bf16.mxu1 %v4318_v43  ;;  %4057 = vmatprep.subr.bf16.mxu0 %v4320_v50 }
  0xdd   : > { %1886 = vmatmul.mubr.bf16.gmra.mxu1 %v4602_v55  ;;  %2263 = vmatmul.mubr.bf16.gmra.mxu0 %v4965_v29  ;;  %v4329_v55 = vld [vmem:[%s5260_s1 + $0x3c8] sm:$0xff]  }
  0xde   : > { %1893 = vmatprep.mubr.bf16.mxu1 %v4842_v2  ;;  %2269 = vmatprep.mubr.bf16.mxu0 %v4968_v30 }
  0xdf   : > { %3994 = vmatpush3.bf16.msra.mxu1 %v4319_v32  ;;  %4058 = vmatpush3.bf16.msra.mxu0 %v4321_v34  ;;  %v4350_v34 = vld [vmem:[%s4449_s10 + $0x24] ss:$8 sps:$4 sm:$0xff]  }
  0xe0   : > { %3995 = vmatprep.subr.bf16.mxu1 %v4325_v35  ;;  %4059 = vmatprep.subr.bf16.mxu0 %v4327_v36 }
  0xe3   : > { %3996 = vmatpush3.bf16.msra.mxu1 %v4326_v37  ;;  %4060 = vmatpush3.bf16.msra.mxu0 %v4328_v39 }
  0xe4   : > { %3997 = vmatprep.subr.bf16.mxu1 %v4329_v55  ;;  %4061 = vmatprep.subr.bf16.mxu0 %v4331_v41 }
  0xe5   : > { %1894 = vmatmul.mubr.bf16.gmra.mxu1 %v4343_v48  ;;  %2270 = vmatmul.mubr.bf16.gmra.mxu0 %v4999_v12  ;;  %v4351_v48 = vld [vmem:[%s4449_s10 + $0x20] ss:$8 sps:$4 sm:$0xff]  }
  0xe6   : > { %1901 = vmatprep.mubr.bf16.mxu1 %v4344_v49  ;;  %2276 = vmatprep.mubr.bf16.mxu0 %v5002_v42  ;;  %v4352_v49 = vld [vmem:[%s4449_s10 + $0x34] ss:$8 sps:$4 sm:$0xff]  }
  0xe7   : > { %3998 = vmatpush3.bf16.msra.mxu1 %v4330_v45  ;;  %4062 = vmatpush3.bf16.msra.mxu0 %v4332_v46 }
  0xe8   : > { %3999 = vmatprep.subr.bf16.mxu1 %v4336_v26  ;;  %4063 = vmatprep.subr.bf16.mxu0 %v4338_v47 }
  0xeb   : > { %4000 = vmatpush3.bf16.msra.mxu1 %v4337_v31  ;;  %4064 = vmatpush3.bf16.msra.mxu0 %v4339_v52 }
  0xed   : > { %v3553_v57 = vpop.f32.mrf.mxu0  ;;  %v3577_v58 = vpop.f32.mrf.mxu1  ;;  %1902 = vmatmul.mubr.bf16.gmra.mxu1 %v4345_v59  ;;  %2277 = vmatmul.mubr.bf16.gmra.mxu0 %v5027_v53 }
  0xee   : > { %1909 = vmatprep.mubr.bf16.mxu1 %v4346_v60  ;;  %2283 = vmatprep.mubr.bf16.mxu0 %v5030_v54 }
  0xef   : > { %v3554_v61 = vpop.f32.mrf.mxu0  ;;  %v3578_v62 = vpop.f32.mrf.mxu1 }
  0xf0   : > { %v5036_v63 = vadd.f32 %v3554_v61, %v3553_v57  ;;  %v5038_v0 = vadd.f32 %v3578_v62, %v3577_v58 }
  0xf1   : > { %v3556_v1 = vpop.f32.mrf.mxu0  ;;  %v3580_v2 = vpop.f32.mrf.mxu1 }
  0xf3   : > { %v3557_v4 = vpop.f32.mrf.mxu0  ;;  %v3581_v5 = vpop.f32.mrf.mxu1 }
  0xf5   : > { %v3559_v6 = vpop.f32.mrf.mxu0  ;;  %v3583_v7 = vpop.f32.mrf.mxu1  ;;  %1910 = vmatmul.mubr.bf16.gmra.mxu1 %v4347_v8  ;;  %2284 = vmatmul.mubr.bf16.gmra.mxu0 %v5041_v3 }
  0xf6   : > { %1917 = vmatprep.mubr.bf16.mxu1 %v4348_v9  ;;  %2290 = vmatprep.mubr.bf16.mxu0 %v4892_v28 }
  0xf7   : > { %v3560_v10 = vpop.f32.mrf.mxu0  ;;  %v3584_v11 = vpop.f32.mrf.mxu1 }
  0xf8   : > { %v5047_v13 = vadd.f32 %v3560_v10, %v3559_v6  ;;  %v5049_v19 = vadd.f32 %v3584_v11, %v3583_v7  ;;  %v4353_v6 = vld [vmem:[%s4449_s10 + $0x30] ss:$8 sps:$4 sm:$0xff]  }
  0xf9   : > { %v3562_v40 = vpop.f32.mrf.mxu0  ;;  %v3586_v44 = vpop.f32.mrf.mxu1 }
  0xfb   : > { %v3563_v56 = vpop.f32.mrf.mxu0  ;;  %v3587_v14 = vpop.f32.mrf.mxu1 }
  0xfd   : > { %v3565_v15 = vpop.f32.mrf.mxu0  ;;  %v3589_v16 = vpop.f32.mrf.mxu1  ;;  %1918 = vmatmul.mubr.bf16.gmra.mxu1 %v4349_v17  ;;  %2291 = vmatmul.mubr.bf16.gmra.mxu0 %v4899_v33 }
  0xfe   : > { %1925 = vmatprep.mubr.bf16.mxu1 %v4892_v28  ;;  %2297 = vmatprep.mubr.bf16.mxu0 %v5052_v51 }
  0xff   : > { %v3566_v18 = vpop.f32.mrf.mxu0  ;;  %v3590_v20 = vpop.f32.mrf.mxu1 }
 0x100   : > { %v5058_v38 = vadd.f32 %v3566_v18, %v3565_v15  ;;  %v5060_v22 = vadd.f32 %v3590_v20, %v3589_v16 }
 0x101   : > { %v3568_v23 = vpop.f32.mrf.mxu0  ;;  %v3592_v24 = vpop.f32.mrf.mxu1 }
 0x103   : > { %v3569_v27 = vpop.f32.mrf.mxu0  ;;  %v3593_v43 = vpop.f32.mrf.mxu1 }
 0x105   : > { %v3571_v50 = vpop.f32.mrf.mxu0  ;;  %v3595_v32 = vpop.f32.mrf.mxu1  ;;  %1926 = vmatmul.mubr.bf16.gmra.mxu1 %v4899_v33  ;;  %2298 = vmatmul.mubr.bf16.gmra.mxu0 %v5063_v25 }
 0x106   : > { %2474 = vmatprep.mubr.bf16.mxu1 %v4350_v34  ;;  %2756 = vmatprep.mubr.bf16.mxu0 %v4350_v34 }
 0x107   : > { %v3572_v35 = vpop.f32.mrf.mxu0  ;;  %v3596_v36 = vpop.f32.mrf.mxu1 }
 0x108   : > { %v5068_v37 = vadd.f32 %v3572_v35, %v3571_v50  ;;  %v5070_v39 = vadd.f32 %v3596_v36, %v3595_v32 }
 0x109   : > { %v3574_v55 = vpop.f32.mrf.mxu0  ;;  %v3598_v41 = vpop.f32.mrf.mxu1 }
 0x10b   : > { %v3575_v45 = vpop.f32.mrf.mxu0  ;;  %v3599_v46 = vpop.f32.mrf.mxu1 }
 0x10d   : > { %v3617_v26 = vpop.f32.mrf.mxu1  ;;  %v3681_v47 = vpop.f32.mrf.mxu0  ;;  %2475 = vmatmul.mubr.bf16.vlgmr.msra.gmra.mxu1 %v4351_v48  ;;  %2757 = vmatmul.mubr.bf16.vlgmr.msra.gmra.mxu0 %v4351_v48 }
 0x10e   : > { %2482 = vmatprep.mubr.bf16.mxu1 %v4352_v49  ;;  %2764 = vmatprep.mubr.bf16.mxu0 %v4352_v49 }
 0x10f   : > { %v3618_v31 = vpop.f32.mrf.mxu1  ;;  %v3682_v52 = vpop.f32.mrf.mxu0 }
 0x110   : > { %v3619_v57 = vadd.f32 %v3618_v31, %v3617_v26  ;;  %v3683_v58 = vadd.f32 %v3682_v52, %v3681_v47 }
 0x111   : > { %v3620_v59 = vpop.f32.mrf.mxu1  ;;  %v3684_v60 = vpop.f32.mrf.mxu0 }
 0x112   : > { %v780_v7 = vrot.slane %v3619_v57, 1  ;;  %v1063_v8 = vrot.slane %v3683_v58, 2 }
 0x113   : > { %v3621_v61 = vpop.f32.mrf.mxu1  ;;  %v3685_v62 = vpop.f32.mrf.mxu0 }
 0x114   : > { %v3622_v1 = vadd.f32 %v3621_v61, %v3620_v59  ;;  %v3686_v2 = vadd.f32 %v3685_v62, %v3684_v60 }
 0x115   : > { %v3623_v4 = vpop.f32.mrf.mxu1  ;;  %v3687_v5 = vpop.f32.mrf.mxu0  ;;  %2483 = vmatmul.mubr.bf16.gmra.mxu1 %v4353_v6  ;;  %2765 = vmatmul.mubr.bf16.gmra.mxu0 %v4353_v6 }
 0x116   : > { %v781_v9 = vrot.slane %v3622_v1, 1  ;;  %v1064_v10 = vrot.slane %v3686_v2, 2  ;;  %2490 = vmatprep.mubr.bf16.mxu1 %v4934_v21  ;;  %2772 = vmatprep.mubr.bf16.mxu0 %v4934_v21 }
 0x117   : > { %v3624_v11 = vpop.f32.mrf.mxu1  ;;  %v3688_v40 = vpop.f32.mrf.mxu0 }
 0x118   : > { %v782_v44 = vsel %vm779_vm0, %v780_v7, %v781_v9  ;;  %v3625_v56 = vadd.f32 %v3624_v11, %v3623_v4  ;;  %v3689_v14 = vadd.f32 %v3688_v40, %v3687_v5  ;;  %v1065_v15 = vsel %vm1062_vm1, %v1063_v8, %v1064_v10 }
 0x119   : > { %v3626_v16 = vpop.f32.mrf.mxu1  ;;  %v3690_v17 = vpop.f32.mrf.mxu0  ;;  %v812_v18 = vadd.f32 %v5036_v63, %v782_v44 }
 0x11a   : > { %v783_v32 = vrot.slane %v3625_v56, 1  ;;  %v1066_v34 = vrot.slane %v3689_v14, 2 }
 0x11b   : > { %v3627_v20 = vpop.f32.mrf.mxu1  ;;  %v3691_v23 = vpop.f32.mrf.mxu0  ;;  %v5080_v24 = vadd.f32 %v1065_v15, %v812_v18 }
 0x11c   : > { %v3628_v27 = vadd.f32 %v3627_v20, %v3626_v16  ;;  %v3692_v43 = vadd.f32 %v3691_v23, %v3690_v17 }
 0x11d   : > { %v3629_v50 = vpop.f32.mrf.mxu1  ;;  %v3693_v21 = vpop.f32.mrf.mxu0  ;;  %2491 = vmatmul.mubr.bf16.gmra.mxu1 %v4965_v29  ;;  %2773 = vmatmul.mubr.bf16.gmra.mxu0 %v4965_v29 }
 0x11e   : > { %v784_v35 = vrot.slane %v3628_v27, 1  ;;  %v1067_v36 = vrot.slane %v3692_v43, 2  ;;  %2498 = vmatprep.mubr.bf16.mxu1 %v4968_v30  ;;  %2780 = vmatprep.mubr.bf16.mxu0 %v4968_v30 }
 0x11f   : > { %v3630_v63 = vpop.f32.mrf.mxu1  ;;  %v3694_v55 = vpop.f32.mrf.mxu0 }
 0x120   : > { %v785_v41 = vsel %vm779_vm0, %v783_v32, %v784_v35  ;;  %v3631_v45 = vadd.f32 %v3630_v63, %v3629_v50  ;;  %v3695_v46 = vadd.f32 %v3694_v55, %v3693_v21  ;;  %v1068_v26 = vsel %vm1062_vm1, %v1066_v34, %v1067_v36 }
 0x121   : > { %v3632_v47 = vpop.f32.mrf.mxu1  ;;  %v3696_v48 = vpop.f32.mrf.mxu0  ;;  %v813_v29 = vadd.f32 %v5047_v13, %v785_v41 }
 0x122   : > { %v786_v60 = vrot.slane %v3631_v45, 1  ;;  %v1069_v61 = vrot.slane %v3695_v46, 2 }
 0x123   : > { %v3633_v49 = vpop.f32.mrf.mxu1  ;;  %v3697_v31 = vpop.f32.mrf.mxu0  ;;  %v5089_v52 = vadd.f32 %v1068_v26, %v813_v29 }
 0x124   : > { %v3634_v57 = vadd.f32 %v3633_v49, %v3632_v47  ;;  %v3698_v58 = vadd.f32 %v3697_v31, %v3696_v48 }
 0x125   : > { %v3635_v59 = vpop.f32.mrf.mxu1  ;;  %v3699_v30 = vpop.f32.mrf.mxu0  ;;  %2499 = vmatmul.mubr.bf16.gmra.mxu1 %v4999_v12  ;;  %2781 = vmatmul.mubr.bf16.gmra.mxu0 %v4999_v12 }
 0x126   : > { %v787_v62 = vrot.slane %v3634_v57, 1  ;;  %v1070_v1 = vrot.slane %v3698_v58, 2  ;;  %2506 = vmatprep.mubr.bf16.mxu1 %v5002_v42  ;;  %2788 = vmatprep.mubr.bf16.mxu0 %v5002_v42 }
 0x127   : > { %v3636_v13 = vpop.f32.mrf.mxu1  ;;  %v3700_v2 = vpop.f32.mrf.mxu0 }
 0x128   : > { %v788_v4 = vsel %vm779_vm0, %v786_v60, %v787_v62  ;;  %v3637_v5 = vadd.f32 %v3636_v13, %v3635_v59  ;;  %v3701_v6 = vadd.f32 %v3700_v2, %v3699_v30  ;;  %v1071_v7 = vsel %vm1062_vm1, %v1069_v61, %v1070_v1 }
 0x129   : > { %v3638_v8 = vpop.f32.mrf.mxu1  ;;  %v3702_v9 = vpop.f32.mrf.mxu0  ;;  %v814_v12 = vadd.f32 %v5058_v38, %v788_v4 }
 0x12a   : > { %v789_v15 = vrot.slane %v3637_v5, 1  ;;  %v1072_v16 = vrot.slane %v3701_v6, 2 }
 0x12b   : > { %v3639_v10 = vpop.f32.mrf.mxu1  ;;  %v3703_v11 = vpop.f32.mrf.mxu0  ;;  %v5098_v40 = vadd.f32 %v1071_v7, %v814_v12 }
 0x12c   : > { %v3640_v44 = vadd.f32 %v3639_v10, %v3638_v8  ;;  %v3704_v56 = vadd.f32 %v3703_v11, %v3702_v9 }
 0x12d   : > { %v3641_v14 = vpop.f32.mrf.mxu1  ;;  %v3705_v42 = vpop.f32.mrf.mxu0  ;;  %2507 = vmatmul.mubr.bf16.gmra.mxu1 %v5027_v53  ;;  %2789 = vmatmul.mubr.bf16.gmra.mxu0 %v5027_v53 }
 0x12e   : > { %v790_v17 = vrot.slane %v3640_v44, 1  ;;  %v1073_v18 = vrot.slane %v3704_v56, 2  ;;  %2514 = vmatprep.mubr.bf16.mxu1 %v5030_v54  ;;  %2796 = vmatprep.mubr.bf16.mxu0 %v5030_v54 }
 0x12f   : > { %v3642_v38 = vpop.f32.mrf.mxu1  ;;  %v3706_v20 = vpop.f32.mrf.mxu0 }
 0x130   : > { %v791_v23 = vsel %vm779_vm0, %v789_v15, %v790_v17  ;;  %v3643_v27 = vadd.f32 %v3642_v38, %v3641_v14  ;;  %v3707_v43 = vadd.f32 %v3706_v20, %v3705_v42  ;;  %v1074_v50 = vsel %vm1062_vm1, %v1072_v16, %v1073_v18 }
 0x131   : > { %v3644_v21 = vpop.f32.mrf.mxu1  ;;  %v3708_v32 = vpop.f32.mrf.mxu0  ;;  %v815_v53 = vadd.f32 %v5068_v37, %v791_v23 }
 0x132   : > { %v792_v45 = vrot.slane %v3643_v27, 1  ;;  %v1075_v46 = vrot.slane %v3707_v43, 2 }
 0x133   : > { %v3645_v34 = vpop.f32.mrf.mxu1  ;;  %v3709_v35 = vpop.f32.mrf.mxu0  ;;  %v5107_v36 = vadd.f32 %v1074_v50, %v815_v53 }
 0x134   : > { %v3646_v63 = vadd.f32 %v3645_v34, %v3644_v21  ;;  %v3710_v55 = vadd.f32 %v3709_v35, %v3708_v32 }
 0x135   : > { %v3647_v41 = vpop.f32.mrf.mxu1  ;;  %v3711_v54 = vpop.f32.mrf.mxu0  ;;  %2515 = vmatmul.mubr.bf16.gmra.mxu1 %v5041_v3  ;;  %2797 = vmatmul.mubr.bf16.gmra.mxu0 %v5041_v3 }
 0x136   : > { %v793_v26 = vrot.slane %v3646_v63, 1  ;;  %v1076_v47 = vrot.slane %v3710_v55, 2  ;;  %2522 = vmatprep.mubr.bf16.mxu1 %v4892_v28  ;;  %2804 = vmatprep.mubr.bf16.mxu0 %v4892_v28 }
 0x137   : > { %v3648_v37 = vpop.f32.mrf.mxu1  ;;  %v3712_v48 = vpop.f32.mrf.mxu0 }
 0x138   : > { %v794_v29 = vsel %vm779_vm0, %v792_v45, %v793_v26  ;;  %v3649_v49 = vadd.f32 %v3648_v37, %v3647_v41  ;;  %v3713_v31 = vadd.f32 %v3712_v48, %v3711_v54  ;;  %v1077_v57 = vsel %vm1062_vm1, %v1075_v46, %v1076_v47 }
 0x139   : > { %v3650_v58 = vpop.f32.mrf.mxu1  ;;  %v3714_v59 = vpop.f32.mrf.mxu0  ;;  %v816_v3 = vadd.f32 %v5038_v0, %v794_v29 }
 0x13a   : > { %v795_v2 = vrot.slane %v3649_v49, 1  ;;  %v1078_v4 = vrot.slane %v3713_v31, 2 }
 0x13b   : > { %v3651_v30 = vpop.f32.mrf.mxu1  ;;  %v3715_v60 = vpop.f32.mrf.mxu0  ;;  %v5116_v61 = vadd.f32 %v1077_v57, %v816_v3 }
 0x13c   : > { %v3652_v62 = vadd.f32 %v3651_v30, %v3650_v58  ;;  %v3716_v1 = vadd.f32 %v3715_v60, %v3714_v59 }
 0x13d   : > { %v3653_v13 = vpop.f32.mrf.mxu1  ;;  %v3717_v28 = vpop.f32.mrf.mxu0  ;;  %2523 = vmatmul.mubr.bf16.gmra.mxu1 %v4899_v33  ;;  %2805 = vmatmul.mubr.bf16.gmra.mxu0 %v4899_v33 }
 0x13e   : > { %v796_v5 = vrot.slane %v3652_v62, 1  ;;  %v1079_v6 = vrot.slane %v3716_v1, 2  ;;  %2530 = vmatprep.mubr.bf16.mxu1 %v5052_v51  ;;  %2812 = vmatprep.mubr.bf16.mxu0 %v5052_v51 }
 0x13f   : > { %v3654_v0 = vpop.f32.mrf.mxu1  ;;  %v3718_v7 = vpop.f32.mrf.mxu0 }
 0x140   : > { %v797_v8 = vsel %vm779_vm0, %v795_v2, %v796_v5  ;;  %v3655_v9 = vadd.f32 %v3654_v0, %v3653_v13  ;;  %v3719_v12 = vadd.f32 %v3718_v7, %v3717_v28  ;;  %v1080_v10 = vsel %vm1062_vm1, %v1078_v4, %v1079_v6 }
 0x141   : > { %v3656_v11 = vpop.f32.mrf.mxu1  ;;  %v3720_v44 = vpop.f32.mrf.mxu0  ;;  %v817_v33 = vadd.f32 %v5049_v19, %v797_v8 }
 0x142   : > { %v798_v18 = vrot.slane %v3655_v9, 1  ;;  %v1081_v38 = vrot.slane %v3719_v12, 2 }
 0x143   : > { %v3657_v56 = vpop.f32.mrf.mxu1  ;;  %v3721_v14 = vpop.f32.mrf.mxu0  ;;  %v5125_v42 = vadd.f32 %v1080_v10, %v817_v33 }
 0x144   : > { %v3658_v15 = vadd.f32 %v3657_v56, %v3656_v11  ;;  %v3722_v16 = vadd.f32 %v3721_v14, %v3720_v44 }
 0x145   : > { %v3659_v17 = vpop.f32.mrf.mxu1  ;;  %v3723_v51 = vpop.f32.mrf.mxu0  ;;  %2531 = vmatmul.mubr.bf16.gmra.mxu1 %v5063_v25  ;;  %2813 = vmatmul.mubr.bf16.gmra.mxu0 %v5063_v25 }
 0x146   : > { %v799_v20 = vrot.slane %v3658_v15, 1  ;;  %v1082_v23 = vrot.slane %v3722_v16, 2 }
 0x147   : > { %v3660_v27 = vpop.f32.mrf.mxu1  ;;  %v3724_v43 = vpop.f32.mrf.mxu0 }
 0x148   : > { %v800_v19 = vsel %vm779_vm0, %v798_v18, %v799_v20  ;;  %v3661_v50 = vadd.f32 %v3660_v27, %v3659_v17  ;;  %v3725_v21 = vadd.f32 %v3724_v43, %v3723_v51  ;;  %v1083_v32 = vsel %vm1062_vm1, %v1081_v38, %v1082_v23 }
 0x149   : > { %v3662_v53 = vpop.f32.mrf.mxu1  ;;  %v3726_v34 = vpop.f32.mrf.mxu0  ;;  %v818_v35 = vadd.f32 %v5060_v22, %v800_v19 }
 0x14a   : > { %v801_v26 = vrot.slane %v3661_v50, 1  ;;  %v1084_v47 = vrot.slane %v3725_v21, 2 }
 0x14b   : > { %v3663_v63 = vpop.f32.mrf.mxu1  ;;  %v3727_v55 = vpop.f32.mrf.mxu0  ;;  %v5132_v41 = vadd.f32 %v1083_v32, %v818_v35 }
 0x14c   : > { %v3664_v25 = vadd.f32 %v3663_v63, %v3662_v53  ;;  %v3728_v54 = vadd.f32 %v3727_v55, %v3726_v34 }
 0x14d   : > { %v3745_v45 = vpop.f32.mrf.mxu1  ;;  %v3809_v46 = vpop.f32.mrf.mxu0 }
 0x14e   : > { %v802_v37 = vrot.slane %v3664_v25, 1  ;;  %v1085_v48 = vrot.slane %v3728_v54, 2 }
 0x14f   : > { %v3746_v29 = vpop.f32.mrf.mxu1  ;;  %v3810_v49 = vpop.f32.mrf.mxu0 }
 0x150   : > { %v803_v31 = vsel %vm779_vm0, %v801_v26, %v802_v37  ;;  %v3747_v57 = vadd.f32 %v3746_v29, %v3745_v45  ;;  %v3811_v58 = vadd.f32 %v3810_v49, %v3809_v46  ;;  %v1086_v22 = vsel %vm1062_vm1, %v1084_v47, %v1085_v48 }
 0x151   : > { %v3748_v59 = vpop.f32.mrf.mxu1  ;;  %v3812_v3 = vpop.f32.mrf.mxu0  ;;  %v819_v30 = vadd.f32 %v5070_v39, %v803_v31 }
 0x152   : > { %v1418_v60 = vadd.f32 %v3747_v57, %v5080_v24  ;;  %v1668_v5 = vrot.slane %v3811_v58, 1 }
 0x153   : > { %v3749_v62 = vpop.f32.mrf.mxu1  ;;  %v3813_v1 = vpop.f32.mrf.mxu0  ;;  %v5138_v13 = vadd.f32 %v1086_v22, %v819_v30 }
 0x154   : > { %v3814_v28 = vadd.f32 %v3813_v1, %v3812_v3 }
 0x155   : > { %v3751_v2 = vpop.f32.mrf.mxu1  ;;  %v3815_v4 = vpop.f32.mrf.mxu0 }
 0x156   : > { %v1669_v6 = vrot.slane %v3814_v28, 1 }
 0x157   : > { %v3752_v0 = vpop.f32.mrf.mxu1  ;;  %v3816_v7 = vpop.f32.mrf.mxu0 }
 0x158   : > { %v1670_v8 = vsel %vm779_vm0, %v1668_v5, %v1669_v6  ;;  %v3753_v9 = vadd.f32 %v3752_v0, %v3751_v2  ;;  %v3817_v12 = vadd.f32 %v3816_v7, %v3815_v4 }
 0x159   : > { %v5141_v10 = vadd.f32 %v1670_v8, %v1418_v60  ;;  %v3754_v39 = vpop.f32.mrf.mxu1  ;;  %v3818_v11 = vpop.f32.mrf.mxu0 }
 0x15a   : > { %v1419_v24 = vadd.f32 %v3753_v9, %v5089_v52  ;;  %v1671_v16 = vrot.slane %v3817_v12, 1 }
 0x15b   : > { %v3755_v44 = vpop.f32.mrf.mxu1  ;;  %v3819_v33 = vpop.f32.mrf.mxu0 }
 0x15c   : > { %v3820_v56 = vadd.f32 %v3819_v33, %v3818_v11 }
 0x15d   : > { %v3757_v14 = vpop.f32.mrf.mxu1  ;;  %v3821_v15 = vpop.f32.mrf.mxu0 }
 0x15e   : > { %v1672_v17 = vrot.slane %v3820_v56, 1 }
 0x15f   : > { %v3758_v51 = vpop.f32.mrf.mxu1  ;;  %v3822_v18 = vpop.f32.mrf.mxu0 }
 0x160   : > { %v1673_v38 = vsel %vm779_vm0, %v1671_v16, %v1672_v17  ;;  %v3759_v20 = vadd.f32 %v3758_v51, %v3757_v14  ;;  %v3823_v23 = vadd.f32 %v3822_v18, %v3821_v15 }
 0x161   : > { %v5145_v27 = vadd.f32 %v1673_v38, %v1419_v24  ;;  %v3760_v43 = vpop.f32.mrf.mxu1  ;;  %v3824_v19 = vpop.f32.mrf.mxu0 }
 0x162   : > { %v1420_v50 = vadd.f32 %v3759_v20, %v5098_v40  ;;  %v1674_v35 = vrot.slane %v3823_v23, 1 }
 0x163   : > { %v3761_v52 = vpop.f32.mrf.mxu1  ;;  %v3825_v21 = vpop.f32.mrf.mxu0 }
 0x164   : > { %v3826_v32 = vadd.f32 %v3825_v21, %v3824_v19 }
 0x165   : > { %v3763_v53 = vpop.f32.mrf.mxu1  ;;  %v3827_v34 = vpop.f32.mrf.mxu0 }
 0x166   : > { %v1675_v63 = vrot.slane %v3826_v32, 1 }
 0x167   : > { %v3764_v55 = vpop.f32.mrf.mxu1  ;;  %v3828_v25 = vpop.f32.mrf.mxu0 }
 0x168   : > { %v1676_v54 = vsel %vm779_vm0, %v1674_v35, %v1675_v63  ;;  %v3765_v45 = vadd.f32 %v3764_v55, %v3763_v53  ;;  %v3829_v46 = vadd.f32 %v3828_v25, %v3827_v34 }
 0x169   : > { %v5149_v26 = vadd.f32 %v1676_v54, %v1420_v50  ;;  %v3766_v47 = vpop.f32.mrf.mxu1  ;;  %v3830_v37 = vpop.f32.mrf.mxu0 }
 0x16a   : > { %v1421_v48 = vadd.f32 %v3765_v45, %v5107_v36  ;;  %v1677_v58 = vrot.slane %v3829_v46, 1 }
 0x16b   : > { %v3767_v40 = vpop.f32.mrf.mxu1  ;;  %v3831_v29 = vpop.f32.mrf.mxu0 }
 0x16c   : > { %v3832_v49 = vadd.f32 %v3831_v29, %v3830_v37 }
 0x16d   : > { %v3769_v31 = vpop.f32.mrf.mxu1  ;;  %v3833_v57 = vpop.f32.mrf.mxu0 }
 0x16e   : > { %v1678_v22 = vrot.slane %v3832_v49, 1 }
 0x16f   : > { %v3770_v59 = vpop.f32.mrf.mxu1  ;;  %v3834_v3 = vpop.f32.mrf.mxu0 }
 0x170   : > { %v1679_v30 = vsel %vm779_vm0, %v1677_v58, %v1678_v22  ;;  %v3771_v60 = vadd.f32 %v3770_v59, %v3769_v31  ;;  %v3835_v62 = vadd.f32 %v3834_v3, %v3833_v57 }
 0x171   : > { %v5153_v1 = vadd.f32 %v1679_v30, %v1421_v48  ;;  %v3772_v28 = vpop.f32.mrf.mxu1  ;;  %v3836_v2 = vpop.f32.mrf.mxu0 }
 0x172   : > { %v1422_v4 = vadd.f32 %v3771_v60, %v5116_v61  ;;  %v1680_v8 = vrot.slane %v3835_v62, 1 }
 0x173   : > { %v3773_v36 = vpop.f32.mrf.mxu1  ;;  %v3837_v5 = vpop.f32.mrf.mxu0 }
 0x174   : > { %v3838_v6 = vadd.f32 %v3837_v5, %v3836_v2 }
 0x175   : > { %v3775_v0 = vpop.f32.mrf.mxu1  ;;  %v3839_v7 = vpop.f32.mrf.mxu0 }
 0x176   : > { %v1681_v9 = vrot.slane %v3838_v6, 1 }
 0x177   : > { %v3776_v12 = vpop.f32.mrf.mxu1  ;;  %v3840_v39 = vpop.f32.mrf.mxu0 }
 0x178   : > { %v1682_v11 = vsel %vm779_vm0, %v1680_v8, %v1681_v9  ;;  %v3777_v24 = vadd.f32 %v3776_v12, %v3775_v0  ;;  %v3841_v44 = vadd.f32 %v3840_v39, %v3839_v7 }
 0x179   : > { %v5157_v33 = vadd.f32 %v1682_v11, %v1422_v4  ;;  %v3778_v56 = vpop.f32.mrf.mxu1  ;;  %v3842_v14 = vpop.f32.mrf.mxu0 }
 0x17a   : > { %v1423_v15 = vadd.f32 %v3777_v24, %v5125_v42  ;;  %v1683_v38 = vrot.slane %v3841_v44, 1 }
 0x17b   : > { %v3779_v61 = vpop.f32.mrf.mxu1  ;;  %v3843_v16 = vpop.f32.mrf.mxu0 }
 0x17c   : > { %v3844_v17 = vadd.f32 %v3843_v16, %v3842_v14 }
 0x17d   : > { %v3781_v51 = vpop.f32.mrf.mxu1  ;;  %v3845_v18 = vpop.f32.mrf.mxu0 }
 0x17e   : > { %v1684_v20 = vrot.slane %v3844_v17, 1 }
 0x17f   : > { %v3782_v23 = vpop.f32.mrf.mxu1  ;;  %v3846_v43 = vpop.f32.mrf.mxu0 }
 0x180   : > { %v1685_v19 = vsel %vm779_vm0, %v1683_v38, %v1684_v20  ;;  %v3783_v50 = vadd.f32 %v3782_v23, %v3781_v51  ;;  %v3847_v52 = vadd.f32 %v3846_v43, %v3845_v18 }
 0x181   : > { %v5161_v21 = vadd.f32 %v1685_v19, %v1423_v15  ;;  %v3784_v32 = vpop.f32.mrf.mxu1  ;;  %v3848_v53 = vpop.f32.mrf.mxu0 }
 0x182   : > { %v1424_v34 = vadd.f32 %v3783_v50, %v5132_v41  ;;  %v1686_v54 = vrot.slane %v3847_v52, 1 }
 0x183   : > { %v3785_v42 = vpop.f32.mrf.mxu1  ;;  %v3849_v35 = vpop.f32.mrf.mxu0 }
 0x184   : > { %v3850_v63 = vadd.f32 %v3849_v35, %v3848_v53 }
 0x185   : > { %v3787_v55 = vpop.f32.mrf.mxu1  ;;  %v3851_v25 = vpop.f32.mrf.mxu0 }
 0x186   : > { %v1687_v45 = vrot.slane %v3850_v63, 1 }
 0x187   : > { %v3788_v46 = vpop.f32.mrf.mxu1  ;;  %v3852_v47 = vpop.f32.mrf.mxu0 }
 0x188   : > { %v1688_v37 = vsel %vm779_vm0, %v1686_v54, %v1687_v45  ;;  %v3789_v48 = vadd.f32 %v3788_v46, %v3787_v55  ;;  %v3853_v40 = vadd.f32 %v3852_v47, %v3851_v25 }
 0x189   : > { %v5165_v29 = vadd.f32 %v1688_v37, %v1424_v34  ;;  %v3790_v49 = vpop.f32.mrf.mxu1  ;;  %v3854_v31 = vpop.f32.mrf.mxu0 }
 0x18a   : > { %v1425_v57 = vadd.f32 %v3789_v48, %v5138_v13  ;;  %v1689_v30 = vrot.slane %v3853_v40, 1 }
 0x18b   : > { %v3791_v41 = vpop.f32.mrf.mxu1  ;;  %v3855_v58 = vpop.f32.mrf.mxu0 }
 0x18c   : > { %v3856_v22 = vadd.f32 %v3855_v58, %v3854_v31 }
 0x18d   : > { %v3873_v59 = vpop.f32.mrf.mxu1  ;;  %v3937_v3 = vpop.f32.mrf.mxu0 }
 0x18e   : > { %v1690_v60 = vrot.slane %v3856_v22, 1 }
 0x18f   : > { %v3874_v62 = vpop.f32.mrf.mxu1  ;;  %v3938_v28 = vpop.f32.mrf.mxu0 }
 0x190   : > { %v1691_v2 = vsel %vm779_vm0, %v1689_v30, %v1690_v60  ;;  %v3875_v4 = vadd.f32 %v3874_v62, %v3873_v59  ;;  %v3939_v36 = vadd.f32 %v3938_v28, %v3937_v3 }
 0x191   : > { %v5169_v5 = vadd.f32 %v1691_v2, %v1425_v57  ;;  %v3876_v6 = vpop.f32.mrf.mxu1  ;;  %v3940_v0 = vpop.f32.mrf.mxu0 }
 0x192   : > { %v1950_v39 = vrot.slane %v3875_v4, 2 }
 0x193   : > { %v3877_v7 = vpop.f32.mrf.mxu1  ;;  %v3941_v8 = vpop.f32.mrf.mxu0 }
 0x194   : > { %v3878_v13 = vadd.f32 %v3877_v7, %v3876_v6 }
 0x195   : > { %v3879_v9 = vpop.f32.mrf.mxu1  ;;  %v3943_v12 = vpop.f32.mrf.mxu0 }
 0x196   : > { %v1951_v11 = vrot.slane %v3878_v13, 2 }
 0x197   : > { %v3880_v24 = vpop.f32.mrf.mxu1  ;;  %v3944_v44 = vpop.f32.mrf.mxu0 }
 0x198   : > { %v1952_v56 = vsel %vm1062_vm1, %v1950_v39, %v1951_v11  ;;  %v3881_v14 = vadd.f32 %v3880_v24, %v3879_v9  ;;  %v3945_v15 = vadd.f32 %v3944_v44, %v3943_v12 }
 0x199   : > { %v1982_v61 = vadd.f32 %v1952_v56, %v5141_v10  ;;  %v3882_v16 = vpop.f32.mrf.mxu1  ;;  %v3946_v17 = vpop.f32.mrf.mxu0 }
 0x19a   : > { %v1953_v19 = vrot.slane %v3881_v14, 2 }
 0x19b   : > { %v3883_v51 = vpop.f32.mrf.mxu1  ;;  %v3947_v18 = vpop.f32.mrf.mxu0  ;;  %v5173_v38 = vadd.f32 %v3939_v36, %v1982_v61 }
 0x19c   : > { %v3884_v20 = vadd.f32 %v3883_v51, %v3882_v16 }
 0x19d   : > { %v3885_v23 = vpop.f32.mrf.mxu1  ;;  %v3949_v43 = vpop.f32.mrf.mxu0 }
 0x19e   : > { %v1954_v50 = vrot.slane %v3884_v20, 2 }
 0x19f   : > { %v3886_v52 = vpop.f32.mrf.mxu1  ;;  %v3950_v32 = vpop.f32.mrf.mxu0 }
 0x1a0   : > { %v1955_v53 = vsel %vm1062_vm1, %v1953_v19, %v1954_v50  ;;  %v3887_v34 = vadd.f32 %v3886_v52, %v3885_v23  ;;  %v3951_v42 = vadd.f32 %v3950_v32, %v3949_v43 }
 0x1a1   : > { %v1983_v35 = vadd.f32 %v1955_v53, %v5145_v27  ;;  %v3888_v10 = vpop.f32.mrf.mxu1  ;;  %v3952_v63 = vpop.f32.mrf.mxu0 }
 0x1a2   : > { %v1956_v37 = vrot.slane %v3887_v34, 2 }
 0x1a3   : > { %v3889_v55 = vpop.f32.mrf.mxu1  ;;  %v3953_v25 = vpop.f32.mrf.mxu0  ;;  %v5177_v54 = vadd.f32 %v3945_v15, %v1983_v35 }
 0x1a4   : > { %v3890_v45 = vadd.f32 %v3889_v55, %v3888_v10 }
 0x1a5   : > { %v3891_v46 = vpop.f32.mrf.mxu1  ;;  %v3955_v47 = vpop.f32.mrf.mxu0 }
 0x1a6   : > { %v1957_v48 = vrot.slane %v3890_v45, 2 }
 0x1a7   : > { %v3892_v40 = vpop.f32.mrf.mxu1  ;;  %v3956_v49 = vpop.f32.mrf.mxu0 }
 0x1a8   : > { %v1958_v31 = vsel %vm1062_vm1, %v1956_v37, %v1957_v48  ;;  %v3893_v57 = vadd.f32 %v3892_v40, %v3891_v46  ;;  %v3957_v41 = vadd.f32 %v3956_v49, %v3955_v47 }
 0x1a9   : > { %v1984_v58 = vadd.f32 %v1958_v31, %v5149_v26  ;;  %v3894_v27 = vpop.f32.mrf.mxu1  ;;  %v3958_v22 = vpop.f32.mrf.mxu0 }
 0x1aa   : > { %v1959_v2 = vrot.slane %v3893_v57, 2 }
 0x1ab   : > { %v3895_v59 = vpop.f32.mrf.mxu1  ;;  %v3959_v3 = vpop.f32.mrf.mxu0  ;;  %v5181_v30 = vadd.f32 %v3951_v42, %v1984_v58 }
 0x1ac   : > { %v3896_v60 = vadd.f32 %v3895_v59, %v3894_v27 }
 0x1ad   : > { %v3897_v62 = vpop.f32.mrf.mxu1  ;;  %v3961_v28 = vpop.f32.mrf.mxu0 }
 0x1ae   : > { %v1960_v4 = vrot.slane %v3896_v60, 2 }
 0x1af   : > { %v3898_v36 = vpop.f32.mrf.mxu1  ;;  %v3962_v6 = vpop.f32.mrf.mxu0 }
 0x1b0   : > { %v1961_v0 = vsel %vm1062_vm1, %v1959_v2, %v1960_v4  ;;  %v3899_v7 = vadd.f32 %v3898_v36, %v3897_v62  ;;  %v3963_v8 = vadd.f32 %v3962_v6, %v3961_v28 }
 0x1b1   : > { %v1985_v13 = vadd.f32 %v1961_v0, %v5153_v1  ;;  %v3900_v26 = vpop.f32.mrf.mxu1  ;;  %v3964_v9 = vpop.f32.mrf.mxu0 }
 0x1b2   : > { %v1962_v14 = vrot.slane %v3899_v7, 2 }
 0x1b3   : > { %v3901_v12 = vpop.f32.mrf.mxu1  ;;  %v3965_v39 = vpop.f32.mrf.mxu0  ;;  %v5185_v11 = vadd.f32 %v3957_v41, %v1985_v13 }
 0x1b4   : > { %v3902_v24 = vadd.f32 %v3901_v12, %v3900_v26 }
 0x1b5   : > { %v3903_v44 = vpop.f32.mrf.mxu1  ;;  %v3967_v56 = vpop.f32.mrf.mxu0 }
 0x1b6   : > { %v1963_v15 = vrot.slane %v3902_v24, 2 }
 0x1b7   : > { %v3904_v61 = vpop.f32.mrf.mxu1  ;;  %v3968_v16 = vpop.f32.mrf.mxu0 }
 0x1b8   : > { %v1964_v17 = vsel %vm1062_vm1, %v1962_v14, %v1963_v15  ;;  %v3905_v51 = vadd.f32 %v3904_v61, %v3903_v44  ;;  %v3969_v18 = vadd.f32 %v3968_v16, %v3967_v56 }
 0x1b9   : > { %v1986_v20 = vadd.f32 %v1964_v17, %v5157_v33  ;;  %v3906_v1 = vpop.f32.mrf.mxu1  ;;  %v3970_v23 = vpop.f32.mrf.mxu0 }
 0x1ba   : > { %v1965_v34 = vrot.slane %v3905_v51, 2 }
 0x1bb   : > { %v3907_v43 = vpop.f32.mrf.mxu1  ;;  %v3971_v19 = vpop.f32.mrf.mxu0  ;;  %v5189_v50 = vadd.f32 %v3963_v8, %v1986_v20 }
 0x1bc   : > { %v3908_v52 = vadd.f32 %v3907_v43, %v3906_v1 }
 0x1bd   : > { %v3909_v32 = vpop.f32.mrf.mxu1  ;;  %v3973_v53 = vpop.f32.mrf.mxu0 }
 0x1be   : > { %v1966_v42 = vrot.slane %v3908_v52, 2 }
 0x1bf   : > { %v3910_v35 = vpop.f32.mrf.mxu1  ;;  %v3974_v10 = vpop.f32.mrf.mxu0 }
 0x1c0   : > { %v1967_v63 = vsel %vm1062_vm1, %v1965_v34, %v1966_v42  ;;  %v3911_v55 = vadd.f32 %v3910_v35, %v3909_v32  ;;  %v3975_v25 = vadd.f32 %v3974_v10, %v3973_v53 }
 0x1c1   : > { %v1987_v45 = vadd.f32 %v1967_v63, %v5161_v21  ;;  %v3912_v33 = vpop.f32.mrf.mxu1  ;;  %v3976_v46 = vpop.f32.mrf.mxu0 }
 0x1c2   : > { %v1968_v57 = vrot.slane %v3911_v55, 2 }
 0x1c3   : > { %v3913_v47 = vpop.f32.mrf.mxu1  ;;  %v3977_v37 = vpop.f32.mrf.mxu0  ;;  %v5193_v48 = vadd.f32 %v3969_v18, %v1987_v45 }
 0x1c4   : > { %v3914_v40 = vadd.f32 %v3913_v47, %v3912_v33 }
 0x1c5   : > { %v3915_v49 = vpop.f32.mrf.mxu1  ;;  %v3979_v31 = vpop.f32.mrf.mxu0 }
 0x1c6   : > { %v1969_v41 = vrot.slane %v3914_v40, 2 }
 0x1c7   : > { %v3916_v58 = vpop.f32.mrf.mxu1  ;;  %v3980_v27 = vpop.f32.mrf.mxu0 }
 0x1c8   : > { %v1970_v22 = vsel %vm1062_vm1, %v1968_v57, %v1969_v41  ;;  %v3917_v59 = vadd.f32 %v3916_v58, %v3915_v49  ;;  %v3981_v3 = vadd.f32 %v3980_v27, %v3979_v31 }
 0x1c9   : > { %v1988_v60 = vadd.f32 %v1970_v22, %v5165_v29  ;;  %v3918_v21 = vpop.f32.mrf.mxu1  ;;  %v3982_v62 = vpop.f32.mrf.mxu0 }
 0x1ca   : > { %v1971_v7 = vrot.slane %v3917_v59, 2 }
 0x1cb   : > { %v3919_v28 = vpop.f32.mrf.mxu1  ;;  %v3983_v2 = vpop.f32.mrf.mxu0  ;;  %v5197_v4 = vadd.f32 %v3975_v25, %v1988_v60 }
 0x1cc   : > { %v3920_v36 = vadd.f32 %v3919_v28, %v3918_v21 }
 0x1cd   : > { %v4001_v6 = vpop.f32.mrf.mxu1  ;;  %v4065_v0 = vpop.f32.mrf.mxu0 }
 0x1ce   : > { %v1972_v8 = vrot.slane %v3920_v36, 2 }
 0x1cf   : > { %v4002_v13 = vpop.f32.mrf.mxu1  ;;  %v4066_v26 = vpop.f32.mrf.mxu0 }
 0x1d0   : > { %v1973_v9 = vsel %vm1062_vm1, %v1971_v7, %v1972_v8  ;;  %v4003_v29 = vadd.f32 %v4002_v13, %v4001_v6  ;;  %v4067_v23 = vadd.f32 %v4066_v26, %v4065_v0 }
 0x1d1   : > { %v1989_v12 = vadd.f32 %v1973_v9, %v5169_v5  ;;  %v4004_v39 = vpop.f32.mrf.mxu1  ;;  %v4068_v24 = vpop.f32.mrf.mxu0 }
 0x1d2   : > { %v2555_v17 = vrot.slane %v4003_v29, 1  ;;  %v2837_v35 = vrot.slane %v4067_v23, 2 }
 0x1d3   : > { %v4005_v44 = vpop.f32.mrf.mxu1  ;;  %v4069_v56 = vpop.f32.mrf.mxu0  ;;  %v5201_v14 = vadd.f32 %v3981_v3, %v1989_v12 }
 0x1d4   : > { %v4006_v15 = vadd.f32 %v4005_v44, %v4004_v39  ;;  %v4070_v18 = vadd.f32 %v4069_v56, %v4068_v24 }
 0x1d5   : > { %v4007_v61 = vpop.f32.mrf.mxu1  ;;  %v4071_v16 = vpop.f32.mrf.mxu0 }
 0x1d6   : > { %v2556_v51 = vrot.slane %v4006_v15, 1  ;;  %v2838_v52 = vrot.slane %v4070_v18, 2 }
 0x1d7   : > { %v4008_v20 = vpop.f32.mrf.mxu1  ;;  %v4072_v1 = vpop.f32.mrf.mxu0 }
 0x1d8   : > { %v2557_v43 = vsel %vm779_vm0, %v2555_v17, %v2556_v51  ;;  %v4009_v32 = vadd.f32 %v4008_v20, %v4007_v61  ;;  %v4073_v10 = vadd.f32 %v4072_v1, %v4071_v16  ;;  %v2839_v33 = vsel %vm1062_vm1, %v2837_v35, %v2838_v52 }
 0x1d9   : > { %v4010_v19 = vpop.f32.mrf.mxu1  ;;  %v4074_v5 = vpop.f32.mrf.mxu0  ;;  %v2587_v53 = vadd.f32 %v2557_v43, %v5173_v38  ;;  %v5209_v38 = vld [vmem:[%s5261_s2] ss:$0 sm:$0xff] }
 0x1da   : > { %v2558_v46 = vrot.slane %v4009_v32, 1  ;;  %v2840_v57 = vrot.slane %v4073_v10, 2 }
 0x1db   : > { %v4011_v34 = vpop.f32.mrf.mxu1  ;;  %v4075_v42 = vpop.f32.mrf.mxu0  ;;  %v2869_v40 = vadd.f32 %v2839_v33, %v2587_v53 }
 0x1dc   : > { %v4012_v63 = vadd.f32 %v4011_v34, %v4010_v19  ;;  %v4076_v55 = vadd.f32 %v4075_v42, %v4074_v5 }
 0x1dd   : > { %v4013_v25 = vpop.f32.mrf.mxu1  ;;  %v4077_v45 = vpop.f32.mrf.mxu0  ;;  %v2883_v60 = vadd.f32 %v5209_v38, %v2869_v40 }
 0x1de   : > { %v2559_v47 = vrot.slane %v4012_v63, 1  ;;  %v2841_v37 = vrot.slane %v4076_v55, 2 }
 0x1df   : > { %v4014_v49 = vpop.f32.mrf.mxu1  ;;  %v4078_v31 = vpop.f32.mrf.mxu0 }
 0x1e0   : > { %v2560_v41 = vsel %vm779_vm0, %v2558_v46, %v2559_v47  ;;  %v2842_v59 = vsel %vm1062_vm1, %v2840_v57, %v2841_v37  ;;  %v4015_v3 = vadd.f32 %v4014_v49, %v4013_v25  ;;  %v4079_v39 = vadd.f32 %v4078_v31, %v4077_v45 }
 0x1e1   : > { %v2588_v58 = vadd.f32 %v2560_v41, %v5177_v54  ;;  %v4016_v27 = vpop.f32.mrf.mxu1  ;;  %v4080_v22 = vpop.f32.mrf.mxu0  ;;  %v2891_v54 = vmax.f32 %v2883_v60, 0.0 }
 0x1e2   : > { %v2561_v7 = vrot.slane %v4015_v3, 1  ;;  %v2843_v18 = vrot.slane %v4079_v39, 2 }
 0x1e3   : > { %v2870_v21 = vadd.f32 %v2842_v59, %v2588_v58  ;;  %v4017_v62 = vpop.f32.mrf.mxu1  ;;  %v4081_v28 = vpop.f32.mrf.mxu0 }
 0x1e4   : > { %v4018_v2 = vadd.f32 %v4017_v62, %v4016_v27  ;;  %v4082_v13 = vadd.f32 %v4081_v28, %v4080_v22 }
 0x1e5   : > { %v2884_v36 = vadd.f32 %v5209_v38, %v2870_v21  ;;  %v4019_v6 = vpop.f32.mrf.mxu1  ;;  %v4083_v0 = vpop.f32.mrf.mxu0 }
 0x1e6   : > { %v2562_v8 = vrot.slane %v4018_v2, 1  ;;  %v2844_v15 = vrot.slane %v4082_v13, 2 }
 0x1e7   : > { %v2892_v26 = vmax.f32 %v2884_v36, 0.0  ;;  %v4020_v9 = vpop.f32.mrf.mxu1  ;;  %v4084_v12 = vpop.f32.mrf.mxu0 }
 0x1e8   : > { %v2563_v24 = vsel %vm779_vm0, %v2561_v7, %v2562_v8  ;;  %v4021_v61 = vadd.f32 %v4020_v9, %v4019_v6  ;;  %v4085_v20 = vadd.f32 %v4084_v12, %v4083_v0  ;;  %v2845_v5 = vsel %vm1062_vm1, %v2843_v18, %v2844_v15 }
 0x1e9   : > { %v3517_v29 = vpack.c.bf16 %v2892_v26, %v2891_v54  ;;  %v4022_v44 = vpop.f32.mrf.mxu1  ;;  %v4086_v56 = vpop.f32.mrf.mxu0  ;;  %v2589_v16 = vadd.f32 %v2563_v24, %v5181_v30 }
 0x1ea   : > { %v2564_v52 = vrot.slane %v4021_v61, 1  ;;  %v2846_v10 = vrot.slane %v4085_v20, 2 }
 0x1eb   : > { %3518 = vst [vmem:[%s5220_s25] sm:$0xff] %v3517_v29   ;;  %v4023_v17 = vpop.f32.mrf.mxu1  ;;  %v4087_v51 = vpop.f32.mrf.mxu0  ;;  %v2871_v34 = vadd.f32 %v2845_v5, %v2589_v16 }
 0x1ec   : > { %v4024_v1 = vadd.f32 %v4023_v17, %v4022_v44  ;;  %v4088_v23 = vadd.f32 %v4087_v51, %v4086_v56 }
 0x1ed   : > { %v4025_v43 = vpop.f32.mrf.mxu1  ;;  %v4089_v19 = vpop.f32.mrf.mxu0  ;;  %v2885_v46 = vadd.f32 %v5209_v38, %v2871_v34 }
 0x1ee   : > { %v2565_v32 = vrot.slane %v4024_v1, 1  ;;  %v2847_v53 = vrot.slane %v4088_v23, 2 }
 0x1ef   : > { %v4026_v42 = vpop.f32.mrf.mxu1  ;;  %v4090_v35 = vpop.f32.mrf.mxu0 }
 0x1f0   : > { %v2566_v63 = vsel %vm779_vm0, %v2564_v52, %v2565_v32  ;;  %v2848_v45 = vsel %vm1062_vm1, %v2846_v10, %v2847_v53  ;;  %v4027_v33 = vadd.f32 %v4026_v42, %v4025_v43  ;;  %v4091_v21 = vadd.f32 %v4090_v35, %v4089_v19 }
 0x1f1   : > { %v2590_v30 = vadd.f32 %v2566_v63, %v5185_v11  ;;  %v4028_v55 = vpop.f32.mrf.mxu1  ;;  %v4092_v25 = vpop.f32.mrf.mxu0  ;;  %v2893_v11 = vmax.f32 %v2885_v46, 0.0 }
 0x1f2   : > { %v2567_v58 = vrot.slane %v4027_v33, 1  ;;  %v2849_v54 = vrot.slane %v4091_v21, 2 }
 0x1f3   : > { %v2872_v47 = vadd.f32 %v2848_v45, %v2590_v30  ;;  %v4029_v37 = vpop.f32.mrf.mxu1  ;;  %v4093_v40 = vpop.f32.mrf.mxu0 }
 0x1f4   : > { %v4030_v49 = vadd.f32 %v4029_v37, %v4028_v55  ;;  %v4094_v22 = vadd.f32 %v4093_v40, %v4092_v25 }
 0x1f5   : > { %v2886_v31 = vadd.f32 %v5209_v38, %v2872_v47  ;;  %v4031_v57 = vpop.f32.mrf.mxu1  ;;  %v4095_v41 = vpop.f32.mrf.mxu0 }
 0x1f6   : > { %v2568_v27 = vrot.slane %v4030_v49, 1  ;;  %v2850_v6 = vrot.slane %v4094_v22, 2 }
 0x1f7   : > { %v2894_v59 = vmax.f32 %v2886_v31, 0.0  ;;  %v4032_v3 = vpop.f32.mrf.mxu1  ;;  %v4096_v60 = vpop.f32.mrf.mxu0 }
 0x1f8   : > { %v2569_v62 = vsel %vm779_vm0, %v2567_v58, %v2568_v27  ;;  %v4033_v0 = vadd.f32 %v4032_v3, %v4031_v57  ;;  %v4097_v26 = vadd.f32 %v4096_v60, %v4095_v41  ;;  %v2851_v29 = vsel %vm1062_vm1, %v2849_v54, %v2850_v6 }
 0x1f9   : > { %v3522_v28 = vpack.c.bf16 %v2894_v59, %v2893_v11  ;;  %v4034_v2 = vpop.f32.mrf.mxu1  ;;  %v4098_v36 = vpop.f32.mrf.mxu0  ;;  %v2591_v7 = vadd.f32 %v2569_v62, %v5189_v50 }
 0x1fa   : > { %v2570_v44 = vrot.slane %v4033_v0, 1  ;;  %v2852_v51 = vrot.slane %v4097_v26, 2 }
 0x1fb   : > { %3534 = vst [vmem:[%s5220_s25 + $0x8] sm:$0xff] %v3522_v28   ;;  %v4035_v8 = vpop.f32.mrf.mxu1  ;;  %v4099_v13 = vpop.f32.mrf.mxu0  ;;  %v2873_v61 = vadd.f32 %v2851_v29, %v2591_v7 }
 0x1fc   : > { %v4036_v9 = vadd.f32 %v4035_v8, %v4034_v2  ;;  %v4100_v12 = vadd.f32 %v4099_v13, %v4098_v36 }
 0x1fd   : > { %v4037_v39 = vpop.f32.mrf.mxu1  ;;  %v4101_v24 = vpop.f32.mrf.mxu0  ;;  %v2887_v19 = vadd.f32 %v5209_v38, %v2873_v61 }
 0x1fe   : > { %v2571_v56 = vrot.slane %v4036_v9, 1  ;;  %v2853_v15 = vrot.slane %v4100_v12, 2 }
 0x1ff   : > { %v4038_v16 = vpop.f32.mrf.mxu1  ;;  %v4102_v17 = vpop.f32.mrf.mxu0 }
 0x200   : > { %v2572_v18 = vsel %vm779_vm0, %v2570_v44, %v2571_v56  ;;  %v2854_v23 = vsel %vm1062_vm1, %v2852_v51, %v2853_v15  ;;  %v4039_v43 = vadd.f32 %v4038_v16, %v4037_v39  ;;  %v4103_v33 = vadd.f32 %v4102_v17, %v4101_v24 }
 0x201   : > { %v2592_v50 = vadd.f32 %v2572_v18, %v5193_v48  ;;  %v4040_v20 = vpop.f32.mrf.mxu1  ;;  %v4104_v1 = vpop.f32.mrf.mxu0  ;;  %v2895_v48 = vmax.f32 %v2887_v19, 0.0 }
 0x202   : > { %v2573_v10 = vrot.slane %v4039_v43, 1  ;;  %v2855_v27 = vrot.slane %v4103_v33, 2 }
 0x203   : > { %v2874_v5 = vadd.f32 %v2854_v23, %v2592_v50  ;;  %v4041_v52 = vpop.f32.mrf.mxu1  ;;  %v4105_v32 = vpop.f32.mrf.mxu0 }
 0x204   : > { %v4042_v53 = vadd.f32 %v4041_v52, %v4040_v20  ;;  %v4106_v30 = vadd.f32 %v4105_v32, %v4104_v1 }
 0x205   : > { %v2888_v34 = vadd.f32 %v5209_v38, %v2874_v5  ;;  %v4043_v42 = vpop.f32.mrf.mxu1  ;;  %v4107_v35 = vpop.f32.mrf.mxu0 }
 0x206   : > { %v2574_v63 = vrot.slane %v4042_v53, 1  ;;  %v2856_v49 = vrot.slane %v4106_v30, 2 }
 0x207   : > { %v2896_v55 = vmax.f32 %v2888_v34, 0.0  ;;  %v4044_v25 = vpop.f32.mrf.mxu1  ;;  %v4108_v45 = vpop.f32.mrf.mxu0 }
 0x208   : > { %v2575_v46 = vsel %vm779_vm0, %v2573_v10, %v2574_v63  ;;  %v4045_v31 = vadd.f32 %v4044_v25, %v4043_v42  ;;  %v4109_v22 = vadd.f32 %v4108_v45, %v4107_v35  ;;  %v2857_v3 = vsel %vm1062_vm1, %v2855_v27, %v2856_v49 }
 0x209   : > { %v3527_v47 = vpack.c.bf16 %v2896_v55, %v2895_v48  ;;  %v4046_v37 = vpop.f32.mrf.mxu1  ;;  %v4110_v40 = vpop.f32.mrf.mxu0  ;;  %v2593_v57 = vadd.f32 %v2575_v46, %v5197_v4 }
 0x20a   : > { %v2576_v60 = vrot.slane %v4045_v31, 1  ;;  %v2858_v2 = vrot.slane %v4109_v22, 2 }
 0x20b   : > { %3535 = vst [vmem:[%s5220_s25 + $0x10] sm:$0xff] %v3527_v47   ;;  %v4047_v41 = vpop.f32.mrf.mxu1  ;;  %v4111_v58 = vpop.f32.mrf.mxu0  ;;  %v2875_v28 = vadd.f32 %v2857_v3, %v2593_v57 }
 0x20c   : > { %v4048_v11 = vadd.f32 %v4047_v41, %v4046_v37  ;;  %v4112_v59 = vadd.f32 %v4111_v58, %v4110_v40 }
 0x20d   : > { %v2889_v0 = vadd.f32 %v5209_v38, %v2875_v28 }
 0x20e   : > { %v2577_v21 = vrot.slane %v4048_v11, 1  ;;  %v2859_v62 = vrot.slane %v4112_v59, 2 }
 0x20f   : > { %v2897_v13 = vmax.f32 %v2889_v0, 0.0 }
 0x210   : > { %v2578_v36 = vsel %vm779_vm0, %v2576_v60, %v2577_v21  ;;  %v2860_v4 = vsel %vm1062_vm1, %v2858_v2, %v2859_v62 }
 0x211   : > { %v2594_v6 = vadd.f32 %v2578_v36, %v5201_v14 }
 0x213   : > { %v2876_v7 = vadd.f32 %v2860_v4, %v2594_v6 }
 0x215   : > { %v2890_v8 = vadd.f32 %v5209_v38, %v2876_v7 }
 0x217   : > { %v2898_v54 = vmax.f32 %v2890_v8, 0.0 }
 0x219   : > { %v3532_v26 = vpack.c.bf16 %v2898_v54, %v2897_v13 }
 0x21b   : > { %3536 = vst [vmem:[%s5220_s25 + $0x18] sm:$0xff] %v3532_v26  }
 0x21c PF: > { %s13_s14 = sadd.s32 1, %s4376_s14   ;;  %s5263_s12 = smov %s4372_s13 }
 0x21d   : > { %p10_p5 = scmp.ge.s32.totalorder %s13_s14, 4   ;;  %s5264_s13 = smov %s5266_s15 }
 0x21f   :  { %12 = sbr.rel (!%p10_p5) target bundleno = 2 (0x2), region = 78 }

</bundles_post_ra>
